<compile_context>
chip_gen: v7x
topology: tpu7x:2x2x1
jax: 0.10.0
libtpu: 0.0.40
codegen_flags: <defaults>
</compile_context>

<pallas_src>
import functools

import jax
import jax.numpy as jnp
from jax.experimental import pallas as pl
from jax.experimental.pallas import tpu as pltpu

LANE = 128


def _round_up(x, m):
    return (x + m - 1) // m * m


@functools.lru_cache(maxsize=None)
def _vmem_limit_bytes():
    """~3/4 of physical VMEM per core: ~48 MiB on v7x, ~96 MiB on v5e/v6e."""
    try:
        cap = int(pltpu.get_tpu_info().vmem_capacity_bytes)
    except Exception:
        cap = 64 * 1024 * 1024
    return max(32 * 1024 * 1024, cap * 3 // 4)


# ----------------------------- Pallas kernels ------------------------------

def _conv_bn_relu_kernel(x_ref, w_ref, b_ref, o_ref, *, taps, th, ow, cin):
    """Stride-1 conv (+ folded BN scale) + shift + ReLU for one output row tile.

    x_ref : (Hp, Wp, Cin)            bf16  full padded image of one batch elem
    w_ref : (len(taps)*Cin, Cout)    bf16  BN scale already folded in
    b_ref : (1, Cout)                f32   folded BN shift (+ conv bias)
    o_ref : (TH, OW, Cout)           bf16  output rows [r*TH, r*TH + TH)
    """
    row0 = pl.program_id(1) * th
    m = th * ow
    # In-VMEM patch gather (no HBM im2col), lane-concatenated into one big-K
    # operand so a SINGLE MXU dot accumulates over all taps.
    patches = [x_ref[pl.ds(row0 + dy, th), pl.ds(dx, ow), :].reshape(m, cin)
               for (dy, dx) in taps]
    patch = patches[0] if len(patches) == 1 else jnp.concatenate(patches, axis=-1)
    acc = jnp.dot(patch, w_ref[...], preferred_element_type=jnp.float32)
    y = jnp.maximum(acc + b_ref[...], 0.0)          # f32 epilogue: shift + ReLU
    o_ref[...] = y.reshape(th, ow, -1).astype(o_ref.dtype)


def _transconv_kernel(x_ref, w_ref, b_ref, o_ref, *, th, ow, cin, cp):
    """Fused 4-phase ConvTranspose2d(k=3, s=2, p=1, op=1) + BN + ReLU.

    x_ref : (H+1, W+1, Cin)   bf16  input of one batch elem, padded 1 bottom/right
    w_ref : (4*Cin, 4*Cp)     bf16  wide phase weight (zero blocks for unused taps)
    b_ref : (1, 4*Cp)         f32   folded BN shift, tiled over the 4 phases
    o_ref : (TH, 2, OW, 2*Cp) bf16  interleaved output rows [2*r*TH, 2*(r+1)*TH)
    """
    row0 = pl.program_id(1) * th
    m = th * ow
    p00 = x_ref[pl.ds(row0, th), pl.ds(0, ow), :].reshape(m, cin)
    p01 = x_ref[pl.ds(row0, th), pl.ds(1, ow), :].reshape(m, cin)
    p10 = x_ref[pl.ds(row0 + 1, th), pl.ds(0, ow), :].reshape(m, cin)
    p11 = x_ref[pl.ds(row0 + 1, th), pl.ds(1, ow), :].reshape(m, cin)
    patch = jnp.concatenate([p00, p01, p10, p11], axis=-1)       # (m, 4*Cin)
    acc = jnp.dot(patch, w_ref[...], preferred_element_type=jnp.float32)  # (m, 4*Cp)
    y = jnp.maximum(acc + b_ref[...], 0.0).reshape(th, ow, 4 * cp)
    # phases ordered [ee | eo | oe | oo] along lanes -> even/odd output rows
    o_ref[:, 0:1, :, :] = y[:, :, 0:2 * cp].reshape(th, 1, ow, 2 * cp).astype(o_ref.dtype)
    o_ref[:, 1:2, :, :] = y[:, :, 2 * cp:4 * cp].reshape(th, 1, ow, 2 * cp).astype(o_ref.dtype)


def _tail_kernel(o1_ref, o2_ref, o3_ref, o4_ref, w5_ref, w4_ref,
                 b5_ref, b4_ref, out_ref):
    """Fused conv4(concat(o2,o3,o4)) + conv5(o1) + residual add (all 1x1)."""
    cat = jnp.concatenate([o2_ref[...], o3_ref[...], o4_ref[...]], axis=-1)
    acc4 = jnp.dot(cat, w4_ref[...], preferred_element_type=jnp.float32)
    acc5 = jnp.dot(o1_ref[...], w5_ref[...], preferred_element_type=jnp.float32)
    out = (jnp.maximum(acc4 + b4_ref[...], 0.0)
           + jnp.maximum(acc5 + b5_ref[...], 0.0))
    out_ref[...] = out.astype(out_ref.dtype)


# ------------------------------ pallas wrappers -----------------------------

def _pick_th(oh, ow, max_rows=2048):
    """Largest divisor of OH whose row tile stays within ~max_rows matmul rows."""
    best = 1
    for d in range(1, oh + 1):
        if oh % d == 0 and d * ow <= max_rows:
            best = d
    return best


def conv_bn_relu(x_pad, w_mat, shift, *, kh, kw, dil, oh, ow):
    """x_pad: (N, Hp, Wp, Cin) bf16, already spatially + channel padded."""
    n, hp, wp, cin = x_pad.shape
    cout = w_mat.shape[1]
    th = _pick_th(oh, ow)
    taps = tuple((ki * dil, kj * dil) for ki in range(kh) for kj in range(kw))
    kernel = functools.partial(_conv_bn_relu_kernel,
                               taps=taps, th=th, ow=ow, cin=cin)
    flops = 2 * n * oh * ow * len(taps) * cin * cout
    bytes_accessed = (x_pad.size * 2 + w_mat.size * 2 + shift.size * 4
                      + n * oh * ow * cout * 2)
    return pl.pallas_call(
        kernel,
        out_shape=jax.ShapeDtypeStruct((n, oh, ow, cout), jnp.bfloat16),
        grid=(n, oh // th),
        in_specs=[
            pl.BlockSpec((None, hp, wp, cin), lambda b, r: (b, 0, 0, 0)),
            pl.BlockSpec((len(taps) * cin, cout), lambda b, r: (0, 0)),
            pl.BlockSpec((1, cout), lambda b, r: (0, 0)),
        ],
        out_specs=pl.BlockSpec((None, th, ow, cout), lambda b, r: (b, r, 0, 0)),
        compiler_params=pltpu.CompilerParams(
            dimension_semantics=("parallel", "arbitrary"),
            vmem_limit_bytes=_vmem_limit_bytes()),
        cost_estimate=pl.CostEstimate(flops=flops, transcendentals=0,
                                      bytes_accessed=bytes_accessed),
    )(x_pad, w_mat, shift)


def transconv_fused(x_p, w_wide, b_wide, *, oh, ow, cp):
    """Fused 4-phase transposed conv. x_p: (N, H+1, W+1, Cin) bf16."""
    n, hp, wp, cin = x_p.shape
    th = _pick_th(oh, ow)
    kernel = functools.partial(_transconv_kernel, th=th, ow=ow, cin=cin, cp=cp)
    flops = 2 * n * oh * ow * (4 * cin) * (4 * cp)
    bytes_accessed = (x_p.size * 2 + w_wide.size * 2 + b_wide.size * 4
                      + n * oh * ow * 4 * cp * 2)
    out = pl.pallas_call(
        kernel,
        out_shape=jax.ShapeDtypeStruct((n, oh, 2, ow, 2 * cp), jnp.bfloat16),
        grid=(n, oh // th),
        in_specs=[
            pl.BlockSpec((None, hp, wp, cin), lambda b, r: (b, 0, 0, 0)),
            pl.BlockSpec((4 * cin, 4 * cp), lambda b, r: (0, 0)),
            pl.BlockSpec((1, 4 * cp), lambda b, r: (0, 0)),
        ],
        out_specs=pl.BlockSpec((None, th, 2, ow, 2 * cp),
                               lambda b, r: (b, r, 0, 0, 0)),
        compiler_params=pltpu.CompilerParams(
            dimension_semantics=("parallel", "arbitrary"),
            vmem_limit_bytes=_vmem_limit_bytes()),
        cost_estimate=pl.CostEstimate(flops=flops, transcendentals=0,
                                      bytes_accessed=bytes_accessed),
    )(x_p, w_wide, b_wide)
    # (N, H, 2, W, 2*Cp) -> (N, 2H, 2W, Cp) is a free (contiguous) reshape.
    return out.reshape(n, 2 * oh, 2 * ow, cp)


def _pick_tm(m):
    """Largest of {2048,1024,512,256} dividing M padded up to a 256 multiple."""
    mp = _round_up(m, 256)
    for tm in (2048, 1024, 512, 256):
        if mp % tm == 0:
            return tm, mp
    return 256, mp


def tail_fused(o1, o2, o3, o4, w5, w4, b5, b4):
    """out = relu(cat(o2,o3,o4) @ w4 + b4) + relu(o1 @ w5 + b5)."""
    m, cp = o1.shape
    tm, mp = _pick_tm(m)
    if mp != m:
        pad = ((0, mp - m), (0, 0))
        o1, o2, o3, o4 = (jnp.pad(a, pad) for a in (o1, o2, o3, o4))
    flops = 2 * mp * cp * cp * 4
    bytes_accessed = 4 * mp * cp * 2 + 4 * cp * cp * 2 + 2 * cp * 4 + mp * cp * 4
    act_spec = pl.BlockSpec((tm, cp), lambda i: (i, 0))
    out = pl.pallas_call(
        _tail_kernel,
        out_shape=jax.ShapeDtypeStruct((mp, cp), jnp.float32),
        grid=(mp // tm,),
        in_specs=[act_spec, act_spec, act_spec, act_spec,
                  pl.BlockSpec((cp, cp), lambda i: (0, 0)),
                  pl.BlockSpec((3 * cp, cp), lambda i: (0, 0)),
                  pl.BlockSpec((1, cp), lambda i: (0, 0)),
                  pl.BlockSpec((1, cp), lambda i: (0, 0))],
        out_specs=pl.BlockSpec((tm, cp), lambda i: (i, 0)),
        compiler_params=pltpu.CompilerParams(
            dimension_semantics=("parallel",),
            vmem_limit_bytes=_vmem_limit_bytes()),
        cost_estimate=pl.CostEstimate(flops=flops, transcendentals=0,
                                      bytes_accessed=bytes_accessed),
    )(o1, o2, o3, o4, w5, w4, b5, b4)
    return out[:m]


# --------------------------- parameter preparation --------------------------

def _fold_bn(bias, bn, eps):
    gamma, beta, mean, var = bn
    scale = gamma / jnp.sqrt(var + eps)
    shift = (bias - mean) * scale + beta
    return scale, shift


def _pad_shift(shift, cout_pad):
    return jnp.pad(shift, (0, cout_pad - shift.shape[0])).reshape(1, cout_pad).astype(jnp.float32)


def _pack_conv_weight(w_oihw, scale, cin_pad, cout_pad):
    """PyTorch OIHW conv weight -> (KH*KW*Cin_pad, Cout_pad) bf16, BN scale folded."""
    cout, cin, kh, kw = w_oihw.shape
    w = jnp.transpose(w_oihw, (2, 3, 1, 0)) * scale[None, None, None, :]
    w = jnp.pad(w, ((0, 0), (0, 0), (0, cin_pad - cin), (0, cout_pad - cout)))
    return w.reshape(kh * kw * cin_pad, cout_pad).astype(jnp.bfloat16)


def _pack_transconv_wide(w_t, scale, cin_pad, cp):
    """ConvTranspose2d weight (Cin, Cout, 3, 3) -> (4*Cin_pad, 4*Cp) wide matrix.

    Column block f in {ee, eo, oe, oo} (phase a,b), row block t = tap (dy,dx) in
    {(0,0),(0,1),(1,0),(1,1)}; the source kernel index is (a+1-2dy, b+1-2dx),
    zero block if out of range (sub-pixel / 4-phase decomposition).
    """
    cin, cout = w_t.shape[0], w_t.shape[1]
    taps = [(0, 0), (0, 1), (1, 0), (1, 1)]
    phases = [(0, 0), (0, 1), (1, 0), (1, 1)]
    cols = []
    for a, b in phases:
        rows = []
        for dy, dx in taps:
            ki = a + 1 - 2 * dy
            kj = b + 1 - 2 * dx
            if 0 <= ki <= 2 and 0 <= kj <= 2:
                blk = w_t[:, :, ki, kj] * scale[None, :]
                blk = jnp.pad(blk, ((0, cin_pad - cin), (0, cp - cout)))
            else:
                blk = jnp.zeros((cin_pad, cp), w_t.dtype)
            rows.append(blk)
        cols.append(jnp.concatenate(rows, axis=0))
    return jnp.concatenate(cols, axis=1).astype(jnp.bfloat16)


# ------------------------------- DecBlock ------------------------------------

def init_decblock_params(key, input_channels):
    c = input_channels
    oc = c // 2
    ks = list(jax.random.split(key, 48))

    def nxt():
        return ks.pop(0)

    def w_init(shape):
        return 0.1 * jax.random.normal(nxt(), shape, jnp.float32)

    def bn_init(ch):
        gamma = 1.0 + 0.1 * jax.random.normal(nxt(), (ch,), jnp.float32)
        beta = 0.1 * jax.random.normal(nxt(), (ch,), jnp.float32)
        mean = 0.1 * jax.random.normal(nxt(), (ch,), jnp.float32)
        var = 1.0 + 0.1 * jnp.abs(jax.random.normal(nxt(), (ch,), jnp.float32))
        return (gamma, beta, mean, var)

    return {
        "transconv_w": w_init((c, oc, 3, 3)), "transconv_b": w_init((oc,)),
        "transconv_bn": bn_init(oc),
        "conv1_w": w_init((oc, oc, 3, 3)), "conv1_b": w_init((oc,)), "conv1_bn": bn_init(oc),
        "conv2_w": w_init((oc, oc, 3, 3)), "conv2_b": w_init((oc,)), "conv2_bn": bn_init(oc),
        "conv3_w": w_init((oc, oc, 2, 2)), "conv3_b": w_init((oc,)), "conv3_bn": bn_init(oc),
        "conv4_w": w_init((oc, oc * 3, 1, 1)), "conv4_b": w_init((oc,)), "conv4_bn": bn_init(oc),
        "conv5_w": w_init((oc, oc, 1, 1)), "conv5_b": w_init((oc,)), "conv5_bn": bn_init(oc),
    }


def decblock_forward(params, x_nchw, eps=1e-5):
    n, c, h, w = x_nchw.shape
    oc = c // 2
    cin_p = _round_up(c, LANE)
    cp = _round_up(oc, LANE)

    # NCHW -> NHWC, pad channels to a lane-dense multiple of 128, cast bf16.
    x = jnp.transpose(x_nchw, (0, 2, 3, 1))
    x = jnp.pad(x, ((0, 0), (0, 0), (0, 0), (0, cin_p - c))).astype(jnp.bfloat16)

    # ------- transconv (k=3, s=2, p=1, op=1): fused 4-phase sub-pixel kernel --
    scale_t, shift_t = _fold_bn(params["transconv_b"], params["transconv_bn"], eps)
    w_wide = _pack_transconv_wide(params["transconv_w"], scale_t, cin_p, cp)
    b_wide = jnp.tile(_pad_shift(shift_t, cp), (1, 4))
    x_p = jnp.pad(x, ((0, 0), (0, 1), (0, 1), (0, 0)))
    o1 = transconv_fused(x_p, w_wide, b_wide, oh=h, ow=w, cp=cp)   # (N, 2H, 2W, Cp)

    oh2, ow2 = 2 * h, 2 * w

    # ------- conv1: 3x3, dilation 1, padding 1 --------------------------------
    s1, sh1 = _fold_bn(params["conv1_b"], params["conv1_bn"], eps)
    w1 = _pack_conv_weight(params["conv1_w"], s1, cp, cp)
    o2 = conv_bn_relu(jnp.pad(o1, ((0, 0), (1, 1), (1, 1), (0, 0))),
                      w1, _pad_shift(sh1, cp), kh=3, kw=3, dil=1, oh=oh2, ow=ow2)

    # ------- conv2: 3x3, dilation 2, padding 2 --------------------------------
    s2, sh2 = _fold_bn(params["conv2_b"], params["conv2_bn"], eps)
    w2 = _pack_conv_weight(params["conv2_w"], s2, cp, cp)
    o3 = conv_bn_relu(jnp.pad(o2, ((0, 0), (2, 2), (2, 2), (0, 0))),
                      w2, _pad_shift(sh2, cp), kh=3, kw=3, dil=2, oh=oh2, ow=ow2)

    # ------- conv3: 2x2, dilation 2, padding 1 --------------------------------
    s3, sh3 = _fold_bn(params["conv3_b"], params["conv3_bn"], eps)
    w3 = _pack_conv_weight(params["conv3_w"], s3, cp, cp)
    o4 = conv_bn_relu(jnp.pad(o3, ((0, 0), (1, 1), (1, 1), (0, 0))),
                      w3, _pad_shift(sh3, cp), kh=2, kw=2, dil=2, oh=oh2, ow=ow2)

    # ------- fused tail: conv4(concat(o2,o3,o4)) + conv5(o1) + residual add ----
    s4, sh4 = _fold_bn(params["conv4_b"], params["conv4_bn"], eps)
    w4 = params["conv4_w"]                                       # (oc, 3*oc, 1, 1)
    w4cat = jnp.concatenate([
        _pack_conv_weight(w4[:, 0 * oc:1 * oc], s4, cp, cp),     # acts on o2
        _pack_conv_weight(w4[:, 1 * oc:2 * oc], s4, cp, cp),     # acts on o3
        _pack_conv_weight(w4[:, 2 * oc:3 * oc], s4, cp, cp),     # acts on o4
    ], axis=0)                                                   # (3*Cp, Cp)
    s5, sh5 = _fold_bn(params["conv5_b"], params["conv5_bn"], eps)
    w5 = _pack_conv_weight(params["conv5_w"], s5, cp, cp)

    m = n * oh2 * ow2
    out = tail_fused(o1.reshape(m, cp), o2.reshape(m, cp),
                     o3.reshape(m, cp), o4.reshape(m, cp),
                     w5, w4cat, _pad_shift(sh5, cp), _pad_shift(sh4, cp))
    out = out.reshape(n, oh2, ow2, cp)[:, :, :, :oc]
    return jnp.transpose(out, (0, 3, 1, 2)).astype(jnp.float32)


# --------------------------- pure-JAX f32 reference --------------------------

def _ref_conv_bn_relu(x, w_oihw, b, bn, *, dilation=1, padding=0, eps=1e-5):
    gamma, beta, mean, var = bn
    y = jax.lax.conv_general_dilated(
        x, jnp.transpose(w_oihw, (2, 3, 1, 0)),
        window_strides=(1, 1),
        padding=[(padding, padding), (padding, padding)],
        rhs_dilation=(dilation, dilation),
        dimension_numbers=("NHWC", "HWIO", "NHWC"))
    y = (y + b - mean) / jnp.sqrt(var + eps) * gamma + beta
    return jnp.maximum(y, 0.0)


def _ref_transconv_bn_relu(x, w_t, b, bn, *, stride, padding, output_padding, eps=1e-5):
    cin, cout, kh, kw = w_t.shape
    w_hwio = jnp.transpose(jnp.flip(w_t, axis=(2, 3)), (2, 3, 0, 1))
    pad_t = kh - 1 - padding
    pad_l = kw - 1 - padding
    y = jax.lax.conv_general_dilated(
        x, w_hwio, window_strides=(1, 1),
        padding=[(pad_t, pad_t + output_padding), (pad_l, pad_l + output_padding)],
        lhs_dilation=(stride, stride),
        dimension_numbers=("NHWC", "HWIO", "NHWC"))
    gamma, beta, mean, var = bn
    y = (y + b - mean) / jnp.sqrt(var + eps) * gamma + beta
    return jnp.maximum(y, 0.0)


def decblock_reference(params, x_nchw, eps=1e-5):
    x = jnp.transpose(x_nchw, (0, 2, 3, 1))
    o1 = _ref_transconv_bn_relu(x, params["transconv_w"], params["transconv_b"],
                                params["transconv_bn"], stride=2, padding=1,
                                output_padding=1, eps=eps)
    o2 = _ref_conv_bn_relu(o1, params["conv1_w"], params["conv1_b"],
                           params["conv1_bn"], dilation=1, padding=1, eps=eps)
    o3 = _ref_conv_bn_relu(o2, params["conv2_w"], params["conv2_b"],
                           params["conv2_bn"], dilation=2, padding=2, eps=eps)
    o4 = _ref_conv_bn_relu(o3, params["conv3_w"], params["conv3_b"],
                           params["conv3_bn"], dilation=2, padding=1, eps=eps)
    o234 = _ref_conv_bn_relu(jnp.concatenate([o2, o3, o4], axis=-1),
                             params["conv4_w"], params["conv4_b"],
                             params["conv4_bn"], dilation=1, padding=0, eps=eps)
    o11 = _ref_conv_bn_relu(o1, params["conv5_w"], params["conv5_b"],
                            params["conv5_bn"], dilation=1, padding=0, eps=eps)
    return jnp.transpose(o234 + o11, (0, 3, 1, 2))


if __name__ == "__main__":
    key = jax.random.PRNGKey(0)
    pkey, xkey = jax.random.split(key)

    input_channels = 8
    batch, h, w = 2, 8, 8

    params = init_decblock_params(pkey, input_channels)
    x = jax.random.normal(xkey, (batch, input_channels, h, w), jnp.float32)

    out = jax.block_until_ready(jax.jit(decblock_forward)(params, x))
    assert out.shape == (batch, input_channels // 2, 2 * h, 2 * w), out.shape
    assert bool(jnp.all(jnp.isfinite(out)))

    # loose check against a pure-JAX f32 reference (kernel path is bf16)
    ref = jax.block_until_ready(decblock_reference(params, x))
    err = float(jnp.max(jnp.abs(out - ref)))
    tol = 0.05 * float(jnp.max(jnp.abs(ref))) + 0.05
    assert err < tol, (err, tol)

    print("KERNEL_OK")
</pallas_src>

<mosaic_0001>
module attributes {stable_mosaic.version = 11 : i64} {
  func.func @_transconv_kernel(%arg0: i32, %arg1: i32, %arg2: memref<1x9x9x128xbf16, #tpu.memory_space<vmem>>, %arg3: memref<512x512xbf16, #tpu.memory_space<vmem>>, %arg4: memref<1x512xf32, #tpu.memory_space<vmem>>, %arg5: memref<1x8x2x8x256xbf16, #tpu.memory_space<vmem>>) attributes {dimension_semantics = [#tpu.dimension_semantics<parallel>, #tpu.dimension_semantics<arbitrary>], iteration_bounds = array<i64: 2, 1>, scalar_prefetch = 0 : i64, scratch_operands = 0 : i64, tpu.core_type = #tpu.core_type<tc>, window_params = [{transform_indices = @transform_0, window_bounds = array<i64: 1, 9, 9, 128>}, {pipeline_mode = #tpu.pipeline_mode<synchronous>, transform_indices = @transform_1, window_bounds = array<i64: 512, 512>}, {pipeline_mode = #tpu.pipeline_mode<synchronous>, transform_indices = @transform_2, window_bounds = array<i64: 1, 512>}, {transform_indices = @transform_3, window_bounds = array<i64: 1, 8, 2, 8, 256>}]} {
    %c8_i32 = arith.constant 8 : i32
    %0 = arith.muli %arg1, %c8_i32 : i32
    %c0 = arith.constant 0 : index
    %1 = arith.index_cast %0 : i32 to index
    %c0_0 = arith.constant 0 : index
    %c0_1 = arith.constant 0 : index
    %2 = vector.load %arg2[%c0, %1, %c0_0, %c0_1] : memref<1x9x9x128xbf16, #tpu.memory_space<vmem>>, vector<1x8x8x128xbf16>
    %3 = vector.shape_cast %2 : vector<1x8x8x128xbf16> to vector<8x8x128xbf16>
    %4 = vector.shape_cast %3 : vector<8x8x128xbf16> to vector<64x128xbf16>
    %c0_2 = arith.constant 0 : index
    %5 = arith.index_cast %0 : i32 to index
    %c1 = arith.constant 1 : index
    %c0_3 = arith.constant 0 : index
    %6 = vector.load %arg2[%c0_2, %5, %c1, %c0_3] : memref<1x9x9x128xbf16, #tpu.memory_space<vmem>>, vector<1x8x8x128xbf16>
    %7 = vector.shape_cast %6 : vector<1x8x8x128xbf16> to vector<8x8x128xbf16>
    %8 = vector.shape_cast %7 : vector<8x8x128xbf16> to vector<64x128xbf16>
    %c1_i32 = arith.constant 1 : i32
    %9 = arith.addi %0, %c1_i32 : i32
    %c0_4 = arith.constant 0 : index
    %10 = arith.index_cast %9 : i32 to index
    %c0_5 = arith.constant 0 : index
    %c0_6 = arith.constant 0 : index
    %11 = vector.load %arg2[%c0_4, %10, %c0_5, %c0_6] : memref<1x9x9x128xbf16, #tpu.memory_space<vmem>>, vector<1x8x8x128xbf16>
    %12 = vector.shape_cast %11 : vector<1x8x8x128xbf16> to vector<8x8x128xbf16>
    %13 = vector.shape_cast %12 : vector<8x8x128xbf16> to vector<64x128xbf16>
    %c1_i32_7 = arith.constant 1 : i32
    %14 = arith.addi %0, %c1_i32_7 : i32
    %c0_8 = arith.constant 0 : index
    %15 = arith.index_cast %14 : i32 to index
    %c1_9 = arith.constant 1 : index
    %c0_10 = arith.constant 0 : index
    %16 = vector.load %arg2[%c0_8, %15, %c1_9, %c0_10] : memref<1x9x9x128xbf16, #tpu.memory_space<vmem>>, vector<1x8x8x128xbf16>
    %17 = vector.shape_cast %16 : vector<1x8x8x128xbf16> to vector<8x8x128xbf16>
    %18 = vector.shape_cast %17 : vector<8x8x128xbf16> to vector<64x128xbf16>
    %19 = tpu.concatenate %4, %8, %13, %18 in 1 : vector<64x128xbf16>, vector<64x128xbf16>, vector<64x128xbf16>, vector<64x128xbf16> -> vector<64x512xbf16>
    %c0_11 = arith.constant 0 : index
    %c0_12 = arith.constant 0 : index
    %20 = vector.load %arg3[%c0_11, %c0_12] : memref<512x512xbf16, #tpu.memory_space<vmem>>, vector<512x512xbf16>
    %cst = arith.constant dense<0.000000e+00> : vector<64x512xf32>
    %21 = tpu.matmul %19, %20, %cst {dimension_numbers = #tpu.dot_dimension_numbers<[1], [0], [0], [1], [0, 0, 1, 1], [], []>} : vector<64x512xbf16>, vector<512x512xbf16>, vector<64x512xf32> -> vector<64x512xf32>
    %c0_13 = arith.constant 0 : index
    %c0_14 = arith.constant 0 : index
    %22 = vector.load %arg4[%c0_13, %c0_14] : memref<1x512xf32, #tpu.memory_space<vmem>>, vector<1x512xf32>
    %23 = vector.broadcast %22 : vector<1x512xf32> to vector<64x512xf32>
    %24 = arith.addf %21, %23 : vector<64x512xf32>
    %cst_15 = arith.constant 0.000000e+00 : f32
    %25 = vector.broadcast %cst_15 : f32 to vector<64x512xf32>
    %26 = arith.maximumf %24, %25 : vector<64x512xf32>
    %27 = vector.shape_cast %26 : vector<64x512xf32> to vector<8x8x512xf32>
    %28 = vector.extract_strided_slice %27 {offsets = [0, 0, 0], sizes = [8, 8, 256], strides = [1, 1, 1]} : vector<8x8x512xf32> to vector<8x8x256xf32>
    %29 = vector.shape_cast %28 : vector<8x8x256xf32> to vector<8x1x8x256xf32>
    %30 = arith.truncf %29 : vector<8x1x8x256xf32> to vector<8x1x8x256xbf16>
    %c0_16 = arith.constant 0 : index
    %c0_17 = arith.constant 0 : index
    %c0_18 = arith.constant 0 : index
    %c0_19 = arith.constant 0 : index
    %c0_20 = arith.constant 0 : index
    %31 = vector.load %arg5[%c0_16, %c0_17, %c0_18, %c0_19, %c0_20] : memref<1x8x2x8x256xbf16, #tpu.memory_space<vmem>>, vector<1x8x1x8x256xbf16>
    %32 = vector.shape_cast %31 : vector<1x8x1x8x256xbf16> to vector<8x1x8x256xbf16>
    %33 = vector.shape_cast %30 : vector<8x1x8x256xbf16> to vector<1x8x1x8x256xbf16>
    tpu.vector_store %arg5[%c0_16, %c0_17, %c0_18, %c0_19, %c0_20], %33 {strides = array<i32>} : memref<1x8x2x8x256xbf16, #tpu.memory_space<vmem>>, vector<1x8x1x8x256xbf16>,
    %34 = vector.extract_strided_slice %27 {offsets = [0, 0, 256], sizes = [8, 8, 256], strides = [1, 1, 1]} : vector<8x8x512xf32> to vector<8x8x256xf32>
    %35 = vector.shape_cast %34 : vector<8x8x256xf32> to vector<8x1x8x256xf32>
    %36 = arith.truncf %35 : vector<8x1x8x256xf32> to vector<8x1x8x256xbf16>
    %c0_21 = arith.constant 0 : index
    %c0_22 = arith.constant 0 : index
    %c1_23 = arith.constant 1 : index
    %c0_24 = arith.constant 0 : index
    %c0_25 = arith.constant 0 : index
    %37 = vector.load %arg5[%c0_21, %c0_22, %c1_23, %c0_24, %c0_25] : memref<1x8x2x8x256xbf16, #tpu.memory_space<vmem>>, vector<1x8x1x8x256xbf16>
    %38 = vector.shape_cast %37 : vector<1x8x1x8x256xbf16> to vector<8x1x8x256xbf16>
    %39 = vector.shape_cast %36 : vector<8x1x8x256xbf16> to vector<1x8x1x8x256xbf16>
    tpu.vector_store %arg5[%c0_21, %c0_22, %c1_23, %c0_24, %c0_25], %39 {strides = array<i32>} : memref<1x8x2x8x256xbf16, #tpu.memory_space<vmem>>, vector<1x8x1x8x256xbf16>,
    return
  }
  func.func @transform_0(%arg0: i32, %arg1: i32) -> (i32, i32, i32, i32) {
    %c0_i32 = arith.constant 0 : i32
    %c0_i32_0 = arith.constant 0 : i32
    %c0_i32_1 = arith.constant 0 : i32
    %c0_i32_2 = arith.constant 0 : i32
    return %arg0, %c0_i32, %c0_i32_0, %c0_i32_1 : i32, i32, i32, i32
  }
  func.func @transform_1(%arg0: i32, %arg1: i32) -> (i32, i32) {
    %c0_i32 = arith.constant 0 : i32
    %c0_i32_0 = arith.constant 0 : i32
    %c0_i32_1 = arith.constant 0 : i32
    return %c0_i32, %c0_i32_0 : i32, i32
  }
  func.func @transform_2(%arg0: i32, %arg1: i32) -> (i32, i32) {
    %c0_i32 = arith.constant 0 : i32
    %c0_i32_0 = arith.constant 0 : i32
    %c0_i32_1 = arith.constant 0 : i32
    return %c0_i32, %c0_i32_0 : i32, i32
  }
  func.func @transform_3(%arg0: i32, %arg1: i32) -> (i32, i32, i32, i32, i32) {
    %c0_i32 = arith.constant 0 : i32
    %c0_i32_0 = arith.constant 0 : i32
    %c0_i32_1 = arith.constant 0 : i32
    %c0_i32_2 = arith.constant 0 : i32
    return %arg0, %arg1, %c0_i32, %c0_i32_0, %c0_i32_1 : i32, i32, i32, i32, i32
  }
}

module attributes {stable_mosaic.version = 11 : i64} {
  func.func @_conv_bn_relu_kernel(%arg0: i32, %arg1: i32, %arg2: memref<1x18x18x128xbf16, #tpu.memory_space<vmem>>, %arg3: memref<1152x128xbf16, #tpu.memory_space<vmem>>, %arg4: memref<1x128xf32, #tpu.memory_space<vmem>>, %arg5: memref<1x16x16x128xbf16, #tpu.memory_space<vmem>>) attributes {dimension_semantics = [#tpu.dimension_semantics<parallel>, #tpu.dimension_semantics<arbitrary>], iteration_bounds = array<i64: 2, 1>, scalar_prefetch = 0 : i64, scratch_operands = 0 : i64, tpu.core_type = #tpu.core_type<tc>, window_params = [{transform_indices = @transform_0, window_bounds = array<i64: 1, 18, 18, 128>}, {pipeline_mode = #tpu.pipeline_mode<synchronous>, transform_indices = @transform_1, window_bounds = array<i64: 1152, 128>}, {pipeline_mode = #tpu.pipeline_mode<synchronous>, transform_indices = @transform_2, window_bounds = array<i64: 1, 128>}, {transform_indices = @transform_3, window_bounds = array<i64: 1, 16, 16, 128>}]} {
    %c16_i32 = arith.constant 16 : i32
    %0 = arith.muli %arg1, %c16_i32 : i32
    %c0_i32 = arith.constant 0 : i32
    %1 = arith.addi %0, %c0_i32 : i32
    %c0 = arith.constant 0 : index
    %2 = arith.index_cast %1 : i32 to index
    %c0_0 = arith.constant 0 : index
    %c0_1 = arith.constant 0 : index
    %3 = vector.load %arg2[%c0, %2, %c0_0, %c0_1] : memref<1x18x18x128xbf16, #tpu.memory_space<vmem>>, vector<1x16x16x128xbf16>
    %4 = vector.shape_cast %3 : vector<1x16x16x128xbf16> to vector<16x16x128xbf16>
    %5 = vector.shape_cast %4 : vector<16x16x128xbf16> to vector<256x128xbf16>
    %c0_i32_2 = arith.constant 0 : i32
    %6 = arith.addi %0, %c0_i32_2 : i32
    %c0_3 = arith.constant 0 : index
    %7 = arith.index_cast %6 : i32 to index
    %c1 = arith.constant 1 : index
    %c0_4 = arith.constant 0 : index
    %8 = vector.load %arg2[%c0_3, %7, %c1, %c0_4] : memref<1x18x18x128xbf16, #tpu.memory_space<vmem>>, vector<1x16x16x128xbf16>
    %9 = vector.shape_cast %8 : vector<1x16x16x128xbf16> to vector<16x16x128xbf16>
    %10 = vector.shape_cast %9 : vector<16x16x128xbf16> to vector<256x128xbf16>
    %c0_i32_5 = arith.constant 0 : i32
    %11 = arith.addi %0, %c0_i32_5 : i32
    %c0_6 = arith.constant 0 : index
    %12 = arith.index_cast %11 : i32 to index
    %c2 = arith.constant 2 : index
    %c0_7 = arith.constant 0 : index
    %13 = vector.load %arg2[%c0_6, %12, %c2, %c0_7] : memref<1x18x18x128xbf16, #tpu.memory_space<vmem>>, vector<1x16x16x128xbf16>
    %14 = vector.shape_cast %13 : vector<1x16x16x128xbf16> to vector<16x16x128xbf16>
    %15 = vector.shape_cast %14 : vector<16x16x128xbf16> to vector<256x128xbf16>
    %c1_i32 = arith.constant 1 : i32
    %16 = arith.addi %0, %c1_i32 : i32
    %c0_8 = arith.constant 0 : index
    %17 = arith.index_cast %16 : i32 to index
    %c0_9 = arith.constant 0 : index
    %c0_10 = arith.constant 0 : index
    %18 = vector.load %arg2[%c0_8, %17, %c0_9, %c0_10] : memref<1x18x18x128xbf16, #tpu.memory_space<vmem>>, vector<1x16x16x128xbf16>
    %19 = vector.shape_cast %18 : vector<1x16x16x128xbf16> to vector<16x16x128xbf16>
    %20 = vector.shape_cast %19 : vector<16x16x128xbf16> to vector<256x128xbf16>
    %c1_i32_11 = arith.constant 1 : i32
    %21 = arith.addi %0, %c1_i32_11 : i32
    %c0_12 = arith.constant 0 : index
    %22 = arith.index_cast %21 : i32 to index
    %c1_13 = arith.constant 1 : index
    %c0_14 = arith.constant 0 : index
    %23 = vector.load %arg2[%c0_12, %22, %c1_13, %c0_14] : memref<1x18x18x128xbf16, #tpu.memory_space<vmem>>, vector<1x16x16x128xbf16>
    %24 = vector.shape_cast %23 : vector<1x16x16x128xbf16> to vector<16x16x128xbf16>
    %25 = vector.shape_cast %24 : vector<16x16x128xbf16> to vector<256x128xbf16>
    %c1_i32_15 = arith.constant 1 : i32
    %26 = arith.addi %0, %c1_i32_15 : i32
    %c0_16 = arith.constant 0 : index
    %27 = arith.index_cast %26 : i32 to index
    %c2_17 = arith.constant 2 : index
    %c0_18 = arith.constant 0 : index
    %28 = vector.load %arg2[%c0_16, %27, %c2_17, %c0_18] : memref<1x18x18x128xbf16, #tpu.memory_space<vmem>>, vector<1x16x16x128xbf16>
    %29 = vector.shape_cast %28 : vector<1x16x16x128xbf16> to vector<16x16x128xbf16>
    %30 = vector.shape_cast %29 : vector<16x16x128xbf16> to vector<256x128xbf16>
    %c2_i32 = arith.constant 2 : i32
    %31 = arith.addi %0, %c2_i32 : i32
    %c0_19 = arith.constant 0 : index
    %32 = arith.index_cast %31 : i32 to index
    %c0_20 = arith.constant 0 : index
    %c0_21 = arith.constant 0 : index
    %33 = vector.load %arg2[%c0_19, %32, %c0_20, %c0_21] : memref<1x18x18x128xbf16, #tpu.memory_space<vmem>>, vector<1x16x16x128xbf16>
    %34 = vector.shape_cast %33 : vector<1x16x16x128xbf16> to vector<16x16x128xbf16>
    %35 = vector.shape_cast %34 : vector<16x16x128xbf16> to vector<256x128xbf16>
    %c2_i32_22 = arith.constant 2 : i32
    %36 = arith.addi %0, %c2_i32_22 : i32
    %c0_23 = arith.constant 0 : index
    %37 = arith.index_cast %36 : i32 to index
    %c1_24 = arith.constant 1 : index
    %c0_25 = arith.constant 0 : index
    %38 = vector.load %arg2[%c0_23, %37, %c1_24, %c0_25] : memref<1x18x18x128xbf16, #tpu.memory_space<vmem>>, vector<1x16x16x128xbf16>
    %39 = vector.shape_cast %38 : vector<1x16x16x128xbf16> to vector<16x16x128xbf16>
    %40 = vector.shape_cast %39 : vector<16x16x128xbf16> to vector<256x128xbf16>
    %c2_i32_26 = arith.constant 2 : i32
    %41 = arith.addi %0, %c2_i32_26 : i32
    %c0_27 = arith.constant 0 : index
    %42 = arith.index_cast %41 : i32 to index
    %c2_28 = arith.constant 2 : index
    %c0_29 = arith.constant 0 : index
    %43 = vector.load %arg2[%c0_27, %42, %c2_28, %c0_29] : memref<1x18x18x128xbf16, #tpu.memory_space<vmem>>, vector<1x16x16x128xbf16>
    %44 = vector.shape_cast %43 : vector<1x16x16x128xbf16> to vector<16x16x128xbf16>
    %45 = vector.shape_cast %44 : vector<16x16x128xbf16> to vector<256x128xbf16>
    %46 = tpu.concatenate %5, %10, %15, %20, %25, %30, %35, %40, %45 in 1 : vector<256x128xbf16>, vector<256x128xbf16>, vector<256x128xbf16>, vector<256x128xbf16>, vector<256x128xbf16>, vector<256x128xbf16>, vector<256x128xbf16>, vector<256x128xbf16>, vector<256x128xbf16> -> vector<256x1152xbf16>
    %c0_30 = arith.constant 0 : index
    %c0_31 = arith.constant 0 : index
    %47 = vector.load %arg3[%c0_30, %c0_31] : memref<1152x128xbf16, #tpu.memory_space<vmem>>, vector<1152x128xbf16>
    %cst = arith.constant dense<0.000000e+00> : vector<256x128xf32>
    %48 = tpu.matmul %46, %47, %cst {dimension_numbers = #tpu.dot_dimension_numbers<[1], [0], [0], [1], [0, 0, 1, 1], [], []>} : vector<256x1152xbf16>, vector<1152x128xbf16>, vector<256x128xf32> -> vector<256x128xf32>
    %c0_32 = arith.constant 0 : index
    %c0_33 = arith.constant 0 : index
    %49 = vector.load %arg4[%c0_32, %c0_33] : memref<1x128xf32, #tpu.memory_space<vmem>>, vector<1x128xf32>
    %50 = vector.broadcast %49 : vector<1x128xf32> to vector<256x128xf32>
    %51 = arith.addf %48, %50 : vector<256x128xf32>
    %cst_34 = arith.constant 0.000000e+00 : f32
    %52 = vector.broadcast %cst_34 : f32 to vector<256x128xf32>
    %53 = arith.maximumf %51, %52 : vector<256x128xf32>
    %54 = vector.shape_cast %53 : vector<256x128xf32> to vector<16x16x128xf32>
    %55 = arith.truncf %54 : vector<16x16x128xf32> to vector<16x16x128xbf16>
    %c0_35 = arith.constant 0 : index
    %c0_36 = arith.constant 0 : index
    %c0_37 = arith.constant 0 : index
    %c0_38 = arith.constant 0 : index
    %56 = vector.load %arg5[%c0_35, %c0_36, %c0_37, %c0_38] : memref<1x16x16x128xbf16, #tpu.memory_space<vmem>>, vector<1x16x16x128xbf16>
    %57 = vector.shape_cast %56 : vector<1x16x16x128xbf16> to vector<16x16x128xbf16>
    %58 = vector.shape_cast %55 : vector<16x16x128xbf16> to vector<1x16x16x128xbf16>
    tpu.vector_store %arg5[%c0_35, %c0_36, %c0_37, %c0_38], %58 {strides = array<i32>} : memref<1x16x16x128xbf16, #tpu.memory_space<vmem>>, vector<1x16x16x128xbf16>,
    return
  }
  func.func @transform_0(%arg0: i32, %arg1: i32) -> (i32, i32, i32, i32) {
    %c0_i32 = arith.constant 0 : i32
    %c0_i32_0 = arith.constant 0 : i32
    %c0_i32_1 = arith.constant 0 : i32
    %c0_i32_2 = arith.constant 0 : i32
    return %arg0, %c0_i32, %c0_i32_0, %c0_i32_1 : i32, i32, i32, i32
  }
  func.func @transform_1(%arg0: i32, %arg1: i32) -> (i32, i32) {
    %c0_i32 = arith.constant 0 : i32
    %c0_i32_0 = arith.constant 0 : i32
    %c0_i32_1 = arith.constant 0 : i32
    return %c0_i32, %c0_i32_0 : i32, i32
  }
  func.func @transform_2(%arg0: i32, %arg1: i32) -> (i32, i32) {
    %c0_i32 = arith.constant 0 : i32
    %c0_i32_0 = arith.constant 0 : i32
    %c0_i32_1 = arith.constant 0 : i32
    return %c0_i32, %c0_i32_0 : i32, i32
  }
  func.func @transform_3(%arg0: i32, %arg1: i32) -> (i32, i32, i32, i32) {
    %c0_i32 = arith.constant 0 : i32
    %c0_i32_0 = arith.constant 0 : i32
    %c0_i32_1 = arith.constant 0 : i32
    return %arg0, %arg1, %c0_i32, %c0_i32_0 : i32, i32, i32, i32
  }
}

module attributes {stable_mosaic.version = 11 : i64} {
  func.func @_conv_bn_relu_kernel(%arg0: i32, %arg1: i32, %arg2: memref<1x20x20x128xbf16, #tpu.memory_space<vmem>>, %arg3: memref<1152x128xbf16, #tpu.memory_space<vmem>>, %arg4: memref<1x128xf32, #tpu.memory_space<vmem>>, %arg5: memref<1x16x16x128xbf16, #tpu.memory_space<vmem>>) attributes {dimension_semantics = [#tpu.dimension_semantics<parallel>, #tpu.dimension_semantics<arbitrary>], iteration_bounds = array<i64: 2, 1>, scalar_prefetch = 0 : i64, scratch_operands = 0 : i64, tpu.core_type = #tpu.core_type<tc>, window_params = [{transform_indices = @transform_0, window_bounds = array<i64: 1, 20, 20, 128>}, {pipeline_mode = #tpu.pipeline_mode<synchronous>, transform_indices = @transform_1, window_bounds = array<i64: 1152, 128>}, {pipeline_mode = #tpu.pipeline_mode<synchronous>, transform_indices = @transform_2, window_bounds = array<i64: 1, 128>}, {transform_indices = @transform_3, window_bounds = array<i64: 1, 16, 16, 128>}]} {
    %c16_i32 = arith.constant 16 : i32
    %0 = arith.muli %arg1, %c16_i32 : i32
    %c0_i32 = arith.constant 0 : i32
    %1 = arith.addi %0, %c0_i32 : i32
    %c0 = arith.constant 0 : index
    %2 = arith.index_cast %1 : i32 to index
    %c0_0 = arith.constant 0 : index
    %c0_1 = arith.constant 0 : index
    %3 = vector.load %arg2[%c0, %2, %c0_0, %c0_1] : memref<1x20x20x128xbf16, #tpu.memory_space<vmem>>, vector<1x16x16x128xbf16>
    %4 = vector.shape_cast %3 : vector<1x16x16x128xbf16> to vector<16x16x128xbf16>
    %5 = vector.shape_cast %4 : vector<16x16x128xbf16> to vector<256x128xbf16>
    %c0_i32_2 = arith.constant 0 : i32
    %6 = arith.addi %0, %c0_i32_2 : i32
    %c0_3 = arith.constant 0 : index
    %7 = arith.index_cast %6 : i32 to index
    %c2 = arith.constant 2 : index
    %c0_4 = arith.constant 0 : index
    %8 = vector.load %arg2[%c0_3, %7, %c2, %c0_4] : memref<1x20x20x128xbf16, #tpu.memory_space<vmem>>, vector<1x16x16x128xbf16>
    %9 = vector.shape_cast %8 : vector<1x16x16x128xbf16> to vector<16x16x128xbf16>
    %10 = vector.shape_cast %9 : vector<16x16x128xbf16> to vector<256x128xbf16>
    %c0_i32_5 = arith.constant 0 : i32
    %11 = arith.addi %0, %c0_i32_5 : i32
    %c0_6 = arith.constant 0 : index
    %12 = arith.index_cast %11 : i32 to index
    %c4 = arith.constant 4 : index
    %c0_7 = arith.constant 0 : index
    %13 = vector.load %arg2[%c0_6, %12, %c4, %c0_7] : memref<1x20x20x128xbf16, #tpu.memory_space<vmem>>, vector<1x16x16x128xbf16>
    %14 = vector.shape_cast %13 : vector<1x16x16x128xbf16> to vector<16x16x128xbf16>
    %15 = vector.shape_cast %14 : vector<16x16x128xbf16> to vector<256x128xbf16>
    %c2_i32 = arith.constant 2 : i32
    %16 = arith.addi %0, %c2_i32 : i32
    %c0_8 = arith.constant 0 : index
    %17 = arith.index_cast %16 : i32 to index
    %c0_9 = arith.constant 0 : index
    %c0_10 = arith.constant 0 : index
    %18 = vector.load %arg2[%c0_8, %17, %c0_9, %c0_10] : memref<1x20x20x128xbf16, #tpu.memory_space<vmem>>, vector<1x16x16x128xbf16>
    %19 = vector.shape_cast %18 : vector<1x16x16x128xbf16> to vector<16x16x128xbf16>
    %20 = vector.shape_cast %19 : vector<16x16x128xbf16> to vector<256x128xbf16>
    %c2_i32_11 = arith.constant 2 : i32
    %21 = arith.addi %0, %c2_i32_11 : i32
    %c0_12 = arith.constant 0 : index
    %22 = arith.index_cast %21 : i32 to index
    %c2_13 = arith.constant 2 : index
    %c0_14 = arith.constant 0 : index
    %23 = vector.load %arg2[%c0_12, %22, %c2_13, %c0_14] : memref<1x20x20x128xbf16, #tpu.memory_space<vmem>>, vector<1x16x16x128xbf16>
    %24 = vector.shape_cast %23 : vector<1x16x16x128xbf16> to vector<16x16x128xbf16>
    %25 = vector.shape_cast %24 : vector<16x16x128xbf16> to vector<256x128xbf16>
    %c2_i32_15 = arith.constant 2 : i32
    %26 = arith.addi %0, %c2_i32_15 : i32
    %c0_16 = arith.constant 0 : index
    %27 = arith.index_cast %26 : i32 to index
    %c4_17 = arith.constant 4 : index
    %c0_18 = arith.constant 0 : index
    %28 = vector.load %arg2[%c0_16, %27, %c4_17, %c0_18] : memref<1x20x20x128xbf16, #tpu.memory_space<vmem>>, vector<1x16x16x128xbf16>
    %29 = vector.shape_cast %28 : vector<1x16x16x128xbf16> to vector<16x16x128xbf16>
    %30 = vector.shape_cast %29 : vector<16x16x128xbf16> to vector<256x128xbf16>
    %c4_i32 = arith.constant 4 : i32
    %31 = arith.addi %0, %c4_i32 : i32
    %c0_19 = arith.constant 0 : index
    %32 = arith.index_cast %31 : i32 to index
    %c0_20 = arith.constant 0 : index
    %c0_21 = arith.constant 0 : index
    %33 = vector.load %arg2[%c0_19, %32, %c0_20, %c0_21] : memref<1x20x20x128xbf16, #tpu.memory_space<vmem>>, vector<1x16x16x128xbf16>
    %34 = vector.shape_cast %33 : vector<1x16x16x128xbf16> to vector<16x16x128xbf16>
    %35 = vector.shape_cast %34 : vector<16x16x128xbf16> to vector<256x128xbf16>
    %c4_i32_22 = arith.constant 4 : i32
    %36 = arith.addi %0, %c4_i32_22 : i32
    %c0_23 = arith.constant 0 : index
    %37 = arith.index_cast %36 : i32 to index
    %c2_24 = arith.constant 2 : index
    %c0_25 = arith.constant 0 : index
    %38 = vector.load %arg2[%c0_23, %37, %c2_24, %c0_25] : memref<1x20x20x128xbf16, #tpu.memory_space<vmem>>, vector<1x16x16x128xbf16>
    %39 = vector.shape_cast %38 : vector<1x16x16x128xbf16> to vector<16x16x128xbf16>
    %40 = vector.shape_cast %39 : vector<16x16x128xbf16> to vector<256x128xbf16>
    %c4_i32_26 = arith.constant 4 : i32
    %41 = arith.addi %0, %c4_i32_26 : i32
    %c0_27 = arith.constant 0 : index
    %42 = arith.index_cast %41 : i32 to index
    %c4_28 = arith.constant 4 : index
    %c0_29 = arith.constant 0 : index
    %43 = vector.load %arg2[%c0_27, %42, %c4_28, %c0_29] : memref<1x20x20x128xbf16, #tpu.memory_space<vmem>>, vector<1x16x16x128xbf16>
    %44 = vector.shape_cast %43 : vector<1x16x16x128xbf16> to vector<16x16x128xbf16>
    %45 = vector.shape_cast %44 : vector<16x16x128xbf16> to vector<256x128xbf16>
    %46 = tpu.concatenate %5, %10, %15, %20, %25, %30, %35, %40, %45 in 1 : vector<256x128xbf16>, vector<256x128xbf16>, vector<256x128xbf16>, vector<256x128xbf16>, vector<256x128xbf16>, vector<256x128xbf16>, vector<256x128xbf16>, vector<256x128xbf16>, vector<256x128xbf16> -> vector<256x1152xbf16>
    %c0_30 = arith.constant 0 : index
    %c0_31 = arith.constant 0 : index
    %47 = vector.load %arg3[%c0_30, %c0_31] : memref<1152x128xbf16, #tpu.memory_space<vmem>>, vector<1152x128xbf16>
    %cst = arith.constant dense<0.000000e+00> : vector<256x128xf32>
    %48 = tpu.matmul %46, %47, %cst {dimension_numbers = #tpu.dot_dimension_numbers<[1], [0], [0], [1], [0, 0, 1, 1], [], []>} : vector<256x1152xbf16>, vector<1152x128xbf16>, vector<256x128xf32> -> vector<256x128xf32>
    %c0_32 = arith.constant 0 : index
    %c0_33 = arith.constant 0 : index
    %49 = vector.load %arg4[%c0_32, %c0_33] : memref<1x128xf32, #tpu.memory_space<vmem>>, vector<1x128xf32>
    %50 = vector.broadcast %49 : vector<1x128xf32> to vector<256x128xf32>
    %51 = arith.addf %48, %50 : vector<256x128xf32>
    %cst_34 = arith.constant 0.000000e+00 : f32
    %52 = vector.broadcast %cst_34 : f32 to vector<256x128xf32>
    %53 = arith.maximumf %51, %52 : vector<256x128xf32>
    %54 = vector.shape_cast %53 : vector<256x128xf32> to vector<16x16x128xf32>
    %55 = arith.truncf %54 : vector<16x16x128xf32> to vector<16x16x128xbf16>
    %c0_35 = arith.constant 0 : index
    %c0_36 = arith.constant 0 : index
    %c0_37 = arith.constant 0 : index
    %c0_38 = arith.constant 0 : index
    %56 = vector.load %arg5[%c0_35, %c0_36, %c0_37, %c0_38] : memref<1x16x16x128xbf16, #tpu.memory_space<vmem>>, vector<1x16x16x128xbf16>
    %57 = vector.shape_cast %56 : vector<1x16x16x128xbf16> to vector<16x16x128xbf16>
    %58 = vector.shape_cast %55 : vector<16x16x128xbf16> to vector<1x16x16x128xbf16>
    tpu.vector_store %arg5[%c0_35, %c0_36, %c0_37, %c0_38], %58 {strides = array<i32>} : memref<1x16x16x128xbf16, #tpu.memory_space<vmem>>, vector<1x16x16x128xbf16>,
    return
  }
  func.func @transform_0(%arg0: i32, %arg1: i32) -> (i32, i32, i32, i32) {
    %c0_i32 = arith.constant 0 : i32
    %c0_i32_0 = arith.constant 0 : i32
    %c0_i32_1 = arith.constant 0 : i32
    %c0_i32_2 = arith.constant 0 : i32
    return %arg0, %c0_i32, %c0_i32_0, %c0_i32_1 : i32, i32, i32, i32
  }
  func.func @transform_1(%arg0: i32, %arg1: i32) -> (i32, i32) {
    %c0_i32 = arith.constant 0 : i32
    %c0_i32_0 = arith.constant 0 : i32
    %c0_i32_1 = arith.constant 0 : i32
    return %c0_i32, %c0_i32_0 : i32, i32
  }
  func.func @transform_2(%arg0: i32, %arg1: i32) -> (i32, i32) {
    %c0_i32 = arith.constant 0 : i32
    %c0_i32_0 = arith.constant 0 : i32
    %c0_i32_1 = arith.constant 0 : i32
    return %c0_i32, %c0_i32_0 : i32, i32
  }
  func.func @transform_3(%arg0: i32, %arg1: i32) -> (i32, i32, i32, i32) {
    %c0_i32 = arith.constant 0 : i32
    %c0_i32_0 = arith.constant 0 : i32
    %c0_i32_1 = arith.constant 0 : i32
    return %arg0, %arg1, %c0_i32, %c0_i32_0 : i32, i32, i32, i32
  }
}

module attributes {stable_mosaic.version = 11 : i64} {
  func.func @_conv_bn_relu_kernel(%arg0: i32, %arg1: i32, %arg2: memref<1x18x18x128xbf16, #tpu.memory_space<vmem>>, %arg3: memref<512x128xbf16, #tpu.memory_space<vmem>>, %arg4: memref<1x128xf32, #tpu.memory_space<vmem>>, %arg5: memref<1x16x16x128xbf16, #tpu.memory_space<vmem>>) attributes {dimension_semantics = [#tpu.dimension_semantics<parallel>, #tpu.dimension_semantics<arbitrary>], iteration_bounds = array<i64: 2, 1>, scalar_prefetch = 0 : i64, scratch_operands = 0 : i64, tpu.core_type = #tpu.core_type<tc>, window_params = [{transform_indices = @transform_0, window_bounds = array<i64: 1, 18, 18, 128>}, {pipeline_mode = #tpu.pipeline_mode<synchronous>, transform_indices = @transform_1, window_bounds = array<i64: 512, 128>}, {pipeline_mode = #tpu.pipeline_mode<synchronous>, transform_indices = @transform_2, window_bounds = array<i64: 1, 128>}, {transform_indices = @transform_3, window_bounds = array<i64: 1, 16, 16, 128>}]} {
    %c16_i32 = arith.constant 16 : i32
    %0 = arith.muli %arg1, %c16_i32 : i32
    %c0_i32 = arith.constant 0 : i32
    %1 = arith.addi %0, %c0_i32 : i32
    %c0 = arith.constant 0 : index
    %2 = arith.index_cast %1 : i32 to index
    %c0_0 = arith.constant 0 : index
    %c0_1 = arith.constant 0 : index
    %3 = vector.load %arg2[%c0, %2, %c0_0, %c0_1] : memref<1x18x18x128xbf16, #tpu.memory_space<vmem>>, vector<1x16x16x128xbf16>
    %4 = vector.shape_cast %3 : vector<1x16x16x128xbf16> to vector<16x16x128xbf16>
    %5 = vector.shape_cast %4 : vector<16x16x128xbf16> to vector<256x128xbf16>
    %c0_i32_2 = arith.constant 0 : i32
    %6 = arith.addi %0, %c0_i32_2 : i32
    %c0_3 = arith.constant 0 : index
    %7 = arith.index_cast %6 : i32 to index
    %c2 = arith.constant 2 : index
    %c0_4 = arith.constant 0 : index
    %8 = vector.load %arg2[%c0_3, %7, %c2, %c0_4] : memref<1x18x18x128xbf16, #tpu.memory_space<vmem>>, vector<1x16x16x128xbf16>
    %9 = vector.shape_cast %8 : vector<1x16x16x128xbf16> to vector<16x16x128xbf16>
    %10 = vector.shape_cast %9 : vector<16x16x128xbf16> to vector<256x128xbf16>
    %c2_i32 = arith.constant 2 : i32
    %11 = arith.addi %0, %c2_i32 : i32
    %c0_5 = arith.constant 0 : index
    %12 = arith.index_cast %11 : i32 to index
    %c0_6 = arith.constant 0 : index
    %c0_7 = arith.constant 0 : index
    %13 = vector.load %arg2[%c0_5, %12, %c0_6, %c0_7] : memref<1x18x18x128xbf16, #tpu.memory_space<vmem>>, vector<1x16x16x128xbf16>
    %14 = vector.shape_cast %13 : vector<1x16x16x128xbf16> to vector<16x16x128xbf16>
    %15 = vector.shape_cast %14 : vector<16x16x128xbf16> to vector<256x128xbf16>
    %c2_i32_8 = arith.constant 2 : i32
    %16 = arith.addi %0, %c2_i32_8 : i32
    %c0_9 = arith.constant 0 : index
    %17 = arith.index_cast %16 : i32 to index
    %c2_10 = arith.constant 2 : index
    %c0_11 = arith.constant 0 : index
    %18 = vector.load %arg2[%c0_9, %17, %c2_10, %c0_11] : memref<1x18x18x128xbf16, #tpu.memory_space<vmem>>, vector<1x16x16x128xbf16>
    %19 = vector.shape_cast %18 : vector<1x16x16x128xbf16> to vector<16x16x128xbf16>
    %20 = vector.shape_cast %19 : vector<16x16x128xbf16> to vector<256x128xbf16>
    %21 = tpu.concatenate %5, %10, %15, %20 in 1 : vector<256x128xbf16>, vector<256x128xbf16>, vector<256x128xbf16>, vector<256x128xbf16> -> vector<256x512xbf16>
    %c0_12 = arith.constant 0 : index
    %c0_13 = arith.constant 0 : index
    %22 = vector.load %arg3[%c0_12, %c0_13] : memref<512x128xbf16, #tpu.memory_space<vmem>>, vector<512x128xbf16>
    %cst = arith.constant dense<0.000000e+00> : vector<256x128xf32>
    %23 = tpu.matmul %21, %22, %cst {dimension_numbers = #tpu.dot_dimension_numbers<[1], [0], [0], [1], [0, 0, 1, 1], [], []>} : vector<256x512xbf16>, vector<512x128xbf16>, vector<256x128xf32> -> vector<256x128xf32>
    %c0_14 = arith.constant 0 : index
    %c0_15 = arith.constant 0 : index
    %24 = vector.load %arg4[%c0_14, %c0_15] : memref<1x128xf32, #tpu.memory_space<vmem>>, vector<1x128xf32>
    %25 = vector.broadcast %24 : vector<1x128xf32> to vector<256x128xf32>
    %26 = arith.addf %23, %25 : vector<256x128xf32>
    %cst_16 = arith.constant 0.000000e+00 : f32
    %27 = vector.broadcast %cst_16 : f32 to vector<256x128xf32>
    %28 = arith.maximumf %26, %27 : vector<256x128xf32>
    %29 = vector.shape_cast %28 : vector<256x128xf32> to vector<16x16x128xf32>
    %30 = arith.truncf %29 : vector<16x16x128xf32> to vector<16x16x128xbf16>
    %c0_17 = arith.constant 0 : index
    %c0_18 = arith.constant 0 : index
    %c0_19 = arith.constant 0 : index
    %c0_20 = arith.constant 0 : index
    %31 = vector.load %arg5[%c0_17, %c0_18, %c0_19, %c0_20] : memref<1x16x16x128xbf16, #tpu.memory_space<vmem>>, vector<1x16x16x128xbf16>
    %32 = vector.shape_cast %31 : vector<1x16x16x128xbf16> to vector<16x16x128xbf16>
    %33 = vector.shape_cast %30 : vector<16x16x128xbf16> to vector<1x16x16x128xbf16>
    tpu.vector_store %arg5[%c0_17, %c0_18, %c0_19, %c0_20], %33 {strides = array<i32>} : memref<1x16x16x128xbf16, #tpu.memory_space<vmem>>, vector<1x16x16x128xbf16>,
    return
  }
  func.func @transform_0(%arg0: i32, %arg1: i32) -> (i32, i32, i32, i32) {
    %c0_i32 = arith.constant 0 : i32
    %c0_i32_0 = arith.constant 0 : i32
    %c0_i32_1 = arith.constant 0 : i32
    %c0_i32_2 = arith.constant 0 : i32
    return %arg0, %c0_i32, %c0_i32_0, %c0_i32_1 : i32, i32, i32, i32
  }
  func.func @transform_1(%arg0: i32, %arg1: i32) -> (i32, i32) {
    %c0_i32 = arith.constant 0 : i32
    %c0_i32_0 = arith.constant 0 : i32
    %c0_i32_1 = arith.constant 0 : i32
    return %c0_i32, %c0_i32_0 : i32, i32
  }
  func.func @transform_2(%arg0: i32, %arg1: i32) -> (i32, i32) {
    %c0_i32 = arith.constant 0 : i32
    %c0_i32_0 = arith.constant 0 : i32
    %c0_i32_1 = arith.constant 0 : i32
    return %c0_i32, %c0_i32_0 : i32, i32
  }
  func.func @transform_3(%arg0: i32, %arg1: i32) -> (i32, i32, i32, i32) {
    %c0_i32 = arith.constant 0 : i32
    %c0_i32_0 = arith.constant 0 : i32
    %c0_i32_1 = arith.constant 0 : i32
    return %arg0, %arg1, %c0_i32, %c0_i32_0 : i32, i32, i32, i32
  }
}

module attributes {stable_mosaic.version = 11 : i64} {
  func.func @_tail_kernel(%arg0: i32, %arg1: memref<512x128xbf16, #tpu.memory_space<vmem>>, %arg2: memref<512x128xbf16, #tpu.memory_space<vmem>>, %arg3: memref<512x128xbf16, #tpu.memory_space<vmem>>, %arg4: memref<512x128xbf16, #tpu.memory_space<vmem>>, %arg5: memref<128x128xbf16, #tpu.memory_space<vmem>>, %arg6: memref<384x128xbf16, #tpu.memory_space<vmem>>, %arg7: memref<1x128xf32, #tpu.memory_space<vmem>>, %arg8: memref<1x128xf32, #tpu.memory_space<vmem>>, %arg9: memref<512x128xf32, #tpu.memory_space<vmem>>) attributes {dimension_semantics = [#tpu.dimension_semantics<parallel>], iteration_bounds = array<i64: 1>, scalar_prefetch = 0 : i64, scratch_operands = 0 : i64, tpu.core_type = #tpu.core_type<tc>, window_params = [{transform_indices = @transform_0, window_bounds = array<i64: 512, 128>}, {transform_indices = @transform_1, window_bounds = array<i64: 512, 128>}, {transform_indices = @transform_2, window_bounds = array<i64: 512, 128>}, {transform_indices = @transform_3, window_bounds = array<i64: 512, 128>}, {pipeline_mode = #tpu.pipeline_mode<synchronous>, transform_indices = @transform_4, window_bounds = array<i64: 128, 128>}, {pipeline_mode = #tpu.pipeline_mode<synchronous>, transform_indices = @transform_5, window_bounds = array<i64: 384, 128>}, {pipeline_mode = #tpu.pipeline_mode<synchronous>, transform_indices = @transform_6, window_bounds = array<i64: 1, 128>}, {pipeline_mode = #tpu.pipeline_mode<synchronous>, transform_indices = @transform_7, window_bounds = array<i64: 1, 128>}, {transform_indices = @transform_8, window_bounds = array<i64: 512, 128>}]} {
    %c0 = arith.constant 0 : index
    %c0_0 = arith.constant 0 : index
    %0 = vector.load %arg2[%c0, %c0_0] : memref<512x128xbf16, #tpu.memory_space<vmem>>, vector<512x128xbf16>
    %c0_1 = arith.constant 0 : index
    %c0_2 = arith.constant 0 : index
    %1 = vector.load %arg3[%c0_1, %c0_2] : memref<512x128xbf16, #tpu.memory_space<vmem>>, vector<512x128xbf16>
    %c0_3 = arith.constant 0 : index
    %c0_4 = arith.constant 0 : index
    %2 = vector.load %arg4[%c0_3, %c0_4] : memref<512x128xbf16, #tpu.memory_space<vmem>>, vector<512x128xbf16>
    %3 = tpu.concatenate %0, %1, %2 in 1 : vector<512x128xbf16>, vector<512x128xbf16>, vector<512x128xbf16> -> vector<512x384xbf16>
    %c0_5 = arith.constant 0 : index
    %c0_6 = arith.constant 0 : index
    %4 = vector.load %arg6[%c0_5, %c0_6] : memref<384x128xbf16, #tpu.memory_space<vmem>>, vector<384x128xbf16>
    %cst = arith.constant dense<0.000000e+00> : vector<512x128xf32>
    %5 = tpu.matmul %3, %4, %cst {dimension_numbers = #tpu.dot_dimension_numbers<[1], [0], [0], [1], [0, 0, 1, 1], [], []>} : vector<512x384xbf16>, vector<384x128xbf16>, vector<512x128xf32> -> vector<512x128xf32>
    %c0_7 = arith.constant 0 : index
    %c0_8 = arith.constant 0 : index
    %6 = vector.load %arg1[%c0_7, %c0_8] : memref<512x128xbf16, #tpu.memory_space<vmem>>, vector<512x128xbf16>
    %c0_9 = arith.constant 0 : index
    %c0_10 = arith.constant 0 : index
    %7 = vector.load %arg5[%c0_9, %c0_10] : memref<128x128xbf16, #tpu.memory_space<vmem>>, vector<128x128xbf16>
    %cst_11 = arith.constant dense<0.000000e+00> : vector<512x128xf32>
    %8 = tpu.matmul %6, %7, %cst_11 {dimension_numbers = #tpu.dot_dimension_numbers<[1], [0], [0], [1], [0, 0, 1, 1], [], []>} : vector<512x128xbf16>, vector<128x128xbf16>, vector<512x128xf32> -> vector<512x128xf32>
    %c0_12 = arith.constant 0 : index
    %c0_13 = arith.constant 0 : index
    %9 = vector.load %arg8[%c0_12, %c0_13] : memref<1x128xf32, #tpu.memory_space<vmem>>, vector<1x128xf32>
    %10 = vector.broadcast %9 : vector<1x128xf32> to vector<512x128xf32>
    %11 = arith.addf %5, %10 : vector<512x128xf32>
    %cst_14 = arith.constant 0.000000e+00 : f32
    %12 = vector.broadcast %cst_14 : f32 to vector<512x128xf32>
    %13 = arith.maximumf %11, %12 : vector<512x128xf32>
    %c0_15 = arith.constant 0 : index
    %c0_16 = arith.constant 0 : index
    %14 = vector.load %arg7[%c0_15, %c0_16] : memref<1x128xf32, #tpu.memory_space<vmem>>, vector<1x128xf32>
    %15 = vector.broadcast %14 : vector<1x128xf32> to vector<512x128xf32>
    %16 = arith.addf %8, %15 : vector<512x128xf32>
    %cst_17 = arith.constant 0.000000e+00 : f32
    %17 = vector.broadcast %cst_17 : f32 to vector<512x128xf32>
    %18 = arith.maximumf %16, %17 : vector<512x128xf32>
    %19 = arith.addf %13, %18 : vector<512x128xf32>
    %c0_18 = arith.constant 0 : index
    %c0_19 = arith.constant 0 : index
    %20 = vector.load %arg9[%c0_18, %c0_19] : memref<512x128xf32, #tpu.memory_space<vmem>>, vector<512x128xf32>
    tpu.vector_store %arg9[%c0_18, %c0_19], %19 {strides = array<i32>} : memref<512x128xf32, #tpu.memory_space<vmem>>, vector<512x128xf32>,
    return
  }
  func.func @transform_0(%arg0: i32) -> (i32, i32) {
    %c0_i32 = arith.constant 0 : i32
    %c0_i32_0 = arith.constant 0 : i32
    return %arg0, %c0_i32 : i32, i32
  }
  func.func @transform_1(%arg0: i32) -> (i32, i32) {
    %c0_i32 = arith.constant 0 : i32
    %c0_i32_0 = arith.constant 0 : i32
    return %arg0, %c0_i32 : i32, i32
  }
  func.func @transform_2(%arg0: i32) -> (i32, i32) {
    %c0_i32 = arith.constant 0 : i32
    %c0_i32_0 = arith.constant 0 : i32
    return %arg0, %c0_i32 : i32, i32
  }
  func.func @transform_3(%arg0: i32) -> (i32, i32) {
    %c0_i32 = arith.constant 0 : i32
    %c0_i32_0 = arith.constant 0 : i32
    return %arg0, %c0_i32 : i32, i32
  }
  func.func @transform_4(%arg0: i32) -> (i32, i32) {
    %c0_i32 = arith.constant 0 : i32
    %c0_i32_0 = arith.constant 0 : i32
    %c0_i32_1 = arith.constant 0 : i32
    return %c0_i32, %c0_i32_0 : i32, i32
  }
  func.func @transform_5(%arg0: i32) -> (i32, i32) {
    %c0_i32 = arith.constant 0 : i32
    %c0_i32_0 = arith.constant 0 : i32
    %c0_i32_1 = arith.constant 0 : i32
    return %c0_i32, %c0_i32_0 : i32, i32
  }
  func.func @transform_6(%arg0: i32) -> (i32, i32) {
    %c0_i32 = arith.constant 0 : i32
    %c0_i32_0 = arith.constant 0 : i32
    %c0_i32_1 = arith.constant 0 : i32
    return %c0_i32, %c0_i32_0 : i32, i32
  }
  func.func @transform_7(%arg0: i32) -> (i32, i32) {
    %c0_i32 = arith.constant 0 : i32
    %c0_i32_0 = arith.constant 0 : i32
    %c0_i32_1 = arith.constant 0 : i32
    return %c0_i32, %c0_i32_0 : i32, i32
  }
  func.func @transform_8(%arg0: i32) -> (i32, i32) {
    %c0_i32 = arith.constant 0 : i32
    %c0_i32_0 = arith.constant 0 : i32
    return %arg0, %c0_i32 : i32, i32
  }
}

</mosaic_0001>

<bundles_post_ra>
// kernel: decblock_forward.5
= control target key start
LH: loop header
LB: loop body
LE: loop exit
PB: predicated region body
PF: predicated region fallthrough
CT: control target
= control target key end

     0   :  { %s2439_s12 = smov 0   ;;  %s2441_s13 = smov 0   ;;  %s3037_s0 = inlined_call_operand.vmem [shape: bf16[2,9,9,128], index: 0, kind: input, shape index: {}]   ;;  %s3038_s1 = inlined_call_operand.vmem [shape: bf16[512,512], index: 1, kind: input, shape index: {}]   ;;  %s3039_s2 = inlined_call_operand.vmem [shape: f32[1,512], index: 2, kind: input, shape index: {}]   ;;  %s3040_s3 = inlined_call_operand.vmem [shape: bf16[2,8,2,8,256], index: 3, kind: output, shape index: {}]  }
   0x1   :  { %s2443_s14 = smov 0  }
   0x2 LB: > { %s25_s15 = sadd.s32 1, %s2413_s13  ;;  %p1899_p0 = scmp.ge.s32.totalorder %s2417_s14, 1  ;;  %s2417_s14 = sphi %s2443_s14, %s13_s14   ;;  %s2413_s13 = sphi %s2441_s13, %s3044_s13   ;;  %s2409_s12 = sphi %s2439_s12, %s3043_s12  }
   0x3   : > { %p27_p1 = scmp.ge.s32.totalorder %s25_s15, 2  ;;  %p151_p2 = scmp.lt.s32.totalorder %s2417_s14, 3 }
   0x5   : > { %s3046_s15 = smov (%p27_p1, %s25_s15), 0  ;;  %p152_p3 = pnand %p1899_p0, %p151_p2 }
   0x6   : > { %v2195_v0 = vld [vmem:[%s3038_s1 + $0x4] ss:$16 sps:$4 sm:$0xff] (!%p152_p3)   ;;  %v2197_v1 = vld [vmem:[%s3038_s1 + $0xc] ss:$16 sps:$4 sm:$0xff] (!%p152_p3)   ;;  %v2199_v2 = vld [vmem:[%s3038_s1] ss:$16 sps:$4 sm:$0xff] (!%p152_p3)  }
   0x7   : > { %155 = sbr.rel (%p152_p3) target bundleno = 381 (0x17d), region = 32  ;;  %1333 = vmatprep.subr.bf16.mxu0 (!%p152_p3), %v2195_v0  ;;  %v2200_v3 = vld [vmem:[%s3038_s1 + $0x8] ss:$16 sps:$4 sm:$0xff] (!%p152_p3)   ;;  %1479 = vmatprep.subr.bf16.mxu1 (!%p152_p3), %v2197_v1  ;;  %v2201_v4 = vld [vmem:[%s3038_s1 + $0x24] ss:$16 sps:$4 sm:$0xff] (!%p152_p3)   ;;  %p180_p4 = scmp.lt.s32.totalorder (!%p152_p3), %s2409_s12, 1 }
   0x8   : > { %1334 = vmatpush1.bf16.msra.mxu0 (!%p152_p3), %v2199_v2  ;;  %1480 = vmatpush1.bf16.msra.mxu1 (!%p152_p3), %v2200_v3  ;;  %v2203_v5 = vld [vmem:[%s3038_s1 + $0x2c] ss:$16 sps:$4 sm:$0xff] (!%p152_p3)   ;;  %v2205_v6 = vld [vmem:[%s3038_s1 + $0x20] ss:$16 sps:$4 sm:$0xff] (!%p152_p3)   ;;  %v2206_v7 = vld [vmem:[%s3038_s1 + $0x28] ss:$16 sps:$4 sm:$0xff] (!%p152_p3)  }
   0x9   : > { %1335 = vmatprep.subr.bf16.mxu0 (!%p152_p3), %v2201_v4  ;;  %1481 = vmatprep.subr.bf16.mxu1 (!%p152_p3), %v2203_v5  ;;  %v2207_v8 = vld [vmem:[%s3038_s1 + $0x44] ss:$16 sps:$4 sm:$0xff] (!%p152_p3)   ;;  %v2209_v9 = vld [vmem:[%s3038_s1 + $0x4c] ss:$16 sps:$4 sm:$0xff] (!%p152_p3)   ;;  %v2211_v10 = vld [vmem:[%s3038_s1 + $0x40] ss:$16 sps:$4 sm:$0xff] (!%p152_p3)  }
   0xa   : > { %v2212_v11 = vld [vmem:[%s3038_s1 + $0x48] ss:$16 sps:$4 sm:$0xff] (!%p152_p3)   ;;  %v2213_v12 = vld [vmem:[%s3038_s1 + $0x64] ss:$16 sps:$4 sm:$0xff] (!%p152_p3)   ;;  %v2215_v13 = vld [vmem:[%s3038_s1 + $0x6c] ss:$16 sps:$4 sm:$0xff] (!%p152_p3)  }
   0xb   : > { %v2217_v14 = vld [vmem:[%s3038_s1 + $0x60] ss:$16 sps:$4 sm:$0xff] (!%p152_p3)   ;;  %v2218_v15 = vld [vmem:[%s3038_s1 + $0x68] ss:$16 sps:$4 sm:$0xff] (!%p152_p3)   ;;  %v2219_v16 = vld [vmem:[%s3038_s1 + $0x84] ss:$16 sps:$4 sm:$0xff] (!%p152_p3)  }
   0xc   : > { %1336 = vmatpush1.bf16.msra.mxu0 (!%p152_p3), %v2205_v6  ;;  %1482 = vmatpush1.bf16.msra.mxu1 (!%p152_p3), %v2206_v7  ;;  %v2221_v17 = vld [vmem:[%s3038_s1 + $0x8c] ss:$16 sps:$4 sm:$0xff] (!%p152_p3)   ;;  %v2223_v18 = vld [vmem:[%s3038_s1 + $0x80] ss:$16 sps:$4 sm:$0xff] (!%p152_p3)   ;;  %v2224_v19 = vld [vmem:[%s3038_s1 + $0x88] ss:$16 sps:$4 sm:$0xff] (!%p152_p3)  }
   0xd   : > { %1337 = vmatprep.subr.bf16.mxu0 (!%p152_p3), %v2207_v8  ;;  %1483 = vmatprep.subr.bf16.mxu1 (!%p152_p3), %v2209_v9  ;;  %v2225_v20 = vld [vmem:[%s3038_s1 + $0xa4] ss:$16 sps:$4 sm:$0xff] (!%p152_p3)   ;;  %v2227_v21 = vld [vmem:[%s3038_s1 + $0xac] ss:$16 sps:$4 sm:$0xff] (!%p152_p3)   ;;  %v2229_v22 = vld [vmem:[%s3038_s1 + $0xa0] ss:$16 sps:$4 sm:$0xff] (!%p152_p3)  }
   0xe   : > { %v2230_v23 = vld [vmem:[%s3038_s1 + $0xa8] ss:$16 sps:$4 sm:$0xff]   ;;  %v2231_v24 = vld [vmem:[%s3038_s1 + $0xc4] ss:$16 sps:$4 sm:$0xff]   ;;  %v2233_v25 = vld [vmem:[%s3038_s1 + $0xcc] ss:$16 sps:$4 sm:$0xff]  }
   0xf   : > { %v2235_v26 = vld [vmem:[%s3038_s1 + $0xc0] ss:$16 sps:$4 sm:$0xff]   ;;  %v2236_v27 = vld [vmem:[%s3038_s1 + $0xc8] ss:$16 sps:$4 sm:$0xff]   ;;  %v2237_v28 = vld [vmem:[%s3038_s1 + $0xe4] ss:$16 sps:$4 sm:$0xff]  }
  0x10   : > { %1338 = vmatpush1.bf16.msra.mxu0 %v2211_v10  ;;  %1484 = vmatpush1.bf16.msra.mxu1 %v2212_v11  ;;  %v2239_v29 = vld [vmem:[%s3038_s1 + $0xec] ss:$16 sps:$4 sm:$0xff]   ;;  %v2241_v30 = vld [vmem:[%s3038_s1 + $0xe0] ss:$16 sps:$4 sm:$0xff]   ;;  %v2242_v31 = vld [vmem:[%s3038_s1 + $0xe8] ss:$16 sps:$4 sm:$0xff]  }
  0x11   : > { %1339 = vmatprep.subr.bf16.mxu0 %v2213_v12  ;;  %1485 = vmatprep.subr.bf16.mxu1 %v2215_v13  ;;  %v2243_v32 = vld [vmem:[%s3038_s1 + $0x104] ss:$16 sps:$4 sm:$0xff]   ;;  %v2245_v33 = vld [vmem:[%s3038_s1 + $0x10c] ss:$16 sps:$4 sm:$0xff]   ;;  %v2247_v34 = vld [vmem:[%s3038_s1 + $0x100] ss:$16 sps:$4 sm:$0xff]  }
  0x12   : > { %v2248_v35 = vld [vmem:[%s3038_s1 + $0x108] ss:$16 sps:$4 sm:$0xff]   ;;  %s3048_s12 = smov (!%p180_p4, %s2409_s12), 1  ;;  %v2249_v36 = vld [vmem:[%s3038_s1 + $0x124] ss:$16 sps:$4 sm:$0xff]  }
  0x13   : > { %v2251_v37 = vld [vmem:[%s3038_s1 + $0x12c] ss:$16 sps:$4 sm:$0xff]   ;;  %v2253_v38 = vld [vmem:[%s3038_s1 + $0x120] ss:$16 sps:$4 sm:$0xff]   ;;  %s2170_s25 = smul.u32 72, %s3048_s12  ;;  %s2089_s4 = sshll.u32 %s3048_s12, 7 }
  0x14   : > { %1340 = vmatpush1.bf16.msra.mxu0 %v2217_v14  ;;  %1486 = vmatpush1.bf16.msra.mxu1 %v2218_v15  ;;  %v2254_v39 = vld [vmem:[%s3038_s1 + $0x128] ss:$16 sps:$4 sm:$0xff]   ;;  %v2255_v40 = vld [vmem:[%s3038_s1 + $0x144] ss:$16 sps:$4 sm:$0xff]   ;;  %v2257_v41 = vld [vmem:[%s3038_s1 + $0x14c] ss:$16 sps:$4 sm:$0xff]   ;;  %s2986_s6 = scalar_lea.vmem %s3040_s3, %s2089_s4 }
  0x15   : > { %1341 = vmatprep.subr.bf16.mxu0 %v2219_v16  ;;  %1487 = vmatprep.subr.bf16.mxu1 %v2221_v17  ;;  %v2259_v42 = vld [vmem:[%s3038_s1 + $0x140] ss:$16 sps:$4 sm:$0xff]   ;;  %v2260_v43 = vld [vmem:[%s3038_s1 + $0x148] ss:$16 sps:$4 sm:$0xff]   ;;  %s2599_s11 = scalar_lea.vmem %s3037_s0, %s2170_s25  ;;  %v2261_v44 = vld [vmem:[%s3038_s1 + $0x164] ss:$16 sps:$4 sm:$0xff]  }
  0x16   : > { %vm216_vm0 = vsmask.f32 3328  ;;  %v2263_v45 = vld [vmem:[%s3038_s1 + $0x16c] ss:$16 sps:$4 sm:$0xff]   ;;  %vm217_vm1 = vsmask.f32 7440 }
  0x17   : > { %v2265_v46 = vld [vmem:[%s3038_s1 + $0x160] ss:$16 sps:$4 sm:$0xff]   ;;  %v2266_v47 = vld [vmem:[%s3038_s1 + $0x168] ss:$16 sps:$4 sm:$0xff]   ;;  %v208_v50 = vld [vmem:[%s2599_s11 + $0x4] sm:$0x1] }
  0x18   : > { %1342 = vmatpush1.bf16.msra.mxu0 %v2223_v18  ;;  %1488 = vmatpush1.bf16.msra.mxu1 %v2224_v19  ;;  %v2614_v48 = vld [vmem:[%s2599_s11] sm:$0xf]  ;;  %v2617_v49 = vld [vmem:[%s2599_s11 + $0x8] sm:$0xf]  ;;  %v209_v51 = vld [vmem:[%s2599_s11 + $0xc] sm:$0x1] }
  0x19   : > { %1343 = vmatprep.subr.bf16.mxu0 %v2225_v20  ;;  %1489 = vmatprep.subr.bf16.mxu1 %v2227_v21  ;;  %v220_v52 = vshrl.u32 %v2614_v48, 16  ;;  %v223_v53 = vshll.u32 %v2614_v48, 16  ;;  %v229_v54 = vshll.u32 %v208_v50, 16  ;;  %v234_v55 = vshrl.u32 %v2617_v49, 16  ;;  %v2267_v56 = vld [vmem:[%s3038_s1 + $0x184] ss:$16 sps:$4 sm:$0xff]   ;;  %vm2645_vm2 = vmor %vm216_vm0, %vm217_vm1 }
  0x1a   : > { %v2269_v57 = vld [vmem:[%s3038_s1 + $0x18c] ss:$16 sps:$4 sm:$0xff]   ;;  %v237_v58 = vshll.u32 %v2617_v49, 16  ;;  %v243_v59 = vshll.u32 %v209_v51, 16  ;;  %v2271_v60 = vld [vmem:[%s3038_s1 + $0x180] ss:$16 sps:$4 sm:$0xff]  }
  0x1b   : > { %v222_v61 = vrot.slane %v220_v52, 4  ;;  %v225_v62 = vrot.slane %v223_v53, 5  ;;  %v236_v63 = vrot.slane %v234_v55, 4  ;;  %v2272_v0 = vld [vmem:[%s3038_s1 + $0x188] ss:$16 sps:$4 sm:$0xff]   ;;  %v231_v5 = vrot.slane %v229_v54, 5 }
  0x1c   : > { %1344 = vmatpush1.bf16.msra.mxu0 %v2229_v22  ;;  %1490 = vmatpush1.bf16.msra.mxu1 %v2230_v23  ;;  %v2273_v1 = vld [vmem:[%s3038_s1 + $0x1a4] ss:$16 sps:$4 sm:$0xff]   ;;  %v239_v2 = vrot.slane %v237_v58, 5  ;;  %v2275_v3 = vld [vmem:[%s3038_s1 + $0x1ac] ss:$16 sps:$4 sm:$0xff]   ;;  %v245_v8 = vrot.slane %v243_v59, 5 }
  0x1d   : > { %1345 = vmatprep.subr.bf16.mxu0 %v2231_v24  ;;  %1491 = vmatprep.subr.bf16.mxu1 %v2233_v25  ;;  %v226_v4 = vor.u32 %v225_v62, %v222_v61  ;;  %v2277_v10 = vld [vmem:[%s3038_s1 + $0x1a0] ss:$16 sps:$4 sm:$0xff]   ;;  %v2278_v11 = vld [vmem:[%s3038_s1 + $0x1a8] ss:$16 sps:$4 sm:$0xff]   ;;  %v2279_v13 = vld [vmem:[%s3038_s1 + $0x1c4] ss:$16 sps:$4 sm:$0xff]  }
  0x1e   : > { %v240_v7 = vor.u32 %v239_v2, %v236_v63  ;;  %v2281_v15 = vld [vmem:[%s3038_s1 + $0x1cc] ss:$16 sps:$4 sm:$0xff]   ;;  %v2283_v18 = vld [vmem:[%s3038_s1 + $0x1c0] ss:$16 sps:$4 sm:$0xff]   ;;  %v2284_v19 = vld [vmem:[%s3038_s1 + $0x1c8] ss:$16 sps:$4 sm:$0xff]  }
  0x1f   : > { %v227_v9 = vrot.slane %v226_v4, 4  ;;  %v2285_v20 = vld [vmem:[%s3038_s1 + $0x1e4] ss:$16 sps:$4 sm:$0xff]   ;;  %v2287_v21 = vld [vmem:[%s3038_s1 + $0x1ec] ss:$16 sps:$4 sm:$0xff]  }
  0x20   : > { %1346 = vmatpush1.bf16.msra.mxu0 %v2235_v26  ;;  %1492 = vmatpush1.bf16.msra.mxu1 %v2236_v27  ;;  %v241_v12 = vrot.slane %v240_v7, 4  ;;  %v2289_v22 = vld [vmem:[%s3038_s1 + $0x1e0] ss:$16 sps:$4 sm:$0xff]   ;;  %v2290_v23 = vld [vmem:[%s3038_s1 + $0x1e8] ss:$16 sps:$4 sm:$0xff]  }
  0x21   : > { %1347 = vmatprep.subr.bf16.mxu0 %v2237_v28  ;;  %1493 = vmatprep.subr.bf16.mxu1 %v2239_v29  ;;  %v232_v14 = vsel %vm2645_vm2, %v227_v9, %v231_v5  ;;  %v2293_v24 = vld [vmem:[%s3038_s1 + $0x204] ss:$16 sps:$4 sm:$0xff]   ;;  %v2296_v25 = vld [vmem:[%s3038_s1 + $0x20c] ss:$16 sps:$4 sm:$0xff]   ;;  %v2291_v26 = vld [vmem:[%s3038_s1 + $0x200] ss:$16 sps:$4 sm:$0xff]   ;;  %v1919_v28 = vcombine.low %v2614_v48, %v2617_v49 }
  0x22   : > { %v246_v16 = vsel %vm2645_vm2, %v241_v12, %v245_v8  ;;  %v2294_v27 = vld [vmem:[%s3038_s1 + $0x208] ss:$16 sps:$4 sm:$0xff]   ;;  %v2300_v29 = vld [vmem:[%s3038_s1 + $0x224] ss:$16 sps:$4 sm:$0xff]   ;;  %v2316_v59 = vld [vmem:[%s3038_s1 + $0x280] ss:$16 sps:$4 sm:$0xff]  }
  0x23   : > { %v1923_v17 = vcombine.low %v232_v14, %v246_v16  ;;  %v2313_v50 = vld [vmem:[%s3038_s1 + $0x268] ss:$16 sps:$4 sm:$0xff]   ;;  %v2318_v54 = vld [vmem:[%s3038_s1 + $0x284] ss:$16 sps:$4 sm:$0xff]   ;;  %v213_v9 = vld [vmem:[%s2599_s11 + $0x2c] sm:$0x1] }
  0x24   : > { %1348 = vmatpush1.bf16.msra.mxu0 %v2241_v30  ;;  %1494 = vmatpush1.bf16.msra.mxu1 %v2242_v31  ;;  %v2303_v30 = vld [vmem:[%s3038_s1 + $0x22c] ss:$16 sps:$4 sm:$0xff]   ;;  %v2298_v31 = vld [vmem:[%s3038_s1 + $0x220] ss:$16 sps:$4 sm:$0xff]   ;;  %v2324_v63 = vld [vmem:[%s3038_s1 + $0x2a4] ss:$16 sps:$4 sm:$0xff]  }
  0x25   : > { %1349 = vmatprep.subr.bf16.mxu0 %v2243_v32  ;;  %1495 = vmatprep.subr.bf16.mxu1 %v2245_v33  ;;  %v2301_v32 = vld [vmem:[%s3038_s1 + $0x228] ss:$16 sps:$4 sm:$0xff]   ;;  %v2306_v33 = vld [vmem:[%s3038_s1 + $0x244] ss:$16 sps:$4 sm:$0xff]   ;;  %v2322_v12 = vld [vmem:[%s3038_s1 + $0x2a0] ss:$16 sps:$4 sm:$0xff]  }
  0x26   : > { %1365 = vmatprep.mubr.bf16.mxu0 %v1923_v17  ;;  %1511 = vmatprep.mubr.bf16.mxu1 %v1923_v17  ;;  %v205_v4 = vld [vmem:[%s2599_s11 + $0x28] sm:$0xf]  ;;  %v212_v8 = vld [vmem:[%s2599_s11 + $0x24] sm:$0x1]  ;;  %v671_v6 = vld [vmem:[%s3039_s2] sm:$0xf] }
  0x27   : > { %v285_v14 = vshll.u32 %v212_v8, 16  ;;  %v293_v16 = vshll.u32 %v205_v4, 16  ;;  %v2325_v17 = vld [vmem:[%s3038_s1 + $0x2a8] ss:$16 sps:$4 sm:$0xff]  }
  0x28   : > { %1350 = vmatpush1.bf16.msra.mxu0 %v2247_v34  ;;  %1496 = vmatpush1.bf16.msra.mxu1 %v2248_v35  ;;  %v2309_v34 = vld [vmem:[%s3038_s1 + $0x24c] ss:$16 sps:$4 sm:$0xff]   ;;  %v2304_v35 = vld [vmem:[%s3038_s1 + $0x240] ss:$16 sps:$4 sm:$0xff]  }
  0x29   : > { %1351 = vmatprep.subr.bf16.mxu0 %v2249_v36  ;;  %1497 = vmatprep.subr.bf16.mxu1 %v2251_v37  ;;  %v2307_v36 = vld [vmem:[%s3038_s1 + $0x248] ss:$16 sps:$4 sm:$0xff]   ;;  %v2312_v37 = vld [vmem:[%s3038_s1 + $0x264] ss:$16 sps:$4 sm:$0xff]  }
  0x2c   : > { %1352 = vmatpush1.bf16.msra.mxu0 %v2253_v38  ;;  %1498 = vmatpush1.bf16.msra.mxu1 %v2254_v39  ;;  %v2315_v38 = vld [vmem:[%s3038_s1 + $0x26c] ss:$16 sps:$4 sm:$0xff]   ;;  %v202_v39 = vld [vmem:[%s2599_s11 + $0x10] sm:$0xf] }
  0x2d   : > { %1353 = vmatprep.subr.bf16.mxu0 %v2255_v40  ;;  %1499 = vmatprep.subr.bf16.mxu1 %v2257_v41  ;;  %v203_v40 = vld [vmem:[%s2599_s11 + $0x18] sm:$0xf]  ;;  %v210_v41 = vld [vmem:[%s2599_s11 + $0x14] sm:$0x1] }
  0x2e   : > { %v265_v48 = vshll.u32 %v203_v40, 16  ;;  %v1920_v7 = vcombine.low %v202_v39, %v203_v40 }
  0x30   : > { %1354 = vmatpush1.bf16.msra.mxu0 %v2259_v42  ;;  %1500 = vmatpush1.bf16.msra.mxu1 %v2260_v43  ;;  %v211_v42 = vld [vmem:[%s2599_s11 + $0x1c] sm:$0x1]  ;;  %v248_v43 = vshrl.u32 %v202_v39, 16  ;;  %v267_v55 = vrot.slane %v265_v48, 5 }
  0x31   : > { %1355 = vmatprep.subr.bf16.mxu0 %v2261_v44  ;;  %1501 = vmatprep.subr.bf16.mxu1 %v2263_v45  ;;  %v251_v44 = vshll.u32 %v202_v39, 16  ;;  %v257_v45 = vshll.u32 %v210_v41, 16  ;;  %v271_v49 = vshll.u32 %v211_v42, 16  ;;  %v215_v41 = vld [vmem:[%s2599_s11 + $0x3c] sm:$0x1] }
  0x32   : > { %v250_v51 = vrot.slane %v248_v43, 4 }
  0x33   : > { %v253_v52 = vrot.slane %v251_v44, 5  ;;  %v259_v58 = vrot.slane %v257_v45, 5  ;;  %v273_v62 = vrot.slane %v271_v49, 5  ;;  %v2334_v44 = vld [vmem:[%s3038_s1 + $0x2e0] ss:$16 sps:$4 sm:$0xff]  }
  0x34   : > { %1356 = vmatpush1.bf16.msra.mxu0 %v2265_v46  ;;  %1502 = vmatpush1.bf16.msra.mxu1 %v2266_v47  ;;  %v262_v46 = vshrl.u32 %v203_v40, 16  ;;  %v2310_v47 = vld [vmem:[%s3038_s1 + $0x260] ss:$16 sps:$4 sm:$0xff]   ;;  %v214_v40 = vld [vmem:[%s2599_s11 + $0x34] sm:$0x1] }
  0x35   : > { %1357 = vmatprep.subr.bf16.mxu0 %v2267_v56  ;;  %1503 = vmatprep.subr.bf16.mxu1 %v2269_v57  ;;  %v2321_v56 = vld [vmem:[%s3038_s1 + $0x28c] ss:$16 sps:$4 sm:$0xff]   ;;  %v254_v57 = vor.u32 %v253_v52, %v250_v51  ;;  %v2337_v49 = vld [vmem:[%s3038_s1 + $0x2e8] ss:$16 sps:$4 sm:$0xff]  }
  0x36   : > { %v264_v53 = vrot.slane %v262_v46, 4  ;;  %v313_v46 = vshll.u32 %v214_v40, 16 }
  0x38   : > { %1358 = vmatpush1.bf16.msra.mxu0 %v2271_v60  ;;  %1504 = vmatpush1.bf16.msra.mxu1 %v2272_v0  ;;  %v2319_v60 = vld [vmem:[%s3038_s1 + $0x288] ss:$16 sps:$4 sm:$0xff]   ;;  %v268_v61 = vor.u32 %v267_v55, %v264_v53  ;;  %v2327_v0 = vld [vmem:[%s3038_s1 + $0x2ac] ss:$16 sps:$4 sm:$0xff]   ;;  %v327_v53 = vshll.u32 %v215_v41, 16 }
  0x39   : > { %1359 = vmatprep.subr.bf16.mxu0 %v2273_v1  ;;  %1505 = vmatprep.subr.bf16.mxu1 %v2275_v3  ;;  %v255_v1 = vrot.slane %v254_v57, 4  ;;  %v204_v3 = vld [vmem:[%s2599_s11 + $0x20] sm:$0xf]  ;;  %v2345_v57 = vld [vmem:[%s3038_s1 + $0x30c] ss:$16 sps:$4 sm:$0xff]  }
  0x3a   : > { %v269_v2 = vrot.slane %v268_v61, 4  ;;  %v1921_v39 = vcombine.low %v204_v3, %v205_v4  ;;  %v2343_v61 = vld [vmem:[%s3038_s1 + $0x308] ss:$16 sps:$4 sm:$0xff]  }
  0x3b   : > { %v260_v5 = vsel %vm2645_vm2, %v255_v1, %v259_v58  ;;  %v2351_v1 = vld [vmem:[%s3038_s1 + $0x32c] ss:$16 sps:$4 sm:$0xff]  }
  0x3c   : > { %1360 = vmatpush1.bf16.msra.mxu0 %v2277_v10  ;;  %1506 = vmatpush1.bf16.msra.mxu1 %v2278_v11  ;;  %v276_v10 = vshrl.u32 %v204_v3, 16  ;;  %v279_v11 = vshll.u32 %v204_v3, 16 }
  0x3d   : > { %1361 = vmatprep.subr.bf16.mxu0 %v2279_v13  ;;  %1507 = vmatprep.subr.bf16.mxu1 %v2281_v15  ;;  %v274_v13 = vsel %vm2645_vm2, %v269_v2, %v273_v62  ;;  %v290_v15 = vshrl.u32 %v205_v4, 16  ;;  %v2820_v4 = vld [vmem:[%s2599_s11 + $0x8] sm:$0xf] }
  0x40   : > { %1362 = vmatpush1.bf16.msra.mxu0 %v2283_v18  ;;  %1508 = vmatpush1.bf16.msra.mxu1 %v2284_v19  ;;  %v1924_v18 = vcombine.low %v260_v5, %v274_v13  ;;  %v278_v19 = vrot.slane %v276_v10, 4  ;;  %v2823_v5 = vld [vmem:[%s2599_s11 + $0x10] sm:$0xf]  ;;  %v1912_v10 = vld [vmem:[%s2599_s11 + $0x14] sm:$0x1] }
  0x41   : > { %1363 = vmatprep.subr.bf16.mxu0 %v2285_v20  ;;  %1509 = vmatprep.subr.bf16.mxu1 %v2287_v21  ;;  %v281_v20 = vrot.slane %v279_v11, 5  ;;  %v299_v21 = vshll.u32 %v213_v9, 16  ;;  %v1911_v9 = vld [vmem:[%s2599_s11 + $0xc] sm:$0x1]  ;;  %v352_v11 = vshrl.u32 %v2820_v4, 16 }
  0x44   : > { %1364 = vmatpush1.bf16.msra.mxu0 %v2289_v22  ;;  %1510 = vmatpush1.bf16.msra.mxu1 %v2290_v23  ;;  %v2330_v22 = vld [vmem:[%s3038_s1 + $0x2c4] ss:$16 sps:$4 sm:$0xff]   ;;  %v292_v23 = vrot.slane %v290_v15, 4  ;;  %v366_v15 = vshrl.u32 %v2823_v5, 16 }
  0x45   : > { %1406 = vmatprep.subr.bf16.mxu0 %v2293_v24  ;;  %1552 = vmatprep.subr.bf16.mxu1 %v2296_v25  ;;  %v295_v24 = vrot.slane %v293_v16, 5  ;;  %v2333_v25 = vld [vmem:[%s3038_s1 + $0x2cc] ss:$16 sps:$4 sm:$0xff]   ;;  %v369_v16 = vshll.u32 %v2823_v5, 16 }
  0x47   : > { %1366 = vmatmul.mubr.bf16.vlgmr.msra.gmra.mrb[0].mxu0 %v1919_v28  ;;  %1512 = vmatmul.mubr.bf16.vlgmr.msra.gmra.mrb[0].mxu1 %v1919_v28  ;;  %v2328_v28 = vld [vmem:[%s3038_s1 + $0x2c0] ss:$16 sps:$4 sm:$0xff]  }
  0x48   : > { %1407 = vmatpush1.bf16.msra.mxu0 %v2291_v26  ;;  %1553 = vmatpush1.bf16.msra.mxu1 %v2294_v27  ;;  %v282_v26 = vor.u32 %v281_v20, %v278_v19  ;;  %v287_v27 = vrot.slane %v285_v14, 5  ;;  %v361_v14 = vshll.u32 %v1911_v9, 16  ;;  %v375_v20 = vshll.u32 %v1912_v10, 16  ;;  %v2381_v9 = vld [vmem:[%s3038_s1 + $0x3c4] ss:$16 sps:$4 sm:$0xff]  }
  0x49   : > { %1408 = vmatprep.subr.bf16.mxu0 %v2300_v29  ;;  %1554 = vmatprep.subr.bf16.mxu1 %v2303_v30  ;;  %v2331_v29 = vld [vmem:[%s3038_s1 + $0x2c8] ss:$16 sps:$4 sm:$0xff]   ;;  %v296_v30 = vor.u32 %v295_v24, %v292_v23  ;;  %v368_v23 = vrot.slane %v366_v15, 4  ;;  %v371_v24 = vrot.slane %v369_v16, 5  ;;  %v2384_v10 = vld [vmem:[%s3038_s1 + $0x3cc] ss:$16 sps:$4 sm:$0xff]  }
  0x4a   : > { %1375 = vmatprep.mubr.bf16.mxu0 %v1924_v18  ;;  %1521 = vmatprep.mubr.bf16.mxu1 %v1924_v18  ;;  %v354_v18 = vrot.slane %v352_v11, 4  ;;  %v2387_v15 = vld [vmem:[%s3038_s1 + $0x3e4] ss:$16 sps:$4 sm:$0xff]   ;;  %v2390_v16 = vld [vmem:[%s3038_s1 + $0x3ec] ss:$16 sps:$4 sm:$0xff]  }
  0x4c   : > { %1409 = vmatpush1.bf16.msra.mxu0 %v2298_v31  ;;  %1555 = vmatpush1.bf16.msra.mxu1 %v2301_v32  ;;  %v301_v31 = vrot.slane %v299_v21, 5  ;;  %v2336_v32 = vld [vmem:[%s3038_s1 + $0x2e4] ss:$16 sps:$4 sm:$0xff]   ;;  %v2346_v21 = vld [vmem:[%s3038_s1 + $0x320] ss:$16 sps:$4 sm:$0xff]  }
  0x4d   : > { %1410 = vmatprep.subr.bf16.mxu0 %v2306_v33  ;;  %1556 = vmatprep.subr.bf16.mxu1 %v2309_v34  ;;  %v2339_v33 = vld [vmem:[%s3038_s1 + $0x2ec] ss:$16 sps:$4 sm:$0xff]   ;;  %v283_v34 = vrot.slane %v282_v26, 4 }
  0x4e   : > { %v2358_v26 = vld [vmem:[%s3038_s1 + $0x34c] ss:$16 sps:$4 sm:$0xff]  }
  0x4f   : > { %1376 = vmatmul.mubr.bf16.gmra.mrb[4].mxu0 %v1920_v7  ;;  %1522 = vmatmul.mubr.bf16.gmra.mrb[4].mxu1 %v1920_v7 }
  0x50   : > { %1411 = vmatpush1.bf16.msra.mxu0 %v2304_v35  ;;  %1557 = vmatpush1.bf16.msra.mxu1 %v2307_v36  ;;  %v297_v35 = vrot.slane %v296_v30, 4  ;;  %v206_v36 = vld [vmem:[%s2599_s11 + $0x30] sm:$0xf]  ;;  %v377_v30 = vrot.slane %v375_v20, 5 }
  0x51   : > { %1412 = vmatprep.subr.bf16.mxu0 %v2312_v37  ;;  %1558 = vmatprep.subr.bf16.mxu1 %v2315_v38  ;;  %v207_v37 = vld [vmem:[%s2599_s11 + $0x38] sm:$0xf]  ;;  %v288_v38 = vsel %vm2645_vm2, %v283_v34, %v287_v27  ;;  %v304_v42 = vshrl.u32 %v206_v36, 16  ;;  %v307_v43 = vshll.u32 %v206_v36, 16 }
  0x52   : > { %v302_v45 = vsel %vm2645_vm2, %v297_v35, %v301_v31  ;;  %v321_v48 = vshll.u32 %v207_v37, 16  ;;  %v1922_v8 = vcombine.low %v206_v36, %v207_v37  ;;  %v2353_v31 = vld [vmem:[%s3038_s1 + $0x340] ss:$16 sps:$4 sm:$0xff]   ;;  %v2854_v35 = vld [vmem:[%s2599_s11 + $0x18] sm:$0xf] }
  0x53   : > { %v306_v51 = vrot.slane %v304_v42, 4  ;;  %v309_v52 = vrot.slane %v307_v43, 5  ;;  %v2361_v36 = vld [vmem:[%s3038_s1 + $0x364] ss:$16 sps:$4 sm:$0xff]   ;;  %v380_v42 = vshrl.u32 %v2854_v35, 16  ;;  %v383_v43 = vshll.u32 %v2854_v35, 16 }
  0x54   : > { %1413 = vmatpush1.bf16.msra.mxu0 %v2310_v47  ;;  %1559 = vmatpush1.bf16.msra.mxu1 %v2313_v50  ;;  %v318_v47 = vshrl.u32 %v207_v37, 16  ;;  %v1925_v50 = vcombine.low %v288_v38, %v302_v45  ;;  %v2364_v37 = vld [vmem:[%s3038_s1 + $0x36c] ss:$16 sps:$4 sm:$0xff]   ;;  %v2362_v45 = vld [vmem:[%s3038_s1 + $0x368] ss:$16 sps:$4 sm:$0xff]  }
  0x55   : > { %1414 = vmatprep.subr.bf16.mxu0 %v2318_v54  ;;  %1560 = vmatprep.subr.bf16.mxu1 %v2321_v56  ;;  %v2342_v54 = vld [vmem:[%s3038_s1 + $0x304] ss:$16 sps:$4 sm:$0xff]   ;;  %v323_v56 = vrot.slane %v321_v48, 5  ;;  %v310_v58 = vor.u32 %v309_v52, %v306_v51  ;;  %v2369_v51 = vld [vmem:[%s3038_s1 + $0x388] ss:$16 sps:$4 sm:$0xff]   ;;  %v382_v52 = vrot.slane %v380_v42, 4 }
  0x56   : > { %v320_v55 = vrot.slane %v318_v47, 4  ;;  %1385 = vmatprep.mubr.bf16.mxu0 %v1925_v50  ;;  %1531 = vmatprep.mubr.bf16.mxu1 %v1925_v50  ;;  %v2368_v48 = vld [vmem:[%s3038_s1 + $0x384] ss:$16 sps:$4 sm:$0xff]   ;;  %v2366_v50 = vld [vmem:[%s3038_s1 + $0x380] ss:$16 sps:$4 sm:$0xff]  }
  0x57   : > { %1386 = vmatmul.mubr.bf16.gmra.mrb[8].mxu0 %v1921_v39  ;;  %1532 = vmatmul.mubr.bf16.gmra.mrb[8].mxu1 %v1921_v39  ;;  %v311_v2 = vrot.slane %v310_v58, 4  ;;  %v2865_v39 = vld [vmem:[%s2599_s11 + $0x20] sm:$0xf]  ;;  %v2377_v58 = vld [vmem:[%s3038_s1 + $0x3ac] ss:$16 sps:$4 sm:$0xff]  }
  0x58   : > { %1415 = vmatpush1.bf16.msra.mxu0 %v2316_v59  ;;  %1561 = vmatpush1.bf16.msra.mxu1 %v2319_v60  ;;  %v315_v59 = vrot.slane %v313_v46, 5  ;;  %v2340_v60 = vld [vmem:[%s3038_s1 + $0x300] ss:$16 sps:$4 sm:$0xff]   ;;  %v324_v62 = vor.u32 %v323_v56, %v320_v55  ;;  %v394_v46 = vshrl.u32 %v2865_v39, 16  ;;  %v397_v47 = vshll.u32 %v2865_v39, 16 }
  0x59   : > { %1416 = vmatprep.subr.bf16.mxu0 %v2324_v63  ;;  %1562 = vmatprep.subr.bf16.mxu1 %v2327_v0  ;;  %v329_v63 = vrot.slane %v327_v53, 5  ;;  %v2348_v0 = vld [vmem:[%s3038_s1 + $0x324] ss:$16 sps:$4 sm:$0xff]   ;;  %v385_v53 = vrot.slane %v383_v43, 5  ;;  %v1913_v55 = vld [vmem:[%s2599_s11 + $0x1c] sm:$0x1]  ;;  %v1927_v43 = vcombine.low %v2820_v4, %v2823_v5 }
  0x5a   : > { %v325_v3 = vrot.slane %v324_v62, 4  ;;  %v316_v7 = vsel %vm2645_vm2, %v311_v2, %v315_v59  ;;  %v396_v56 = vrot.slane %v394_v46, 4  ;;  %v1914_v59 = vld [vmem:[%s2599_s11 + $0x24] sm:$0x1]  ;;  %v2372_v62 = vld [vmem:[%s3038_s1 + $0x3a0] ss:$16 sps:$4 sm:$0xff]  }
  0x5c   : > { %1417 = vmatpush1.bf16.msra.mxu0 %v2322_v12  ;;  %1563 = vmatpush1.bf16.msra.mxu1 %v2325_v17  ;;  %v355_v12 = vshll.u32 %v2820_v4, 16  ;;  %v330_v13 = vsel %vm2645_vm2, %v325_v3, %v329_v63  ;;  %v386_v63 = vor.u32 %v385_v53, %v382_v52  ;;  %v403_v3 = vshll.u32 %v1914_v59, 16 }
  0x5d   : > { %1418 = vmatprep.subr.bf16.mxu0 %v2330_v22  ;;  %1564 = vmatprep.subr.bf16.mxu1 %v2333_v25  ;;  %v1926_v17 = vcombine.low %v316_v7, %v330_v13  ;;  %v2349_v22 = vld [vmem:[%s3038_s1 + $0x328] ss:$16 sps:$4 sm:$0xff]   ;;  %v2355_v25 = vld [vmem:[%s3038_s1 + $0x344] ss:$16 sps:$4 sm:$0xff]   ;;  %v2379_v13 = vld [vmem:[%s3038_s1 + $0x3c0] ss:$16 sps:$4 sm:$0xff]   ;;  %v1928_v59 = vcombine.low %v2854_v35, %v2865_v39  ;;  %v673_v39 = vlaneseq }
  0x5e   : > { %v357_v19 = vrot.slane %v355_v12, 5  ;;  %v405_v20 = vrot.slane %v403_v3, 5 }
  0x5f   : > { %1395 = vmatprep.mubr.bf16.mxu0 %v1926_v17  ;;  %1541 = vmatprep.mubr.bf16.mxu1 %v1926_v17  ;;  %v387_v17 = vrot.slane %v386_v63, 4 }
  0x60   : > { %1419 = vmatpush1.bf16.msra.mxu0 %v2328_v28  ;;  %1565 = vmatpush1.bf16.msra.mxu1 %v2331_v29  ;;  %v358_v27 = vor.u32 %v357_v19, %v354_v18  ;;  %v363_v28 = vrot.slane %v361_v14, 5  ;;  %v372_v29 = vor.u32 %v371_v24, %v368_v23  ;;  %v2382_v14 = vld [vmem:[%s3038_s1 + $0x3c8] ss:$16 sps:$4 sm:$0xff]   ;;  %v1916_v24 = vld [vmem:[%s2599_s11 + $0x34] sm:$0x1] }
  0x61   : > { %1420 = vmatprep.subr.bf16.mxu0 %v2336_v32  ;;  %1566 = vmatprep.subr.bf16.mxu1 %v2339_v33  ;;  %v2356_v33 = vld [vmem:[%s3038_s1 + $0x348] ss:$16 sps:$4 sm:$0xff]  }
  0x62   : > { %1396 = vmatmul.mubr.bf16.gmra.mrb[12].mxu0 %v1922_v8  ;;  %1542 = vmatmul.mubr.bf16.gmra.mrb[12].mxu1 %v1922_v8  ;;  %v359_v32 = vrot.slane %v358_v27, 4  ;;  %v373_v34 = vrot.slane %v372_v29, 4  ;;  %v1909_v27 = vld [vmem:[%s2599_s11 + $0x38] sm:$0xf] }
  0x64   : > { %1421 = vmatpush1.bf16.msra.mxu0 %v2334_v44  ;;  %1567 = vmatpush1.bf16.msra.mxu1 %v2337_v49  ;;  %v364_v38 = vsel %vm2645_vm2, %v359_v32, %v363_v28  ;;  %v378_v40 = vsel %vm2645_vm2, %v373_v34, %v377_v30  ;;  %v2359_v44 = vld [vmem:[%s3038_s1 + $0x360] ss:$16 sps:$4 sm:$0xff]   ;;  %v2371_v49 = vld [vmem:[%s3038_s1 + $0x38c] ss:$16 sps:$4 sm:$0xff]   ;;  %v2388_v32 = vld [vmem:[%s3038_s1 + $0x3e8] ss:$16 sps:$4 sm:$0xff]  }
  0x65   : > { %1422 = vmatprep.subr.bf16.mxu0 %v2342_v54  ;;  %1568 = vmatprep.subr.bf16.mxu1 %v2345_v57  ;;  %v1931_v41 = vcombine.low %v364_v38, %v378_v40  ;;  %v2374_v54 = vld [vmem:[%s3038_s1 + $0x3a4] ss:$16 sps:$4 sm:$0xff]   ;;  %v399_v57 = vrot.slane %v397_v47, 5  ;;  %v1910_v28 = vld [vmem:[%s2599_s11 + $0x40] sm:$0xf]  ;;  %v439_v40 = vshll.u32 %v1909_v27, 16 }
  0x66   : > { %v453_v42 = vshll.u32 %v1910_v28, 16  ;;  %v1930_v35 = vcombine.low %v1909_v27, %v1910_v28 }
  0x67   : > { %1438 = vmatprep.mubr.bf16.mxu0 %v1931_v41  ;;  %1584 = vmatprep.mubr.bf16.mxu1 %v1931_v41  ;;  %v400_v2 = vor.u32 %v399_v57, %v396_v56  ;;  %v450_v41 = vshrl.u32 %v1910_v28, 16  ;;  %v441_v52 = vrot.slane %v439_v40, 5 }
  0x68   : > { %1423 = vmatpush1.bf16.msra.mxu0 %v2340_v60  ;;  %1569 = vmatpush1.bf16.msra.mxu1 %v2343_v61  ;;  %v2900_v60 = vld [vmem:[%s2599_s11 + $0x28] sm:$0xf]  ;;  %v2903_v61 = vld [vmem:[%s2599_s11 + $0x30] sm:$0xf] }
  0x69   : > { %1424 = vmatprep.subr.bf16.mxu0 %v2348_v0  ;;  %1570 = vmatprep.subr.bf16.mxu1 %v2351_v1  ;;  %v389_v0 = vshll.u32 %v1913_v55, 16  ;;  %v2375_v1 = vld [vmem:[%s3038_s1 + $0x3a8] ss:$16 sps:$4 sm:$0xff]   ;;  %v408_v7 = vshrl.u32 %v2900_v60, 16  ;;  %v411_v8 = vshll.u32 %v2900_v60, 16  ;;  %v422_v11 = vshrl.u32 %v2903_v61, 16 }
  0x6a   : > { %v425_v12 = vshll.u32 %v2903_v61, 16  ;;  %v401_v19 = vrot.slane %v400_v2, 4  ;;  %v452_v53 = vrot.slane %v450_v41, 4 }
  0x6b   : > { %v391_v18 = vrot.slane %v389_v0, 5  ;;  %v413_v23 = vrot.slane %v411_v8, 5  ;;  %v1929_v8 = vcombine.low %v2900_v60, %v2903_v61 }
  0x6c   : > { %1425 = vmatpush1.bf16.msra.mxu0 %v2346_v21  ;;  %1571 = vmatpush1.bf16.msra.mxu1 %v2349_v22  ;;  %v1915_v21 = vld [vmem:[%s2599_s11 + $0x2c] sm:$0x1]  ;;  %v410_v22 = vrot.slane %v408_v7, 4 }
  0x6d   : > { %1426 = vmatprep.subr.bf16.mxu0 %v2355_v25  ;;  %1572 = vmatprep.subr.bf16.mxu1 %v2358_v26  ;;  %v424_v25 = vrot.slane %v422_v11, 4  ;;  %v427_v26 = vrot.slane %v425_v12, 5  ;;  %v392_v29 = vsel %vm2645_vm2, %v387_v17, %v391_v18  ;;  %v417_v30 = vshll.u32 %v1915_v21, 16 }
  0x6e   : > { %v414_v34 = vor.u32 %v413_v23, %v410_v22 }
  0x6f   : > { %v428_v38 = vor.u32 %v427_v26, %v424_v25 }
  0x70   : > { %1427 = vmatpush1.bf16.msra.mxu0 %v2353_v31  ;;  %1573 = vmatpush1.bf16.msra.mxu1 %v2356_v33  ;;  %v2385_v31 = vld [vmem:[%s3038_s1 + $0x3e0] ss:$16 sps:$4 sm:$0xff]   ;;  %v406_v33 = vsel %vm2645_vm2, %v401_v19, %v405_v20  ;;  %v415_v46 = vrot.slane %v414_v34, 4 }
  0x71   : > { %1428 = vmatprep.subr.bf16.mxu0 %v2361_v36  ;;  %1574 = vmatprep.subr.bf16.mxu1 %v2364_v37  ;;  %v431_v36 = vshll.u32 %v1916_v24, 16  ;;  %v436_v37 = vshrl.u32 %v1909_v27, 16 }
  0x73   : > { %v433_v47 = vrot.slane %v431_v36, 5 }
  0x74   : > { %1429 = vmatpush1.bf16.msra.mxu0 %v2359_v44  ;;  %1575 = vmatpush1.bf16.msra.mxu1 %v2362_v45  ;;  %v419_v44 = vrot.slane %v417_v30, 5  ;;  %v1932_v45 = vcombine.low %v392_v29, %v406_v33 }
  0x75   : > { %1430 = vmatprep.subr.bf16.mxu0 %v2368_v48  ;;  %1576 = vmatprep.subr.bf16.mxu1 %v2371_v49  ;;  %v1917_v48 = vld [vmem:[%s2599_s11 + $0x3c] sm:$0x1]  ;;  %v438_v49 = vrot.slane %v436_v37, 4 }
  0x76   : > { %v445_v55 = vshll.u32 %v1917_v48, 16  ;;  %v420_v4 = vsel %vm2645_vm2, %v415_v46, %v419_v44 }
  0x77   : > { %v442_v57 = vor.u32 %v441_v52, %v438_v49 }
  0x78   : > { %1431 = vmatpush1.bf16.msra.mxu0 %v2366_v50  ;;  %1577 = vmatpush1.bf16.msra.mxu1 %v2369_v51  ;;  %v429_v50 = vrot.slane %v428_v38, 4  ;;  %v1918_v51 = vld [vmem:[%s2599_s11 + $0x44] sm:$0x1]  ;;  %v447_v0 = vrot.slane %v445_v55, 5 }
  0x79   : > { %1432 = vmatprep.subr.bf16.mxu0 %v2374_v54  ;;  %1578 = vmatprep.subr.bf16.mxu1 %v2377_v58  ;;  %v455_v54 = vrot.slane %v453_v42, 5  ;;  %v459_v56 = vshll.u32 %v1918_v51, 16  ;;  %v443_v63 = vrot.slane %v442_v57, 4 }
  0x7a   : > { %v434_v5 = vsel %vm2645_vm2, %v429_v50, %v433_v47 }
  0x7b   : > { %v456_v58 = vor.u32 %v455_v54, %v452_v53  ;;  %v461_v2 = vrot.slane %v459_v56, 5  ;;  %v448_v3 = vsel %vm2645_vm2, %v443_v63, %v447_v0 }
  0x7c   : > { %1433 = vmatpush1.bf16.msra.mxu0 %v2372_v62  ;;  %1579 = vmatpush1.bf16.msra.mxu1 %v2375_v1  ;;  %v1933_v62 = vcombine.low %v420_v4, %v434_v5 }
  0x7d   : > { %1434 = vmatprep.subr.bf16.mxu0 %v2381_v9  ;;  %1580 = vmatprep.subr.bf16.mxu1 %v2384_v10  ;;  %v457_v1 = vrot.slane %v456_v58, 4  ;;  %v674_v10 = vshrl.u32 %v673_v39, 7 }
  0x7f   : > { %v462_v7 = vsel %vm2645_vm2, %v457_v1, %v461_v2  ;;  %v675_v11 = vsub.s32 0, %v674_v10  ;;  %v683_v12 = vsub.s32 2, %v674_v10 }
  0x80   : > { %1435 = vmatpush1.bf16.msra.mxu0 %v2379_v13  ;;  %1581 = vmatpush1.bf16.msra.mxu1 %v2382_v14  ;;  %v1934_v9 = vcombine.low %v448_v3, %v462_v7  ;;  %v679_v13 = vsub.s32 1, %v674_v10  ;;  %v687_v14 = vsub.s32 3, %v674_v10 }
  0x81   : > { %1436 = vmatprep.subr.bf16.mxu0 %v2387_v15  ;;  %1582 = vmatprep.subr.bf16.mxu1 %v2390_v16  ;;  %v2966_v60 = vrot.slane %v671_v6, %v675_v11  ;;  %v2968_v61 = vrot.slane %v671_v6, %v683_v12 }
  0x82   : > { %v2970_v15 = vrot.slane %v671_v6, %v679_v13  ;;  %v2972_v16 = vrot.slane %v671_v6, %v687_v14 }
  0x84   : > { %1437 = vmatpush1.bf16.msra.mxu0 %v2385_v31  ;;  %1583 = vmatpush1.bf16.msra.mxu1 %v2388_v32 }
  0x87   : > { %1439 = vmatmul.mubr.bf16.vlgmr.msra.gmra.mrb[0].mxu0 %v1927_v43  ;;  %1585 = vmatmul.mubr.bf16.vlgmr.msra.gmra.mrb[0].mxu1 %v1927_v43 }
  0x88   : > { %1448 = vmatprep.mubr.bf16.mxu0 %v1932_v45  ;;  %1594 = vmatprep.mubr.bf16.mxu1 %v1932_v45 }
  0x8f   : > { %1449 = vmatmul.mubr.bf16.gmra.mrb[4].mxu0 %v1928_v59  ;;  %1595 = vmatmul.mubr.bf16.gmra.mrb[4].mxu1 %v1928_v59 }
  0x90   : > { %1458 = vmatprep.mubr.bf16.mxu0 %v1933_v62  ;;  %1604 = vmatprep.mubr.bf16.mxu1 %v1933_v62 }
  0x97   : > { %1459 = vmatmul.mubr.bf16.gmra.mrb[8].mxu0 %v1929_v8  ;;  %1605 = vmatmul.mubr.bf16.gmra.mrb[8].mxu1 %v1929_v8 }
  0x98   : > { %1468 = vmatprep.mubr.bf16.mxu0 %v1934_v9  ;;  %1614 = vmatprep.mubr.bf16.mxu1 %v1934_v9 }
  0x9f   : > { %1469 = vmatmul.mubr.bf16.gmra.mrb[12].mxu0 %v1930_v35  ;;  %1615 = vmatmul.mubr.bf16.gmra.mrb[12].mxu1 %v1930_v35 }
 0x15a   : > { %v1440_v17 = vpop.f32.mrb[0].mxu0  ;;  %v1586_v18 = vpop.f32.mrb[0].mxu1 }
 0x15b   : > { %v2106_v19 = vadd.f32 %v1440_v17, %v2966_v60  ;;  %v2122_v20 = vadd.f32 %v1586_v18, %v2968_v61  ;;  %v1442_v21 = vpop.f32.mrb[1].mxu0  ;;  %v1588_v22 = vpop.f32.mrb[1].mxu1 }
 0x15c   : > { %v2107_v23 = vadd.f32 %v1442_v21, %v2970_v15  ;;  %v2123_v24 = vadd.f32 %v1588_v22, %v2972_v16  ;;  %v1444_v25 = vpop.f32.mrb[2].mxu0  ;;  %v1590_v26 = vpop.f32.mrb[2].mxu1 }
 0x15d   : > { %v1625_v27 = vmax.f32 %v2106_v19, 0.0  ;;  %v1627_v28 = vmax.f32 %v2122_v20, 0.0  ;;  %v2108_v29 = vadd.f32 %v1444_v25, %v2966_v60  ;;  %v2124_v30 = vadd.f32 %v1590_v26, %v2968_v61  ;;  %v1446_v31 = vpop.f32.mrb[3].mxu0  ;;  %v1592_v32 = vpop.f32.mrb[3].mxu1 }
 0x15e   : > { %v1626_v33 = vmax.f32 %v2107_v23, 0.0  ;;  %v1628_v34 = vmax.f32 %v2123_v24, 0.0  ;;  %v2109_v36 = vadd.f32 %v1446_v31, %v2970_v15  ;;  %v2125_v37 = vadd.f32 %v1592_v32, %v2972_v16 }
 0x15f   : > { %v1629_v38 = vmax.f32 %v2108_v29, 0.0  ;;  %v1631_v40 = vmax.f32 %v2124_v30, 0.0 }
 0x160   : > { %v2090_v41 = vpack.c.bf16 %v1626_v33, %v1625_v27  ;;  %v2098_v42 = vpack.c.bf16 %v1628_v34, %v1627_v28  ;;  %v1630_v43 = vmax.f32 %v2109_v36, 0.0  ;;  %v1632_v44 = vmax.f32 %v2125_v37, 0.0 }
 0x162   : > { %1721 = vst [vmem:[%s2986_s6] sm:$0xff] %v2090_v41  ;;  %2079 = vst [vmem:[%s2986_s6 + $0x8] sm:$0xff] %v2098_v42  ;;  %v2091_v45 = vpack.c.bf16 %v1630_v43, %v1629_v38  ;;  %v2099_v46 = vpack.c.bf16 %v1632_v44, %v1631_v40  ;;  %v1450_v47 = vpop.f32.mrb[4].mxu0  ;;  %v1596_v48 = vpop.f32.mrb[4].mxu1 }
 0x163   : > { %v2110_v49 = vadd.f32 %v1450_v47, %v2966_v60  ;;  %v2126_v50 = vadd.f32 %v1596_v48, %v2968_v61  ;;  %v1452_v51 = vpop.f32.mrb[5].mxu0  ;;  %v1598_v52 = vpop.f32.mrb[5].mxu1 }
 0x164   : > { %1722 = vst [vmem:[%s2986_s6 + $0x10] sm:$0xff] %v2091_v45  ;;  %2080 = vst [vmem:[%s2986_s6 + $0x18] sm:$0xff] %v2099_v46  ;;  %v2111_v53 = vadd.f32 %v1452_v51, %v2970_v15  ;;  %v2127_v54 = vadd.f32 %v1598_v52, %v2972_v16  ;;  %v1454_v55 = vpop.f32.mrb[6].mxu0  ;;  %v1600_v56 = vpop.f32.mrb[6].mxu1 }
 0x165   : > { %v1633_v4 = vmax.f32 %v2110_v49, 0.0  ;;  %v1635_v5 = vmax.f32 %v2126_v50, 0.0  ;;  %v2112_v57 = vadd.f32 %v1454_v55, %v2966_v60  ;;  %v2128_v58 = vadd.f32 %v1600_v56, %v2968_v61  ;;  %v1456_v59 = vpop.f32.mrb[7].mxu0  ;;  %v1602_v62 = vpop.f32.mrb[7].mxu1 }
 0x166   : > { %v1634_v63 = vmax.f32 %v2111_v53, 0.0  ;;  %v1636_v0 = vmax.f32 %v2127_v54, 0.0  ;;  %v2113_v1 = vadd.f32 %v1456_v59, %v2970_v15  ;;  %v2129_v2 = vadd.f32 %v1602_v62, %v2972_v16 }
 0x167   : > { %v1637_v3 = vmax.f32 %v2112_v57, 0.0  ;;  %v1639_v7 = vmax.f32 %v2128_v58, 0.0 }
 0x168   : > { %v2092_v8 = vpack.c.bf16 %v1634_v63, %v1633_v4  ;;  %v2100_v9 = vpack.c.bf16 %v1636_v0, %v1635_v5  ;;  %v1638_v35 = vmax.f32 %v2113_v1, 0.0  ;;  %v1640_v39 = vmax.f32 %v2129_v2, 0.0 }
 0x16a   : > { %1723 = vst [vmem:[%s2986_s6 + $0x20] sm:$0xff] %v2092_v8  ;;  %2081 = vst [vmem:[%s2986_s6 + $0x28] sm:$0xff] %v2100_v9  ;;  %v2093_v10 = vpack.c.bf16 %v1638_v35, %v1637_v3  ;;  %v2101_v11 = vpack.c.bf16 %v1640_v39, %v1639_v7  ;;  %v1460_v12 = vpop.f32.mrb[8].mxu0  ;;  %v1606_v6 = vpop.f32.mrb[8].mxu1 }
 0x16b   : > { %v2114_v13 = vadd.f32 %v1460_v12, %v2966_v60  ;;  %v2130_v14 = vadd.f32 %v1606_v6, %v2968_v61  ;;  %v1462_v17 = vpop.f32.mrb[9].mxu0  ;;  %v1608_v18 = vpop.f32.mrb[9].mxu1 }
 0x16c   : > { %1724 = vst [vmem:[%s2986_s6 + $0x30] sm:$0xff] %v2093_v10  ;;  %2082 = vst [vmem:[%s2986_s6 + $0x38] sm:$0xff] %v2101_v11  ;;  %v2115_v19 = vadd.f32 %v1462_v17, %v2970_v15  ;;  %v2131_v20 = vadd.f32 %v1608_v18, %v2972_v16  ;;  %v1464_v21 = vpop.f32.mrb[10].mxu0  ;;  %v1610_v22 = vpop.f32.mrb[10].mxu1 }
 0x16d   : > { %v1641_v23 = vmax.f32 %v2114_v13, 0.0  ;;  %v1643_v24 = vmax.f32 %v2130_v14, 0.0  ;;  %v2116_v25 = vadd.f32 %v1464_v21, %v2966_v60  ;;  %v2132_v26 = vadd.f32 %v1610_v22, %v2968_v61  ;;  %v1466_v27 = vpop.f32.mrb[11].mxu0  ;;  %v1612_v28 = vpop.f32.mrb[11].mxu1 }
 0x16e   : > { %v1642_v29 = vmax.f32 %v2115_v19, 0.0  ;;  %v1644_v30 = vmax.f32 %v2131_v20, 0.0  ;;  %v2117_v31 = vadd.f32 %v1466_v27, %v2970_v15  ;;  %v2133_v32 = vadd.f32 %v1612_v28, %v2972_v16 }
 0x16f   : > { %v1645_v33 = vmax.f32 %v2116_v25, 0.0  ;;  %v1647_v34 = vmax.f32 %v2132_v26, 0.0 }
 0x170   : > { %v2094_v36 = vpack.c.bf16 %v1642_v29, %v1641_v23  ;;  %v2102_v37 = vpack.c.bf16 %v1644_v30, %v1643_v24  ;;  %v1646_v38 = vmax.f32 %v2117_v31, 0.0  ;;  %v1648_v40 = vmax.f32 %v2133_v32, 0.0 }
 0x172   : > { %1725 = vst [vmem:[%s2986_s6 + $0x40] sm:$0xff] %v2094_v36  ;;  %2083 = vst [vmem:[%s2986_s6 + $0x48] sm:$0xff] %v2102_v37  ;;  %v2095_v41 = vpack.c.bf16 %v1646_v38, %v1645_v33  ;;  %v2103_v42 = vpack.c.bf16 %v1648_v40, %v1647_v34  ;;  %v1470_v43 = vpop.f32.mrb[12].mxu0  ;;  %v1616_v44 = vpop.f32.mrb[12].mxu1 }
 0x173   : > { %v2118_v45 = vadd.f32 %v1470_v43, %v2966_v60  ;;  %v2134_v46 = vadd.f32 %v1616_v44, %v2968_v61  ;;  %v1472_v47 = vpop.f32.mrb[13].mxu0  ;;  %v1618_v48 = vpop.f32.mrb[13].mxu1 }
 0x174   : > { %1726 = vst [vmem:[%s2986_s6 + $0x50] sm:$0xff] %v2095_v41  ;;  %2084 = vst [vmem:[%s2986_s6 + $0x58] sm:$0xff] %v2103_v42  ;;  %v2119_v49 = vadd.f32 %v1472_v47, %v2970_v15  ;;  %v2135_v50 = vadd.f32 %v1618_v48, %v2972_v16  ;;  %v1474_v51 = vpop.f32.mrb[14].mxu0  ;;  %v1620_v52 = vpop.f32.mrb[14].mxu1 }
 0x175   : > { %v1649_v53 = vmax.f32 %v2118_v45, 0.0  ;;  %v1651_v54 = vmax.f32 %v2134_v46, 0.0  ;;  %v2120_v55 = vadd.f32 %v1474_v51, %v2966_v60  ;;  %v2136_v56 = vadd.f32 %v1620_v52, %v2968_v61  ;;  %v1476_v4 = vpop.f32.mrb[15].mxu0  ;;  %v1622_v5 = vpop.f32.mrb[15].mxu1 }
 0x176   : > { %v1650_v57 = vmax.f32 %v2119_v49, 0.0  ;;  %v1652_v58 = vmax.f32 %v2135_v50, 0.0  ;;  %v2121_v59 = vadd.f32 %v1476_v4, %v2970_v15  ;;  %v2137_v62 = vadd.f32 %v1622_v5, %v2972_v16 }
 0x177   : > { %v1653_v63 = vmax.f32 %v2120_v55, 0.0  ;;  %v1655_v0 = vmax.f32 %v2136_v56, 0.0 }
 0x178   : > { %v2096_v1 = vpack.c.bf16 %v1650_v57, %v1649_v53  ;;  %v2104_v2 = vpack.c.bf16 %v1652_v58, %v1651_v54  ;;  %v1654_v3 = vmax.f32 %v2121_v59, 0.0  ;;  %v1656_v7 = vmax.f32 %v2137_v62, 0.0 }
 0x17a   : > { %1727 = vst [vmem:[%s2986_s6 + $0x60] sm:$0xff] %v2096_v1  ;;  %2085 = vst [vmem:[%s2986_s6 + $0x68] sm:$0xff] %v2104_v2  ;;  %v2097_v60 = vpack.c.bf16 %v1654_v3, %v1653_v63  ;;  %v2105_v61 = vpack.c.bf16 %v1656_v7, %v1655_v0 }
 0x17c   : > { %1728 = vst [vmem:[%s2986_s6 + $0x70] sm:$0xff] %v2097_v60  ;;  %2086 = vst [vmem:[%s2986_s6 + $0x78] sm:$0xff] %v2105_v61 }
 0x17d PF: > { %s13_s14 = sadd.s32 1, %s2417_s14   ;;  %s3043_s12 = smov %s2413_s13 }
 0x17e   : > { %p10_p5 = scmp.ge.s32.totalorder %s13_s14, 4   ;;  %s3044_s13 = smov %s3046_s15 }
 0x180   :  { %12 = sbr.rel (!%p10_p5) target bundleno = 2 (0x2), region = 65 }

// kernel: decblock_forward.6
= control target key start
LH: loop header
LB: loop body
LE: loop exit
PB: predicated region body
PF: predicated region fallthrough
CT: control target
= control target key end

     0   :  { %s5636_s12 = smov 0   ;;  %s5638_s13 = smov 0   ;;  %s7763_s0 = inlined_call_operand.vmem [shape: bf16[2,18,18,128], index: 0, kind: input, shape index: {}]   ;;  %s7764_s1 = inlined_call_operand.vmem [shape: bf16[1152,128], index: 1, kind: input, shape index: {}]   ;;  %s7765_s2 = inlined_call_operand.vmem [shape: f32[1,128], index: 2, kind: input, shape index: {}]   ;;  %s7766_s3 = inlined_call_operand.vmem [shape: bf16[2,16,16,128], index: 3, kind: output, shape index: {}]  }
   0x1   :  { %s5640_s14 = smov 0  }
   0x2 LB: > { %s25_s15 = sadd.s32 1, %s5610_s13  ;;  %p4344_p0 = scmp.ge.s32.totalorder %s5614_s14, 1  ;;  %s5614_s14 = sphi %s5640_s14, %s13_s14   ;;  %s5610_s13 = sphi %s5638_s13, %s7790_s13   ;;  %s5606_s12 = sphi %s5636_s12, %s7789_s12  }
   0x3   : > { %p27_p1 = scmp.ge.s32.totalorder %s25_s15, 2  ;;  %p151_p2 = scmp.lt.s32.totalorder %s5614_s14, 3 }
   0x5   : > { %s7792_s15 = smov (%p27_p1, %s25_s15), 0  ;;  %p152_p3 = pnand %p4344_p0, %p151_p2 }
   0x7   : > { %155 = sbr.rel (%p152_p3) target bundleno = 574 (0x23e), region = 32 }
   0xe   : > { %v5464_v0 = vld [vmem:[%s7764_s1 + $0x40] sm:$0xff]   ;;  %p180_p4 = scmp.lt.s32.totalorder %s5606_s12, 1  ;;  %v5466_v2 = vld [vmem:[%s7764_s1 + $0x48] sm:$0xff]   ;;  %v5468_v4 = vld [vmem:[%s7764_s1 + $0x50] sm:$0xff]   ;;  %vm249_vm0 = vsmask.f32 3328 }
   0xf   : > { %v5465_v1 = vld [vmem:[%s7764_s1] sm:$0xff]   ;;  %4903 = vmatprep.subr.bf16.mxu0 %v5464_v0  ;;  %5423 = vmatprep.subr.bf16.mxu1 %v5464_v0  ;;  %v5467_v3 = vld [vmem:[%s7764_s1 + $0x8] sm:$0xff]   ;;  %v5469_v5 = vld [vmem:[%s7764_s1 + $0x10] sm:$0xff]   ;;  %vm250_vm1 = vsmask.f32 7440  ;;  %vm700_vm3 = vcmask 1042432  }
  0x10   : > { %4904 = vmatpush3.bf16.msra.mxu0 %v5465_v1  ;;  %5431 = vmatpush3.bf16.msra.mxu1 %v5465_v1  ;;  %s7794_s12 = smov (!%p180_p4, %s5606_s12), 1  ;;  %v5470_v6 = vld [vmem:[%s7764_s1 + $0x58] sm:$0xff]   ;;  %v5472_v8 = vld [vmem:[%s7764_s1 + $0x60] sm:$0xff]   ;;  %v5474_v10 = vld [vmem:[%s7764_s1 + $0x68] sm:$0xff]   ;;  %vm701_vm4 = vcmask 1046532  }
  0x11   : > { %4905 = vmatprep.subr.bf16.mxu0 %v5466_v2  ;;  %5424 = vmatprep.subr.bf16.mxu1 %v5466_v2  ;;  %s5439_s30 = smul.u32 216, %s7794_s12  ;;  %v5471_v7 = vld [vmem:[%s7764_s1 + $0x18] sm:$0xff]   ;;  %v5473_v9 = vld [vmem:[%s7764_s1 + $0x20] sm:$0xff]   ;;  %v5475_v20 = vld [vmem:[%s7764_s1 + $0x28] sm:$0xff]   ;;  %s4775_s7 = sshll.u32 %s7794_s12, 7 }
  0x12   : > { %v5476_v25 = vld [vmem:[%s7764_s1 + $0x70] sm:$0xff]   ;;  %vm5729_vm2 = vmor %vm249_vm0, %vm250_vm1  ;;  %v5478_v42 = vld [vmem:[%s7764_s1 + $0x78] sm:$0xff]   ;;  %s7699_s11 = scalar_lea.vmem %s7766_s3, %s4775_s7 }
  0x13   : > { %s5687_s10 = scalar_lea.vmem %s7763_s0, %s5439_s30  ;;  %v5477_v38 = vld [vmem:[%s7764_s1 + $0x30] sm:$0xff]   ;;  %v5479_v45 = vld [vmem:[%s7764_s1 + $0x38] sm:$0xff]   ;;  %v5482_v55 = vld [vmem:[%s7764_s1 + $0xc0] sm:$0xff]  }
  0x14   : > { %4906 = vmatpush3.bf16.msra.mxu0 %v5467_v3  ;;  %5432 = vmatpush3.bf16.msra.mxu1 %v5467_v3  ;;  %v5696_v11 = vld [vmem:[%s5687_s10] sm:$0xf]  ;;  %v5699_v12 = vld [vmem:[%s5687_s10 + $0x4] sm:$0xf]  ;;  %v5702_v13 = vld [vmem:[%s5687_s10 + $0x8] sm:$0x1] }
  0x15   : > { %4907 = vmatprep.subr.bf16.mxu0 %v5468_v4  ;;  %5425 = vmatprep.subr.bf16.mxu1 %v5468_v4  ;;  %v253_v14 = vshrl.u32 %v5696_v11, 16  ;;  %v256_v15 = vshll.u32 %v5696_v11, 16  ;;  %v262_v16 = vshll.u32 %v5699_v12, 16  ;;  %v266_v17 = vshrl.u32 %v5699_v12, 16  ;;  %v5710_v19 = vld [vmem:[%s5687_s10 + $0x90] sm:$0xf]  ;;  %vm5923_vm5 = vmor %vm700_vm3, %vm701_vm4 }
  0x16   : > { %v272_v18 = vshll.u32 %v5702_v13, 16  ;;  %v5716_v23 = vld [vmem:[%s5687_s10 + $0x94] sm:$0xf]  ;;  %v541_v24 = vshrl.u32 %v5710_v19, 16  ;;  %v5723_v29 = vld [vmem:[%s5687_s10 + $0x98] sm:$0x1]  ;;  %v4524_v57 = vcombine.low %v5696_v11, %v5699_v12 }
  0x17   : > { %v255_v21 = vrot.slane %v253_v14, 4  ;;  %v258_v22 = vrot.slane %v256_v15, 5  ;;  %v264_v26 = vrot.slane %v262_v16, 5  ;;  %v268_v27 = vrot.slane %v266_v17, 4  ;;  %v5485_v58 = vld [vmem:[%s7764_s1 + $0x140] sm:$0xff]   ;;  %v5484_v4 = vld [vmem:[%s7764_s1 + $0xc8] sm:$0xff]  }
  0x18   : > { %4908 = vmatpush3.bf16.msra.mxu0 %v5469_v5  ;;  %5433 = vmatpush3.bf16.msra.mxu1 %v5469_v5  ;;  %v274_v28 = vrot.slane %v272_v18, 5  ;;  %v543_v31 = vrot.slane %v541_v24, 4  ;;  %v544_v32 = vshll.u32 %v5710_v19, 16  ;;  %v550_v33 = vshll.u32 %v5716_v23, 16  ;;  %v5759_v59 = vld [vmem:[%s5687_s10 + $0xc] sm:$0xf] }
  0x19   : > { %4909 = vmatprep.subr.bf16.mxu0 %v5470_v6  ;;  %5426 = vmatprep.subr.bf16.mxu1 %v5470_v6  ;;  %v259_v30 = vor.u32 %v258_v22, %v255_v21  ;;  %v269_v35 = vor.u32 %v268_v27, %v264_v26  ;;  %v554_v36 = vshrl.u32 %v5716_v23, 16  ;;  %v560_v37 = vshll.u32 %v5723_v29, 16  ;;  %v5483_v62 = vld [vmem:[%s7764_s1 + $0x80] sm:$0xff]   ;;  %v5769_v63 = vld [vmem:[%s5687_s10 + $0x10] sm:$0xf]  ;;  %v5486_v21 = vld [vmem:[%s7764_s1 + $0x88] sm:$0xff]  }
  0x1a   : > { %v546_v40 = vrot.slane %v544_v32, 5  ;;  %v552_v41 = vrot.slane %v550_v33, 5  ;;  %v705_v47 = vrot.slane %v5699_v12, 5  ;;  %v708_v50 = vrot.slane %v5702_v13, 5  ;;  %v5772_v0 = vld [vmem:[%s5687_s10 + $0x14] sm:$0x1] }
  0x1b   : > { %v260_v39 = vrot.slane %v259_v30, 4  ;;  %v270_v43 = vrot.slane %v269_v35, 4  ;;  %v556_v44 = vrot.slane %v554_v36, 4  ;;  %v562_v52 = vrot.slane %v560_v37, 5  ;;  %v5487_v5 = vld [vmem:[%s7764_s1 + $0x100] sm:$0xff]  }
  0x1c   : > { %4910 = vmatpush3.bf16.msra.mxu0 %v5471_v7  ;;  %5434 = vmatpush3.bf16.msra.mxu1 %v5471_v7  ;;  %v547_v48 = vor.u32 %v546_v40, %v543_v31  ;;  %v4536_v61 = vcombine.low %v5710_v19, %v5716_v23  ;;  %v277_v1 = vshrl.u32 %v5759_v59, 16  ;;  %v280_v2 = vshll.u32 %v5759_v59, 16  ;;  %v5791_v15 = vld [vmem:[%s5687_s10 + $0xa0] sm:$0xf]  ;;  %v246_v16 = vld [vmem:[%s5687_s10 + $0xa4] sm:$0x1] }
  0x1d   : > { %4911 = vmatprep.subr.bf16.mxu0 %v5472_v8  ;;  %5427 = vmatprep.subr.bf16.mxu1 %v5472_v8  ;;  %v265_v46 = vsel %vm5729_vm2, %v260_v39, %v264_v26  ;;  %v275_v49 = vsel %vm5729_vm2, %v270_v43, %v274_v28  ;;  %v557_v51 = vor.u32 %v556_v44, %v552_v41  ;;  %v286_v6 = vshll.u32 %v5769_v63, 16  ;;  %v5491_v43 = vld [vmem:[%s7764_s1 + $0x90] sm:$0xff]   ;;  %v5816_v44 = vld [vmem:[%s5687_s10 + $0x18] sm:$0xf] }
  0x1e   : > { %v4540_v53 = vcombine.low %v265_v46, %v275_v49  ;;  %v548_v54 = vrot.slane %v547_v48, 4  ;;  %v290_v7 = vshrl.u32 %v5769_v63, 16  ;;  %v296_v8 = vshll.u32 %v5772_v0, 16  ;;  %v5823_v48 = vld [vmem:[%s5687_s10 + $0x1c] sm:$0xf] }
  0x1f   : > { %v558_v56 = vrot.slane %v557_v51, 4  ;;  %v279_v11 = vrot.slane %v277_v1, 4  ;;  %v282_v14 = vrot.slane %v280_v2, 5  ;;  %v288_v17 = vrot.slane %v286_v6, 5  ;;  %v5826_v49 = vld [vmem:[%s5687_s10 + $0x20] sm:$0x1] }
  0x20   : > { %4912 = vmatpush3.bf16.msra.mxu0 %v5473_v9  ;;  %5435 = vmatpush3.bf16.msra.mxu1 %v5473_v9  ;;  %v553_v60 = vsel %vm5729_vm2, %v548_v54, %v552_v41  ;;  %v5788_v9 = vld [vmem:[%s5687_s10 + $0x9c] sm:$0xf]  ;;  %v292_v18 = vrot.slane %v290_v7, 4  ;;  %v298_v19 = vrot.slane %v296_v8, 5  ;;  %v574_v24 = vshll.u32 %v5791_v15, 16 }
  0x21   : > { %4913 = vmatprep.subr.bf16.mxu0 %v5474_v10  ;;  %5428 = vmatprep.subr.bf16.mxu1 %v5474_v10  ;;  %v563_v3 = vsel %vm5729_vm2, %v558_v56, %v562_v52  ;;  %v283_v22 = vor.u32 %v282_v14, %v279_v11  ;;  %v568_v23 = vshll.u32 %v5788_v9, 16  ;;  %v584_v28 = vshll.u32 %v246_v16, 16  ;;  %v5492_v56 = vld [vmem:[%s7764_s1 + $0xd8] sm:$0xff]   ;;  %v5840_v1 = vld [vmem:[%s5687_s10 + $0xac] sm:$0xf]  ;;  %v5496_v11 = vld [vmem:[%s7764_s1 + $0xe0] sm:$0xff]  }
  0x22   : > { %3278 = vmatprep.mubr.bf16.mxu0 %v4540_v53  ;;  %v4552_v10 = vcombine.low %v553_v60, %v563_v3  ;;  %v293_v26 = vor.u32 %v292_v18, %v288_v17  ;;  %v576_v32 = vrot.slane %v574_v24, 5  ;;  %v5803_v35 = vrot.slane %v705_v47, 4  ;;  %v247_v6 = vld [vmem:[%s5687_s10 + $0xb0] sm:$0x1]  ;;  %v5955_v13 = vld [vmem:[%s5687_s10 + $0x34] sm:$0xf] }
  0x23   : > { %v284_v30 = vrot.slane %v283_v22, 4  ;;  %v570_v31 = vrot.slane %v568_v23, 5  ;;  %v586_v37 = vrot.slane %v584_v28, 5  ;;  %v4537_v46 = vcombine.low %v5788_v9, %v5791_v15  ;;  %v5497_v22 = vld [vmem:[%s7764_s1 + $0x148] sm:$0xff]  }
  0x24   : > { %4914 = vmatpush3.bf16.msra.mxu0 %v5475_v20  ;;  %5436 = vmatpush3.bf16.msra.mxu1 %v5475_v20  ;;  %v565_v20 = vshrl.u32 %v5788_v9, 16  ;;  %v294_v36 = vrot.slane %v293_v26, 4  ;;  %v301_v51 = vshrl.u32 %v5816_v44, 16  ;;  %v304_v52 = vshll.u32 %v5816_v44, 16  ;;  %v5499_v26 = vld [vmem:[%s7764_s1 + $0x108] sm:$0xff]  }
  0x25   : > { %4915 = vmatprep.subr.bf16.mxu0 %v5476_v25  ;;  %5429 = vmatprep.subr.bf16.mxu1 %v5476_v25  ;;  %v578_v25 = vshrl.u32 %v5791_v15, 16  ;;  %v289_v39 = vsel %vm5729_vm2, %v284_v30, %v288_v17  ;;  %v598_v16 = vshll.u32 %v5840_v1, 16  ;;  %v602_v17 = vshrl.u32 %v5840_v1, 16 }
  0x26   : > { %3374 = vmatprep.mubr.bf16.mxu1 %v4552_v10  ;;  %v567_v27 = vrot.slane %v565_v20, 4  ;;  %v306_v60 = vrot.slane %v304_v52, 5  ;;  %v5889_v52 = vld [vmem:[%s5687_s10 + $0x2c] sm:$0x1] }
  0x27   : > { %v580_v33 = vrot.slane %v578_v25, 4  ;;  %v600_v24 = vrot.slane %v598_v16, 5  ;;  %v604_v25 = vrot.slane %v602_v17, 4  ;;  %v5505_v17 = vld [vmem:[%s7764_s1 + $0xb0] sm:$0xff]  }
  0x28   : > { %4916 = vmatpush3.bf16.msra.mxu0 %v5477_v38  ;;  %5437 = vmatpush3.bf16.msra.mxu1 %v5477_v38  ;;  %v5490_v38 = vld [vmem:[%s7764_s1 + $0xd0] sm:$0xff]   ;;  %v571_v40 = vor.u32 %v570_v31, %v567_v27  ;;  %v642_v27 = vld [vmem:[%s5687_s10 + $0x48] sm:$0xe] }
  0x29   : > { %4917 = vmatprep.subr.bf16.mxu0 %v5478_v42  ;;  %5430 = vmatprep.subr.bf16.mxu1 %v5478_v42  ;;  %v581_v41 = vor.u32 %v580_v33, %v576_v32  ;;  %v4525_v42 = vcombine.low %v5759_v59, %v5769_v63  ;;  %v303_v59 = vrot.slane %v301_v51, 4  ;;  %v5883_v51 = vld [vmem:[%s5687_s10 + $0x28] sm:$0xf] }
  0x2a   : > { %v572_v54 = vrot.slane %v571_v40, 4  ;;  %v712_v40 = vrot.slane %v5769_v63, 5 }
  0x2b   : > { %v307_v9 = vor.u32 %v306_v60, %v303_v59  ;;  %v344_v59 = vshll.u32 %v5889_v52, 16  ;;  %v5901_v60 = vld [vmem:[%s5687_s10 + $0xb4] sm:$0xf] }
  0x2c   : > { %4918 = vmatpush3.bf16.msra.mxu0 %v5479_v45  ;;  %5438 = vmatpush3.bf16.msra.mxu1 %v5479_v45  ;;  %v299_v45 = vsel %vm5729_vm2, %v294_v36, %v298_v19  ;;  %v577_v2 = vsel %vm5729_vm2, %v572_v54, %v576_v32  ;;  %v605_v32 = vor.u32 %v604_v25, %v600_v24  ;;  %v5498_v36 = vld [vmem:[%s7764_s1 + $0xa0] sm:$0xff]  }
  0x2d   : > { %5015 = vmatprep.subr.bf16.mxu1 %v5482_v55  ;;  %5127 = vmatprep.subr.bf16.mxu0 %v5485_v58  ;;  %v4541_v53 = vcombine.low %v289_v39, %v299_v45  ;;  %v582_v55 = vrot.slane %v581_v41, 4  ;;  %v5835_v58 = vld [vmem:[%s5687_s10 + $0xa8] sm:$0xf]  ;;  %v308_v18 = vrot.slane %v307_v9, 4  ;;  %v613_v9 = vshrl.u32 %v5901_v60, 16 }
  0x2e   : > { %v589_v7 = vshrl.u32 %v5835_v58, 16  ;;  %v592_v15 = vshll.u32 %v5835_v58, 16  ;;  %v5500_v39 = vld [vmem:[%s7764_s1 + $0xe8] sm:$0xff]   ;;  %v4538_v45 = vcombine.low %v5835_v58, %v5840_v1 }
  0x2f   : > { %3279 = vmatmul.mubr.bf16.vlgmr.msra.gmra.mrb[0].mxu0 %v4524_v57  ;;  %3375 = vmatmul.mubr.bf16.vlgmr.msra.gmra.mrb[0].mxu1 %v4536_v61  ;;  %v310_v57 = vshll.u32 %v5823_v48, 16  ;;  %v314_v61 = vshrl.u32 %v5823_v48, 16  ;;  %v587_v3 = vsel %vm5729_vm2, %v582_v55, %v586_v37  ;;  %v334_v55 = vshll.u32 %v5883_v51, 16 }
  0x30   : > { %5016 = vmatpush3.bf16.msra.mxu1 %v5483_v62  ;;  %5128 = vmatpush3.bf16.msra.mxu0 %v5487_v5  ;;  %v320_v62 = vshll.u32 %v5826_v49, 16  ;;  %v4553_v8 = vcombine.low %v577_v2, %v587_v3  ;;  %v591_v14 = vrot.slane %v589_v7, 4  ;;  %v594_v23 = vrot.slane %v592_v15, 5 }
  0x31   : > { %5017 = vmatprep.subr.bf16.mxu1 %v5484_v4  ;;  %3286 = vmatprep.mubr.bf16.mxu0 %v4541_v53  ;;  %v5493_v4 = vld [vmem:[%s7764_s1 + $0x98] sm:$0xff]   ;;  %v312_v5 = vrot.slane %v310_v57, 5  ;;  %v316_v10 = vrot.slane %v314_v61, 4 }
  0x32   : > { %3382 = vmatprep.mubr.bf16.mxu1 %v4553_v8  ;;  %v322_v20 = vrot.slane %v320_v62, 5  ;;  %5129 = vmatprep.subr.bf16.mxu0 %v5497_v22  ;;  %v595_v31 = vor.u32 %v594_v23, %v591_v14  ;;  %v5904_v61 = vld [vmem:[%s5687_s10 + $0xb8] sm:$0xf]  ;;  %v715_v62 = vrot.slane %v5772_v0, 5  ;;  %v346_v8 = vrot.slane %v344_v59, 5 }
  0x33   : > { %v317_v19 = vor.u32 %v316_v10, %v312_v5  ;;  %v313_v28 = vsel %vm5729_vm2, %v308_v18, %v312_v5  ;;  %v248_v5 = vld [vmem:[%s5687_s10 + $0xbc] sm:$0x1]  ;;  %v616_v10 = vshll.u32 %v5901_v60, 16  ;;  %v622_v14 = vshll.u32 %v5904_v61, 16 }
  0x34   : > { %5018 = vmatpush3.bf16.msra.mxu1 %v5486_v21  ;;  %v608_v21 = vshll.u32 %v247_v6, 16  ;;  %5130 = vmatpush3.bf16.msra.mxu0 %v5499_v26  ;;  %v5504_v6 = vld [vmem:[%s7764_s1 + $0xf0] sm:$0xff]   ;;  %v626_v15 = vshrl.u32 %v5904_v61, 16  ;;  %v632_v16 = vshll.u32 %v248_v5, 16 }
  0x35   : > { %5019 = vmatprep.subr.bf16.mxu1 %v5490_v38  ;;  %v318_v30 = vrot.slane %v317_v19, 4  ;;  %v4526_v38 = vcombine.low %v5816_v44, %v5823_v48  ;;  %v5501_v44 = vld [vmem:[%s7764_s1 + $0xa8] sm:$0xff]   ;;  %v615_v19 = vrot.slane %v613_v9, 4 }
  0x36   : > { %v610_v33 = vrot.slane %v608_v21, 5  ;;  %v5506_v21 = vld [vmem:[%s7764_s1 + $0xf8] sm:$0xff]   ;;  %v628_v25 = vrot.slane %v626_v15, 4  ;;  %v634_v26 = vrot.slane %v632_v16, 5 }
  0x37   : > { %3287 = vmatmul.mubr.bf16.gmra.mrb[4].mxu0 %v4525_v42  ;;  %3383 = vmatmul.mubr.bf16.gmra.mrb[4].mxu1 %v4537_v46  ;;  %v323_v37 = vsel %vm5729_vm2, %v318_v30, %v322_v20  ;;  %v596_v42 = vrot.slane %v595_v31, 4  ;;  %v5880_v46 = vld [vmem:[%s5687_s10 + $0x24] sm:$0xf]  ;;  %v618_v20 = vrot.slane %v616_v10, 5  ;;  %v5507_v31 = vld [vmem:[%s7764_s1 + $0x150] sm:$0xff]  }
  0x38   : > { %5020 = vmatpush3.bf16.msra.mxu1 %v5491_v43  ;;  %v4542_v41 = vcombine.low %v313_v28, %v323_v37  ;;  %v606_v43 = vrot.slane %v605_v32, 4  ;;  %v325_v53 = vshrl.u32 %v5880_v46, 16  ;;  %v328_v54 = vshll.u32 %v5880_v46, 16  ;;  %5131 = vmatprep.subr.bf16.mxu0 %v5507_v31 }
  0x39   : > { %5021 = vmatprep.subr.bf16.mxu1 %v5492_v56  ;;  %v338_v56 = vshrl.u32 %v5883_v51, 16  ;;  %v601_v57 = vsel %vm5729_vm2, %v596_v42, %v600_v24  ;;  %v624_v24 = vrot.slane %v622_v14, 5  ;;  %v619_v30 = vor.u32 %v618_v20, %v615_v19 }
  0x3a   : > { %3294 = vmatprep.mubr.bf16.mxu0 %v4542_v41  ;;  %v611_v58 = vsel %vm5729_vm2, %v606_v43, %v610_v33  ;;  %v327_v2 = vrot.slane %v325_v53, 4  ;;  %v330_v3 = vrot.slane %v328_v54, 5  ;;  %v5944_v41 = vsel %vm5923_vm5, %v5803_v35, %v708_v50  ;;  %v5960_v35 = vld [vmem:[%s5687_s10 + $0x38] sm:$0x1] }
  0x3b   : > { %v4554_v1 = vcombine.low %v601_v57, %v611_v58  ;;  %v340_v7 = vrot.slane %v338_v56, 4  ;;  %v629_v33 = vor.u32 %v628_v25, %v624_v24  ;;  %v620_v37 = vrot.slane %v619_v30, 4  ;;  %v5512_v56 = vld [vmem:[%s7764_s1 + $0x1c0] sm:$0xff]  }
  0x3c   : > { %5022 = vmatpush3.bf16.msra.mxu1 %v5493_v4  ;;  %v336_v4 = vrot.slane %v334_v55, 5  ;;  %v358_v55 = vshll.u32 %v5955_v13, 16  ;;  %v362_v58 = vshrl.u32 %v5955_v13, 16  ;;  %v368_v59 = vshll.u32 %v5960_v35, 16 }
  0x3d   : > { %5023 = vmatprep.subr.bf16.mxu1 %v5496_v11  ;;  %3390 = vmatprep.mubr.bf16.mxu1 %v4554_v1  ;;  %v331_v11 = vor.u32 %v330_v3, %v327_v2  ;;  %v630_v43 = vrot.slane %v629_v33, 4  ;;  %v625_v50 = vsel %vm5729_vm2, %v620_v37, %v624_v24  ;;  %v5997_v33 = vld [vmem:[%s5687_s10 + $0x40] sm:$0xf] }
  0x3e   : > { %v341_v18 = vor.u32 %v340_v7, %v336_v4  ;;  %v360_v5 = vrot.slane %v358_v55, 5  ;;  %v364_v7 = vrot.slane %v362_v58, 4  ;;  %v637_v55 = vld [vmem:[%s5687_s10 + $0xc] sm:$0xe] }
  0x3f   : > { %3295 = vmatmul.mubr.bf16.gmra.mrb[8].mxu0 %v4526_v38  ;;  %3391 = vmatmul.mubr.bf16.gmra.mrb[8].mxu1 %v4538_v45  ;;  %v332_v23 = vrot.slane %v331_v11, 4  ;;  %v4527_v38 = vcombine.low %v5880_v46, %v5883_v51  ;;  %v4539_v45 = vcombine.low %v5901_v60, %v5904_v61  ;;  %v5509_v46 = vld [vmem:[%s7764_s1 + $0x110] sm:$0xff]   ;;  %v635_v57 = vsel %vm5729_vm2, %v630_v43, %v634_v26  ;;  %v4364_v60 = vld [vmem:[%s5687_s10 + $0xc] sm:$0xf]  ;;  %v5988_v26 = vld [vmem:[%s5687_s10 + $0x3c] sm:$0xf] }
  0x40   : > { %5024 = vmatpush3.bf16.msra.mxu1 %v5498_v36  ;;  %v342_v28 = vrot.slane %v341_v18, 4  ;;  %5132 = vmatpush3.bf16.msra.mxu0 %v5509_v46  ;;  %v5974_v61 = vld [vmem:[%s5687_s10 + $0x10] sm:$0xf]  ;;  %v4555_v2 = vcombine.low %v625_v50, %v635_v57  ;;  %v868_v9 = vshrl.u32 %v4364_v60, 16  ;;  %v871_v10 = vshll.u32 %v4364_v60, 16 }
  0x41   : > { %5025 = vmatprep.subr.bf16.mxu1 %v5500_v39  ;;  %v337_v32 = vsel %vm5729_vm2, %v332_v23, %v336_v4  ;;  %v5508_v39 = vld [vmem:[%s7764_s1 + $0xb8] sm:$0xff]   ;;  %v877_v14 = vshll.u32 %v5974_v61, 16  ;;  %v881_v15 = vshrl.u32 %v5974_v61, 16  ;;  %v4572_v16 = vcombine.low %v4364_v60, %v5974_v61  ;;  %v5520_v60 = vld [vmem:[%s7764_s1 + $0x1c8] sm:$0xff]  }
  0x42   : > { %v347_v36 = vsel %vm5729_vm2, %v342_v28, %v346_v8  ;;  %v370_v8 = vrot.slane %v368_v59, 5  ;;  %3398 = vmatprep.mubr.bf16.mxu1 %v4555_v2  ;;  %v870_v18 = vrot.slane %v868_v9, 4  ;;  %v873_v19 = vrot.slane %v871_v10, 5  ;;  %v4366_v43 = vld [vmem:[%s5687_s10 + $0x18] sm:$0xf]  ;;  %v5521_v10 = vld [vmem:[%s7764_s1 + $0x188] sm:$0xff]  }
  0x43   : > { %v4543_v42 = vcombine.low %v337_v32, %v347_v36  ;;  %v5985_v24 = vrot.slane %v877_v14, 5  ;;  %v883_v25 = vrot.slane %v881_v15, 4  ;;  %v714_v28 = vrot.slane %v712_v40, 4  ;;  %v6000_v36 = vld [vmem:[%s5687_s10 + $0x44] sm:$0x1] }
  0x44   : > { %5026 = vmatpush3.bf16.msra.mxu1 %v5501_v44  ;;  %v5952_v44 = vld [vmem:[%s5687_s10 + $0x30] sm:$0xf]  ;;  %v874_v31 = vor.u32 %v873_v19, %v870_v18  ;;  %v373_v37 = vshrl.u32 %v5988_v26, 16  ;;  %v376_v12 = vshll.u32 %v5988_v26, 16  ;;  %v386_v59 = vshrl.u32 %v5997_v33, 16  ;;  %v5522_v18 = vld [vmem:[%s7764_s1 + $0x160] sm:$0xff]  }
  0x45   : > { %5027 = vmatprep.subr.bf16.mxu1 %v5504_v6  ;;  %v349_v53 = vshrl.u32 %v5952_v44, 16  ;;  %v352_v54 = vshll.u32 %v5952_v44, 16  ;;  %3302 = vmatprep.mubr.bf16.mxu0 %v4543_v42  ;;  %v4528_v1 = vcombine.low %v5952_v44, %v5955_v13  ;;  %v636_v6 = vld [vmem:[%s5687_s10] sm:$0xe] }
  0x46   : > { %v4348_v20 = vrot.slane %v636_v6, 9  ;;  %v6017_v50 = vrot.slane %v874_v31, 4  ;;  %v378_v58 = vrot.slane %v376_v12, 5 }
  0x47   : > { %3303 = vmatmul.mubr.bf16.gmra.mrb[12].mxu0 %v4527_v38  ;;  %v351_v3 = vrot.slane %v349_v53, 4  ;;  %v354_v4 = vrot.slane %v352_v54, 5  ;;  %3399 = vmatmul.mubr.bf16.gmra.mrb[12].mxu1 %v4539_v45  ;;  %v6010_v45 = vld [vmem:[%s5687_s10 + $0x1c] sm:$0xf]  ;;  %v5513_v53 = vld [vmem:[%s7764_s1 + $0x180] sm:$0xff]   ;;  %v375_v54 = vrot.slane %v373_v37, 4 }
  0x48   : > { %5028 = vmatpush3.bf16.msra.mxu1 %v5505_v17  ;;  %v365_v17 = vor.u32 %v364_v7, %v360_v5  ;;  %3439 = vmatprep.mubr.bf16.mxu1 %v4572_v16  ;;  %v706_v32 = vsel %vm5923_vm5, %v4348_v20, %v705_v47  ;;  %v5517_v47 = vld [vmem:[%s7764_s1 + $0x118] sm:$0xff]   ;;  %v388_v7 = vrot.slane %v386_v59, 4  ;;  %v4573_v9 = vcombine.low %v4366_v43, %v6010_v45 }
  0x49   : > { %5029 = vmatprep.subr.bf16.mxu1 %v5506_v21  ;;  %v355_v11 = vor.u32 %v354_v4, %v351_v3  ;;  %v5516_v21 = vld [vmem:[%s7764_s1 + $0x158] sm:$0xff]   ;;  %v4556_v42 = vcombine.low %v706_v32, %v5944_v41  ;;  %v382_v41 = vshll.u32 %v5997_v33, 16  ;;  %v392_v3 = vshll.u32 %v6000_v36, 16  ;;  %v4368_v32 = vld [vmem:[%s5687_s10 + $0x24] sm:$0xf] }
  0x4a   : > { %v366_v30 = vrot.slane %v365_v17, 4  ;;  %5133 = vmatprep.subr.bf16.mxu0 %v5516_v21  ;;  %v892_v4 = vshrl.u32 %v4366_v43, 16  ;;  %v379_v6 = vor.u32 %v378_v58, %v375_v54  ;;  %v4529_v16 = vcombine.low %v5988_v26, %v5997_v33  ;;  %v6046_v17 = vld [vmem:[%s5687_s10 + $0x48] sm:$0xf]  ;;  %v6056_v21 = vld [vmem:[%s5687_s10 + $0x4c] sm:$0xf] }
  0x4b   : > { %v356_v23 = vrot.slane %v355_v11, 4  ;;  %5134 = vmatpush3.bf16.msra.mxu0 %v5517_v47  ;;  %v384_v2 = vrot.slane %v382_v41, 5  ;;  %v394_v11 = vrot.slane %v392_v3, 5  ;;  %v716_v20 = vsel %vm5923_vm5, %v714_v28, %v715_v62 }
  0x4c   : > { %5030 = vmatpush3.bf16.msra.mxu1 %v5508_v39  ;;  %v884_v39 = vor.u32 %v883_v25, %v5985_v24  ;;  %v371_v46 = vsel %vm5729_vm2, %v366_v30, %v370_v8  ;;  %v6039_v14 = vrot.slane %v892_v4, 4  ;;  %v380_v44 = vrot.slane %v379_v6, 4  ;;  %5135 = vmatprep.subr.bf16.mxu0 %v5522_v18  ;;  %v6099_v18 = vld [vmem:[%s5687_s10 + $0x54] sm:$0xf] }
  0x4d   : > { %5239 = vmatprep.subr.bf16.mxu1 %v5512_v56  ;;  %v361_v38 = vsel %vm5729_vm2, %v356_v23, %v360_v5  ;;  %v895_v5 = vshll.u32 %v4366_v43, 16  ;;  %v389_v19 = vor.u32 %v388_v7, %v384_v2  ;;  %v6059_v23 = vld [vmem:[%s5687_s10 + $0x50] sm:$0x1]  ;;  %v397_v25 = vshrl.u32 %v6046_v17, 16 }
  0x4e   : > { %v4544_v56 = vcombine.low %v361_v38, %v371_v46  ;;  %v6024_v57 = vrot.slane %v884_v39, 4  ;;  %v400_v26 = vshll.u32 %v6046_v17, 16  ;;  %v406_v30 = vshll.u32 %v6056_v21, 16  ;;  %v6074_v38 = vld [vmem:[%s5687_s10 + $0x28] sm:$0xf]  ;;  %v5523_v46 = vld [vmem:[%s7764_s1 + $0x120] sm:$0xff]  }
  0x4f   : > { %3440 = vmatmul.mubr.bf16.vlgmr.msra.gmra.mrb[16].mxu1 %v4556_v42  ;;  %v6041_v15 = vrot.slane %v895_v5, 5  ;;  %v410_v31 = vshrl.u32 %v6056_v21, 16  ;;  %v385_v0 = vsel %vm5729_vm2, %v380_v44, %v384_v2  ;;  %v390_v37 = vrot.slane %v389_v19, 4  ;;  %v638_v39 = vld [vmem:[%s5687_s10 + $0x18] sm:$0xe]  ;;  %5136 = vmatpush3.bf16.msra.mxu0 %v5523_v46  ;;  %v5529_v5 = vld [vmem:[%s7764_s1 + $0x1d0] sm:$0xff]  }
  0x50   : > { %3310 = vmatprep.mubr.bf16.mxu0 %v4544_v56  ;;  %5240 = vmatpush3.bf16.msra.mxu1 %v5513_v53  ;;  %v416_v28 = vshll.u32 %v6059_v23, 16  ;;  %v399_v12 = vrot.slane %v397_v25, 4  ;;  %v402_v43 = vrot.slane %v400_v26, 5  ;;  %v408_v47 = vrot.slane %v406_v30, 5  ;;  %v4396_v19 = vld [vmem:[%s5687_s10 + $0x14] sm:$0x1] }
  0x51   : > { %3311 = vmatmul.mubr.bf16.gmra.mrb[16].mxu0 %v4528_v1  ;;  %3447 = vmatprep.mubr.bf16.mxu1 %v4573_v9  ;;  %v4349_v1 = vrot.slane %v637_v55, 9  ;;  %v395_v53 = vsel %vm5729_vm2, %v390_v37, %v394_v11  ;;  %v412_v63 = vrot.slane %v410_v31, 4  ;;  %v916_v41 = vshrl.u32 %v4368_v32, 16  ;;  %v4412_v44 = vld [vmem:[%s5687_s10 + $0xc] sm:$0xe] }
  0x52   : > { %5241 = vmatprep.subr.bf16.mxu1 %v5520_v60  ;;  %v418_v54 = vrot.slane %v416_v28, 5  ;;  %v4545_v55 = vcombine.low %v385_v0, %v395_v53  ;;  %v403_v56 = vor.u32 %v402_v43, %v399_v12  ;;  %v919_v58 = vshll.u32 %v4368_v32, 16  ;;  %v5530_v0 = vld [vmem:[%s7764_s1 + $0x128] sm:$0xff]   ;;  %v6131_v12 = vld [vmem:[%s5687_s10 + $0x34] sm:$0xf] }
  0x53   : > { %v713_v62 = vsel %vm5923_vm5, %v4349_v1, %v712_v40  ;;  %v5528_v40 = vld [vmem:[%s7764_s1 + $0x168] sm:$0xff]   ;;  %v413_v60 = vor.u32 %v412_v63, %v408_v47  ;;  %v6086_v2 = vrot.slane %v916_v41, 4  ;;  %v4574_v3 = vcombine.low %v4368_v32, %v6074_v38  ;;  %v639_v63 = vld [vmem:[%s5687_s10 + $0x24] sm:$0xe] }
  0x54   : > { %v4557_v42 = vcombine.low %v713_v62, %v716_v20  ;;  %5242 = vmatpush3.bf16.msra.mxu1 %v5521_v10  ;;  %v4530_v4 = vcombine.low %v6046_v17, %v6056_v21  ;;  %5137 = vmatprep.subr.bf16.mxu0 %v5528_v40  ;;  %v404_v6 = vrot.slane %v403_v56, 4  ;;  %v6094_v7 = vrot.slane %v919_v58, 5  ;;  %v6115_v20 = vld [vmem:[%s5687_s10 + $0x5c] sm:$0x1]  ;;  %v6139_v58 = vld [vmem:[%s5687_s10 + $0x60] sm:$0xf] }
  0x55   : > { %3318 = vmatprep.mubr.bf16.mxu0 %v4545_v55  ;;  %v4350_v9 = vrot.slane %v638_v39, 9  ;;  %v719_v10 = vrot.slane %v5823_v48, 5  ;;  %v414_v11 = vrot.slane %v413_v60, 4  ;;  %v722_v17 = vrot.slane %v5826_v49, 5  ;;  %v6112_v49 = vld [vmem:[%s5687_s10 + $0x58] sm:$0xf]  ;;  %5243 = vmatprep.subr.bf16.mxu1 %v5529_v5 }
  0x56   : > { %v409_v1 = vsel %vm5729_vm2, %v404_v6, %v408_v47  ;;  %v421_v25 = vshrl.u32 %v6099_v18, 16  ;;  %v424_v30 = vshll.u32 %v6099_v18, 16  ;;  %v430_v31 = vshll.u32 %v6112_v49, 16  ;;  %5138 = vmatpush3.bf16.msra.mxu0 %v5530_v0  ;;  %v6272_v56 = vld [vmem:[%s5687_s10 + $0x84] sm:$0xf] }
  0x57   : > { %3448 = vmatmul.mubr.bf16.gmra.mrb[20].mxu1 %v4557_v42  ;;  %v720_v48 = vsel %vm5923_vm5, %v4350_v9, %v719_v10  ;;  %v419_v26 = vsel %vm5729_vm2, %v414_v11, %v418_v54  ;;  %v434_v32 = vshrl.u32 %v6112_v49, 16  ;;  %v440_v39 = vshll.u32 %v6115_v20, 16  ;;  %v4370_v42 = vld [vmem:[%s5687_s10 + $0x30] sm:$0xf]  ;;  %v6145_v9 = vld [vmem:[%s5687_s10 + $0x64] sm:$0xf] }
  0x58   : > { %3455 = vmatprep.mubr.bf16.mxu1 %v4574_v3  ;;  %v4546_v37 = vcombine.low %v409_v1, %v419_v26  ;;  %v423_v28 = vrot.slane %v421_v25, 4  ;;  %v426_v47 = vrot.slane %v424_v30, 5  ;;  %v432_v46 = vrot.slane %v430_v31, 5  ;;  %v5531_v54 = vld [vmem:[%s7764_s1 + $0x190] sm:$0xff]   ;;  %v4372_v30 = vld [vmem:[%s5687_s10 + $0x3c] sm:$0xf] }
  0x59   : > { %3319 = vmatmul.mubr.bf16.gmra.mrb[20].mxu0 %v4529_v16  ;;  %v721_v16 = vrot.slane %v719_v10, 4  ;;  %v436_v53 = vrot.slane %v434_v32, 4  ;;  %v442_v41 = vrot.slane %v440_v39, 5  ;;  %v940_v40 = vshrl.u32 %v4370_v42, 16  ;;  %5244 = vmatpush3.bf16.msra.mxu1 %v5531_v54  ;;  %v6159_v31 = vld [vmem:[%s5687_s10 + $0x40] sm:$0xf] }
  0x5a   : > { %3326 = vmatprep.mubr.bf16.mxu0 %v4546_v37  ;;  %v943_v55 = vshll.u32 %v4370_v42, 16  ;;  %v427_v60 = vor.u32 %v426_v47, %v423_v28  ;;  %v4575_v5 = vcombine.low %v4370_v42, %v6131_v12  ;;  %v4531_v6 = vcombine.low %v6099_v18, %v6112_v49  ;;  %v640_v42 = vld [vmem:[%s5687_s10 + $0x30] sm:$0xe] }
  0x5b   : > { %v723_v62 = vsel %vm5923_vm5, %v721_v16, %v722_v17  ;;  %v437_v3 = vor.u32 %v436_v53, %v432_v46  ;;  %v6147_v10 = vrot.slane %v940_v40, 4  ;;  %v4351_v17 = vrot.slane %v639_v63, 9 }
  0x5c   : > { %v4558_v43 = vcombine.low %v720_v48, %v723_v62  ;;  %v6149_v11 = vrot.slane %v943_v55, 5  ;;  %v726_v1 = vrot.slane %v5883_v51, 5  ;;  %v6153_v48 = vld [vmem:[%s5687_s10 + $0x68] sm:$0x1]  ;;  %v428_v16 = vrot.slane %v427_v60, 4 }
  0x5d   : > { %v438_v25 = vrot.slane %v437_v3, 4  ;;  %v729_v18 = vrot.slane %v5889_v52, 5  ;;  %v445_v26 = vshrl.u32 %v6139_v58, 16  ;;  %v448_v51 = vshll.u32 %v6139_v58, 16 }
  0x5e   : > { %v727_v32 = vsel %vm5923_vm5, %v4351_v17, %v726_v1  ;;  %v728_v0 = vrot.slane %v726_v1, 4  ;;  %v454_v37 = vshll.u32 %v6145_v9, 16  ;;  %v433_v52 = vsel %vm5729_vm2, %v428_v16, %v432_v46  ;;  %v6183_v1 = vld [vmem:[%s5687_s10 + $0x6c] sm:$0xf] }
  0x5f   : > { %3456 = vmatmul.mubr.bf16.gmra.mrb[24].mxu1 %v4558_v43  ;;  %v443_v62 = vsel %vm5729_vm2, %v438_v25, %v442_v41  ;;  %v447_v28 = vrot.slane %v445_v26, 4  ;;  %v458_v39 = vshrl.u32 %v6145_v9, 16  ;;  %v450_v53 = vrot.slane %v448_v51, 5  ;;  %v5535_v41 = vld [vmem:[%s7764_s1 + $0x130] sm:$0xff]  }
  0x60   : > { %3463 = vmatprep.mubr.bf16.mxu1 %v4575_v5  ;;  %v4547_v43 = vcombine.low %v433_v52, %v443_v62  ;;  %v730_v47 = vsel %vm5923_vm5, %v728_v0, %v729_v18  ;;  %v456_v63 = vrot.slane %v454_v37, 5  ;;  %v464_v46 = vshll.u32 %v6153_v48, 16 }
  0x61   : > { %3327 = vmatmul.mubr.bf16.gmra.mrb[24].mxu0 %v4530_v4  ;;  %v5534_v4 = vld [vmem:[%s7764_s1 + $0x170] sm:$0xff]   ;;  %v4559_v54 = vcombine.low %v727_v32, %v730_v47  ;;  %v460_v40 = vrot.slane %v458_v39, 4  ;;  %v964_v55 = vshrl.u32 %v4372_v30, 16  ;;  %v451_v60 = vor.u32 %v450_v53, %v447_v28  ;;  %v4374_v39 = vld [vmem:[%s5687_s10 + $0x48] sm:$0xf] }
  0x62   : > { %5139 = vmatprep.subr.bf16.mxu0 %v5534_v4  ;;  %3334 = vmatprep.mubr.bf16.mxu0 %v4547_v43  ;;  %v967_v3 = vshll.u32 %v4372_v30, 16  ;;  %v4576_v17 = vcombine.low %v4372_v30, %v6159_v31  ;;  %v466_v25 = vrot.slane %v464_v46, 5  ;;  %v4532_v26 = vcombine.low %v6139_v58, %v6145_v9  ;;  %v6190_v32 = vld [vmem:[%s5687_s10 + $0x70] sm:$0xf]  ;;  %v6196_v4 = vld [vmem:[%s5687_s10 + $0x74] sm:$0x1] }
  0x63   : > { %v461_v16 = vor.u32 %v460_v40, %v456_v63  ;;  %v6185_v18 = vrot.slane %v964_v55, 4  ;;  %5140 = vmatpush3.bf16.msra.mxu0 %v5535_v41  ;;  %v452_v0 = vrot.slane %v451_v60, 4  ;;  %v4352_v37 = vrot.slane %v640_v42, 9 }
  0x64   : > { %v6192_v51 = vrot.slane %v967_v3, 5  ;;  %v733_v30 = vrot.slane %v5955_v13, 5  ;;  %v736_v62 = vrot.slane %v5960_v35, 5  ;;  %v469_v58 = vshrl.u32 %v6183_v1, 16 }
  0x65   : > { %v462_v52 = vrot.slane %v461_v16, 4  ;;  %v472_v28 = vshll.u32 %v6183_v1, 16  ;;  %v457_v43 = vsel %vm5729_vm2, %v452_v0, %v456_v63  ;;  %v478_v13 = vshll.u32 %v6190_v32, 16  ;;  %v5538_v63 = vld [vmem:[%s7764_s1 + $0x1d8] sm:$0xff]  }
  0x66   : > { %v734_v42 = vsel %vm5923_vm5, %v4352_v37, %v733_v30  ;;  %v735_v47 = vrot.slane %v733_v30, 4  ;;  %v471_v53 = vrot.slane %v469_v58, 4  ;;  %v482_v40 = vshrl.u32 %v6190_v32, 16  ;;  %v641_v0 = vld [vmem:[%s5687_s10 + $0x3c] sm:$0xe]  ;;  %5245 = vmatprep.subr.bf16.mxu1 %v5538_v63 }
  0x67   : > { %3464 = vmatmul.mubr.bf16.gmra.mrb[28].mxu1 %v4559_v54  ;;  %v467_v35 = vsel %vm5729_vm2, %v462_v52, %v466_v25  ;;  %v474_v54 = vrot.slane %v472_v28, 5  ;;  %v480_v41 = vrot.slane %v478_v13, 5  ;;  %v488_v60 = vshll.u32 %v6196_v4, 16  ;;  %v6223_v28 = vld [vmem:[%s5687_s10 + $0x78] sm:$0xf] }
  0x68   : > { %3471 = vmatprep.mubr.bf16.mxu1 %v4576_v17  ;;  %v4548_v46 = vcombine.low %v457_v43, %v467_v35  ;;  %v737_v55 = vsel %vm5923_vm5, %v735_v47, %v736_v62  ;;  %v484_v16 = vrot.slane %v482_v40, 4  ;;  %v988_v25 = vshrl.u32 %v4374_v39, 16  ;;  %v5539_v62 = vld [vmem:[%s7764_s1 + $0x198] sm:$0xff]   ;;  %v6240_v63 = vld [vmem:[%s5687_s10 + $0x80] sm:$0x1] }
  0x69   : > { %3335 = vmatmul.mubr.bf16.gmra.mrb[28].mxu0 %v4531_v6  ;;  %v6208_v6 = vld [vmem:[%s5687_s10 + $0x4c] sm:$0xf]  ;;  %v4560_v3 = vcombine.low %v734_v42, %v737_v55  ;;  %v475_v17 = vor.u32 %v474_v54, %v471_v53  ;;  %v490_v37 = vrot.slane %v488_v60, 5  ;;  %v991_v30 = vshll.u32 %v4374_v39, 16  ;;  %v6233_v35 = vld [vmem:[%s5687_s10 + $0x7c] sm:$0xf]  ;;  %5246 = vmatpush3.bf16.msra.mxu1 %v5539_v62 }
  0x6a   : > { %3342 = vmatprep.mubr.bf16.mxu0 %v4548_v46  ;;  %v4577_v58 = vcombine.low %v4374_v39, %v6208_v6  ;;  %v485_v42 = vor.u32 %v484_v16, %v480_v41  ;;  %v6228_v47 = vrot.slane %v988_v25, 4  ;;  %v4533_v13 = vcombine.low %v6183_v1, %v6190_v32  ;;  %v5543_v25 = vld [vmem:[%s7764_s1 + $0x138] sm:$0xff]  }
  0x6b   : > { %v476_v43 = vrot.slane %v475_v17, 4  ;;  %v6235_v53 = vrot.slane %v991_v30, 5  ;;  %v4353_v39 = vrot.slane %v641_v0, 9  ;;  %v740_v54 = vrot.slane %v5997_v33, 5  ;;  %v6248_v17 = vld [vmem:[%s5687_s10 + $0x58] sm:$0xf] }
  0x6c   : > { %v743_v40 = vrot.slane %v6000_v36, 5  ;;  %v486_v55 = vrot.slane %v485_v42, 4  ;;  %v493_v1 = vshrl.u32 %v6223_v28, 16  ;;  %v496_v60 = vshll.u32 %v6223_v28, 16  ;;  %v5542_v33 = vld [vmem:[%s7764_s1 + $0x178] sm:$0xff]   ;;  %v5545_v42 = vld [vmem:[%s7764_s1 + $0x1e0] sm:$0xff]  }
  0x6d   : > { %v481_v46 = vsel %vm5729_vm2, %v476_v43, %v480_v41  ;;  %v741_v36 = vsel %vm5923_vm5, %v4353_v39, %v740_v54  ;;  %v502_v41 = vshll.u32 %v6233_v35, 16  ;;  %v506_v16 = vshrl.u32 %v6233_v35, 16  ;;  %5141 = vmatprep.subr.bf16.mxu0 %v5542_v33  ;;  %5247 = vmatprep.subr.bf16.mxu1 %v5545_v42 }
  0x6e   : > { %v491_v0 = vsel %vm5729_vm2, %v486_v55, %v490_v37  ;;  %v495_v30 = vrot.slane %v493_v1, 4  ;;  %v512_v43 = vshll.u32 %v6240_v63, 16  ;;  %5142 = vmatpush3.bf16.msra.mxu0 %v5543_v25  ;;  %v6282_v25 = vld [vmem:[%s5687_s10 + $0x8c] sm:$0x1] }
  0x6f   : > { %3472 = vmatmul.mubr.bf16.gmra.mrb[32].mxu1 %v4560_v3  ;;  %v4376_v3 = vld [vmem:[%s5687_s10 + $0x54] sm:$0xf]  ;;  %v4549_v39 = vcombine.low %v481_v46, %v491_v0  ;;  %v508_v52 = vrot.slane %v506_v16, 4  ;;  %v4354_v16 = vrot.slane %v642_v27, 9  ;;  %v517_v27 = vshrl.u32 %v6272_v56, 16 }
  0x70   : > { %3479 = vmatprep.mubr.bf16.mxu1 %v4577_v58  ;;  %v498_v58 = vrot.slane %v496_v60, 5  ;;  %v514_v1 = vrot.slane %v512_v43, 5  ;;  %v1012_v60 = vshrl.u32 %v4376_v3, 16  ;;  %v1015_v5 = vshll.u32 %v4376_v3, 16  ;;  %v6323_v46 = vld [vmem:[%s5687_s10 + $0x6c] sm:$0xf] }
  0x71   : > { %3343 = vmatmul.mubr.bf16.gmra.mrb[32].mxu0 %v4532_v26  ;;  %v742_v26 = vrot.slane %v740_v54, 4  ;;  %v504_v54 = vrot.slane %v502_v41, 5  ;;  %v4578_v0 = vcombine.low %v4376_v3, %v6248_v17  ;;  %v750_v43 = vrot.slane %v6059_v23, 5 }
  0x72   : > { %v499_v55 = vor.u32 %v498_v58, %v495_v30  ;;  %3350 = vmatprep.mubr.bf16.mxu0 %v4549_v39  ;;  %v6277_v41 = vrot.slane %v1012_v60, 4  ;;  %v6287_v30 = vrot.slane %v1015_v5, 5  ;;  %v747_v58 = vrot.slane %v6056_v21, 5  ;;  %v6300_v5 = vld [vmem:[%s7764_s1 + $0x200] sm:$0xff]  }
  0x73   : > { %v744_v62 = vsel %vm5923_vm5, %v742_v26, %v743_v40  ;;  %v509_v33 = vor.u32 %v508_v52, %v504_v54  ;;  %v6275_v40 = vld [vmem:[%s5687_s10 + $0x88] sm:$0xf]  ;;  %v5546_v52 = vld [vmem:[%s7764_s1 + $0x1a0] sm:$0xff]   ;;  %5375 = vmatprep.subr.bf16.mxu0 %v6300_v5 }
  0x74   : > { %v4561_v37 = vcombine.low %v741_v36, %v744_v62  ;;  %v500_v26 = vrot.slane %v499_v55, 4  ;;  %v4534_v36 = vcombine.low %v6223_v28, %v6233_v35  ;;  %v520_v28 = vshll.u32 %v6272_v56, 16  ;;  %v4378_v62 = vld [vmem:[%s5687_s10 + $0x60] sm:$0xf]  ;;  %5248 = vmatpush3.bf16.msra.mxu1 %v5546_v52 }
  0x75   : > { %v510_v3 = vrot.slane %v509_v33, 4  ;;  %v526_v39 = vshll.u32 %v6275_v40, 16  ;;  %v748_v23 = vsel %vm5923_vm5, %v4354_v16, %v747_v58  ;;  %v519_v55 = vrot.slane %v517_v27, 4 }
  0x76   : > { %v505_v42 = vsel %vm5729_vm2, %v500_v26, %v504_v54  ;;  %v530_v54 = vshrl.u32 %v6275_v40, 16  ;;  %v522_v60 = vrot.slane %v520_v28, 5  ;;  %v536_v52 = vshll.u32 %v6282_v25, 16 }
  0x77   : > { %3480 = vmatmul.mubr.bf16.gmra.mrb[36].mxu1 %v4561_v37  ;;  %v515_v21 = vsel %vm5729_vm2, %v510_v3, %v514_v1  ;;  %v528_v33 = vrot.slane %v526_v39, 5  ;;  %v5550_v1 = vld [vmem:[%s7764_s1 + $0x1e8] sm:$0xff]   ;;  %v1036_v3 = vshrl.u32 %v4378_v62, 16  ;;  %v1039_v39 = vshll.u32 %v4378_v62, 16 }
  0x78   : > { %3487 = vmatprep.mubr.bf16.mxu1 %v4578_v0  ;;  %v4550_v37 = vcombine.low %v505_v42, %v515_v21  ;;  %v6308_v0 = vld [vmem:[%s5687_s10 + $0x64] sm:$0xf]  ;;  %v532_v16 = vrot.slane %v530_v54, 4  ;;  %v5551_v42 = vld [vmem:[%s7764_s1 + $0x1a8] sm:$0xff]   ;;  %v523_v28 = vor.u32 %v522_v60, %v519_v55  ;;  %5249 = vmatprep.subr.bf16.mxu1 %v5550_v1  ;;  %v538_v54 = vrot.slane %v536_v52, 5 }
  0x79   : > { %3351 = vmatmul.mubr.bf16.gmra.mrb[36].mxu0 %v4533_v13  ;;  %v749_v13 = vrot.slane %v747_v58, 4  ;;  %v643_v58 = vld [vmem:[%s5687_s10 + $0x54] sm:$0xe]  ;;  %v6328_v59 = vrot.slane %v1036_v3, 4  ;;  %v4579_v8 = vcombine.low %v4378_v62, %v6308_v0  ;;  %5250 = vmatpush3.bf16.msra.mxu1 %v5551_v42  ;;  %v4535_v55 = vcombine.low %v6272_v56, %v6275_v40 }
  0x7a   : > { %3358 = vmatprep.mubr.bf16.mxu0 %v4550_v37  ;;  %v6333_v37 = vrot.slane %v1039_v39, 5  ;;  %v4355_v60 = vrot.slane %v643_v58, 9  ;;  %v754_v1 = vrot.slane %v6112_v49, 5  ;;  %v1060_v52 = vshrl.u32 %v6323_v46, 16  ;;  %v5555_v39 = vld [vmem:[%s7764_s1 + $0x1f0] sm:$0xff]  }
  0x7b   : > { %v751_v26 = vsel %vm5923_vm5, %v749_v13, %v750_v43  ;;  %v6326_v43 = vld [vmem:[%s5687_s10 + $0x70] sm:$0xf]  ;;  %v533_v13 = vor.u32 %v532_v16, %v528_v33  ;;  %v757_v16 = vrot.slane %v6115_v20, 5  ;;  %v1063_v3 = vshll.u32 %v6323_v46, 16  ;;  %5251 = vmatprep.subr.bf16.mxu1 %v5555_v39 }
  0x7c   : > { %v4562_v27 = vcombine.low %v748_v23, %v751_v26  ;;  %v524_v23 = vrot.slane %v523_v28, 4  ;;  %v644_v26 = vld [vmem:[%s5687_s10 + $0x60] sm:$0xe]  ;;  %v1073_v56 = vshrl.u32 %v6326_v43, 16  ;;  %v4580_v58 = vcombine.low %v6323_v46, %v6326_v43 }
  0x7d   : > { %v534_v21 = vrot.slane %v533_v13, 4  ;;  %v755_v20 = vsel %vm5923_vm5, %v4355_v60, %v754_v1  ;;  %v756_v42 = vrot.slane %v754_v1, 4  ;;  %v4428_v28 = vrot.slane %v4412_v44, 9  ;;  %v5556_v60 = vld [vmem:[%s7764_s1 + $0x1b0] sm:$0xff]  }
  0x7e   : > { %v529_v62 = vsel %vm5729_vm2, %v524_v23, %v528_v33  ;;  %v887_v33 = vshll.u32 %v4396_v19, 16  ;;  %v1320_v13 = vrot.slane %v4396_v19, 5  ;;  %v6362_v23 = vld [vmem:[%s5687_s10 + $0x78] sm:$0xf]  ;;  %5252 = vmatpush3.bf16.msra.mxu1 %v5556_v60 }
  0x7f   : > { %3488 = vmatmul.mubr.bf16.gmra.mrb[40].mxu1 %v4562_v27  ;;  %v539_v49 = vsel %vm5729_vm2, %v534_v21, %v538_v54  ;;  %v758_v46 = vsel %vm5923_vm5, %v756_v42, %v757_v16  ;;  %v1317_v21 = vrot.slane %v5974_v61, 5  ;;  %v4356_v54 = vrot.slane %v644_v26, 9 }
  0x80   : > { %3495 = vmatprep.mubr.bf16.mxu1 %v4579_v8  ;;  %v4551_v27 = vcombine.low %v529_v62, %v539_v49  ;;  %v6353_v8 = vrot.slane %v1063_v3, 5  ;;  %v4563_v44 = vcombine.low %v755_v20, %v758_v46  ;;  %v889_v1 = vrot.slane %v887_v33, 5  ;;  %v6370_v62 = vld [vmem:[%s5687_s10 + $0x7c] sm:$0xf]  ;;  %v4413_v49 = vld [vmem:[%s5687_s10 + $0x18] sm:$0xe] }
  0x81   : > { %3359 = vmatmul.mubr.bf16.gmra.mrb[40].mxu0 %v4534_v36  ;;  %v6351_v36 = vrot.slane %v1060_v52, 4  ;;  %v761_v52 = vrot.slane %v6145_v9, 5  ;;  %v764_v16 = vrot.slane %v6153_v48, 5  ;;  %v1318_v61 = vsel %vm5923_vm5, %v4428_v28, %v1317_v21  ;;  %v5560_v9 = vld [vmem:[%s7764_s1 + $0x1f8] sm:$0xff]   ;;  %v4397_v33 = vld [vmem:[%s5687_s10 + $0x20] sm:$0x1] }
  0x82   : > { %3366 = vmatprep.mubr.bf16.mxu0 %v4551_v27  ;;  %v1319_v19 = vrot.slane %v1317_v21, 4  ;;  %v1084_v26 = vshrl.u32 %v6362_v23, 16  ;;  %v1087_v3 = vshll.u32 %v6362_v23, 16  ;;  %v890_v42 = vsel %vm5729_vm2, %v6024_v57, %v889_v1  ;;  %v645_v28 = vld [vmem:[%s5687_s10 + $0x6c] sm:$0xe]  ;;  %5253 = vmatprep.subr.bf16.mxu1 %v5560_v9 }
  0x83   : > { %v762_v48 = vsel %vm5923_vm5, %v4356_v54, %v761_v52  ;;  %v763_v20 = vrot.slane %v761_v52, 4  ;;  %v1097_v27 = vshrl.u32 %v6370_v62, 16  ;;  %v7771_v46 = vsel %vm5729_vm2, %v6017_v50, %v5985_v24  ;;  %v5561_v24 = vld [vmem:[%s7764_s1 + $0x1b8] sm:$0xff]  }
  0x84   : > { %v1321_v39 = vsel %vm5923_vm5, %v1319_v19, %v1320_v13  ;;  %v4588_v21 = vcombine.low %v7771_v46, %v890_v42  ;;  %v6395_v54 = vrot.slane %v1084_v26, 4  ;;  %v6397_v60 = vrot.slane %v1087_v3, 5  ;;  %5254 = vmatpush3.bf16.msra.mxu1 %v5561_v24 }
  0x85   : > { %v4604_v57 = vcombine.low %v1318_v61, %v1321_v39  ;;  %v4581_v13 = vcombine.low %v6362_v23, %v6370_v62  ;;  %v4429_v1 = vrot.slane %v4413_v49, 9  ;;  %v1324_v52 = vrot.slane %v6010_v45, 5  ;;  %v6417_v49 = vld [vmem:[%s5687_s10 + $0x88] sm:$0xf] }
  0x86   : > { %v1327_v19 = vrot.slane %v4397_v33, 5  ;;  %v768_v61 = vrot.slane %v6190_v32, 5  ;;  %v7772_v23 = vor.u32 %v6041_v15, %v6039_v14  ;;  %v901_v3 = vshll.u32 %v6010_v45, 16 }
  0x87   : > { %3496 = vmatmul.mubr.bf16.gmra.mrb[44].mxu1 %v4563_v44  ;;  %v765_v44 = vsel %vm5923_vm5, %v763_v20, %v764_v16  ;;  %v771_v16 = vrot.slane %v6196_v4, 5  ;;  %v1325_v9 = vsel %vm5923_vm5, %v4429_v1, %v1324_v52  ;;  %v7773_v20 = vshrl.u32 %v6010_v45, 16  ;;  %v4398_v4 = vld [vmem:[%s5687_s10 + $0x2c] sm:$0x1]  ;;  %v4414_v1 = vld [vmem:[%s5687_s10 + $0x24] sm:$0xe] }
  0x88   : > { %3503 = vmatprep.mubr.bf16.mxu1 %v4580_v58  ;;  %v4564_v50 = vcombine.low %v762_v48, %v765_v44  ;;  %v6408_v58 = vld [vmem:[%s5687_s10 + $0x84] sm:$0xf]  ;;  %v899_v26 = vrot.slane %v7772_v23, 4  ;;  %v1326_v48 = vrot.slane %v1324_v52, 4  ;;  %v911_v42 = vshll.u32 %v4397_v33, 16 }
  0x89   : > { %3367 = vmatmul.mubr.bf16.gmra.mrb[44].mxu0 %v4535_v55  ;;  %v4357_v55 = vrot.slane %v645_v28, 9  ;;  %v907_v32 = vrot.slane %v7773_v20, 4  ;;  %v770_v15 = vrot.slane %v768_v61, 4  ;;  %v903_v28 = vrot.slane %v901_v3, 5  ;;  %v646_v23 = vld [vmem:[%s5687_s10 + $0x78] sm:$0xe] }
  0x8a   : > { %3600 = vmatprep.mubr.bf16.mxu0 %v4604_v57  ;;  %v1108_v39 = vshrl.u32 %v6408_v58, 16  ;;  %v1328_v46 = vsel %vm5923_vm5, %v1326_v48, %v1327_v19  ;;  %v913_v57 = vrot.slane %v911_v42, 5  ;;  %v1111_v44 = vshll.u32 %v6408_v58, 16 }
  0x8b   : > { %v769_v14 = vsel %vm5923_vm5, %v4357_v55, %v768_v61  ;;  %v4605_v24 = vcombine.low %v1325_v9, %v1328_v46  ;;  %v772_v45 = vsel %vm5923_vm5, %v770_v15, %v771_v16  ;;  %v908_v33 = vor.u32 %v907_v32, %v903_v28  ;;  %v5552_v55 = vld [vmem:[%s7764_s1 + $0x208] sm:$0xff]   ;;  %v6459_v15 = vld [vmem:[%s5687_s10 + $0x90] sm:$0xf]  ;;  %v4399_v46 = vld [vmem:[%s5687_s10 + $0x38] sm:$0x1] }
  0x8c   : > { %v1121_v52 = vshrl.u32 %v6417_v49, 16  ;;  %v4565_v61 = vcombine.low %v769_v14, %v772_v45  ;;  %v904_v19 = vsel %vm5729_vm2, %v899_v26, %v903_v28  ;;  %v6440_v3 = vrot.slane %v1108_v39, 4 }
  0x8d   : > { %v4582_v9 = vcombine.low %v6408_v58, %v6417_v49  ;;  %v909_v16 = vrot.slane %v908_v33, 4  ;;  %v4430_v48 = vrot.slane %v4414_v1, 9  ;;  %v1331_v20 = vrot.slane %v6074_v38, 5 }
  0x8e   : > { %v1334_v32 = vrot.slane %v4398_v4, 5  ;;  %v775_v26 = vrot.slane %v6233_v35, 5  ;;  %v778_v42 = vrot.slane %v6240_v63, 5  ;;  %v925_v35 = vshll.u32 %v6074_v38, 16  ;;  %v6462_v63 = vld [vmem:[%s5687_s10 + $0x94] sm:$0xf] }
  0x8f   : > { %3504 = vmatmul.mubr.bf16.gmra.mrb[48].mxu1 %v4564_v50  ;;  %v4358_v50 = vrot.slane %v646_v23, 9  ;;  %v914_v58 = vsel %vm5729_vm2, %v909_v16, %v913_v57  ;;  %v1333_v14 = vrot.slane %v1331_v20, 4  ;;  %v4415_v57 = vld [vmem:[%s5687_s10 + $0x30] sm:$0xe]  ;;  %v7774_v45 = vshrl.u32 %v6074_v38, 16 }
  0x90   : > { %3511 = vmatprep.mubr.bf16.mxu1 %v4581_v13  ;;  %v5557_v13 = vld [vmem:[%s7764_s1 + $0x210] sm:$0xff]   ;;  %v777_v28 = vrot.slane %v775_v26, 4  ;;  %v935_v23 = vshll.u32 %v4398_v4, 16  ;;  %v647_v16 = vld [vmem:[%s5687_s10 + $0x84] sm:$0xe]  ;;  %v1135_v38 = vshll.u32 %v6459_v15, 16 }
  0x91   : > { %3601 = vmatmul.mubr.bf16.vlgmr.msra.gmra.mrb[48].mxu0 %v4588_v21  ;;  %v922_v21 = vor.u32 %v6094_v7, %v6086_v2  ;;  %v4589_v2 = vcombine.low %v904_v19, %v914_v58  ;;  %v6466_v7 = vsel %vm5923_vm5, %v4358_v50, %v775_v26  ;;  %v1335_v1 = vsel %vm5923_vm5, %v1333_v14, %v1334_v32  ;;  %v5562_v19 = vld [vmem:[%s7764_s1 + $0x218] sm:$0xff]  }
  0x92   : > { %5376 = vmatpush3.bf16.msra.mxu0 %v6300_v5  ;;  %3608 = vmatprep.mubr.bf16.mxu0 %v4605_v24  ;;  %v1332_v5 = vsel %vm5923_vm5, %v4430_v48, %v1331_v20  ;;  %v927_v24 = vrot.slane %v925_v35, 5  ;;  %v931_v33 = vrot.slane %v7774_v45, 4  ;;  %v6478_v48 = vrot.slane %v1111_v44, 5 }
  0x93   : > { %5377 = vmatprep.subr.bf16.mxu0 %v5552_v55  ;;  %v923_v39 = vrot.slane %v922_v21, 4  ;;  %v4606_v20 = vcombine.low %v1332_v5, %v1335_v1  ;;  %v779_v50 = vsel %vm5923_vm5, %v777_v28, %v778_v42  ;;  %v1132_v26 = vshrl.u32 %v6459_v15, 16  ;;  %v6509_v1 = vld [vmem:[%s5687_s10 + $0x9c] sm:$0xf] }
  0x94   : > { %v932_v32 = vor.u32 %v931_v33, %v927_v24  ;;  %v937_v21 = vrot.slane %v935_v23, 5  ;;  %v4566_v4 = vcombine.low %v6466_v7, %v779_v50  ;;  %v4583_v5 = vcombine.low %v6459_v15, %v6462_v63  ;;  %v5568_v50 = vld [vmem:[%s7764_s1 + $0x228] sm:$0xff]  }
  0x95   : > { %v928_v58 = vsel %vm5729_vm2, %v923_v39, %v927_v24  ;;  %v6487_v44 = vrot.slane %v1132_v26, 4  ;;  %v4431_v42 = vrot.slane %v4415_v57, 9  ;;  %v1338_v14 = vrot.slane %v6131_v12, 5 }
  0x96   : > { %5378 = vmatpush3.bf16.msra.mxu0 %v5552_v55  ;;  %v933_v55 = vrot.slane %v932_v32, 4  ;;  %v1341_v35 = vrot.slane %v4399_v46, 5  ;;  %v782_v7 = vrot.slane %v6275_v40, 5  ;;  %v785_v28 = vrot.slane %v6282_v25, 5  ;;  %v5565_v40 = vld [vmem:[%s7764_s1 + $0x220] sm:$0xff]  }
  0x97   : > { %5379 = vmatprep.subr.bf16.mxu0 %v5557_v13  ;;  %3512 = vmatmul.mubr.bf16.gmra.mrb[52].mxu1 %v4565_v61  ;;  %v4359_v61 = vrot.slane %v647_v16, 9  ;;  %v946_v39 = vor.u32 %v6149_v11, %v6147_v10  ;;  %v1339_v15 = vsel %vm5923_vm5, %v4431_v42, %v1338_v14  ;;  %v949_v57 = vshll.u32 %v6131_v12, 16  ;;  %v648_v42 = vld [vmem:[%s5687_s10 + $0x90] sm:$0xe] }
  0x98   : > { %3519 = vmatprep.mubr.bf16.mxu1 %v4582_v9  ;;  %v938_v9 = vsel %vm5729_vm2, %v933_v55, %v937_v21  ;;  %v784_v11 = vrot.slane %v782_v7, 4  ;;  %v7775_v33 = vshrl.u32 %v6131_v12, 16  ;;  %v959_v16 = vshll.u32 %v4399_v46, 16  ;;  %v4416_v55 = vld [vmem:[%s5687_s10 + $0x3c] sm:$0xe] }
  0x99   : > { %3609 = vmatmul.mubr.bf16.gmra.mrb[52].mxu0 %v4589_v2  ;;  %v1340_v2 = vrot.slane %v1338_v14, 4  ;;  %v4590_v25 = vcombine.low %v928_v58, %v938_v9  ;;  %v6506_v10 = vsel %vm5923_vm5, %v4359_v61, %v782_v7  ;;  %v951_v45 = vrot.slane %v949_v57, 5  ;;  %v6531_v61 = vld [vmem:[%s5687_s10 + $0xa0] sm:$0xf] }
  0x9a   : > { %3616 = vmatprep.mubr.bf16.mxu0 %v4606_v20  ;;  %5380 = vmatpush3.bf16.msra.mxu0 %v5557_v13  ;;  %v947_v13 = vrot.slane %v946_v39, 4  ;;  %v955_v23 = vrot.slane %v7775_v33, 4  ;;  %v4400_v20 = vld [vmem:[%s5687_s10 + $0x44] sm:$0x1]  ;;  %v6519_v26 = vrot.slane %v1135_v38, 5  ;;  %v786_v21 = vsel %vm5923_vm5, %v784_v11, %v785_v28 }
  0x9b   : > { %5381 = vmatprep.subr.bf16.mxu0 %v5562_v19  ;;  %v1342_v24 = vsel %vm5923_vm5, %v1340_v2, %v1341_v35  ;;  %v1156_v58 = vshrl.u32 %v6509_v1, 16  ;;  %v1145_v12 = vshrl.u32 %v6462_v63, 16  ;;  %v961_v14 = vrot.slane %v959_v16, 5  ;;  %v5584_v2 = vld [vmem:[%s5687_s10 + $0x94] sm:$0xf] }
  0x9c   : > { %v4607_v32 = vcombine.low %v1339_v15, %v1342_v24  ;;  %v956_v46 = vor.u32 %v955_v23, %v951_v45  ;;  %v4567_v35 = vcombine.low %v6506_v10, %v786_v21  ;;  %v952_v38 = vsel %vm5729_vm2, %v947_v13, %v951_v45 }
  0x9d   : > { %v6533_v7 = vrot.slane %v1156_v58, 4  ;;  %v1159_v28 = vshll.u32 %v6509_v1, 16  ;;  %v4432_v39 = vrot.slane %v4416_v55, 9  ;;  %v1345_v9 = vrot.slane %v6159_v31, 5  ;;  %v6559_v58 = vld [vmem:[%s5687_s10 + $0xa8] sm:$0xf] }
  0x9e   : > { %5382 = vmatpush3.bf16.msra.mxu0 %v5562_v19  ;;  %v957_v19 = vrot.slane %v956_v46, 4  ;;  %v1348_v15 = vrot.slane %v4400_v20, 5  ;;  %v789_v57 = vrot.slane %v5584_v2, 5  ;;  %v970_v10 = vor.u32 %v6192_v51, %v6185_v18  ;;  %v5571_v18 = vld [vmem:[%s7764_s1 + $0x230] sm:$0xff]   ;;  %v4417_v55 = vld [vmem:[%s5687_s10 + $0x48] sm:$0xe] }
  0x9f   : > { %5383 = vmatprep.subr.bf16.mxu0 %v5565_v40  ;;  %3520 = vmatmul.mubr.bf16.gmra.mrb[56].mxu1 %v4566_v4  ;;  %v4360_v4 = vrot.slane %v648_v42, 9  ;;  %v973_v11 = vshll.u32 %v6159_v31, 16  ;;  %v1347_v13 = vrot.slane %v1345_v9, 4  ;;  %v7776_v24 = vshrl.u32 %v6159_v31, 16 }
  0xa0   : > { %3527 = vmatprep.mubr.bf16.mxu1 %v4583_v5  ;;  %v962_v5 = vsel %vm5729_vm2, %v957_v19, %v961_v14  ;;  %v791_v33 = vrot.slane %v789_v57, 4  ;;  %v971_v23 = vrot.slane %v970_v10, 4  ;;  %v983_v21 = vshll.u32 %v4400_v20, 16  ;;  %v4401_v19 = vld [vmem:[%s5687_s10 + $0x50] sm:$0x1] }
  0xa1   : > { %3617 = vmatmul.mubr.bf16.gmra.mrb[56].mxu0 %v4590_v25  ;;  %v1346_v25 = vsel %vm5923_vm5, %v4432_v39, %v1345_v9  ;;  %v979_v45 = vrot.slane %v7776_v24, 4  ;;  %v4591_v51 = vcombine.low %v952_v38, %v962_v5  ;;  %v1349_v16 = vsel %vm5923_vm5, %v1347_v13, %v1348_v15  ;;  %v649_v39 = vld [vmem:[%s5687_s10 + $0x9c] sm:$0xe]  ;;  %v5585_v24 = vld [vmem:[%s5687_s10 + $0xa0] sm:$0xf] }
  0xa2   : > { %3624 = vmatprep.mubr.bf16.mxu0 %v4607_v32  ;;  %5384 = vmatpush3.bf16.msra.mxu0 %v5565_v40  ;;  %v4584_v40 = vcombine.low %v6509_v1, %v6531_v61  ;;  %v6556_v31 = vsel %vm5923_vm5, %v4360_v4, %v789_v57  ;;  %v975_v32 = vrot.slane %v973_v11, 5  ;;  %v6562_v42 = vrot.slane %v1159_v28, 5  ;;  %v6572_v4 = vld [vmem:[%s5687_s10 + $0xac] sm:$0xf] }
  0xa3   : > { %5385 = vmatprep.subr.bf16.mxu0 %v5568_v50  ;;  %v1169_v46 = vshrl.u32 %v6531_v61, 16  ;;  %v4608_v1 = vcombine.low %v1346_v25, %v1349_v16  ;;  %v7777_v14 = vrot.slane %v5723_v29, 5  ;;  %v985_v15 = vrot.slane %v983_v21, 5  ;;  %v5574_v29 = vld [vmem:[%s7764_s1 + $0x238] sm:$0xff]  }
  0xa4   : > { %v980_v9 = vor.u32 %v979_v45, %v975_v32  ;;  %v1180_v20 = vshrl.u32 %v6559_v58, 16  ;;  %v1183_v28 = vshll.u32 %v6559_v58, 16  ;;  %v1193_v57 = vshrl.u32 %v6572_v4, 16 }
  0xa5   : > { %v793_v38 = vsel %vm5923_vm5, %v791_v33, %v7777_v14  ;;  %v4433_v10 = vrot.slane %v4417_v55, 9  ;;  %v1352_v5 = vrot.slane %v6208_v6, 5  ;;  %v1355_v25 = vrot.slane %v4401_v19, 5  ;;  %v5586_v33 = vld [vmem:[%s5687_s10 + $0xa4] sm:$0x1] }
  0xa6   : > { %5386 = vmatpush3.bf16.msra.mxu0 %v5568_v50  ;;  %v4568_v2 = vcombine.low %v6556_v31, %v793_v38  ;;  %v976_v50 = vsel %vm5729_vm2, %v971_v23, %v975_v32  ;;  %v981_v11 = vrot.slane %v980_v9, 4  ;;  %v4361_v13 = vrot.slane %v649_v39, 9  ;;  %v4418_v9 = vld [vmem:[%s5687_s10 + $0x54] sm:$0xe] }
  0xa7   : > { %5387 = vmatprep.subr.bf16.mxu0 %v5571_v18  ;;  %3528 = vmatmul.mubr.bf16.gmra.mrb[60].mxu1 %v4567_v35  ;;  %v796_v45 = vrot.slane %v5585_v24, 5  ;;  %v799_v35 = vrot.slane %v5586_v33, 5  ;;  %v994_v16 = vor.u32 %v6235_v53, %v6228_v47  ;;  %v997_v23 = vshll.u32 %v6208_v6, 16 }
  0xa8   : > { %3535 = vmatprep.mubr.bf16.mxu1 %v4584_v40  ;;  %v1353_v40 = vsel %vm5923_vm5, %v4433_v10, %v1352_v5  ;;  %v1354_v31 = vrot.slane %v1352_v5, 4  ;;  %v7778_v32 = vshrl.u32 %v6208_v6, 16  ;;  %v4585_v47 = vcombine.low %v6559_v58, %v6572_v4  ;;  %v6602_v6 = vld [vmem:[%s5687_s10 + $0xb4] sm:$0xf]  ;;  %v650_v5 = vld [vmem:[%s5687_s10 + $0xa8] sm:$0xe] }
  0xa9   : > { %3625 = vmatmul.mubr.bf16.gmra.mrb[60].mxu0 %v4591_v51  ;;  %v986_v51 = vsel %vm5729_vm2, %v981_v11, %v985_v15  ;;  %v798_v53 = vrot.slane %v796_v45, 4  ;;  %v797_v14 = vsel %vm5923_vm5, %v4361_v13, %v796_v45  ;;  %v999_v38 = vrot.slane %v997_v23, 5  ;;  %v4402_v11 = vld [vmem:[%s5687_s10 + $0x5c] sm:$0x1]  ;;  %v6614_v13 = vld [vmem:[%s5687_s10 + $0xb8] sm:$0xf] }
  0xaa   : > { %3632 = vmatprep.mubr.bf16.mxu0 %v4608_v1  ;;  %5388 = vmatpush3.bf16.msra.mxu0 %v5571_v18  ;;  %v1003_v21 = vrot.slane %v7778_v32, 4  ;;  %v4592_v55 = vcombine.low %v976_v50, %v986_v51  ;;  %v995_v1 = vrot.slane %v994_v16, 4  ;;  %v1356_v18 = vsel %vm5923_vm5, %v1354_v31, %v1355_v25  ;;  %v5588_v32 = vld [vmem:[%s5687_s10 + $0xb0] sm:$0x1] }
  0xab   : > { %5389 = vmatprep.subr.bf16.mxu0 %v5574_v29  ;;  %v1007_v39 = vshll.u32 %v4401_v19, 16  ;;  %v6605_v15 = vrot.slane %v1180_v20, 4  ;;  %v6607_v50 = vrot.slane %v1183_v28, 5  ;;  %v4609_v10 = vcombine.low %v1353_v40, %v1356_v18  ;;  %v5587_v40 = vld [vmem:[%s5687_s10 + $0xac] sm:$0xf] }
  0xac   : > { %v800_v58 = vsel %vm5923_vm5, %v798_v53, %v799_v35  ;;  %v1004_v25 = vor.u32 %v1003_v21, %v999_v38  ;;  %v1204_v19 = vshrl.u32 %v6602_v6, 16  ;;  %v1207_v20 = vshll.u32 %v6602_v6, 16 }
  0xad   : > { %v1009_v24 = vrot.slane %v1007_v39, 5  ;;  %v4569_v28 = vcombine.low %v797_v14, %v800_v58  ;;  %v1000_v45 = vsel %vm5729_vm2, %v995_v1, %v999_v38  ;;  %v1217_v33 = vshrl.u32 %v6614_v13, 16 }
  0xae   : > { %5390 = vmatpush3.bf16.msra.mxu0 %v5574_v29  ;;  %v4434_v35 = vrot.slane %v4418_v9, 9  ;;  %v1005_v29 = vrot.slane %v1004_v25, 4  ;;  %v1359_v16 = vrot.slane %v6248_v17, 5  ;;  %v1362_v23 = vrot.slane %v4402_v11, 5  ;;  %v6640_v25 = vld [vmem:[%s5687_s10 + $0xc0] sm:$0xf] }
  0xaf   : > { %3536 = vmatmul.mubr.bf16.gmra.mrb[64].mxu1 %v4568_v2  ;;  %v4362_v51 = vrot.slane %v650_v5, 9  ;;  %v803_v31 = vrot.slane %v5587_v40, 5  ;;  %v806_v2 = vrot.slane %v5588_v32, 5  ;;  %v1018_v21 = vor.u32 %v6287_v30, %v6277_v41  ;;  %v6652_v32 = vld [vmem:[%s5687_s10 + $0xc4] sm:$0xf] }
  0xb0   : > { %3543 = vmatprep.mubr.bf16.mxu1 %v4585_v47  ;;  %v1021_v53 = vshll.u32 %v6248_v17, 16  ;;  %v1360_v47 = vsel %vm5923_vm5, %v4434_v35, %v1359_v16  ;;  %v1361_v1 = vrot.slane %v1359_v16, 4  ;;  %v7779_v18 = vshrl.u32 %v6248_v17, 16  ;;  %v4419_v17 = vld [vmem:[%s5687_s10 + $0x60] sm:$0xe] }
  0xb1   : > { %3633 = vmatmul.mubr.bf16.gmra.mrb[64].mxu0 %v4592_v55  ;;  %v1010_v55 = vsel %vm5729_vm2, %v1005_v29, %v1009_v24  ;;  %v4586_v39 = vcombine.low %v6602_v6, %v6614_v13  ;;  %v805_v9 = vrot.slane %v803_v31, 4  ;;  %v1019_v41 = vrot.slane %v1018_v21, 4  ;;  %v4403_v29 = vld [vmem:[%s5687_s10 + $0x68] sm:$0x1]  ;;  %v651_v16 = vld [vmem:[%s5687_s10 + $0xb4] sm:$0xe] }
  0xb2   : > { %3640 = vmatprep.mubr.bf16.mxu0 %v4609_v10  ;;  %v1027_v14 = vrot.slane %v7779_v18, 4  ;;  %v4593_v38 = vcombine.low %v1000_v45, %v1010_v55  ;;  %v1363_v30 = vsel %vm5923_vm5, %v1361_v1, %v1362_v23  ;;  %v804_v10 = vsel %vm5923_vm5, %v4362_v51, %v803_v31  ;;  %v4420_v1 = vld [vmem:[%s5687_s10 + $0x6c] sm:$0xe]  ;;  %v5589_v18 = vld [vmem:[%s5687_s10 + $0xb8] sm:$0xf] }
  0xb3   : > { %v1023_v58 = vrot.slane %v1021_v53, 5  ;;  %v1031_v5 = vshll.u32 %v4402_v11, 16  ;;  %v6643_v24 = vrot.slane %v1204_v19, 4  ;;  %v6645_v45 = vrot.slane %v1207_v20, 5  ;;  %v6711_v51 = vld [vmem:[%s5687_s10 + $0x80] sm:$0x1] }
  0xb4   : > { %v4610_v35 = vcombine.low %v1360_v47, %v1363_v30  ;;  %v807_v6 = vsel %vm5923_vm5, %v805_v9, %v806_v2  ;;  %v1228_v11 = vshrl.u32 %v6640_v25, 16  ;;  %v4435_v2 = vrot.slane %v4419_v17, 9  ;;  %v6673_v17 = vld [vmem:[%s5687_s10 + $0x74] sm:$0x1] }
  0xb5   : > { %v1028_v40 = vor.u32 %v1027_v14, %v1023_v58  ;;  %v1033_v23 = vrot.slane %v1031_v5, 5  ;;  %v4570_v19 = vcombine.low %v804_v10, %v807_v6  ;;  %v1024_v20 = vsel %vm5729_vm2, %v1019_v41, %v1023_v58 }
  0xb6   : > { %v1366_v53 = vrot.slane %v6308_v0, 5  ;;  %v1369_v55 = vrot.slane %v4403_v29, 5  ;;  %v4363_v47 = vrot.slane %v651_v16, 9  ;;  %v810_v14 = vrot.slane %v5589_v18, 5 }
  0xb7   : > { %3544 = vmatmul.mubr.bf16.gmra.mrb[68].mxu1 %v4569_v28  ;;  %v1029_v21 = vrot.slane %v1028_v40, 4  ;;  %v5590_v28 = vld [vmem:[%s5687_s10 + $0xbc] sm:$0x1]  ;;  %v1042_v41 = vor.u32 %v6333_v37, %v6328_v59  ;;  %v1045_v30 = vshll.u32 %v6308_v0, 16  ;;  %v7780_v58 = vshrl.u32 %v6308_v0, 16 }
  0xb8   : > { %3551 = vmatprep.mubr.bf16.mxu1 %v4586_v39  ;;  %v813_v9 = vrot.slane %v5590_v28, 5  ;;  %v1367_v39 = vsel %vm5923_vm5, %v4435_v2, %v1366_v53  ;;  %v1368_v10 = vrot.slane %v1366_v53, 4  ;;  %v4587_v59 = vcombine.low %v6640_v25, %v6652_v32  ;;  %v6687_v28 = vld [vmem:[%s5687_s10 + $0x1c] sm:$0xf] }
  0xb9   : > { %3641 = vmatmul.mubr.bf16.gmra.mrb[68].mxu0 %v4593_v38  ;;  %v1034_v38 = vsel %vm5729_vm2, %v1029_v21, %v1033_v23  ;;  %v1051_v5 = vrot.slane %v7780_v58, 4  ;;  %v812_v37 = vrot.slane %v810_v14, 4  ;;  %v1043_v6 = vrot.slane %v1042_v41, 4  ;;  %v6680_v21 = vld [vmem:[%s5687_s10 + $0x18] sm:$0xf] }
  0xba   : > { %3648 = vmatprep.mubr.bf16.mxu0 %v4610_v35  ;;  %v4594_v35 = vcombine.low %v1024_v20, %v1034_v38  ;;  %v1370_v16 = vsel %vm5923_vm5, %v1368_v10, %v1369_v55  ;;  %v1047_v40 = vrot.slane %v1045_v30, 5  ;;  %v1055_v23 = vshll.u32 %v4403_v29, 16  ;;  %v6690_v38 = vld [vmem:[%s5687_s10 + $0x20] sm:$0x1] }
  0xbb   : > { %v4436_v2 = vrot.slane %v4420_v1, 9  ;;  %v4611_v0 = vcombine.low %v1367_v39, %v1370_v16  ;;  %v811_v53 = vsel %vm5923_vm5, %v4363_v47, %v810_v14  ;;  %v1373_v18 = vrot.slane %v6326_v43, 5 }
  0xbc   : > { %v1376_v20 = vrot.slane %v6673_v17, 5  ;;  %v814_v55 = vsel %vm5923_vm5, %v812_v37, %v813_v9  ;;  %v1048_v29 = vsel %vm5729_vm2, %v1043_v6, %v1047_v40  ;;  %v1052_v1 = vor.u32 %v1051_v5, %v1047_v40 }
  0xbd   : > { %v1057_v41 = vrot.slane %v1055_v23, 5  ;;  %v1374_v47 = vsel %vm5923_vm5, %v4436_v2, %v1373_v18  ;;  %v1375_v14 = vrot.slane %v1373_v18, 4  ;;  %v1480_v30 = vshrl.u32 %v6680_v21, 16  ;;  %v4421_v2 = vld [vmem:[%s5687_s10 + $0x78] sm:$0xe] }
  0xbe   : > { %v1483_v39 = vshll.u32 %v6680_v21, 16  ;;  %v1053_v10 = vrot.slane %v1052_v1, 4  ;;  %v1489_v9 = vshll.u32 %v6687_v28, 16  ;;  %v1493_v58 = vshrl.u32 %v6687_v28, 16 }
  0xbf   : > { %3552 = vmatmul.mubr.bf16.gmra.mrb[72].mxu1 %v4570_v19  ;;  %v1499_v5 = vshll.u32 %v6690_v38, 16  ;;  %v1377_v19 = vsel %vm5923_vm5, %v1375_v14, %v1376_v20  ;;  %v1482_v37 = vrot.slane %v1480_v30, 4  ;;  %v1066_v16 = vor.u32 %v6353_v8, %v6351_v36 }
  0xc0   : > { %3559 = vmatprep.mubr.bf16.mxu1 %v4587_v59  ;;  %v1485_v6 = vrot.slane %v1483_v39, 5  ;;  %v1058_v59 = vsel %vm5729_vm2, %v1053_v10, %v1057_v41  ;;  %v1491_v40 = vrot.slane %v1489_v9, 5  ;;  %v1495_v23 = vrot.slane %v1493_v58, 4  ;;  %v6725_v58 = vld [vmem:[%s5687_s10 + $0x28] sm:$0xf] }
  0xc1   : > { %3649 = vmatmul.mubr.bf16.gmra.mrb[72].mxu0 %v4594_v35  ;;  %v4571_v35 = vcombine.low %v811_v53, %v814_v55  ;;  %v4595_v18 = vcombine.low %v1048_v29, %v1058_v59  ;;  %v4612_v1 = vcombine.low %v1374_v47, %v1377_v19  ;;  %v1069_v14 = vshll.u32 %v6326_v43, 16  ;;  %v6718_v53 = vld [vmem:[%s5687_s10 + $0x24] sm:$0xf] }
  0xc2   : > { %3656 = vmatprep.mubr.bf16.mxu0 %v4611_v0  ;;  %v1486_v31 = vor.u32 %v1485_v6, %v1482_v37  ;;  %v1501_v0 = vrot.slane %v1499_v5, 5  ;;  %v1496_v20 = vor.u32 %v1495_v23, %v1491_v40  ;;  %v1075_v36 = vrot.slane %v1073_v56, 4  ;;  %v6735_v37 = vld [vmem:[%s5687_s10 + $0x2c] sm:$0x1] }
  0xc3   : > { %v1079_v8 = vshll.u32 %v6673_v17, 16  ;;  %v1067_v41 = vrot.slane %v1066_v16, 4  ;;  %v4437_v30 = vrot.slane %v4421_v2, 9  ;;  %v1380_v29 = vrot.slane %v6370_v62, 5 }
  0xc4   : > { %v1487_v55 = vrot.slane %v1486_v31, 4  ;;  %v1497_v47 = vrot.slane %v1496_v20, 4  ;;  %v1071_v39 = vrot.slane %v1069_v14, 5  ;;  %v4620_v10 = vcombine.low %v6680_v21, %v6687_v28 }
  0xc5   : > { %v1383_v9 = vrot.slane %v6711_v51, 5  ;;  %v1081_v56 = vrot.slane %v1079_v8, 5  ;;  %v1382_v31 = vrot.slane %v1380_v29, 4  ;;  %v1504_v17 = vshrl.u32 %v6718_v53, 16 }
  0xc6   : > { %v1492_v43 = vsel %vm5729_vm2, %v1487_v55, %v1491_v40  ;;  %v1502_v5 = vsel %vm5729_vm2, %v1497_v47, %v1501_v0  ;;  %v1076_v19 = vor.u32 %v1075_v36, %v1071_v39  ;;  %v1381_v21 = vsel %vm5923_vm5, %v4437_v30, %v1380_v29  ;;  %v4406_v29 = vld [vmem:[%s5687_s10 + $0x8c] sm:$0x1]  ;;  %v4422_v47 = vld [vmem:[%s5687_s10 + $0x84] sm:$0xe] }
  0xc7   : > { %3560 = vmatmul.mubr.bf16.gmra.mrb[76].mxu1 %v4571_v35  ;;  %v1507_v6 = vshll.u32 %v6718_v53, 16  ;;  %v4636_v16 = vcombine.low %v1492_v43, %v1502_v5  ;;  %v1384_v35 = vsel %vm5923_vm5, %v1382_v31, %v1383_v9  ;;  %v1506_v59 = vrot.slane %v1504_v17, 4 }
  0xc8   : > { %v1513_v40 = vshll.u32 %v6725_v58, 16  ;;  %v1072_v23 = vsel %vm5729_vm2, %v1067_v41, %v1071_v39  ;;  %v1077_v2 = vrot.slane %v1076_v19, 4  ;;  %v1517_v0 = vshrl.u32 %v6725_v58, 16 }
  0xc9   : > { %3657 = vmatmul.mubr.bf16.gmra.mrb[76].mxu0 %v4595_v18  ;;  %v1509_v18 = vrot.slane %v1507_v6, 5  ;;  %3761 = vmatprep.mubr.bf16.mxu1 %v4636_v16  ;;  %v4613_v20 = vcombine.low %v1381_v21, %v1384_v35  ;;  %v1090_v36 = vor.u32 %v6397_v60, %v6395_v54  ;;  %v1093_v41 = vshll.u32 %v6370_v62, 16  ;;  %v6756_v60 = vld [vmem:[%s5687_s10 + $0x30] sm:$0xf]  ;;  %v6762_v35 = vld [vmem:[%s5687_s10 + $0x34] sm:$0xf] }
  0xca   : > { %3664 = vmatprep.mubr.bf16.mxu0 %v4612_v1  ;;  %v1515_v14 = vrot.slane %v1513_v40, 5  ;;  %v1523_v1 = vshll.u32 %v6735_v37, 16  ;;  %v1082_v8 = vsel %vm5729_vm2, %v1077_v2, %v1081_v56  ;;  %v1519_v30 = vrot.slane %v1517_v0, 4  ;;  %v6774_v0 = vld [vmem:[%s5687_s10 + $0x38] sm:$0x1] }
  0xcb   : > { %v1510_v55 = vor.u32 %v1509_v18, %v1506_v59  ;;  %v4596_v39 = vcombine.low %v1072_v23, %v1082_v8  ;;  %v1091_v43 = vrot.slane %v1090_v36, 4  ;;  %v1099_v31 = vrot.slane %v1097_v27, 4 }
  0xcc   : > { %v1525_v9 = vrot.slane %v1523_v1, 5  ;;  %v1520_v5 = vor.u32 %v1519_v30, %v1515_v14  ;;  %v1095_v19 = vrot.slane %v1093_v41, 5  ;;  %v1103_v54 = vshll.u32 %v6711_v51, 16 }
  0xcd   : > { %v1511_v17 = vrot.slane %v1510_v55, 4  ;;  %v4621_v56 = vcombine.low %v6718_v53, %v6725_v58  ;;  %v4438_v21 = vrot.slane %v4422_v47, 9  ;;  %v1387_v6 = vrot.slane %v6417_v49, 5 }
  0xce   : > { %v1390_v16 = vrot.slane %v4406_v29, 5  ;;  %v1521_v27 = vrot.slane %v1520_v5, 4  ;;  %v1096_v51 = vsel %vm5729_vm2, %v1091_v43, %v1095_v19  ;;  %v1100_v59 = vor.u32 %v1099_v31, %v1095_v19  ;;  %v6787_v5 = vld [vmem:[%s5687_s10 + $0x98] sm:$0x1]  ;;  %v4423_v19 = vld [vmem:[%s5687_s10 + $0x90] sm:$0xe] }
  0xcf   : > { %3762 = vmatmul.mubr.bf16.vlgmr.msra.gmra.mrb[80].mxu1 %v4620_v10  ;;  %v1516_v62 = vsel %vm5729_vm2, %v1511_v17, %v1515_v14  ;;  %v1105_v10 = vrot.slane %v1103_v54, 5  ;;  %v1388_v53 = vsel %vm5923_vm5, %v4438_v21, %v1387_v6  ;;  %v1389_v40 = vrot.slane %v1387_v6, 4 }
  0xd0   : > { %v1528_v23 = vshrl.u32 %v6756_v60, 16  ;;  %v1526_v2 = vsel %vm5729_vm2, %v1521_v27, %v1525_v9  ;;  %v1101_v18 = vrot.slane %v1100_v59, 4  ;;  %v1531_v14 = vshll.u32 %v6756_v60, 16 }
  0xd1   : > { %3665 = vmatmul.mubr.bf16.gmra.mrb[80].mxu0 %v4596_v39  ;;  %v1537_v1 = vshll.u32 %v6762_v35, 16  ;;  %v1391_v36 = vsel %vm5923_vm5, %v1389_v40, %v1390_v16  ;;  %v1541_v55 = vshrl.u32 %v6762_v35, 16  ;;  %v1547_v31 = vshll.u32 %v6774_v0, 16 }
  0xd2   : > { %3672 = vmatprep.mubr.bf16.mxu0 %v4613_v20  ;;  %v4637_v20 = vcombine.low %v1516_v62, %v1526_v2  ;;  %v1530_v8 = vrot.slane %v1528_v23, 4  ;;  %v1106_v30 = vsel %vm5729_vm2, %v1101_v18, %v1105_v10  ;;  %v4614_v41 = vcombine.low %v1388_v53, %v1391_v36  ;;  %v6794_v62 = vld [vmem:[%s5687_s10 + $0x3c] sm:$0xf]  ;;  %v6801_v23 = vld [vmem:[%s5687_s10 + $0x40] sm:$0xf] }
  0xd3   : > { %v1533_v47 = vrot.slane %v1531_v14, 5  ;;  %v1539_v39 = vrot.slane %v1537_v1, 5  ;;  %v4597_v9 = vcombine.low %v1096_v51, %v1106_v30  ;;  %v1543_v43 = vrot.slane %v1541_v55, 4  ;;  %v6809_v14 = vld [vmem:[%s5687_s10 + $0x44] sm:$0x1] }
  0xd4   : > { %3769 = vmatprep.mubr.bf16.mxu1 %v4637_v20  ;;  %v1114_v17 = vor.u32 %v6478_v48, %v6440_v3  ;;  %v1117_v21 = vshll.u32 %v6417_v49, 16  ;;  %v1123_v6 = vrot.slane %v1121_v52, 4  ;;  %v1127_v16 = vshll.u32 %v4406_v29, 16 }
  0xd5   : > { %v1534_v54 = vor.u32 %v1533_v47, %v1530_v8  ;;  %v1544_v27 = vor.u32 %v1543_v43, %v1539_v39  ;;  %v1549_v51 = vrot.slane %v1547_v31, 5  ;;  %v4622_v3 = vcombine.low %v6756_v60, %v6762_v35 }
  0xd6   : > { %v1115_v59 = vrot.slane %v1114_v17, 4  ;;  %v1119_v10 = vrot.slane %v1117_v21, 5  ;;  %v1129_v53 = vrot.slane %v1127_v16, 5  ;;  %v4439_v40 = vrot.slane %v4423_v19, 9  ;;  %v4424_v16 = vld [vmem:[%s5687_s10 + $0x9c] sm:$0xe] }
  0xd7   : > { %3770 = vmatmul.mubr.bf16.gmra.mrb[84].mxu1 %v4621_v56  ;;  %v1535_v48 = vrot.slane %v1534_v54, 4  ;;  %v1545_v49 = vrot.slane %v1544_v27, 4  ;;  %v1394_v52 = vrot.slane %v6462_v63, 5  ;;  %v1397_v29 = vrot.slane %v6787_v5, 5 }
  0xd8   : > { %v1552_v56 = vshrl.u32 %v6794_v62, 16  ;;  %v1120_v60 = vsel %vm5729_vm2, %v1115_v59, %v1119_v10  ;;  %v1124_v18 = vor.u32 %v1123_v6, %v1119_v10  ;;  %v1555_v1 = vshll.u32 %v6794_v62, 16  ;;  %v6827_v10 = vld [vmem:[%s5687_s10 + $0xa4] sm:$0x1] }
  0xd9   : > { %3673 = vmatmul.mubr.bf16.gmra.mrb[84].mxu0 %v4597_v9  ;;  %v1540_v2 = vsel %vm5729_vm2, %v1535_v48, %v1539_v39  ;;  %v1550_v20 = vsel %vm5729_vm2, %v1545_v49, %v1549_v51  ;;  %v1395_v36 = vsel %vm5923_vm5, %v4439_v40, %v1394_v52  ;;  %v1396_v8 = vrot.slane %v1394_v52, 4  ;;  %v6834_v49 = vld [vmem:[%s5687_s10 + $0x48] sm:$0xf] }
  0xda   : > { %3680 = vmatprep.mubr.bf16.mxu0 %v4614_v41  ;;  %v1554_v55 = vrot.slane %v1552_v56, 4  ;;  %v4638_v30 = vcombine.low %v1540_v2, %v1550_v20  ;;  %v1125_v41 = vrot.slane %v1124_v18, 4  ;;  %v1557_v47 = vrot.slane %v1555_v1, 5  ;;  %v6840_v2 = vld [vmem:[%s5687_s10 + $0x4c] sm:$0xf] }
  0xdb   : > { %v1561_v39 = vshll.u32 %v6801_v23, 16  ;;  %v1398_v9 = vsel %vm5923_vm5, %v1396_v8, %v1397_v29  ;;  %v1565_v43 = vshrl.u32 %v6801_v23, 16  ;;  %v1571_v31 = vshll.u32 %v6809_v14, 16 }
  0xdc   : > { %v1138_v17 = vor.u32 %v6519_v26, %v6487_v44  ;;  %3777 = vmatprep.mubr.bf16.mxu1 %v4638_v30  ;;  %v1130_v19 = vsel %vm5729_vm2, %v1125_v41, %v1129_v53  ;;  %v4615_v54 = vcombine.low %v1395_v36, %v1398_v9  ;;  %v1558_v21 = vor.u32 %v1557_v47, %v1554_v55  ;;  %v6851_v55 = vld [vmem:[%s5687_s10 + $0x50] sm:$0x1] }
  0xdd   : > { %v1563_v6 = vrot.slane %v1561_v39, 5  ;;  %v4598_v27 = vcombine.low %v1120_v60, %v1130_v19  ;;  %v1567_v51 = vrot.slane %v1565_v43, 4  ;;  %v1573_v59 = vrot.slane %v1571_v31, 5 }
  0xde   : > { %v1139_v48 = vrot.slane %v1138_v17, 4  ;;  %v1559_v40 = vrot.slane %v1558_v21, 4  ;;  %v1141_v44 = vshll.u32 %v6462_v63, 16  ;;  %v1147_v26 = vrot.slane %v1145_v12, 4 }
  0xdf   : > { %3778 = vmatmul.mubr.bf16.gmra.mrb[88].mxu1 %v4622_v3  ;;  %v1151_v53 = vshll.u32 %v6787_v5, 16  ;;  %v1568_v52 = vor.u32 %v1567_v51, %v1563_v6  ;;  %v4623_v3 = vcombine.low %v6794_v62, %v6801_v23  ;;  %v4440_v29 = vrot.slane %v4424_v16, 9 }
  0xe0   : > { %v1401_v56 = vrot.slane %v6531_v61, 5  ;;  %v1564_v63 = vsel %vm5729_vm2, %v1559_v40, %v1563_v6  ;;  %v1143_v12 = vrot.slane %v1141_v44, 5  ;;  %v1404_v5 = vrot.slane %v6827_v10, 5  ;;  %v4409_v44 = vld [vmem:[%s5687_s10 + $0xb0] sm:$0x1] }
  0xe1   : > { %3681 = vmatmul.mubr.bf16.gmra.mrb[88].mxu0 %v4598_v27  ;;  %v1153_v60 = vrot.slane %v1151_v53, 5  ;;  %v1569_v18 = vrot.slane %v1568_v52, 4  ;;  %v1576_v62 = vshrl.u32 %v6834_v49, 16  ;;  %v1579_v30 = vshll.u32 %v6834_v49, 16 }
  0xe2   : > { %3688 = vmatprep.mubr.bf16.mxu0 %v4615_v54  ;;  %v1402_v1 = vsel %vm5923_vm5, %v4440_v29, %v1401_v56  ;;  %v1403_v20 = vrot.slane %v1401_v56, 4  ;;  %v1144_v36 = vsel %vm5729_vm2, %v1139_v48, %v1143_v12  ;;  %v1148_v8 = vor.u32 %v1147_v26, %v1143_v12  ;;  %v4425_v26 = vld [vmem:[%s5687_s10 + $0xa8] sm:$0xe] }
  0xe3   : > { %v1585_v41 = vshll.u32 %v6840_v2, 16  ;;  %v1574_v47 = vsel %vm5729_vm2, %v1569_v18, %v1573_v59  ;;  %v1578_v9 = vrot.slane %v1576_v62, 4  ;;  %v1589_v43 = vshrl.u32 %v6840_v2, 16 }
  0xe4   : > { %v1405_v39 = vsel %vm5923_vm5, %v1403_v20, %v1404_v5  ;;  %v4639_v31 = vcombine.low %v1564_v63, %v1574_v47  ;;  %v1149_v17 = vrot.slane %v1148_v8, 4  ;;  %v1581_v54 = vrot.slane %v1579_v30, 5 }
  0xe5   : > { %v4616_v19 = vcombine.low %v1402_v1, %v1405_v39  ;;  %v1587_v21 = vrot.slane %v1585_v41, 5  ;;  %v1591_v6 = vrot.slane %v1589_v43, 4  ;;  %v1595_v16 = vshll.u32 %v6851_v55, 16 }
  0xe6   : > { %v1162_v27 = vor.u32 %v6562_v42, %v6533_v7  ;;  %3785 = vmatprep.mubr.bf16.mxu1 %v4639_v31  ;;  %v1154_v51 = vsel %vm5729_vm2, %v1149_v17, %v1153_v60  ;;  %v1582_v59 = vor.u32 %v1581_v54, %v1578_v9  ;;  %v1165_v48 = vshll.u32 %v6531_v61, 16  ;;  %v6874_v60 = vld [vmem:[%s5687_s10 + $0x54] sm:$0xf] }
  0xe7   : > { %v1171_v40 = vrot.slane %v1169_v46, 4  ;;  %v4599_v53 = vcombine.low %v1144_v36, %v1154_v51  ;;  %3786 = vmatmul.mubr.bf16.gmra.mrb[92].mxu1 %v4623_v3  ;;  %v1592_v52 = vor.u32 %v1591_v6, %v1587_v21  ;;  %v1597_v29 = vrot.slane %v1595_v16, 5  ;;  %v6878_v3 = vld [vmem:[%s5687_s10 + $0x58] sm:$0xf]  ;;  %v4426_v51 = vld [vmem:[%s5687_s10 + $0xb4] sm:$0xe] }
  0xe8   : > { %v1163_v56 = vrot.slane %v1162_v27, 4  ;;  %v1583_v7 = vrot.slane %v1582_v59, 4  ;;  %v1167_v42 = vrot.slane %v1165_v48, 5  ;;  %v1175_v63 = vshll.u32 %v6827_v10, 16 }
  0xe9   : > { %v4624_v12 = vcombine.low %v6834_v49, %v6840_v2  ;;  %3689 = vmatmul.mubr.bf16.gmra.mrb[92].mxu0 %v4599_v53  ;;  %v1593_v61 = vrot.slane %v1592_v52, 4  ;;  %v4441_v46 = vrot.slane %v4425_v26, 9  ;;  %v1408_v5 = vrot.slane %v6572_v4, 5  ;;  %v6885_v49 = vld [vmem:[%s5687_s10 + $0x5c] sm:$0x1] }
  0xea   : > { %v1411_v18 = vrot.slane %v4409_v44, 5  ;;  %3696 = vmatprep.mubr.bf16.mxu0 %v4616_v19  ;;  %v1588_v1 = vsel %vm5729_vm2, %v1583_v7, %v1587_v21  ;;  %v1168_v10 = vsel %vm5729_vm2, %v1163_v56, %v1167_v42  ;;  %v1172_v20 = vor.u32 %v1171_v40, %v1167_v42  ;;  %v6904_v53 = vld [vmem:[%s5687_s10 + $0xbc] sm:$0x1]  ;;  %v6910_v42 = vld [vmem:[%s5687_s10 + $0x60] sm:$0xf] }
  0xeb   : > { %v1177_v62 = vrot.slane %v1175_v63, 5  ;;  %v1598_v36 = vsel %vm5729_vm2, %v1593_v61, %v1597_v29  ;;  %v1409_v8 = vsel %vm5923_vm5, %v4441_v46, %v1408_v5  ;;  %v1410_v30 = vrot.slane %v1408_v5, 4 }
  0xec   : > { %v1600_v41 = vshrl.u32 %v6874_v60, 16  ;;  %v4640_v47 = vcombine.low %v1588_v1, %v1598_v36  ;;  %v1173_v39 = vrot.slane %v1172_v20, 4  ;;  %v1603_v9 = vshll.u32 %v6874_v60, 16 }
  0xed   : > { %v1609_v43 = vshll.u32 %v6878_v3, 16  ;;  %v1412_v31 = vsel %vm5923_vm5, %v1410_v30, %v1411_v18  ;;  %v1613_v19 = vshrl.u32 %v6878_v3, 16  ;;  %v1619_v54 = vshll.u32 %v6885_v49, 16 }
  0xee   : > { %v1602_v17 = vrot.slane %v1600_v41, 4  ;;  %3793 = vmatprep.mubr.bf16.mxu1 %v4640_v47  ;;  %v1178_v21 = vsel %vm5729_vm2, %v1173_v39, %v1177_v62  ;;  %v4617_v6 = vcombine.low %v1409_v8, %v1412_v31  ;;  %v1605_v16 = vrot.slane %v1603_v9, 5  ;;  %v6928_v8 = vld [vmem:[%s5687_s10 + $0x68] sm:$0x1] }
  0xef   : > { %v1611_v27 = vrot.slane %v1609_v43, 5  ;;  %v4600_v59 = vcombine.low %v1168_v10, %v1178_v21  ;;  %3794 = vmatmul.mubr.bf16.gmra.mrb[96].mxu1 %v4624_v12  ;;  %v1615_v48 = vrot.slane %v1613_v19, 4  ;;  %v1621_v40 = vrot.slane %v1619_v54, 5 }
  0xf0   : > { %v1186_v26 = vor.u32 %v6607_v50, %v6605_v15  ;;  %v1606_v52 = vor.u32 %v1605_v16, %v1602_v17  ;;  %v1189_v29 = vshll.u32 %v6572_v4, 16  ;;  %v1195_v56 = vrot.slane %v1193_v57, 4 }
  0xf1   : > { %v1199_v7 = vshll.u32 %v4409_v44, 16  ;;  %3697 = vmatmul.mubr.bf16.gmra.mrb[96].mxu0 %v4600_v59  ;;  %v1616_v63 = vor.u32 %v1615_v48, %v1611_v27  ;;  %v4625_v61 = vcombine.low %v6874_v60, %v6878_v3  ;;  %v4442_v15 = vrot.slane %v4426_v51, 9  ;;  %v6917_v44 = vld [vmem:[%s5687_s10 + $0x64] sm:$0xf] }
  0xf2   : > { %v1187_v12 = vrot.slane %v1186_v26, 4  ;;  %3704 = vmatprep.mubr.bf16.mxu0 %v4617_v6  ;;  %v1607_v50 = vrot.slane %v1606_v52, 4  ;;  %v1191_v46 = vrot.slane %v1189_v29, 5  ;;  %v1415_v18 = vrot.slane %v6614_v13, 5  ;;  %v4427_v26 = vld [vmem:[%s5687_s10 + $0xc0] sm:$0xe] }
  0xf3   : > { %v1201_v5 = vrot.slane %v1199_v7, 5  ;;  %v1617_v4 = vrot.slane %v1616_v63, 4  ;;  %v1418_v57 = vrot.slane %v6904_v53, 5  ;;  %v1624_v1 = vshrl.u32 %v6910_v42, 16 }
  0xf4   : > { %v1627_v10 = vshll.u32 %v6910_v42, 16  ;;  %v1612_v60 = vsel %vm5729_vm2, %v1607_v50, %v1611_v27  ;;  %v1192_v20 = vsel %vm5729_vm2, %v1187_v12, %v1191_v46  ;;  %v1196_v62 = vor.u32 %v1195_v56, %v1191_v46 }
  0xf5   : > { %v1416_v36 = vsel %vm5923_vm5, %v4442_v15, %v1415_v18  ;;  %v1622_v30 = vsel %vm5729_vm2, %v1617_v4, %v1621_v40  ;;  %v1417_v41 = vrot.slane %v1415_v18, 4  ;;  %v1626_v47 = vrot.slane %v1624_v1, 4 }
  0xf6   : > { %v1629_v39 = vrot.slane %v1627_v10, 5  ;;  %v4641_v9 = vcombine.low %v1612_v60, %v1622_v30  ;;  %v1197_v43 = vrot.slane %v1196_v62, 4  ;;  %v1633_v31 = vshll.u32 %v6917_v44, 16  ;;  %v6963_v30 = vld [vmem:[%s5687_s10 + $0x6c] sm:$0xf] }
  0xf7   : > { %v1637_v17 = vshrl.u32 %v6917_v44, 16  ;;  %v1419_v19 = vsel %vm5923_vm5, %v1417_v41, %v1418_v57  ;;  %v1643_v21 = vshll.u32 %v6928_v8, 16  ;;  %v1210_v6 = vor.u32 %v6645_v45, %v6643_v24  ;;  %v6966_v41 = vld [vmem:[%s5687_s10 + $0x70] sm:$0xf] }
  0xf8   : > { %v1630_v54 = vor.u32 %v1629_v39, %v1626_v47  ;;  %3801 = vmatprep.mubr.bf16.mxu1 %v4641_v9  ;;  %v1202_v16 = vsel %vm5729_vm2, %v1197_v43, %v1201_v5  ;;  %v4618_v27 = vcombine.low %v1416_v36, %v1419_v19  ;;  %v1635_v51 = vrot.slane %v1633_v31, 5  ;;  %v6973_v31 = vld [vmem:[%s5687_s10 + $0x74] sm:$0x1] }
  0xf9   : > { %v1639_v59 = vrot.slane %v1637_v17, 4  ;;  %v4601_v52 = vcombine.low %v1192_v20, %v1202_v16  ;;  %3802 = vmatmul.mubr.bf16.gmra.mrb[100].mxu1 %v4625_v61  ;;  %v1645_v56 = vrot.slane %v1643_v21, 5  ;;  %v1211_v7 = vrot.slane %v1210_v6, 4 }
  0xfa   : > { %v1631_v29 = vrot.slane %v1630_v54, 4  ;;  %v1213_v24 = vshll.u32 %v6614_v13, 16  ;;  %v1219_v45 = vrot.slane %v1217_v33, 4  ;;  %v1223_v50 = vshll.u32 %v6904_v53, 16 }
  0xfb   : > { %v1640_v15 = vor.u32 %v1639_v59, %v1635_v51  ;;  %v1230_v18 = vrot.slane %v1228_v11, 4  ;;  %v7781_v61 = vshll.u32 %v6640_v25, 16  ;;  %3705 = vmatmul.mubr.bf16.gmra.mrb[100].mxu0 %v4601_v52  ;;  %v4411_v25 = vld [vmem:[%s5687_s10 + $0xc8] sm:$0x1]  ;;  %v4626_v20 = vcombine.low %v6910_v42, %v6917_v44 }
  0xfc   : > { %3712 = vmatprep.mubr.bf16.mxu0 %v4618_v27  ;;  %v1636_v53 = vsel %vm5729_vm2, %v1631_v29, %v1635_v51  ;;  %v1215_v60 = vrot.slane %v1213_v24, 5  ;;  %v4443_v62 = vrot.slane %v4427_v26, 9  ;;  %v1422_v36 = vrot.slane %v6652_v32, 5 }
  0xfd   : > { %v1233_v4 = vrot.slane %v7781_v61, 5  ;;  %v1641_v10 = vrot.slane %v1640_v15, 4  ;;  %v1225_v43 = vrot.slane %v1223_v50, 5  ;;  %v1425_v54 = vrot.slane %v4411_v25, 5 }
  0xfe   : > { %v1216_v39 = vsel %vm5729_vm2, %v1211_v7, %v1215_v60  ;;  %v1220_v9 = vor.u32 %v1219_v45, %v1215_v60  ;;  %v1423_v42 = vsel %vm5923_vm5, %v4443_v62, %v1422_v36  ;;  %v1424_v19 = vrot.slane %v1422_v36, 4 }
  0xff   : > { %v1646_v47 = vsel %vm5729_vm2, %v1641_v10, %v1645_v56  ;;  %v1648_v6 = vshrl.u32 %v6963_v30, 16  ;;  %v1651_v16 = vshll.u32 %v6963_v30, 16  ;;  %v1657_v27 = vshll.u32 %v6966_v41, 16 }
 0x100   : > { %v4642_v17 = vcombine.low %v1636_v53, %v1646_v47  ;;  %v1221_v21 = vrot.slane %v1220_v9, 4  ;;  %v1426_v59 = vsel %vm5923_vm5, %v1424_v19, %v1425_v54  ;;  %v7782_v60 = vshrl.u32 %v6652_v32, 16 }
 0x101   : > { %v4619_v56 = vcombine.low %v1423_v42, %v1426_v59  ;;  %v1650_v7 = vrot.slane %v1648_v6, 4  ;;  %v1659_v24 = vrot.slane %v1657_v27, 5  ;;  %v1247_v62 = vshll.u32 %v4411_v25, 16  ;;  %v7008_v6 = vld [vmem:[%s5687_s10 + $0x80] sm:$0x1] }
 0x102   : > { %v4991_v48 = vpop.f32.mrb[0].mxu1  ;;  %v4919_v40 = vpop.f32.mrb[0].mxu0  ;;  %3809 = vmatprep.mubr.bf16.mxu1 %v4642_v17  ;;  %v1226_v29 = vsel %vm5729_vm2, %v1221_v21, %v1225_v43 }
 0x103   : > { %v4992_v63 = vpop.f32.mrb[1].mxu1  ;;  %v4920_v12 = vpop.f32.mrb[1].mxu0  ;;  %3810 = vmatmul.mubr.bf16.gmra.mrb[104].mxu1 %v4626_v20  ;;  %v4602_v15 = vcombine.low %v1216_v39, %v1226_v29  ;;  %v1243_v20 = vrot.slane %v7782_v60, 4  ;;  %v1249_v21 = vrot.slane %v1247_v62, 5  ;;  %v1932_v62 = vrot.slane %v6690_v38, 5 }
 0x104   : > { %v4994_v46 = vpop.f32.mrb[2].mxu1  ;;  %v4922_v5 = vpop.f32.mrb[2].mxu0  ;;  %v6950_v57 = vadd.f32 %v4992_v63, %v4991_v48  ;;  %v6952_v1 = vadd.f32 %v4920_v12, %v4919_v40  ;;  %v1661_v48 = vshrl.u32 %v6966_v41, 16  ;;  %v1667_v40 = vshll.u32 %v6973_v31, 16 }
 0x105   : > { %v4995_v13 = vpop.f32.mrb[3].mxu1  ;;  %v4923_v33 = vpop.f32.mrb[3].mxu0  ;;  %v1653_v63 = vrot.slane %v1651_v16, 5  ;;  %3713 = vmatmul.mubr.bf16.gmra.mrb[104].mxu0 %v4602_v15  ;;  %v4492_v16 = vld [vmem:[%s5687_s10 + $0x18] sm:$0xe] }
 0x106   : > { %v6956_v11 = vadd.f32 %v4995_v13, %v4994_v46  ;;  %v6984_v26 = vadd.f32 %v4923_v33, %v4922_v5  ;;  %v1663_v45 = vrot.slane %v1661_v48, 4  ;;  %v1234_v13 = vor.u32 %v1233_v4, %v1230_v18  ;;  %3720 = vmatprep.mubr.bf16.mxu0 %v4619_v56  ;;  %v6996_v4 = vld [vmem:[%s5687_s10 + $0x78] sm:$0xf] }
 0x107   : > { %v1654_v61 = vor.u32 %v1653_v63, %v1650_v7  ;;  %v1237_v5 = vshll.u32 %v6652_v32, 16  ;;  %v1669_v10 = vrot.slane %v1667_v40, 5  ;;  %v7003_v32 = vld [vmem:[%s5687_s10 + $0x7c] sm:$0xf]  ;;  %v1672_v48 = vshrl.u32 %v6996_v4, 16 }
 0x108   : > { %v1664_v53 = vor.u32 %v1663_v45, %v1659_v24  ;;  %v1235_v39 = vrot.slane %v1234_v13, 4  ;;  %v1675_v29 = vshll.u32 %v6996_v4, 16  ;;  %v1681_v56 = vshll.u32 %v7003_v32, 16 }
 0x109   : > { %v1655_v47 = vrot.slane %v1654_v61, 4  ;;  %v1239_v9 = vrot.slane %v1237_v5, 5  ;;  %v1674_v63 = vrot.slane %v1672_v48, 4  ;;  %v1685_v15 = vshrl.u32 %v7003_v32, 16  ;;  %v7039_v48 = vld [vmem:[%s5687_s10 + $0x84] sm:$0xf] }
 0x10a   : > { %v4925_v51 = vpop.f32.mrb[4].mxu0  ;;  %v4997_v50 = vpop.f32.mrb[4].mxu1  ;;  %v1665_v17 = vrot.slane %v1664_v53, 4  ;;  %v4508_v45 = vrot.slane %v4492_v16, 9  ;;  %v1677_v61 = vrot.slane %v1675_v29, 5  ;;  %v1683_v13 = vrot.slane %v1681_v56, 5 }
 0x10b   : > { %v4926_v52 = vpop.f32.mrb[5].mxu0  ;;  %v4998_v33 = vpop.f32.mrb[5].mxu1  ;;  %v1660_v25 = vsel %vm5729_vm2, %v1655_v47, %v1659_v24  ;;  %v1244_v54 = vor.u32 %v1243_v20, %v1239_v9  ;;  %v1240_v59 = vsel %vm5729_vm2, %v1235_v39, %v1239_v9  ;;  %v1691_v24 = vshll.u32 %v7008_v6, 16 }
 0x10c   : > { %v6988_v12 = vpop.f32.mrb[6].mxu0  ;;  %v5000_v36 = vpop.f32.mrb[6].mxu1  ;;  %v6993_v43 = vadd.f32 %v4998_v33, %v4997_v50  ;;  %v6998_v42 = vadd.f32 %v4926_v52, %v4925_v51  ;;  %v1670_v27 = vsel %vm5729_vm2, %v1665_v17, %v1669_v10  ;;  %v4627_v51 = vcombine.low %v6963_v30, %v6966_v41  ;;  %v4493_v33 = vld [vmem:[%s5687_s10 + $0x24] sm:$0xe] }
 0x10d   : > { %v4929_v46 = vpop.f32.mrb[7].mxu0  ;;  %v5001_v18 = vpop.f32.mrb[7].mxu1  ;;  %v4643_v40 = vcombine.low %v1660_v25, %v1670_v27  ;;  %v1245_v52 = vrot.slane %v1244_v54, 4  ;;  %v1929_v5 = vrot.slane %v6687_v28, 5  ;;  %v1939_v10 = vrot.slane %v6735_v37, 5 }
 0x10e   : > { %v7000_v19 = vadd.f32 %v5001_v18, %v5000_v36  ;;  %v1687_v20 = vrot.slane %v1685_v15, 4  ;;  %v1678_v39 = vor.u32 %v1677_v61, %v1674_v63  ;;  %v7031_v17 = vadd.f32 %v4929_v46, %v6988_v12  ;;  %v7052_v15 = vld [vmem:[%s5687_s10 + $0x88] sm:$0xf] }
 0x10f   : > { %3817 = vmatprep.mubr.bf16.mxu1 %v4643_v40  ;;  %v1250_v30 = vsel %vm5729_vm2, %v1245_v52, %v1249_v21  ;;  %v1930_v9 = vsel %vm5923_vm5, %v4508_v45, %v1929_v5  ;;  %v1931_v18 = vrot.slane %v1929_v5, 4  ;;  %v1693_v37 = vrot.slane %v1691_v24, 5  ;;  %v4495_v5 = vld [vmem:[%s5687_s10 + $0x3c] sm:$0xe] }
 0x110   : > { %v4603_v60 = vcombine.low %v1240_v59, %v1250_v30  ;;  %3818 = vmatmul.mubr.bf16.gmra.mrb[108].mxu1 %v4627_v51  ;;  %v1688_v25 = vor.u32 %v1687_v20, %v1683_v13  ;;  %v4509_v54 = vrot.slane %v4493_v33, 9  ;;  %v1936_v21 = vrot.slane %v6725_v58, 5  ;;  %v7059_v30 = vld [vmem:[%s5687_s10 + $0x8c] sm:$0x1] }
 0x111   : > { %v1679_v16 = vrot.slane %v1678_v39, 4  ;;  %v1933_v27 = vsel %vm5923_vm5, %v1931_v18, %v1932_v62  ;;  %v4628_v29 = vcombine.low %v6996_v4, %v7003_v32  ;;  %v1696_v61 = vshrl.u32 %v7039_v48, 16  ;;  %v4494_v4 = vld [vmem:[%s5687_s10 + $0x30] sm:$0xe] }
 0x112   : > { %v4931_v7 = vpop.f32.mrb[8].mxu0  ;;  %v5003_v36 = vpop.f32.mrb[8].mxu1  ;;  %3721 = vmatmul.mubr.bf16.gmra.mrb[108].mxu0 %v4603_v60  ;;  %v1689_v12 = vrot.slane %v1688_v25, 4  ;;  %v4652_v46 = vcombine.low %v1930_v9, %v1933_v27  ;;  %v1937_v40 = vsel %vm5923_vm5, %v4509_v54, %v1936_v21  ;;  %v1938_v52 = vrot.slane %v1936_v21, 4 }
 0x113   : > { %v4932_v50 = vpop.f32.mrb[9].mxu0  ;;  %v5004_v28 = vpop.f32.mrb[9].mxu1  ;;  %v1684_v58 = vsel %vm5729_vm2, %v1679_v16, %v1683_v13  ;;  %v1699_v13 = vshll.u32 %v7039_v48, 16  ;;  %v1698_v33 = vrot.slane %v1696_v61, 4  ;;  %v1705_v20 = vshll.u32 %v7052_v15, 16 }
 0x114   : > { %v4934_v53 = vpop.f32.mrb[10].mxu0  ;;  %v5006_v38 = vpop.f32.mrb[10].mxu1  ;;  %v7036_v59 = vadd.f32 %v5004_v28, %v5003_v36  ;;  %v7047_v56 = vadd.f32 %v4932_v50, %v4931_v7  ;;  %v1694_v24 = vsel %vm5729_vm2, %v1689_v12, %v1693_v37  ;;  %5391 = vmatprep.mubr.bf16.mxu0 %v4652_v46  ;;  %v1940_v45 = vsel %vm5923_vm5, %v1938_v52, %v1939_v10  ;;  %v7086_v61 = vld [vmem:[%s7765_s2] ss:$0 sm:$0xff] }
 0x115   : > { %v4935_v47 = vpop.f32.mrb[11].mxu0  ;;  %v5007_v51 = vpop.f32.mrb[11].mxu1  ;;  %v4644_v7 = vcombine.low %v1684_v58, %v1694_v24  ;;  %v4653_v50 = vcombine.low %v1937_v40, %v1940_v45  ;;  %v1701_v60 = vrot.slane %v1699_v13, 5  ;;  %v1709_v62 = vshrl.u32 %v7052_v15, 16  ;;  %v7081_v45 = vld [vmem:[%s5687_s10 + $0x90] sm:$0xf] }
 0x116   : > { %v7049_v63 = vadd.f32 %v5007_v51, %v5006_v38  ;;  %v1715_v10 = vshll.u32 %v7059_v30, 16  ;;  %v4510_v39 = vrot.slane %v4494_v4, 9  ;;  %v1943_v9 = vrot.slane %v6762_v35, 5 }
 0x117   : > { %3825 = vmatprep.mubr.bf16.mxu1 %v4644_v7  ;;  %v1946_v18 = vrot.slane %v6774_v0, 5  ;;  %v1702_v25 = vor.u32 %v1701_v60, %v1698_v33  ;;  %v1707_v37 = vrot.slane %v1705_v20, 5  ;;  %v1711_v54 = vrot.slane %v1709_v62, 4 }
 0x118   : > { %7783 = vst [vmem:[#allocation2_spill] sm:$0xff] %v7049_v63  ;;  %3826 = vmatmul.mubr.bf16.gmra.mrb[112].mxu1 %v4628_v29  ;;  %v7070_v21 = vadd.f32 %v4935_v47, %v4934_v53  ;;  %v1944_v16 = vsel %vm5923_vm5, %v4510_v39, %v1943_v9  ;;  %v1945_v27 = vrot.slane %v1943_v9, 4  ;;  %v1717_v0 = vrot.slane %v1715_v10, 5  ;;  %v7106_v10 = vld [vmem:[%s5687_s10 + $0x98] sm:$0x1] }
 0x119   : > { %v1703_v46 = vrot.slane %v1702_v25, 4  ;;  %v1712_v35 = vor.u32 %v1711_v54, %v1707_v37  ;;  %v4511_v40 = vrot.slane %v4495_v5, 9  ;;  %v1950_v53 = vrot.slane %v6801_v23, 5  ;;  %v4496_v9 = vld [vmem:[%s5687_s10 + $0x48] sm:$0xe] }
 0x11a   : > { %v4937_v36 = vpop.f32.mrb[12].mxu0  ;;  %5392 = vmatmul.mubr.bf16.vlgmr.msra.gmra.mrb[112].mxu0 %v4653_v50  ;;  %v5009_v51 = vpop.f32.mrb[12].mxu1  ;;  %v1947_v58 = vsel %vm5923_vm5, %v1945_v27, %v1946_v18  ;;  %v1953_v47 = vrot.slane %v6809_v14, 5  ;;  %v7093_v50 = vld [vmem:[%s5687_s10 + $0x94] sm:$0xf]  ;;  %v3281_v5 = vadd.f32 %v6952_v1, %v7086_v61  ;;  %v1720_v39 = vshrl.u32 %v7081_v45, 16 }
 0x11b   : > { %v4938_v28 = vpop.f32.mrb[13].mxu0  ;;  %v5010_v52 = vpop.f32.mrb[13].mxu1  ;;  %v1708_v13 = vsel %vm5729_vm2, %v1703_v46, %v1707_v37  ;;  %v1713_v4 = vrot.slane %v1712_v35, 4  ;;  %v4654_v7 = vcombine.low %v1944_v16, %v1947_v58  ;;  %v1951_v33 = vsel %vm5923_vm5, %v4511_v40, %v1950_v53 }
 0x11c   : > { %v4940_v38 = vpop.f32.mrb[14].mxu0  ;;  %v7078_v29 = vadd.f32 %v5010_v52, %v5009_v51  ;;  %v5012_v24 = vpop.f32.mrb[14].mxu1  ;;  %v7090_v23 = vadd.f32 %v4938_v28, %v4937_v36  ;;  %v1952_v60 = vrot.slane %v1950_v53, 4  ;;  %v4629_v36 = vcombine.low %v7039_v48, %v7052_v15  ;;  %v4497_v51 = vld [vmem:[%s5687_s10 + $0x54] sm:$0xe] }
 0x11d   : > { %v4941_v12 = vpop.f32.mrb[15].mxu0  ;;  %v5013_v14 = vpop.f32.mrb[15].mxu1  ;;  %v1718_v62 = vsel %vm5729_vm2, %v1713_v4, %v1717_v0  ;;  %5395 = vmatprep.mubr.bf16.mxu0 %v4654_v7  ;;  %v1723_v1 = vshll.u32 %v7081_v45, 16  ;;  %v3284_v18 = vadd.f32 %v6984_v26, %v7086_v61  ;;  %v1729_v37 = vshll.u32 %v7093_v50, 16 }
 0x11e   : > { %7784 = vst [vmem:[#allocation3_spill] sm:$0xff] %v7078_v29  ;;  %v7099_v20 = vadd.f32 %v5013_v14, %v5012_v24  ;;  %v4645_v28 = vcombine.low %v1708_v13, %v1718_v62  ;;  %v1954_v25 = vsel %vm5923_vm5, %v1952_v60, %v1953_v47  ;;  %v1722_v16 = vrot.slane %v1720_v39, 4 }
 0x11f   : > { %v4655_v54 = vcombine.low %v1951_v33, %v1954_v25  ;;  %v1725_v27 = vrot.slane %v1723_v1, 5  ;;  %v1733_v48 = vshrl.u32 %v7093_v50, 16  ;;  %v1731_v46 = vrot.slane %v1729_v37, 5  ;;  %v7138_v25 = vld [vmem:[%s5687_s10 + $0x9c] sm:$0xf] }
 0x120   : > { %7785 = vst [vmem:[#allocation4_spill] sm:$0xff] %v7099_v20  ;;  %3833 = vmatprep.mubr.bf16.mxu1 %v4645_v28  ;;  %v1739_v35 = vshll.u32 %v7106_v10, 16  ;;  %v4512_v0 = vrot.slane %v4496_v9, 9  ;;  %v1957_v40 = vrot.slane %v6840_v2, 5  ;;  %v1960_v47 = vrot.slane %v6851_v55, 5 }
 0x121   : > { %3834 = vmatmul.mubr.bf16.gmra.mrb[116].mxu1 %v4629_v36  ;;  %v1726_v58 = vor.u32 %v1725_v27, %v1722_v16  ;;  %v1735_v53 = vrot.slane %v1733_v48, 4  ;;  %v7121_v24 = vadd.f32 %v4941_v12, %v4940_v38  ;;  %v7125_v7 = vadd.f32 %v6998_v42, %v7086_v61  ;;  %v7145_v48 = vld [vmem:[%s5687_s10 + $0xa0] sm:$0xf] }
 0x122   : > { %v5031_v26 = vpop.f32.mrb[16].mxu1  ;;  %5396 = vmatmul.mubr.bf16.gmra.mrb[116].mxu0 %v4655_v54  ;;  %v7129_v2 = vadd.f32 %v7031_v17, %v7086_v61  ;;  %v1958_v14 = vsel %vm5923_vm5, %v4512_v0, %v1957_v40  ;;  %v1959_v33 = vrot.slane %v1957_v40, 4  ;;  %v1741_v12 = vrot.slane %v1739_v35, 5  ;;  %v7156_v40 = vld [vmem:[%s5687_s10 + $0xa4] sm:$0x1] }
 0x123   : > { %v5032_v13 = vpop.f32.mrb[17].mxu1  ;;  %v1727_v55 = vrot.slane %v1726_v58, 4  ;;  %v1736_v38 = vor.u32 %v1735_v53, %v1731_v46  ;;  %v4513_v36 = vrot.slane %v4497_v51, 9  ;;  %v1964_v9 = vrot.slane %v6878_v3, 5  ;;  %v4498_v58 = vld [vmem:[%s5687_s10 + $0x60] sm:$0xe] }
 0x124   : > { %v4943_v52 = vpop.f32.mrb[16].mxu0  ;;  %v5034_v60 = vpop.f32.mrb[18].mxu1  ;;  %v1961_v42 = vsel %vm5923_vm5, %v1959_v33, %v1960_v47  ;;  %v1967_v17 = vrot.slane %v6885_v49, 5  ;;  %v5033_v28 = vadd.f32 %v5032_v13, %v5031_v26  ;;  %v1744_v26 = vshrl.u32 %v7138_v25, 16 }
 0x125   : > { %v4944_v4 = vpop.f32.mrb[17].mxu0  ;;  %v5035_v39 = vpop.f32.mrb[19].mxu1  ;;  %v1732_v37 = vsel %vm5729_vm2, %v1727_v55, %v1731_v46  ;;  %v1737_v54 = vrot.slane %v1736_v38, 4  ;;  %v4656_v16 = vcombine.low %v1958_v14, %v1961_v42  ;;  %v1965_v3 = vsel %vm5923_vm5, %v4513_v36, %v1964_v9 }
 0x126   : > { %v4946_v62 = vpop.f32.mrb[18].mxu0  ;;  %v7142_v27 = vadd.f32 %v4944_v4, %v4943_v52  ;;  %v1966_v51 = vrot.slane %v1964_v9, 4  ;;  %v7149_v35 = vadd.f32 %v5033_v28, %v3281_v5  ;;  %v5036_v49 = vadd.f32 %v5035_v39, %v5034_v60  ;;  %v4499_v4 = vld [vmem:[%s5687_s10 + $0x6c] sm:$0xe] }
 0x127   : > { %v4947_v1 = vpop.f32.mrb[19].mxu0  ;;  %v1742_v0 = vsel %vm5729_vm2, %v1737_v54, %v1741_v12  ;;  %5399 = vmatprep.mubr.bf16.mxu0 %v4656_v16  ;;  %v4630_v46 = vcombine.low %v7081_v45, %v7093_v50  ;;  %v1747_v52 = vshll.u32 %v7138_v25, 16  ;;  %v1753_v13 = vshll.u32 %v7145_v48, 16 }
 0x128   : > { %v4646_v53 = vcombine.low %v1732_v37, %v1742_v0  ;;  %v1968_v5 = vsel %vm5923_vm5, %v1966_v51, %v1967_v17  ;;  %v7163_v47 = vadd.f32 %v5036_v49, %v3284_v18  ;;  %v1746_v60 = vrot.slane %v1744_v26, 4 }
 0x129   : > { %v4657_v33 = vcombine.low %v1965_v3, %v1968_v5  ;;  %v1749_v45 = vrot.slane %v1747_v52, 5  ;;  %v1757_v55 = vshrl.u32 %v7145_v48, 16  ;;  %v1755_v36 = vrot.slane %v1753_v13, 5  ;;  %v7188_v5 = vld [vmem:[%s5687_s10 + $0xa8] sm:$0xf] }
 0x12a   : > { %v5037_v14 = vpop.f32.mrb[20].mxu1  ;;  %3841 = vmatprep.mubr.bf16.mxu1 %v4646_v53  ;;  %v1763_v39 = vshll.u32 %v7156_v40, 16  ;;  %v4514_v42 = vrot.slane %v4498_v58, 9  ;;  %v1971_v9 = vrot.slane %v6917_v44, 5  ;;  %v1974_v54 = vrot.slane %v6928_v8, 5 }
 0x12b   : > { %v5038_v38 = vpop.f32.mrb[21].mxu1  ;;  %3842 = vmatmul.mubr.bf16.gmra.mrb[120].mxu1 %v4630_v46  ;;  %5400 = vmatmul.mubr.bf16.gmra.mrb[120].mxu0 %v4657_v33  ;;  %v1750_v28 = vor.u32 %v1749_v45, %v1746_v60  ;;  %v1759_v37 = vrot.slane %v1757_v55, 4  ;;  %v7171_v16 = vadd.f32 %v4947_v1, %v4946_v62  ;;  %v7175_v49 = vadd.f32 %v7047_v56, %v7086_v61  ;;  %v7195_v55 = vld [vmem:[%s5687_s10 + $0xac] sm:$0xf] }
 0x12c   : > { %v4949_v12 = vpop.f32.mrb[20].mxu0  ;;  %v5040_v18 = vpop.f32.mrb[22].mxu1  ;;  %v7179_v44 = vadd.f32 %v7070_v21, %v7086_v61  ;;  %v1972_v0 = vsel %vm5923_vm5, %v4514_v42, %v1971_v9  ;;  %v1973_v46 = vrot.slane %v1971_v9, 4  ;;  %v1765_v1 = vrot.slane %v1763_v39, 5 }
 0x12d   : > { %v4950_v17 = vpop.f32.mrb[21].mxu0  ;;  %v5041_v3 = vpop.f32.mrb[23].mxu1  ;;  %v1751_v8 = vrot.slane %v1750_v28, 4  ;;  %v1760_v62 = vor.u32 %v1759_v37, %v1755_v36  ;;  %v4515_v52 = vrot.slane %v4499_v4, 9  ;;  %v1978_v56 = vrot.slane %v6966_v41, 5 }
 0x12e   : > { %v4952_v51 = vpop.f32.mrb[22].mxu0  ;;  %v1975_v58 = vsel %vm5923_vm5, %v1973_v46, %v1974_v54  ;;  %v1981_v53 = vrot.slane %v6973_v31, 5  ;;  %v5039_v21 = vadd.f32 %v5038_v38, %v5037_v14  ;;  %v7192_v45 = vadd.f32 %v4950_v17, %v4949_v12  ;;  %v7203_v14 = vld [vmem:[%s5687_s10 + $0xb0] sm:$0x1]  ;;  %v4500_v17 = vld [vmem:[%s5687_s10 + $0x78] sm:$0xe] }
 0x12f   : > { %v4953_v26 = vpop.f32.mrb[23].mxu0  ;;  %v1756_v13 = vsel %vm5729_vm2, %v1751_v8, %v1755_v36  ;;  %v1761_v33 = vrot.slane %v1760_v62, 4  ;;  %v4658_v60 = vcombine.low %v1972_v0, %v1975_v58  ;;  %v1979_v4 = vsel %vm5923_vm5, %v4515_v52, %v1978_v56  ;;  %v4501_v0 = vld [vmem:[%s5687_s10 + $0x84] sm:$0xe] }
 0x130   : > { %v1980_v39 = vrot.slane %v1978_v56, 4  ;;  %v7200_v41 = vadd.f32 %v5039_v21, %v7125_v7  ;;  %v5042_v31 = vadd.f32 %v5041_v3, %v5040_v18  ;;  %v4631_v12 = vcombine.low %v7138_v25, %v7145_v48 }
 0x131   : > { %v1766_v36 = vsel %vm5729_vm2, %v1761_v33, %v1765_v1  ;;  %5403 = vmatprep.mubr.bf16.mxu0 %v4658_v60  ;;  %v1768_v42 = vshrl.u32 %v7188_v5, 16  ;;  %v1771_v9 = vshll.u32 %v7188_v5, 16  ;;  %v1777_v3 = vshll.u32 %v7195_v55, 16 }
 0x132   : > { %v5043_v38 = vpop.f32.mrb[24].mxu1  ;;  %v4647_v37 = vcombine.low %v1756_v13, %v1766_v36  ;;  %v1982_v18 = vsel %vm5923_vm5, %v1980_v39, %v1981_v53  ;;  %v7215_v54 = vadd.f32 %v5042_v31, %v7129_v2  ;;  %v1781_v52 = vshrl.u32 %v7195_v55, 16 }
 0x133   : > { %v5044_v28 = vpop.f32.mrb[25].mxu1  ;;  %v4659_v25 = vcombine.low %v1979_v4, %v1982_v18  ;;  %v1770_v62 = vrot.slane %v1768_v42, 4  ;;  %v1773_v1 = vrot.slane %v1771_v9, 5  ;;  %v1779_v21 = vrot.slane %v1777_v3, 5 }
 0x134   : > { %v4955_v7 = vpop.f32.mrb[24].mxu0  ;;  %v5046_v46 = vpop.f32.mrb[26].mxu1  ;;  %3849 = vmatprep.mubr.bf16.mxu1 %v4647_v37  ;;  %v1787_v53 = vshll.u32 %v7203_v14, 16  ;;  %v4516_v13 = vrot.slane %v4500_v17, 9  ;;  %v1985_v2 = vrot.slane %v7003_v32, 5  ;;  %v1783_v4 = vrot.slane %v1781_v52, 4 }
 0x135   : > { %v4956_v8 = vpop.f32.mrb[25].mxu0  ;;  %v5047_v58 = vpop.f32.mrb[27].mxu1  ;;  %3850 = vmatmul.mubr.bf16.gmra.mrb[124].mxu1 %v4631_v12  ;;  %5404 = vmatmul.mubr.bf16.gmra.mrb[124].mxu0 %v4659_v25  ;;  %v1774_v60 = vor.u32 %v1773_v1, %v1770_v62  ;;  %v1988_v39 = vrot.slane %v7008_v6, 5  ;;  %v7227_v31 = vadd.f32 %v4953_v26, %v4952_v51  ;;  %v7231_v36 = vadd.f32 %v7090_v23, %v7086_v61 }
 0x136   : > { %v7220_v56 = vpop.f32.mrb[26].mxu0  ;;  %v7235_v42 = vadd.f32 %v7121_v24, %v7086_v61  ;;  %v1986_v32 = vsel %vm5923_vm5, %v4516_v13, %v1985_v2  ;;  %v1987_v12 = vrot.slane %v1985_v2, 4  ;;  %v1784_v17 = vor.u32 %v1783_v4, %v1779_v21  ;;  %v7244_v24 = vld [vmem:[%s5687_s10 + $0xb4] sm:$0xf]  ;;  %v7259_v2 = vld [vmem:[%s5687_s10 + $0xbc] sm:$0x1] }
 0x137   : > { %v7224_v33 = vpop.f32.mrb[27].mxu0  ;;  %v1775_v9 = vrot.slane %v1774_v60, 4  ;;  %v1789_v37 = vrot.slane %v1787_v53, 5  ;;  %v4517_v18 = vrot.slane %v4501_v0, 9  ;;  %v1992_v51 = vrot.slane %v7052_v15, 5 }
 0x138   : > { %v1989_v6 = vsel %vm5923_vm5, %v1987_v12, %v1988_v39  ;;  %v1995_v23 = vrot.slane %v7059_v30, 5  ;;  %v5045_v26 = vadd.f32 %v5044_v28, %v5043_v38  ;;  %v1785_v62 = vrot.slane %v1784_v17, 4  ;;  %v7251_v0 = vld [vmem:[%s5687_s10 + $0xb8] sm:$0xf] }
 0x139   : > { %v1780_v25 = vsel %vm5729_vm2, %v1775_v9, %v1779_v21  ;;  %v4660_v1 = vcombine.low %v1986_v32, %v1989_v6  ;;  %v7248_v52 = vadd.f32 %v4956_v8, %v4955_v7  ;;  %v1993_v15 = vsel %vm5923_vm5, %v4517_v18, %v1992_v51  ;;  %v4502_v32 = vld [vmem:[%s5687_s10 + $0x90] sm:$0xe] }
 0x13a   : > { %v5049_v3 = vpop.f32.mrb[28].mxu1  ;;  %v1994_v30 = vrot.slane %v1992_v51, 4  ;;  %v7256_v38 = vadd.f32 %v5045_v26, %v7175_v49  ;;  %v5048_v28 = vadd.f32 %v5047_v58, %v5046_v46  ;;  %v1790_v7 = vsel %vm5729_vm2, %v1785_v62, %v1789_v37 }
 0x13b   : > { %v5050_v53 = vpop.f32.mrb[29].mxu1  ;;  %5407 = vmatprep.mubr.bf16.mxu0 %v4660_v1  ;;  %v4632_v8 = vcombine.low %v7188_v5, %v7195_v55  ;;  %v1792_v4 = vshrl.u32 %v7244_v24, 16  ;;  %v1795_v39 = vshll.u32 %v7244_v24, 16  ;;  %v4648_v46 = vcombine.low %v1780_v25, %v1790_v7 }
 0x13c   : > { %v4961_v13 = vpop.f32.mrb[28].mxu0  ;;  %v5052_v21 = vpop.f32.mrb[30].mxu1  ;;  %v1996_v58 = vsel %vm5923_vm5, %v1994_v30, %v1995_v23  ;;  %v7273_v9 = vadd.f32 %v5048_v28, %v7179_v44  ;;  %v1801_v17 = vshll.u32 %v7251_v0, 16  ;;  %v1805_v51 = vshrl.u32 %v7251_v0, 16  ;;  %v4503_v23 = vld [vmem:[%s5687_s10 + $0x9c] sm:$0xe] }
 0x13d   : > { %v4962_v60 = vpop.f32.mrb[29].mxu0  ;;  %v5053_v12 = vpop.f32.mrb[31].mxu1  ;;  %v4661_v5 = vcombine.low %v1993_v15, %v1996_v58  ;;  %v1794_v18 = vrot.slane %v1792_v4, 4  ;;  %v1797_v6 = vrot.slane %v1795_v39, 5  ;;  %3857 = vmatprep.mubr.bf16.mxu1 %v4648_v46  ;;  %v1811_v62 = vshll.u32 %v7259_v2, 16 }
 0x13e   : > { %v7268_v49 = vpop.f32.mrb[30].mxu0  ;;  %v1803_v26 = vrot.slane %v1801_v17, 5  ;;  %v4518_v25 = vrot.slane %v4502_v32, 9  ;;  %v1999_v1 = vrot.slane %v7093_v50, 5  ;;  %3858 = vmatmul.mubr.bf16.gmra.mrb[128].mxu1 %v4632_v8  ;;  %v1807_v30 = vrot.slane %v1805_v51, 4 }
 0x13f   : > { %v7276_v37 = vpop.f32.mrb[31].mxu0  ;;  %5408 = vmatmul.mubr.bf16.gmra.mrb[128].mxu0 %v4661_v5  ;;  %v1798_v44 = vor.u32 %v1797_v6, %v1794_v18  ;;  %v2002_v28 = vrot.slane %v7106_v10, 5  ;;  %v7285_v15 = vadd.f32 %v7224_v33, %v7220_v56  ;;  %v7289_v7 = vadd.f32 %v7142_v27, %v7086_v61  ;;  %v7308_v18 = vld [vmem:[%s5687_s10 + $0xc0] sm:$0xf] }
 0x140   : > { %v7293_v4 = vadd.f32 %v7171_v16, %v7086_v61  ;;  %v2000_v50 = vsel %vm5923_vm5, %v4518_v25, %v1999_v1  ;;  %v2001_v8 = vrot.slane %v1999_v1, 4  ;;  %v1808_v32 = vor.u32 %v1807_v30, %v1803_v26 }
 0x141   : > { %v1799_v10 = vrot.slane %v1798_v44, 4  ;;  %v1813_v56 = vrot.slane %v1811_v62, 5  ;;  %v4519_v33 = vrot.slane %v4503_v23, 9  ;;  %v2006_v16 = vrot.slane %v7145_v48, 5  ;;  %v7319_v44 = vld [vmem:[%s5687_s10 + $0xc4] sm:$0xf] }
 0x142   : > { %v7297_v39 = vpop.f32.mrb[32].mxu1  ;;  %v2003_v27 = vsel %vm5923_vm5, %v2001_v8, %v2002_v28  ;;  %v2009_v17 = vrot.slane %v7156_v40, 5  ;;  %v5051_v5 = vadd.f32 %v5050_v53, %v5049_v3  ;;  %v1809_v25 = vrot.slane %v1808_v32, 4  ;;  %v4504_v32 = vld [vmem:[%s5687_s10 + $0xa8] sm:$0xe] }
 0x143   : > { %v7299_v46 = vpop.f32.mrb[33].mxu1  ;;  %v1804_v62 = vsel %vm5729_vm2, %v1799_v10, %v1803_v26  ;;  %v4662_v1 = vcombine.low %v2000_v50, %v2003_v27  ;;  %v7316_v23 = vadd.f32 %v4962_v60, %v4961_v13  ;;  %v2007_v3 = vsel %vm5923_vm5, %v4519_v33, %v2006_v16  ;;  %v7337_v50 = vld [vmem:[%s5687_s10 + $0xc8] sm:$0x1] }
 0x144   : > { %v7301_v58 = vpop.f32.mrb[32].mxu0  ;;  %v7310_v6 = vpop.f32.mrb[34].mxu1  ;;  %v2008_v53 = vrot.slane %v2006_v16, 4  ;;  %v7328_v30 = vadd.f32 %v5051_v5, %v7231_v36  ;;  %v5054_v28 = vadd.f32 %v5053_v12, %v5052_v21  ;;  %v1814_v13 = vsel %vm5729_vm2, %v1809_v25, %v1813_v56  ;;  %v4505_v5 = vld [vmem:[%s5687_s10 + $0xb4] sm:$0xe] }
 0x145   : > { %v7312_v51 = vpop.f32.mrb[33].mxu0  ;;  %v7321_v48 = vpop.f32.mrb[35].mxu1  ;;  %5411 = vmatprep.mubr.bf16.mxu0 %v4662_v1  ;;  %v4633_v60 = vcombine.low %v7244_v24, %v7251_v0  ;;  %v1816_v8 = vshrl.u32 %v7308_v18, 16  ;;  %v1819_v10 = vshll.u32 %v7308_v18, 16  ;;  %v4649_v36 = vcombine.low %v1804_v62, %v1814_v13 }
 0x146   : > { %v7323_v40 = vpop.f32.mrb[34].mxu0  ;;  %v2010_v21 = vsel %vm5923_vm5, %v2008_v53, %v2009_v17  ;;  %v7345_v12 = vadd.f32 %v5054_v28, %v7235_v42  ;;  %v1825_v56 = vshll.u32 %v7319_v44, 16  ;;  %v1829_v24 = vshrl.u32 %v7319_v44, 16 }
 0x147   : > { %v7330_v26 = vpop.f32.mrb[35].mxu0  ;;  %v4663_v33 = vcombine.low %v2007_v3, %v2010_v21  ;;  %v1818_v27 = vrot.slane %v1816_v8, 4  ;;  %v1821_v16 = vrot.slane %v1819_v10, 5  ;;  %3865 = vmatprep.mubr.bf16.mxu1 %v4649_v36  ;;  %v1835_v1 = vshll.u32 %v7337_v50, 16 }
 0x148   : > { %v1827_v25 = vrot.slane %v1825_v56, 5  ;;  %v4520_v20 = vrot.slane %v4504_v32, 9  ;;  %v2013_v62 = vrot.slane %v7195_v55, 5  ;;  %3866 = vmatmul.mubr.bf16.gmra.mrb[132].mxu1 %v4633_v60  ;;  %v1831_v17 = vrot.slane %v1829_v24, 4  ;;  %v7388_v24 = vld [vmem:[%s5687_s10 + $0xcc] sm:$0xf] }
 0x149   : > { %5412 = vmatmul.mubr.bf16.gmra.mrb[132].mxu0 %v4663_v33  ;;  %v1822_v42 = vor.u32 %v1821_v16, %v1818_v27  ;;  %v2016_v3 = vrot.slane %v7203_v14, 5  ;;  %v7357_v53 = vadd.f32 %v7276_v37, %v7268_v49  ;;  %v7365_v10 = vadd.f32 %v7192_v45, %v7086_v61 }
 0x14a   : > { %v7352_v13 = vpop.f32.mrb[36].mxu1  ;;  %v7369_v55 = vadd.f32 %v7227_v31, %v7086_v61  ;;  %v2014_v14 = vsel %vm5923_vm5, %v4520_v20, %v2013_v62  ;;  %v2015_v60 = vrot.slane %v2013_v62, 4  ;;  %v1832_v36 = vor.u32 %v1831_v17, %v1827_v25 }
 0x14b   : > { %v7359_v28 = vpop.f32.mrb[37].mxu1  ;;  %v1823_v37 = vrot.slane %v1822_v42, 4  ;;  %v1837_v21 = vrot.slane %v1835_v1, 5  ;;  %v4521_v56 = vrot.slane %v4505_v5, 9  ;;  %v2020_v27 = vrot.slane %v7251_v0, 5 }
 0x14c   : > { %v7361_v8 = vpop.f32.mrb[36].mxu0  ;;  %v7373_v32 = vpop.f32.mrb[38].mxu1  ;;  %v2017_v31 = vsel %vm5923_vm5, %v2015_v60, %v2016_v3  ;;  %v2023_v20 = vrot.slane %v7259_v2, 5  ;;  %v5057_v16 = vadd.f32 %v7299_v46, %v7297_v39  ;;  %v1833_v1 = vrot.slane %v1832_v36, 4  ;;  %v7399_v0 = vld [vmem:[%s5687_s10 + $0xd0] sm:$0xf] }
 0x14d   : > { %v7375_v49 = vpop.f32.mrb[37].mxu0  ;;  %v7377_v45 = vpop.f32.mrb[39].mxu1  ;;  %v1828_v5 = vsel %vm5729_vm2, %v1823_v37, %v1827_v25  ;;  %v4664_v42 = vcombine.low %v2014_v14, %v2017_v31  ;;  %v7396_v17 = vadd.f32 %v7312_v51, %v7301_v58  ;;  %v2021_v2 = vsel %vm5923_vm5, %v4521_v56, %v2020_v27  ;;  %v7413_v51 = vld [vmem:[%s5687_s10 + $0xd4] sm:$0x1]  ;;  %v4506_v37 = vld [vmem:[%s5687_s10 + $0xc0] sm:$0xe] }
 0x14e   : > { %v7379_v33 = vpop.f32.mrb[38].mxu0  ;;  %v2022_v39 = vrot.slane %v2020_v27, 4  ;;  %v7404_v46 = vadd.f32 %v5057_v16, %v7289_v7  ;;  %v5060_v3 = vadd.f32 %v7321_v48, %v7310_v6  ;;  %v1838_v25 = vsel %vm5729_vm2, %v1833_v1, %v1837_v21  ;;  %v4507_v21 = vld [vmem:[%s5687_s10 + $0xcc] sm:$0xe] }
 0x14f   : > { %v7390_v62 = vpop.f32.mrb[39].mxu0  ;;  %5415 = vmatprep.mubr.bf16.mxu0 %v4664_v42  ;;  %v4634_v58 = vcombine.low %v7308_v18, %v7319_v44  ;;  %v1840_v14 = vshrl.u32 %v7388_v24, 16  ;;  %v1843_v60 = vshll.u32 %v7388_v24, 16  ;;  %v4650_v36 = vcombine.low %v1828_v5, %v1838_v25 }
 0x150   : > { %v2024_v7 = vsel %vm5923_vm5, %v2022_v39, %v2023_v20  ;;  %v7421_v6 = vadd.f32 %v5060_v3, %v7293_v4  ;;  %v1849_v48 = vshll.u32 %v7399_v0, 16  ;;  %v1853_v16 = vshrl.u32 %v7399_v0, 16 }
 0x151   : > { %v4665_v31 = vcombine.low %v2021_v2, %v2024_v7  ;;  %v1842_v18 = vrot.slane %v1840_v14, 4  ;;  %v1845_v27 = vrot.slane %v1843_v60, 5  ;;  %3873 = vmatprep.mubr.bf16.mxu1 %v4650_v36  ;;  %v1859_v5 = vshll.u32 %v7413_v51, 16 }
 0x152   : > { %v5067_v56 = vpop.f32.mrb[40].mxu1  ;;  %v1851_v29 = vrot.slane %v1849_v48, 5  ;;  %v4522_v25 = vrot.slane %v4506_v37, 9  ;;  %v2027_v20 = vrot.slane %v7319_v44, 5  ;;  %3874 = vmatmul.mubr.bf16.gmra.mrb[136].mxu1 %v4634_v58  ;;  %v1855_v63 = vrot.slane %v1853_v16, 4 }
 0x153   : > { %v5068_v1 = vpop.f32.mrb[41].mxu1  ;;  %5416 = vmatmul.mubr.bf16.gmra.mrb[136].mxu0 %v4665_v31  ;;  %v1846_v3 = vor.u32 %v1845_v27, %v1842_v18  ;;  %v2030_v2 = vrot.slane %v7337_v50, 5  ;;  %v7431_v14 = vadd.f32 %v7330_v26, %v7323_v40  ;;  %v3329_v7 = vadd.f32 %v7248_v52, %v7086_v61 }
 0x154   : > { %v4979_v42 = vpop.f32.mrb[40].mxu0  ;;  %v5070_v4 = vpop.f32.mrb[42].mxu1  ;;  %v3332_v44 = vadd.f32 %v7285_v15, %v7086_v61  ;;  %v2028_v58 = vsel %vm5923_vm5, %v4522_v25, %v2027_v20  ;;  %v2029_v37 = vrot.slane %v2027_v20, 4  ;;  %v1856_v18 = vor.u32 %v1855_v63, %v1851_v29 }
 0x155   : > { %v4980_v39 = vpop.f32.mrb[41].mxu0  ;;  %v5071_v60 = vpop.f32.mrb[43].mxu1  ;;  %v1847_v31 = vrot.slane %v1846_v3, 4  ;;  %v1861_v50 = vrot.slane %v1859_v5, 5  ;;  %v4523_v27 = vrot.slane %v4507_v21, 9  ;;  %v2034_v26 = vrot.slane %v7399_v0, 5 }
 0x156   : > { %v4982_v36 = vpop.f32.mrb[42].mxu0  ;;  %v2031_v40 = vsel %vm5923_vm5, %v2029_v37, %v2030_v2  ;;  %v2037_v16 = vrot.slane %v7413_v51, 5  ;;  %v5063_v52 = vadd.f32 %v7359_v28, %v7352_v13  ;;  %v1857_v25 = vrot.slane %v1856_v18, 4 }
 0x157   : > { %v4983_v48 = vpop.f32.mrb[43].mxu0  ;;  %v1852_v15 = vsel %vm5729_vm2, %v1847_v31, %v1851_v29  ;;  %v4666_v20 = vcombine.low %v2028_v58, %v2031_v40  ;;  %v4975_v63 = vadd.f32 %v7375_v49, %v7361_v8  ;;  %v2035_v21 = vsel %vm5923_vm5, %v4523_v27, %v2034_v26 }
 0x158   : > { %v2036_v5 = vrot.slane %v2034_v26, 4  ;;  %v7452_v3 = vadd.f32 %v5063_v52, %v7365_v10  ;;  %v5066_v51 = vadd.f32 %v7377_v45, %v7373_v32  ;;  %v1862_v13 = vsel %vm5729_vm2, %v1857_v25, %v1861_v50 }
 0x159   : > { %5419 = vmatprep.mubr.bf16.mxu0 %v4666_v20  ;;  %v4635_v29 = vcombine.low %v7388_v24, %v7399_v0  ;;  %v4978_v28 = vadd.f32 %v7390_v62, %v7379_v33  ;;  %v5069_v8 = vadd.f32 %v5068_v1, %v5067_v56  ;;  %v4651_v37 = vcombine.low %v1852_v15, %v1862_v13 }
 0x15a   : > { %v5073_v2 = vpop.f32.mrb[44].mxu1  ;;  %v2038_v10 = vsel %vm5923_vm5, %v2036_v5, %v2037_v16  ;;  %v7465_v32 = vadd.f32 %v5066_v51, %v7369_v55  ;;  %v4981_v45 = vadd.f32 %v4980_v39, %v4979_v42  ;;  %v3337_v18 = vadd.f32 %v7316_v23, %v7086_v61 }
 0x15b   : > { %v5074_v49 = vpop.f32.mrb[45].mxu1  ;;  %v4667_v24 = vcombine.low %v2035_v21, %v2038_v10  ;;  %v7469_v0 = vadd.f32 %v5069_v8, %v3329_v7  ;;  %v5072_v33 = vadd.f32 %v5071_v60, %v5070_v4  ;;  %v3340_v1 = vadd.f32 %v7357_v53, %v7086_v61  ;;  %3881 = vmatprep.mubr.bf16.mxu1 %v4651_v37 }
 0x15c   : > { %v4985_v58 = vpop.f32.mrb[44].mxu0  ;;  %v5076_v34 = vpop.f32.mrb[46].mxu1  ;;  %v4984_v22 = vadd.f32 %v4983_v48, %v4982_v36  ;;  %v5075_v50 = vadd.f32 %v5074_v49, %v5073_v2  ;;  %3882 = vmatmul.mubr.bf16.gmra.mrb[140].mxu1 %v4635_v29  ;;  %v3345_v36 = vadd.f32 %v7396_v17, %v7086_v61  ;;  %v3348_v25 = vadd.f32 %v7431_v14, %v7086_v61 }
 0x15d   : > { %v4986_v31 = vpop.f32.mrb[45].mxu0  ;;  %v5077_v62 = vpop.f32.mrb[47].mxu1  ;;  %5420 = vmatmul.mubr.bf16.gmra.mrb[140].mxu0 %v4667_v24  ;;  %v7475_v39 = vadd.f32 %v5072_v33, %v3332_v44 }
 0x15e   : > { %v4988_v56 = vpop.f32.mrb[46].mxu0  ;;  %v7473_v55 = vadd.f32 %v4986_v31, %v4985_v58  ;;  %v5078_v23 = vadd.f32 %v5077_v62, %v5076_v34  ;;  %v7479_v7 = vadd.f32 %v5075_v50, %v3337_v18  ;;  %v3353_v58 = vadd.f32 %v4975_v63, %v7086_v61 }
 0x15f   : > { %v4989_v42 = vpop.f32.mrb[47].mxu0 }
 0x160   : > { %v7477_v27 = vadd.f32 %v4989_v42, %v4988_v56  ;;  %v7481_v4 = vadd.f32 %v5078_v23, %v3340_v1 }
 0x162   : > { %v5079_v60 = vpop.f32.mrb[48].mxu1 }
 0x163   : > { %v5080_v53 = vpop.f32.mrb[49].mxu1 }
 0x164   : > { %v5143_v40 = vpop.f32.mrb[48].mxu0  ;;  %v5081_v48 = vadd.f32 %v5080_v53, %v5079_v60  ;;  %v5082_v16 = vpop.f32.mrb[50].mxu1  ;;  %v3361_v60 = vadd.f32 %v4981_v45, %v7086_v61 }
 0x165   : > { %v5144_v26 = vpop.f32.mrb[49].mxu0  ;;  %v5083_v44 = vpop.f32.mrb[51].mxu1 }
 0x166   : > { %v5145_v52 = vadd.f32 %v5144_v26, %v5143_v40  ;;  %v5146_v15 = vpop.f32.mrb[50].mxu0  ;;  %v7487_v20 = vadd.f32 %v5081_v48, %v3345_v36  ;;  %v5084_v21 = vadd.f32 %v5083_v44, %v5082_v16 }
 0x167   : > { %v5147_v5 = vpop.f32.mrb[51].mxu0 }
 0x168   : > { %v7490_v51 = vadd.f32 %v5145_v52, %v7149_v35  ;;  %v5148_v2 = vadd.f32 %v5147_v5, %v5146_v15  ;;  %v7492_v13 = vadd.f32 %v5084_v21, %v3348_v25  ;;  %v3356_v35 = vadd.f32 %v4978_v28, %v7086_v61 }
 0x16a   : > { %v7495_v17 = vadd.f32 %v5148_v2, %v7163_v47  ;;  %v5085_v29 = vpop.f32.mrb[52].mxu1 }
 0x16b   : > { %v5086_v49 = vpop.f32.mrb[53].mxu1 }
 0x16c   : > { %v5149_v8 = vpop.f32.mrb[52].mxu0  ;;  %v5087_v37 = vadd.f32 %v5086_v49, %v5085_v29  ;;  %v5088_v10 = vpop.f32.mrb[54].mxu1  ;;  %v3369_v29 = vadd.f32 %v7473_v55, %v7086_v61 }
 0x16d   : > { %v5150_v14 = vpop.f32.mrb[53].mxu0  ;;  %v5089_v18 = vpop.f32.mrb[55].mxu1 }
 0x16e   : > { %v5151_v34 = vadd.f32 %v5150_v14, %v5149_v8  ;;  %v5152_v31 = vpop.f32.mrb[54].mxu0  ;;  %v7499_v24 = vadd.f32 %v5087_v37, %v3353_v58  ;;  %v5090_v33 = vadd.f32 %v5089_v18, %v5088_v10 }
 0x16f   : > { %v5153_v62 = vpop.f32.mrb[55].mxu0 }
 0x170   : > { %v7502_v47 = vadd.f32 %v5151_v34, %v7200_v41  ;;  %v5154_v56 = vadd.f32 %v5153_v62, %v5152_v31  ;;  %v7504_v1 = vadd.f32 %v5090_v33, %v3356_v35  ;;  %v3364_v41 = vadd.f32 %v4984_v22, %v7086_v61 }
 0x172   : > { %v7507_v63 = vadd.f32 %v5154_v56, %v7215_v54  ;;  %v5091_v50 = vpop.f32.mrb[56].mxu1 }
 0x173   : > { %v5092_v23 = vpop.f32.mrb[57].mxu1 }
 0x174   : > { %v5155_v42 = vpop.f32.mrb[56].mxu0  ;;  %v5093_v40 = vadd.f32 %v5092_v23, %v5091_v50  ;;  %v5094_v53 = vpop.f32.mrb[58].mxu1  ;;  %v3377_v50 = vadd.f32 %v6950_v57, %v7086_v61 }
 0x175   : > { %v5156_v28 = vpop.f32.mrb[57].mxu0  ;;  %v5095_v26 = vpop.f32.mrb[59].mxu1 }
 0x176   : > { %v5157_v36 = vadd.f32 %v5156_v28, %v5155_v42  ;;  %v5158_v48 = vpop.f32.mrb[58].mxu0  ;;  %v7511_v16 = vadd.f32 %v5093_v40, %v3361_v60  ;;  %v5096_v52 = vadd.f32 %v5095_v26, %v5094_v53 }
 0x177   : > { %v5159_v15 = vpop.f32.mrb[59].mxu0 }
 0x178   : > { %v7514_v54 = vadd.f32 %v5157_v36, %v7256_v38  ;;  %v5160_v44 = vadd.f32 %v5159_v15, %v5158_v48  ;;  %v7516_v25 = vadd.f32 %v5096_v52, %v3364_v41  ;;  %v3372_v38 = vadd.f32 %v7477_v27, %v7086_v61 }
 0x17a   : > { %v7519_v45 = vadd.f32 %v5160_v44, %v7273_v9  ;;  %v5097_v21 = vpop.f32.mrb[60].mxu1 }
 0x17b   : > { %v5098_v2 = vpop.f32.mrb[61].mxu1 }
 0x17c   : > { %v5161_v5 = vpop.f32.mrb[60].mxu0  ;;  %v5099_v22 = vadd.f32 %v5098_v2, %v5097_v21  ;;  %v5100_v49 = vpop.f32.mrb[62].mxu1  ;;  %v3385_v21 = vadd.f32 %v6993_v43, %v7086_v61 }
 0x17d   : > { %v5162_v8 = vpop.f32.mrb[61].mxu0  ;;  %v5101_v14 = vpop.f32.mrb[63].mxu1 }
 0x17e   : > { %v5163_v58 = vadd.f32 %v5162_v8, %v5161_v5  ;;  %v5164_v37 = vpop.f32.mrb[62].mxu0  ;;  %v7525_v10 = vadd.f32 %v5099_v22, %v3369_v29  ;;  %v5102_v34 = vadd.f32 %v5101_v14, %v5100_v49 }
 0x17f   : > { %v5165_v9 = vpop.f32.mrb[63].mxu0 }
 0x180   : > { %v7528_v31 = vadd.f32 %v5163_v58, %v7328_v30  ;;  %v5166_v18 = vadd.f32 %v5165_v9, %v5164_v37  ;;  %v7530_v35 = vadd.f32 %v5102_v34, %v3372_v38  ;;  %v3380_v30 = vadd.f32 %v6956_v11, %v7086_v61 }
 0x182   : > { %v7533_v55 = vadd.f32 %v5166_v18, %v7345_v12  ;;  %v5103_v33 = vpop.f32.mrb[64].mxu1 }
 0x183   : > { %v5104_v56 = vpop.f32.mrb[65].mxu1 }
 0x184   : > { %v5167_v62 = vpop.f32.mrb[64].mxu0  ;;  %v5105_v27 = vadd.f32 %v5104_v56, %v5103_v33  ;;  %v5106_v23 = vpop.f32.mrb[66].mxu1  ;;  %v3393_v33 = vadd.f32 %v7036_v59, %v7086_v61 }
 0x185   : > { %v5168_v42 = vpop.f32.mrb[65].mxu0  ;;  %v5107_v28 = vpop.f32.mrb[67].mxu1 }
 0x186   : > { %v5169_v60 = vadd.f32 %v5168_v42, %v5167_v62  ;;  %v5170_v40 = vpop.f32.mrb[66].mxu0  ;;  %v7539_v53 = vadd.f32 %v5105_v27, %v3377_v50  ;;  %v5108_v36 = vadd.f32 %v5107_v28, %v5106_v23 }
 0x187   : > { %v5171_v12 = vpop.f32.mrb[67].mxu0 }
 0x188   : > { %v7542_v48 = vadd.f32 %v5169_v60, %v7404_v46  ;;  %v5172_v26 = vadd.f32 %v5171_v12, %v5170_v40  ;;  %v7544_v41 = vadd.f32 %v5108_v36, %v3380_v30  ;;  %v3388_v46 = vadd.f32 %v7000_v19, %v7086_v61 }
 0x18a   : > { %v7547_v57 = vadd.f32 %v5172_v26, %v7421_v6  ;;  %v5109_v52 = vpop.f32.mrb[68].mxu1 }
 0x18b   : > { %v5110_v44 = vpop.f32.mrb[69].mxu1 }
 0x18c   : > { %v5173_v15 = vpop.f32.mrb[68].mxu0  ;;  %v5111_v11 = vadd.f32 %v5110_v44, %v5109_v52  ;;  %v5112_v2 = vpop.f32.mrb[70].mxu1 }
 0x18d   : > { %v5174_v5 = vpop.f32.mrb[69].mxu0  ;;  %v5113_v8 = vpop.f32.mrb[71].mxu1 }
 0x18e   : > { %v5175_v29 = vadd.f32 %v5174_v5, %v5173_v15  ;;  %v5176_v22 = vpop.f32.mrb[70].mxu0  ;;  %v7553_v49 = vadd.f32 %v5111_v11, %v3385_v21  ;;  %v5114_v58 = vadd.f32 %v5113_v8, %v5112_v2  ;;  %v7787_v15 = vld [vmem:[#allocation3_spill] sm:$0xff] }
 0x18f   : > { %v5177_v6 = vpop.f32.mrb[71].mxu0 }
 0x190   : > { %v7556_v37 = vadd.f32 %v5175_v29, %v7452_v3  ;;  %v5178_v14 = vadd.f32 %v5177_v6, %v5176_v22  ;;  %v7558_v38 = vadd.f32 %v5114_v58, %v3388_v46  ;;  %v7786_v3 = vld [vmem:[#allocation2_spill] sm:$0xff]  ;;  %v7788_v22 = vld [vmem:[#allocation4_spill] sm:$0xff] }
 0x191   : > { %v3396_v23 = vadd.f32 %v7786_v3, %v7086_v61  ;;  %v5591_v61 = vld [vmem:[%s7765_s2] ss:$0 sm:$0xff] }
 0x192   : > { %v7561_v43 = vadd.f32 %v5178_v14, %v7465_v32  ;;  %v5115_v34 = vpop.f32.mrb[72].mxu1  ;;  %v3401_v44 = vadd.f32 %v5591_v61, %v7787_v15  ;;  %v3404_v8 = vadd.f32 %v5591_v61, %v7788_v22 }
 0x193   : > { %v5116_v18 = vpop.f32.mrb[73].mxu1 }
 0x194   : > { %v5179_v9 = vpop.f32.mrb[72].mxu0  ;;  %v5117_v19 = vadd.f32 %v5116_v18, %v5115_v34  ;;  %v5118_v56 = vpop.f32.mrb[74].mxu1 }
 0x195   : > { %v5180_v62 = vpop.f32.mrb[73].mxu0  ;;  %v5119_v42 = vpop.f32.mrb[75].mxu1 }
 0x196   : > { %v5181_v50 = vadd.f32 %v5180_v62, %v5179_v9  ;;  %v5182_v27 = vpop.f32.mrb[74].mxu0  ;;  %v7567_v60 = vadd.f32 %v5117_v19, %v3393_v33  ;;  %v5120_v40 = vadd.f32 %v5119_v42, %v5118_v56 }
 0x197   : > { %v5183_v32 = vpop.f32.mrb[75].mxu0 }
 0x198   : > { %v7570_v28 = vadd.f32 %v5181_v50, %v7469_v0  ;;  %v5184_v30 = vadd.f32 %v5183_v32, %v5182_v27  ;;  %v7572_v36 = vadd.f32 %v5120_v40, %v3396_v23 }
 0x19a   : > { %v7575_v59 = vadd.f32 %v5184_v30, %v7475_v39  ;;  %v5121_v12 = vpop.f32.mrb[76].mxu1 }
 0x19b   : > { %v5122_v52 = vpop.f32.mrb[77].mxu1 }
 0x19c   : > { %v5185_v26 = vpop.f32.mrb[76].mxu0  ;;  %v5123_v21 = vadd.f32 %v5122_v52, %v5121_v12  ;;  %v5124_v5 = vpop.f32.mrb[78].mxu1 }
 0x19d   : > { %v5186_v11 = vpop.f32.mrb[77].mxu0  ;;  %v5125_v29 = vpop.f32.mrb[79].mxu1 }
 0x19e   : > { %v5187_v0 = vadd.f32 %v5186_v11, %v5185_v26  ;;  %v5188_v2 = vpop.f32.mrb[78].mxu0  ;;  %v7582_v46 = vadd.f32 %v5123_v21, %v3401_v44  ;;  %v5126_v39 = vadd.f32 %v5125_v29, %v5124_v5 }
 0x19f   : > { %v5189_v58 = vpop.f32.mrb[79].mxu0 }
 0x1a0   : > { %v7585_v6 = vadd.f32 %v5187_v0, %v7479_v7  ;;  %v5190_v14 = vadd.f32 %v5189_v58, %v5188_v2  ;;  %v7587_v34 = vadd.f32 %v5126_v39, %v3404_v8 }
 0x1a2   : > { %v7590_v9 = vadd.f32 %v5190_v14, %v7481_v4  ;;  %v5255_v18 = vpop.f32.mrb[80].mxu1 }
 0x1a3   : > { %v5256_v19 = vpop.f32.mrb[81].mxu1 }
 0x1a4   : > { %v5191_v33 = vpop.f32.mrb[80].mxu0  ;;  %v5257_v56 = vadd.f32 %v5256_v19, %v5255_v18  ;;  %v5258_v50 = vpop.f32.mrb[82].mxu1 }
 0x1a5   : > { %v5192_v62 = vpop.f32.mrb[81].mxu0  ;;  %v5259_v3 = vpop.f32.mrb[83].mxu1 }
 0x1a6   : > { %v5193_v27 = vadd.f32 %v5192_v62, %v5191_v33  ;;  %v5194_v42 = vpop.f32.mrb[82].mxu0  ;;  %v5260_v40 = vadd.f32 %v5259_v3, %v5258_v50  ;;  %v7593_v7 = vadd.f32 %v5257_v56, %v7490_v51 }
 0x1a7   : > { %v5195_v23 = vpop.f32.mrb[83].mxu0 }
 0x1a8   : > { %v7596_v32 = vadd.f32 %v5193_v27, %v7487_v20  ;;  %v5196_v30 = vadd.f32 %v5195_v23, %v5194_v42  ;;  %v7599_v4 = vadd.f32 %v5260_v40, %v7495_v17 }
 0x1aa   : > { %v7602_v12 = vadd.f32 %v5196_v30, %v7492_v13  ;;  %v5261_v26 = vpop.f32.mrb[84].mxu1 }
 0x1ab   : > { %v5262_v61 = vpop.f32.mrb[85].mxu1 }
 0x1ac   : > { %v5197_v52 = vpop.f32.mrb[84].mxu0  ;;  %v5263_v44 = vadd.f32 %v5262_v61, %v5261_v26  ;;  %v5264_v21 = vpop.f32.mrb[86].mxu1 }
 0x1ad   : > { %v5198_v15 = vpop.f32.mrb[85].mxu0  ;;  %v5265_v51 = vpop.f32.mrb[87].mxu1 }
 0x1ae   : > { %v5199_v11 = vadd.f32 %v5198_v15, %v5197_v52  ;;  %v5200_v5 = vpop.f32.mrb[86].mxu0  ;;  %v5266_v2 = vadd.f32 %v5265_v51, %v5264_v21  ;;  %v7605_v20 = vadd.f32 %v5263_v44, %v7502_v47 }
 0x1af   : > { %v5201_v0 = vpop.f32.mrb[87].mxu0 }
 0x1b0   : > { %v7608_v17 = vadd.f32 %v5199_v11, %v7499_v24  ;;  %v5202_v29 = vadd.f32 %v5201_v0, %v5200_v5  ;;  %v7611_v13 = vadd.f32 %v5266_v2, %v7507_v63 }
 0x1b2   : > { %v7614_v22 = vadd.f32 %v5202_v29, %v7504_v1  ;;  %v5267_v8 = vpop.f32.mrb[88].mxu1 }
 0x1b3   : > { %v5268_v39 = vpop.f32.mrb[89].mxu1 }
 0x1b4   : > { %v5203_v58 = vpop.f32.mrb[88].mxu0  ;;  %v5269_v14 = vadd.f32 %v5268_v39, %v5267_v8  ;;  %v5270_v18 = vpop.f32.mrb[90].mxu1 }
 0x1b5   : > { %v5204_v33 = vpop.f32.mrb[89].mxu0  ;;  %v5271_v19 = vpop.f32.mrb[91].mxu1 }
 0x1b6   : > { %v5205_v62 = vadd.f32 %v5204_v33, %v5203_v58  ;;  %v5206_v47 = vpop.f32.mrb[90].mxu0  ;;  %v5272_v56 = vadd.f32 %v5271_v19, %v5270_v18  ;;  %v7617_v24 = vadd.f32 %v5269_v14, %v7514_v54 }
 0x1b7   : > { %v5207_v50 = vpop.f32.mrb[91].mxu0 }
 0x1b8   : > { %v7620_v63 = vadd.f32 %v5205_v62, %v7511_v16  ;;  %v5208_v27 = vadd.f32 %v5207_v50, %v5206_v47  ;;  %v7623_v1 = vadd.f32 %v5272_v56, %v7519_v45 }
 0x1ba   : > { %v7626_v42 = vadd.f32 %v5208_v27, %v7516_v25  ;;  %v5273_v3 = vpop.f32.mrb[92].mxu1 }
 0x1bb   : > { %v5274_v23 = vpop.f32.mrb[93].mxu1 }
 0x1bc   : > { %v5209_v40 = vpop.f32.mrb[92].mxu0  ;;  %v5275_v30 = vadd.f32 %v5274_v23, %v5273_v3  ;;  %v5276_v26 = vpop.f32.mrb[94].mxu1 }
 0x1bd   : > { %v5210_v52 = vpop.f32.mrb[93].mxu0  ;;  %v5277_v61 = vpop.f32.mrb[95].mxu1 }
 0x1be   : > { %v5211_v54 = vadd.f32 %v5210_v52, %v5209_v40  ;;  %v5212_v15 = vpop.f32.mrb[94].mxu0  ;;  %v5278_v44 = vadd.f32 %v5277_v61, %v5276_v26  ;;  %v7629_v16 = vadd.f32 %v5275_v30, %v7528_v31 }
 0x1bf   : > { %v5213_v21 = vpop.f32.mrb[95].mxu0 }
 0x1c0   : > { %v7632_v45 = vadd.f32 %v5211_v54, %v7525_v10  ;;  %v5214_v11 = vadd.f32 %v5213_v21, %v5212_v15  ;;  %v7635_v25 = vadd.f32 %v5278_v44, %v7533_v55 }
 0x1c2   : > { %v7638_v5 = vadd.f32 %v5214_v11, %v7530_v35  ;;  %v5279_v51 = vpop.f32.mrb[96].mxu1 }
 0x1c3   : > { %v5280_v0 = vpop.f32.mrb[97].mxu1 }
 0x1c4   : > { %v5215_v2 = vpop.f32.mrb[96].mxu0  ;;  %v5281_v29 = vadd.f32 %v5280_v0, %v5279_v51  ;;  %v5282_v8 = vpop.f32.mrb[98].mxu1 }
 0x1c5   : > { %v5216_v39 = vpop.f32.mrb[97].mxu0  ;;  %v5283_v58 = vpop.f32.mrb[99].mxu1 }
 0x1c6   : > { %v5217_v31 = vadd.f32 %v5216_v39, %v5215_v2  ;;  %v5218_v14 = vpop.f32.mrb[98].mxu0  ;;  %v5284_v18 = vadd.f32 %v5283_v58, %v5282_v8  ;;  %v7641_v10 = vadd.f32 %v5281_v29, %v7542_v48 }
 0x1c7   : > { %v5219_v33 = vpop.f32.mrb[99].mxu0 }
 0x1c8   : > { %v7644_v55 = vadd.f32 %v5217_v31, %v7539_v53  ;;  %v5220_v19 = vadd.f32 %v5219_v33, %v5218_v14  ;;  %v7647_v35 = vadd.f32 %v5284_v18, %v7547_v57 }
 0x1ca   : > { %v7650_v62 = vadd.f32 %v5220_v19, %v7544_v41 }
 0x1cc   : > { %v5285_v47 = vpop.f32.mrb[100].mxu1 }
 0x1cd   : > { %v5286_v56 = vpop.f32.mrb[101].mxu1 }
 0x1ce   : > { %v5221_v50 = vpop.f32.mrb[100].mxu0  ;;  %v5287_v27 = vadd.f32 %v5286_v56, %v5285_v47  ;;  %v5288_v3 = vpop.f32.mrb[102].mxu1 }
 0x1cf   : > { %v5222_v23 = vpop.f32.mrb[101].mxu0  ;;  %v5289_v40 = vpop.f32.mrb[103].mxu1 }
 0x1d0   : > { %v5223_v48 = vadd.f32 %v5222_v23, %v5221_v50  ;;  %v5224_v30 = vpop.f32.mrb[102].mxu0  ;;  %v5290_v26 = vadd.f32 %v5289_v40, %v5288_v3  ;;  %v7653_v53 = vadd.f32 %v5287_v27, %v7556_v37 }
 0x1d1   : > { %v5225_v52 = vpop.f32.mrb[103].mxu0 }
 0x1d2   : > { %v7656_v57 = vadd.f32 %v5223_v48, %v7553_v49  ;;  %v5226_v61 = vadd.f32 %v5225_v52, %v5224_v30  ;;  %v7659_v41 = vadd.f32 %v5290_v26, %v7561_v43 }
 0x1d4   : > { %v7662_v54 = vadd.f32 %v5226_v61, %v7558_v38 }
 0x1d6   : > { %v5291_v15 = vpop.f32.mrb[104].mxu1 }
 0x1d7   : > { %v5292_v44 = vpop.f32.mrb[105].mxu1 }
 0x1d8   : > { %v5293_v21 = vadd.f32 %v5292_v44, %v5291_v15  ;;  %v5294_v11 = vpop.f32.mrb[106].mxu1  ;;  %v5227_v51 = vpop.f32.mrb[104].mxu0 }
 0x1d9   : > { %v5295_v0 = vpop.f32.mrb[107].mxu1  ;;  %v5228_v2 = vpop.f32.mrb[105].mxu0 }
 0x1da   : > { %v5296_v37 = vadd.f32 %v5295_v0, %v5294_v11  ;;  %v7665_v29 = vadd.f32 %v5293_v21, %v7570_v28  ;;  %v5229_v49 = vadd.f32 %v5228_v2, %v5227_v51  ;;  %v5230_v8 = vpop.f32.mrb[106].mxu0 }
 0x1db   : > { %v5231_v39 = vpop.f32.mrb[107].mxu0 }
 0x1dc   : > { %v7668_v43 = vadd.f32 %v5296_v37, %v7575_v59  ;;  %v7671_v38 = vadd.f32 %v5229_v49, %v7567_v60  ;;  %v5232_v58 = vadd.f32 %v5231_v39, %v5230_v8 }
 0x1de   : > { %v7674_v31 = vadd.f32 %v5232_v58, %v7572_v36 }
 0x1e3   : > { %v5297_v14 = vpop.f32.mrb[108].mxu1 }
 0x1e4   : > { %v5298_v18 = vpop.f32.mrb[109].mxu1 }
 0x1e5   : > { %v5233_v33 = vpop.f32.mrb[108].mxu0  ;;  %v5299_v19 = vadd.f32 %v5298_v18, %v5297_v14  ;;  %v5300_v47 = vpop.f32.mrb[110].mxu1 }
 0x1e6   : > { %v5234_v28 = vpop.f32.mrb[109].mxu0  ;;  %v5301_v56 = vpop.f32.mrb[111].mxu1 }
 0x1e7   : > { %v5235_v50 = vadd.f32 %v5234_v28, %v5233_v33  ;;  %v5236_v27 = vpop.f32.mrb[110].mxu0  ;;  %v5302_v3 = vadd.f32 %v5301_v56, %v5300_v47  ;;  %v7677_v59 = vadd.f32 %v5299_v19, %v7585_v6 }
 0x1e8   : > { %v5237_v60 = vpop.f32.mrb[111].mxu0 }
 0x1e9   : > { %v7680_v23 = vadd.f32 %v5235_v50, %v7582_v46  ;;  %v5238_v36 = vadd.f32 %v5237_v60, %v5236_v27  ;;  %v7683_v40 = vadd.f32 %v5302_v3, %v7590_v9 }
 0x1eb   : > { %v7686_v48 = vadd.f32 %v5238_v36, %v7587_v34  ;;  %v5303_v30 = vpop.f32.mrb[112].mxu1 }
 0x1ec   : > { %v5304_v61 = vpop.f32.mrb[113].mxu1 }
 0x1ed   : > { %v5393_v26 = vpop.f32.mrb[112].mxu0  ;;  %v5305_v44 = vadd.f32 %v5304_v61, %v5303_v30  ;;  %v5306_v21 = vpop.f32.mrb[114].mxu1 }
 0x1ee   : > { %v3933_v52 = vadd.f32 %v5393_v26, %v7605_v20  ;;  %v3924_v15 = vpop.f32.mrb[113].mxu0  ;;  %v5307_v51 = vpop.f32.mrb[115].mxu1 }
 0x1ef   : > { %v3925_v6 = vadd.f32 %v3924_v15, %v7593_v7  ;;  %v5394_v11 = vpop.f32.mrb[114].mxu0  ;;  %v5308_v0 = vadd.f32 %v5307_v51, %v5306_v21  ;;  %v7694_v2 = vadd.f32 %v5305_v44, %v7596_v32 }
 0x1f0   : > { %v3936_v46 = vadd.f32 %v5394_v11, %v7611_v13  ;;  %v3927_v9 = vpop.f32.mrb[115].mxu0  ;;  %v4053_v37 = vmax.f32 %v3933_v52, 0.0 }
 0x1f1   : > { %v3928_v34 = vadd.f32 %v3927_v9, %v7599_v4  ;;  %v4051_v49 = vmax.f32 %v3925_v6, 0.0  ;;  %v7702_v13 = vadd.f32 %v5308_v0, %v7602_v12 }
 0x1f2   : > { %v4054_v20 = vmax.f32 %v3936_v46, 0.0 }
 0x1f3   : > { %v4052_v7 = vmax.f32 %v3928_v34, 0.0 }
 0x1f4   : > { %v4816_v8 = vpack.c.bf16 %v4054_v20, %v4053_v37  ;;  %v5309_v32 = vpop.f32.mrb[116].mxu1 }
 0x1f5   : > { %v4811_v39 = vpack.c.bf16 %v4052_v7, %v4051_v49  ;;  %v5397_v4 = vpop.f32.mrb[116].mxu0  ;;  %v5310_v14 = vpop.f32.mrb[117].mxu1 }
 0x1f6   : > { %4888 = vst [vmem:[%s7699_s11 + $0x8] sm:$0xff] %v4816_v8   ;;  %v3949_v58 = vadd.f32 %v5397_v4, %v7629_v16  ;;  %v3940_v18 = vpop.f32.mrb[117].mxu0  ;;  %v5311_v33 = vadd.f32 %v5310_v14, %v5309_v32  ;;  %v5312_v47 = vpop.f32.mrb[118].mxu1 }
 0x1f7   : > { %4812 = vst [vmem:[%s7699_s11] sm:$0xff] %v4811_v39   ;;  %v3941_v19 = vadd.f32 %v3940_v18, %v7617_v24  ;;  %v5398_v28 = vpop.f32.mrb[118].mxu0  ;;  %v5313_v56 = vpop.f32.mrb[119].mxu1 }
 0x1f8   : > { %v3952_v12 = vadd.f32 %v5398_v28, %v7635_v25  ;;  %v3943_v50 = vpop.f32.mrb[119].mxu0  ;;  %v5314_v27 = vadd.f32 %v5313_v56, %v5312_v47  ;;  %v3836_v60 = vadd.f32 %v5311_v33, %v7608_v17  ;;  %v4057_v36 = vmax.f32 %v3949_v58, 0.0 }
 0x1f9   : > { %v3944_v3 = vadd.f32 %v3943_v50, %v7623_v1  ;;  %v4055_v30 = vmax.f32 %v3941_v19, 0.0 }
 0x1fa   : > { %v4058_v16 = vmax.f32 %v3952_v12, 0.0  ;;  %v3839_v52 = vadd.f32 %v5314_v27, %v7614_v22 }
 0x1fb   : > { %v4056_v26 = vmax.f32 %v3944_v3, 0.0 }
 0x1fc   : > { %v4826_v24 = vpack.c.bf16 %v4058_v16, %v4057_v36 }
 0x1fd   : > { %v4821_v61 = vpack.c.bf16 %v4056_v26, %v4055_v30 }
 0x1fe   : > { %4890 = vst [vmem:[%s7699_s11 + $0x18] sm:$0xff] %v4826_v24   ;;  %v5315_v15 = vpop.f32.mrb[120].mxu1  ;;  %v5401_v44 = vpop.f32.mrb[120].mxu0 }
 0x1ff   : > { %4889 = vst [vmem:[%s7699_s11 + $0x10] sm:$0xff] %v4821_v61   ;;  %v3965_v25 = vadd.f32 %v5401_v44, %v7653_v53  ;;  %v5316_v6 = vpop.f32.mrb[121].mxu1  ;;  %v3956_v21 = vpop.f32.mrb[121].mxu0 }
 0x200   : > { %v5317_v11 = vadd.f32 %v5316_v6, %v5315_v15  ;;  %v3957_v1 = vadd.f32 %v3956_v21, %v7641_v10  ;;  %v5318_v17 = vpop.f32.mrb[122].mxu1  ;;  %v5402_v46 = vpop.f32.mrb[122].mxu0 }
 0x201   : > { %v3968_v51 = vadd.f32 %v5402_v46, %v7659_v41  ;;  %v5319_v22 = vpop.f32.mrb[123].mxu1  ;;  %v3959_v9 = vpop.f32.mrb[123].mxu0  ;;  %v4061_v53 = vmax.f32 %v3965_v25, 0.0 }
 0x202   : > { %v5320_v0 = vadd.f32 %v5319_v22, %v5318_v17  ;;  %v3960_v34 = vadd.f32 %v3959_v9, %v7647_v35  ;;  %v7719_v37 = vadd.f32 %v5317_v11, %v7620_v63  ;;  %v4059_v49 = vmax.f32 %v3957_v1, 0.0 }
 0x203   : > { %v4062_v20 = vmax.f32 %v3968_v51, 0.0 }
 0x204   : > { %v4060_v7 = vmax.f32 %v3960_v34, 0.0  ;;  %v7722_v10 = vadd.f32 %v5320_v0, %v7626_v42 }
 0x205   : > { %v4836_v8 = vpack.c.bf16 %v4062_v20, %v4061_v53 }
 0x206   : > { %v4831_v39 = vpack.c.bf16 %v4060_v7, %v4059_v49 }
 0x207   : > { %4892 = vst [vmem:[%s7699_s11 + $0x28] sm:$0xff] %v4836_v8  }
 0x208   : > { %4891 = vst [vmem:[%s7699_s11 + $0x20] sm:$0xff] %v4831_v39   ;;  %v5321_v41 = vpop.f32.mrb[124].mxu1  ;;  %v5405_v32 = vpop.f32.mrb[124].mxu0 }
 0x209   : > { %v3981_v4 = vadd.f32 %v5405_v32, %v7677_v59  ;;  %v5322_v58 = vpop.f32.mrb[125].mxu1  ;;  %v3972_v35 = vpop.f32.mrb[125].mxu0 }
 0x20a   : > { %v5323_v14 = vadd.f32 %v5322_v58, %v5321_v41  ;;  %v3973_v63 = vadd.f32 %v3972_v35, %v7665_v29  ;;  %v5324_v18 = vpop.f32.mrb[126].mxu1  ;;  %v5406_v33 = vpop.f32.mrb[126].mxu0 }
 0x20b   : > { %v3984_v42 = vadd.f32 %v5406_v33, %v7683_v40  ;;  %v5325_v19 = vpop.f32.mrb[127].mxu1  ;;  %v3975_v47 = vpop.f32.mrb[127].mxu0  ;;  %v4065_v50 = vmax.f32 %v3981_v4, 0.0 }
 0x20c   : > { %v5326_v28 = vadd.f32 %v5325_v19, %v5324_v18  ;;  %v3976_v12 = vadd.f32 %v3975_v47, %v7668_v43  ;;  %v3852_v56 = vadd.f32 %v5323_v14, %v7632_v45  ;;  %v4063_v27 = vmax.f32 %v3973_v63, 0.0 }
 0x20d   : > { %v4066_v59 = vmax.f32 %v3984_v42, 0.0 }
 0x20e   : > { %v4064_v3 = vmax.f32 %v3976_v12, 0.0  ;;  %v3855_v36 = vadd.f32 %v5326_v28, %v7638_v5 }
 0x20f   : > { %v4846_v29 = vpack.c.bf16 %v4066_v59, %v4065_v50 }
 0x210   : > { %v4841_v16 = vpack.c.bf16 %v4064_v3, %v4063_v27 }
 0x211   : > { %4894 = vst [vmem:[%s7699_s11 + $0x38] sm:$0xff] %v4846_v29   ;;  %v5327_v30 = vpop.f32.mrb[128].mxu1 }
 0x212   : > { %4893 = vst [vmem:[%s7699_s11 + $0x30] sm:$0xff] %v4841_v16   ;;  %v5409_v26 = vpop.f32.mrb[128].mxu0  ;;  %v5328_v24 = vpop.f32.mrb[129].mxu1 }
 0x213   : > { %v3997_v40 = vadd.f32 %v5409_v26, %v3836_v60  ;;  %v3988_v61 = vpop.f32.mrb[129].mxu0  ;;  %v5329_v15 = vadd.f32 %v5328_v24, %v5327_v30  ;;  %v5330_v45 = vpop.f32.mrb[130].mxu1 }
 0x214   : > { %v3989_v43 = vadd.f32 %v3988_v61, %v7694_v2  ;;  %v5410_v44 = vpop.f32.mrb[130].mxu0  ;;  %v5331_v6 = vpop.f32.mrb[131].mxu1 }
 0x215   : > { %v4000_v25 = vadd.f32 %v5410_v44, %v3839_v52  ;;  %v3991_v21 = vpop.f32.mrb[131].mxu0  ;;  %v5332_v5 = vadd.f32 %v5331_v6, %v5330_v45  ;;  %v3860_v1 = vadd.f32 %v5329_v15, %v7644_v55  ;;  %v4069_v17 = vmax.f32 %v3997_v40, 0.0 }
 0x216   : > { %v3992_v11 = vadd.f32 %v3991_v21, %v7702_v13  ;;  %v4067_v60 = vmax.f32 %v3989_v43, 0.0 }
 0x217   : > { %v4070_v46 = vmax.f32 %v4000_v25, 0.0  ;;  %v3863_v22 = vadd.f32 %v5332_v5, %v7650_v62 }
 0x218   : > { %v4068_v51 = vmax.f32 %v3992_v11, 0.0 }
 0x219   : > { %v4856_v9 = vpack.c.bf16 %v4070_v46, %v4069_v17 }
 0x21a   : > { %v4851_v2 = vpack.c.bf16 %v4068_v51, %v4067_v60 }
 0x21b   : > { %4896 = vst [vmem:[%s7699_s11 + $0x48] sm:$0xff] %v4856_v9   ;;  %v5333_v0 = vpop.f32.mrb[132].mxu1 }
 0x21c   : > { %4895 = vst [vmem:[%s7699_s11 + $0x40] sm:$0xff] %v4851_v2   ;;  %v5413_v34 = vpop.f32.mrb[132].mxu0  ;;  %v5334_v53 = vpop.f32.mrb[133].mxu1 }
 0x21d   : > { %v4013_v52 = vadd.f32 %v5413_v34, %v3852_v56  ;;  %v4004_v20 = vpop.f32.mrb[133].mxu0  ;;  %v5335_v49 = vadd.f32 %v5334_v53, %v5333_v0  ;;  %v5336_v55 = vpop.f32.mrb[134].mxu1 }
 0x21e   : > { %v4005_v13 = vadd.f32 %v4004_v20, %v7719_v37  ;;  %v5414_v7 = vpop.f32.mrb[134].mxu0  ;;  %v5337_v39 = vpop.f32.mrb[135].mxu1 }
 0x21f   : > { %v4016_v8 = vadd.f32 %v5414_v7, %v3855_v36  ;;  %v4007_v41 = vpop.f32.mrb[135].mxu0  ;;  %v5338_v62 = vadd.f32 %v5337_v39, %v5336_v55  ;;  %v3868_v4 = vadd.f32 %v5335_v49, %v7656_v57  ;;  %v4073_v58 = vmax.f32 %v4013_v52, 0.0 }
 0x220   : > { %v4008_v32 = vadd.f32 %v4007_v41, %v7722_v10  ;;  %v4071_v14 = vmax.f32 %v4005_v13, 0.0 }
 0x221   : > { %v4074_v35 = vmax.f32 %v4016_v8, 0.0  ;;  %v3871_v18 = vadd.f32 %v5338_v62, %v7662_v54 }
 0x222   : > { %v4072_v63 = vmax.f32 %v4008_v32, 0.0 }
 0x223   : > { %v4866_v33 = vpack.c.bf16 %v4074_v35, %v4073_v58 }
 0x224   : > { %v4861_v37 = vpack.c.bf16 %v4072_v63, %v4071_v14 }
 0x225   : > { %4898 = vst [vmem:[%s7699_s11 + $0x58] sm:$0xff] %v4866_v33   ;;  %v5339_v42 = vpop.f32.mrb[136].mxu1 }
 0x226   : > { %4897 = vst [vmem:[%s7699_s11 + $0x50] sm:$0xff] %v4861_v37   ;;  %v5417_v19 = vpop.f32.mrb[136].mxu0  ;;  %v5340_v28 = vpop.f32.mrb[137].mxu1 }
 0x227   : > { %v4029_v47 = vadd.f32 %v5417_v19, %v3868_v4  ;;  %v4020_v12 = vpop.f32.mrb[137].mxu0  ;;  %v5341_v56 = vadd.f32 %v5340_v28, %v5339_v42  ;;  %v5342_v10 = vpop.f32.mrb[138].mxu1 }
 0x228   : > { %v4021_v50 = vadd.f32 %v4020_v12, %v3860_v1  ;;  %v5418_v57 = vpop.f32.mrb[138].mxu0  ;;  %v5343_v27 = vpop.f32.mrb[139].mxu1 }
 0x229   : > { %v4032_v59 = vadd.f32 %v5418_v57, %v3871_v18  ;;  %v4023_v3 = vpop.f32.mrb[139].mxu0  ;;  %v5344_v36 = vadd.f32 %v5343_v27, %v5342_v10  ;;  %v3876_v29 = vadd.f32 %v5341_v56, %v7671_v38  ;;  %v4077_v16 = vmax.f32 %v4029_v47, 0.0 }
 0x22a   : > { %v4024_v54 = vadd.f32 %v4023_v3, %v3863_v22  ;;  %v4075_v26 = vmax.f32 %v4021_v50, 0.0 }
 0x22b   : > { %v4078_v30 = vmax.f32 %v4032_v59, 0.0  ;;  %v3879_v24 = vadd.f32 %v5344_v36, %v7674_v31 }
 0x22c   : > { %v4076_v40 = vmax.f32 %v4024_v54, 0.0 }
 0x22d   : > { %v4876_v61 = vpack.c.bf16 %v4078_v30, %v4077_v16 }
 0x22e   : > { %v4871_v15 = vpack.c.bf16 %v4076_v40, %v4075_v26 }
 0x22f   : > { %4900 = vst [vmem:[%s7699_s11 + $0x68] sm:$0xff] %v4876_v61   ;;  %v5345_v43 = vpop.f32.mrb[140].mxu1 }
 0x230   : > { %4899 = vst [vmem:[%s7699_s11 + $0x60] sm:$0xff] %v4871_v15   ;;  %v5421_v45 = vpop.f32.mrb[140].mxu0  ;;  %v5346_v44 = vpop.f32.mrb[141].mxu1 }
 0x231   : > { %v4036_v25 = vpop.f32.mrb[141].mxu0  ;;  %v5347_v6 = vadd.f32 %v5346_v44, %v5345_v43  ;;  %v5348_v5 = vpop.f32.mrb[142].mxu1 }
 0x232   : > { %v4037_v21 = vadd.f32 %v4036_v25, %v3876_v29  ;;  %v5422_v11 = vpop.f32.mrb[142].mxu0  ;;  %v5349_v38 = vpop.f32.mrb[143].mxu1 }
 0x233   : > { %v4039_v1 = vpop.f32.mrb[143].mxu0  ;;  %v3884_v17 = vadd.f32 %v5347_v6, %v7680_v23  ;;  %v5350_v46 = vadd.f32 %v5349_v38, %v5348_v5 }
 0x234   : > { %v4040_v31 = vadd.f32 %v4039_v1, %v3879_v24  ;;  %v4079_v51 = vmax.f32 %v4037_v21, 0.0 }
 0x235   : > { %v4045_v60 = vadd.f32 %v5421_v45, %v3884_v17  ;;  %v3887_v22 = vadd.f32 %v5350_v46, %v7686_v48 }
 0x236   : > { %v4080_v9 = vmax.f32 %v4040_v31, 0.0 }
 0x237   : > { %v4048_v2 = vadd.f32 %v5422_v11, %v3887_v22  ;;  %v4081_v34 = vmax.f32 %v4045_v60, 0.0 }
 0x238   : > { %v4881_v0 = vpack.c.bf16 %v4080_v9, %v4079_v51 }
 0x239   : > { %v4082_v52 = vmax.f32 %v4048_v2, 0.0 }
 0x23a   : > { %4901 = vst [vmem:[%s7699_s11 + $0x70] sm:$0xff] %v4881_v0  }
 0x23b   : > { %v4886_v53 = vpack.c.bf16 %v4082_v52, %v4081_v34 }
 0x23d   : > { %4902 = vst [vmem:[%s7699_s11 + $0x78] sm:$0xff] %v4886_v53  }
 0x23e PF: > { %s13_s14 = sadd.s32 1, %s5614_s14   ;;  %s7789_s12 = smov %s5610_s13 }
 0x23f   : > { %p10_p5 = scmp.ge.s32.totalorder %s13_s14, 4   ;;  %s7790_s13 = smov %s7792_s15 }
 0x241   :  { %12 = sbr.rel (!%p10_p5) target bundleno = 2 (0x2), region = 65 }

// kernel: decblock_forward.7
= control target key start
LH: loop header
LB: loop body
LE: loop exit
PB: predicated region body
PF: predicated region fallthrough
CT: control target
= control target key end

     0   :  { %s5120_s12 = smov 0   ;;  %s5122_s13 = smov 0   ;;  %s6709_s0 = inlined_call_operand.vmem [shape: bf16[2,20,20,128], index: 0, kind: input, shape index: {}]   ;;  %s6710_s1 = inlined_call_operand.vmem [shape: bf16[1152,128], index: 1, kind: input, shape index: {}]   ;;  %s6711_s2 = inlined_call_operand.vmem [shape: f32[1,128], index: 2, kind: input, shape index: {}]   ;;  %s6712_s3 = inlined_call_operand.vmem [shape: bf16[2,16,16,128], index: 3, kind: output, shape index: {}]  }
   0x1   :  { %s5124_s14 = smov 0  }
   0x2 LB: > { %s25_s15 = sadd.s32 1, %s5094_s13  ;;  %p3720_p0 = scmp.ge.s32.totalorder %s5098_s14, 1  ;;  %s5098_s14 = sphi %s5124_s14, %s13_s14   ;;  %s5094_s13 = sphi %s5122_s13, %s6718_s13   ;;  %s5090_s12 = sphi %s5120_s12, %s6717_s12  }
   0x3   : > { %p27_p1 = scmp.ge.s32.totalorder %s25_s15, 2  ;;  %p151_p2 = scmp.lt.s32.totalorder %s5098_s14, 3 }
   0x5   : > { %s6720_s15 = smov (%p27_p1, %s25_s15), 0  ;;  %p152_p3 = pnand %p3720_p0, %p151_p2 }
   0x6   : > { %v4952_v0 = vld [vmem:[%s6710_s1 + $0x40] sm:$0xff] (!%p152_p3)   ;;  %p180_p4 = scmp.lt.s32.totalorder (!%p152_p3), %s5090_s12, 1  ;;  %v4954_v2 = vld [vmem:[%s6710_s1 + $0x48] sm:$0xff] (!%p152_p3)   ;;  %v4956_v4 = vld [vmem:[%s6710_s1 + $0x50] sm:$0xff] (!%p152_p3)   ;;  %vm313_vm0 = vcmask (!%p152_p3), 1042432   ;;  %vm314_vm1 = vcmask (!%p152_p3), 1046532  }
   0x7   : > { %155 = sbr.rel (%p152_p3) target bundleno = 545 (0x221), region = 32  ;;  %v4953_v1 = vld [vmem:[%s6710_s1] sm:$0xff] (!%p152_p3)   ;;  %4391 = vmatprep.subr.bf16.mxu0 (!%p152_p3), %v4952_v0  ;;  %4911 = vmatprep.subr.bf16.mxu1 (!%p152_p3), %v4952_v0  ;;  %v4955_v3 = vld [vmem:[%s6710_s1 + $0x8] sm:$0xff] (!%p152_p3)   ;;  %v4957_v5 = vld [vmem:[%s6710_s1 + $0x10] sm:$0xff] (!%p152_p3)   ;;  %vm492_vm3 = vcmask (!%p152_p3), 1041408   ;;  %vm493_vm4 = vcmask (!%p152_p3), 1045508  }
   0x8   : > { %4392 = vmatpush3.bf16.msra.mxu0 (!%p152_p3), %v4953_v1  ;;  %4919 = vmatpush3.bf16.msra.mxu1 (!%p152_p3), %v4953_v1  ;;  %v4958_v6 = vld [vmem:[%s6710_s1 + $0x58] sm:$0xff] (!%p152_p3)   ;;  %v4960_v8 = vld [vmem:[%s6710_s1 + $0x60] sm:$0xff] (!%p152_p3)   ;;  %v4962_v10 = vld [vmem:[%s6710_s1 + $0x68] sm:$0xff] (!%p152_p3)  }
   0x9   : > { %4393 = vmatprep.subr.bf16.mxu0 (!%p152_p3), %v4954_v2  ;;  %4912 = vmatprep.subr.bf16.mxu1 (!%p152_p3), %v4954_v2  ;;  %v4959_v7 = vld [vmem:[%s6710_s1 + $0x18] sm:$0xff] (!%p152_p3)   ;;  %v4961_v9 = vld [vmem:[%s6710_s1 + $0x20] sm:$0xff] (!%p152_p3)   ;;  %vm5184_vm2 = vmor (!%p152_p3), %vm313_vm0, %vm314_vm1 }
   0xa   : > { %v4963_v22 = vld [vmem:[%s6710_s1 + $0x28] sm:$0xff] (!%p152_p3)   ;;  %v4964_v26 = vld [vmem:[%s6710_s1 + $0x70] sm:$0xff] (!%p152_p3)   ;;  %v4966_v35 = vld [vmem:[%s6710_s1 + $0x78] sm:$0xff] (!%p152_p3)  }
   0xb   : > { %v4965_v33 = vld [vmem:[%s6710_s1 + $0x30] sm:$0xff] (!%p152_p3)   ;;  %v4967_v36 = vld [vmem:[%s6710_s1 + $0x38] sm:$0xff] (!%p152_p3)   ;;  %v4970_v42 = vld [vmem:[%s6710_s1 + $0xc0] sm:$0xff] (!%p152_p3)  }
   0xc   : > { %4394 = vmatpush3.bf16.msra.mxu0 (!%p152_p3), %v4955_v3  ;;  %4920 = vmatpush3.bf16.msra.mxu1 (!%p152_p3), %v4955_v3  ;;  %v4973_v47 = vld [vmem:[%s6710_s1 + $0x140] sm:$0xff] (!%p152_p3)   ;;  %v4972_v58 = vld [vmem:[%s6710_s1 + $0xc8] sm:$0xff] (!%p152_p3)   ;;  %vm5370_vm5 = vmor (!%p152_p3), %vm492_vm3, %vm493_vm4 }
   0xd   : > { %4395 = vmatprep.subr.bf16.mxu0 (!%p152_p3), %v4956_v4  ;;  %4913 = vmatprep.subr.bf16.mxu1 (!%p152_p3), %v4956_v4  ;;  %v4971_v51 = vld [vmem:[%s6710_s1 + $0x80] sm:$0xff] (!%p152_p3)   ;;  %v4974_v1 = vld [vmem:[%s6710_s1 + $0x88] sm:$0xff] (!%p152_p3)  }
   0xe   : > { %s6722_s12 = smov (!%p180_p4, %s5090_s12), 1  ;;  %v4975_v59 = vld [vmem:[%s6710_s1 + $0x100] sm:$0xff]  }
   0xf   : > { %s4927_s30 = smul.u32 240, %s6722_s12 }
  0x10   : > { %4396 = vmatpush3.bf16.msra.mxu0 %v4957_v5  ;;  %4921 = vmatpush3.bf16.msra.mxu1 %v4957_v5 }
  0x11   : > { %4397 = vmatprep.subr.bf16.mxu0 %v4958_v6  ;;  %4914 = vmatprep.subr.bf16.mxu1 %v4958_v6  ;;  %s5171_s10 = scalar_lea.vmem %s6709_s0, %s4927_s30 }
  0x12   : > { %v5180_v11 = vld [vmem:[%s5171_s10 + $0x4] sm:$0xf]  ;;  %v233_v12 = vld [vmem:[%s5171_s10] sm:$0xe]  ;;  %v234_v13 = vld [vmem:[%s5171_s10 + $0x8] sm:$0x1] }
  0x13   : > { %v3724_v15 = vrot.slane %v233_v12, 9  ;;  %v318_v16 = vrot.slane %v5180_v11, 5  ;;  %v321_v17 = vrot.slane %v234_v13, 5  ;;  %v5190_v18 = vld [vmem:[%s5171_s10 + $0x94] sm:$0xf] }
  0x14   : > { %4398 = vmatpush3.bf16.msra.mxu0 %v4959_v7  ;;  %4922 = vmatpush3.bf16.msra.mxu1 %v4959_v7  ;;  %v257_v19 = vld [vmem:[%s5171_s10 + $0x90] sm:$0xe]  ;;  %v258_v20 = vld [vmem:[%s5171_s10 + $0x98] sm:$0x1]  ;;  %v402_v21 = vrot.slane %v5190_v18, 5 }
  0x15   : > { %4399 = vmatprep.subr.bf16.mxu0 %v4960_v8  ;;  %4915 = vmatprep.subr.bf16.mxu1 %v4960_v8  ;;  %v319_v23 = vsel %vm5184_vm2, %v3724_v15, %v318_v16  ;;  %v320_v24 = vrot.slane %v318_v16, 4  ;;  %v3736_v25 = vrot.slane %v257_v19, 9  ;;  %v405_v28 = vrot.slane %v258_v20, 5  ;;  %v201_v37 = vld [vmem:[%s5171_s10] sm:$0xf] }
  0x16   : > { %v404_v27 = vrot.slane %v402_v21, 4  ;;  %v225_v38 = vld [vmem:[%s5171_s10 + $0x90] sm:$0xf]  ;;  %v235_v40 = vld [vmem:[%s5171_s10 + $0xc] sm:$0xe]  ;;  %v4012_v56 = vcombine.low %v201_v37, %v5180_v11 }
  0x17   : > { %v322_v29 = vsel %vm5184_vm2, %v320_v24, %v321_v17  ;;  %v403_v30 = vsel %vm5184_vm2, %v3736_v25, %v402_v21  ;;  %v5221_v39 = vld [vmem:[%s5171_s10 + $0x10] sm:$0xf]  ;;  %v236_v41 = vld [vmem:[%s5171_s10 + $0x14] sm:$0x1]  ;;  %v3725_v43 = vrot.slane %v235_v40, 9  ;;  %v4024_v57 = vcombine.low %v225_v38, %v5190_v18  ;;  %v4985_v24 = vld [vmem:[%s6710_s1 + $0x148] sm:$0xff]  }
  0x18   : > { %4400 = vmatpush3.bf16.msra.mxu0 %v4961_v9  ;;  %4923 = vmatpush3.bf16.msra.mxu1 %v4961_v9  ;;  %v4028_v31 = vcombine.low %v319_v23, %v322_v29  ;;  %v406_v32 = vsel %vm5184_vm2, %v404_v27, %v405_v28  ;;  %v325_v44 = vrot.slane %v5221_v39, 5  ;;  %v328_v45 = vrot.slane %v236_v41, 5  ;;  %v5230_v46 = vld [vmem:[%s5171_s10 + $0xa0] sm:$0xf]  ;;  %v259_v48 = vld [vmem:[%s5171_s10 + $0x9c] sm:$0xe] }
  0x19   : > { %4401 = vmatprep.subr.bf16.mxu0 %v4962_v10  ;;  %4916 = vmatprep.subr.bf16.mxu1 %v4962_v10  ;;  %v4040_v34 = vcombine.low %v403_v30, %v406_v32  ;;  %v260_v49 = vld [vmem:[%s5171_s10 + $0xa4] sm:$0x1]  ;;  %v409_v50 = vrot.slane %v5230_v46, 5  ;;  %v3737_v54 = vrot.slane %v259_v48, 9  ;;  %v203_v3 = vld [vmem:[%s5171_s10 + $0xc] sm:$0xf] }
  0x1a   : > { %2654 = vmatprep.mubr.bf16.mxu0 %v4028_v31  ;;  %v326_v52 = vsel %vm5184_vm2, %v3725_v43, %v325_v44  ;;  %v327_v53 = vrot.slane %v325_v44, 4  ;;  %v412_v55 = vrot.slane %v260_v49, 5  ;;  %v227_v4 = vld [vmem:[%s5171_s10 + $0x9c] sm:$0xf]  ;;  %v237_v6 = vld [vmem:[%s5171_s10 + $0x18] sm:$0xe]  ;;  %v4013_v25 = vcombine.low %v203_v3, %v5221_v39 }
  0x1b   : > { %2750 = vmatprep.mubr.bf16.mxu1 %v4040_v34  ;;  %v411_v60 = vrot.slane %v409_v50, 4  ;;  %v410_v62 = vsel %vm5184_vm2, %v3737_v54, %v409_v50  ;;  %v5263_v5 = vld [vmem:[%s5171_s10 + $0x1c] sm:$0xf]  ;;  %v238_v7 = vld [vmem:[%s5171_s10 + $0x20] sm:$0x1]  ;;  %v3726_v8 = vrot.slane %v237_v6, 9 }
  0x1c   : > { %4402 = vmatpush3.bf16.msra.mxu0 %v4963_v22  ;;  %4924 = vmatpush3.bf16.msra.mxu1 %v4963_v22  ;;  %v329_v61 = vsel %vm5184_vm2, %v327_v53, %v328_v45  ;;  %v332_v9 = vrot.slane %v5263_v5, 5  ;;  %v5269_v10 = vld [vmem:[%s5171_s10 + $0xac] sm:$0xf]  ;;  %v335_v12 = vrot.slane %v238_v7, 5  ;;  %v261_v13 = vld [vmem:[%s5171_s10 + $0xa8] sm:$0xe] }
  0x1d   : > { %4403 = vmatprep.subr.bf16.mxu0 %v4964_v26  ;;  %4917 = vmatprep.subr.bf16.mxu1 %v4964_v26  ;;  %v4029_v63 = vcombine.low %v326_v52, %v329_v61  ;;  %v413_v0 = vsel %vm5184_vm2, %v411_v60, %v412_v55  ;;  %v262_v15 = vld [vmem:[%s5171_s10 + $0xb0] sm:$0x1]  ;;  %v416_v16 = vrot.slane %v5269_v10, 5  ;;  %v3738_v20 = vrot.slane %v261_v13, 9  ;;  %v4980_v29 = vld [vmem:[%s6710_s1 + $0xd8] sm:$0xff]   ;;  %v4984_v41 = vld [vmem:[%s6710_s1 + $0xe0] sm:$0xff]  }
  0x1e   : > { %v4041_v2 = vcombine.low %v410_v62, %v413_v0  ;;  %v4978_v17 = vld [vmem:[%s6710_s1 + $0xd0] sm:$0xff]   ;;  %v333_v18 = vsel %vm5184_vm2, %v3726_v8, %v332_v9  ;;  %v334_v19 = vrot.slane %v332_v9, 4  ;;  %v419_v21 = vrot.slane %v262_v15, 5  ;;  %v4981_v34 = vld [vmem:[%s6710_s1 + $0x98] sm:$0xff]   ;;  %v5305_v37 = vld [vmem:[%s5171_s10 + $0x28] sm:$0xf] }
  0x1f   : > { %v4979_v22 = vld [vmem:[%s6710_s1 + $0x90] sm:$0xff]   ;;  %v418_v23 = vrot.slane %v416_v16, 4  ;;  %v4025_v26 = vcombine.low %v227_v4, %v5230_v46  ;;  %v417_v28 = vsel %vm5184_vm2, %v3738_v20, %v416_v16  ;;  %v239_v38 = vld [vmem:[%s5171_s10 + $0x24] sm:$0xe]  ;;  %v240_v40 = vld [vmem:[%s5171_s10 + $0x2c] sm:$0x1] }
  0x20   : > { %4404 = vmatpush3.bf16.msra.mxu0 %v4965_v33  ;;  %4925 = vmatpush3.bf16.msra.mxu1 %v4965_v33  ;;  %v336_v27 = vsel %vm5184_vm2, %v334_v19, %v335_v12  ;;  %v205_v33 = vld [vmem:[%s5171_s10 + $0x18] sm:$0xf]  ;;  %v339_v43 = vrot.slane %v5305_v37, 5  ;;  %v342_v44 = vrot.slane %v240_v40, 5  ;;  %v263_v48 = vld [vmem:[%s5171_s10 + $0xb4] sm:$0xe] }
  0x21   : > { %4405 = vmatprep.subr.bf16.mxu0 %v4966_v35  ;;  %4918 = vmatprep.subr.bf16.mxu1 %v4966_v35  ;;  %v4030_v30 = vcombine.low %v333_v18, %v336_v27  ;;  %v420_v31 = vsel %vm5184_vm2, %v418_v23, %v419_v21  ;;  %v4987_v35 = vld [vmem:[%s6710_s1 + $0x108] sm:$0xff]   ;;  %v5314_v45 = vld [vmem:[%s5171_s10 + $0xb8] sm:$0xf]  ;;  %v4014_v46 = vcombine.low %v205_v33, %v5263_v5  ;;  %v264_v49 = vld [vmem:[%s5171_s10 + $0xbc] sm:$0x1]  ;;  %v3739_v54 = vrot.slane %v263_v48, 9 }
  0x22   : > { %v4042_v32 = vcombine.low %v417_v28, %v420_v31  ;;  %v423_v50 = vrot.slane %v5314_v45, 5  ;;  %v341_v53 = vrot.slane %v339_v43, 4  ;;  %v426_v55 = vrot.slane %v264_v49, 5  ;;  %v207_v0 = vld [vmem:[%s5171_s10 + $0x24] sm:$0xf]  ;;  %v4997_v4 = vld [vmem:[%s6710_s1 + $0x110] sm:$0xff]  }
  0x23   : > { %v231_v3 = vld [vmem:[%s5171_s10 + $0xb4] sm:$0xf]  ;;  %v241_v7 = vld [vmem:[%s5171_s10 + $0x30] sm:$0xe]  ;;  %v242_v8 = vld [vmem:[%s5171_s10 + $0x38] sm:$0x1]  ;;  %v4015_v15 = vcombine.low %v207_v0, %v5305_v37 }
  0x24   : > { %4406 = vmatpush3.bf16.msra.mxu0 %v4967_v36  ;;  %4926 = vmatpush3.bf16.msra.mxu1 %v4967_v36  ;;  %v229_v36 = vld [vmem:[%s5171_s10 + $0xa8] sm:$0xf]  ;;  %v343_v60 = vsel %vm5184_vm2, %v341_v53, %v342_v44  ;;  %v424_v61 = vsel %vm5184_vm2, %v3739_v54, %v423_v50  ;;  %v5351_v6 = vld [vmem:[%s5171_s10 + $0x34] sm:$0xf]  ;;  %v3728_v9 = vrot.slane %v241_v7, 9  ;;  %v4027_v16 = vcombine.low %v231_v3, %v5314_v45  ;;  %v5004_v33 = vld [vmem:[%s6710_s1 + $0x158] sm:$0xff]  }
  0x25   : > { %4503 = vmatprep.subr.bf16.mxu1 %v4970_v42  ;;  %4615 = vmatprep.subr.bf16.mxu0 %v4973_v47  ;;  %v3727_v42 = vrot.slane %v239_v38, 9  ;;  %v4026_v47 = vcombine.low %v229_v36, %v5269_v10  ;;  %v346_v10 = vrot.slane %v5351_v6, 5  ;;  %v3756_v12 = vld [vmem:[%s5171_s10 + $0x18] sm:$0xf]  ;;  %v5360_v18 = vld [vmem:[%s5171_s10 + $0x1c] sm:$0xf] }
  0x26   : > { %v4993_v19 = vld [vmem:[%s6710_s1 + $0xb0] sm:$0xff]   ;;  %v4060_v27 = vcombine.low %v3756_v12, %v5360_v18  ;;  %v429_v28 = vld [vmem:[%s5171_s10 + $0x8] sm:$0x3]  ;;  %v243_v36 = vld [vmem:[%s5171_s10 + $0x3c] sm:$0xe] }
  0x27   : > { %2655 = vmatmul.mubr.bf16.vlgmr.msra.gmra.mrb[0].mxu0 %v4012_v56  ;;  %2751 = vmatmul.mubr.bf16.vlgmr.msra.gmra.mrb[0].mxu1 %v4024_v57  ;;  %v340_v52 = vsel %vm5184_vm2, %v3727_v42, %v339_v43  ;;  %v497_v56 = vrot.slane %v5180_v11, 6  ;;  %v4988_v57 = vld [vmem:[%s6710_s1 + $0xe8] sm:$0xff]   ;;  %v347_v20 = vsel %vm5184_vm2, %v3728_v9, %v346_v10  ;;  %v348_v21 = vrot.slane %v346_v10, 4  ;;  %v209_v38 = vld [vmem:[%s5171_s10 + $0x30] sm:$0xf]  ;;  %v5000_v45 = vld [vmem:[%s6710_s1 + $0x1c0] sm:$0xff]  }
  0x28   : > { %4504 = vmatpush3.bf16.msra.mxu1 %v4971_v51  ;;  %4616 = vmatpush3.bf16.msra.mxu0 %v4975_v59  ;;  %v4986_v51 = vld [vmem:[%s6710_s1 + $0xa0] sm:$0xff]   ;;  %v4995_v59 = vld [vmem:[%s6710_s1 + $0x150] sm:$0xff]   ;;  %v4989_v11 = vld [vmem:[%s6710_s1 + $0xa8] sm:$0xff]   ;;  %v4031_v62 = vcombine.low %v340_v52, %v343_v60  ;;  %v3729_v43 = vrot.slane %v243_v36, 9 }
  0x29   : > { %4505 = vmatprep.subr.bf16.mxu1 %v4972_v58  ;;  %2662 = vmatprep.mubr.bf16.mxu0 %v4029_v63  ;;  %v425_v58 = vrot.slane %v423_v50, 4  ;;  %v499_v13 = vrot.slane %v497_v56, 4  ;;  %v244_v42 = vld [vmem:[%s5171_s10 + $0x44] sm:$0x1]  ;;  %v5005_v49 = vld [vmem:[%s6710_s1 + $0x118] sm:$0xff]   ;;  %v5009_v10 = vld [vmem:[%s6710_s1 + $0x188] sm:$0xff]  }
  0x2a   : > { %2758 = vmatprep.mubr.bf16.mxu1 %v4041_v2  ;;  %4617 = vmatprep.subr.bf16.mxu0 %v4985_v24  ;;  %v4992_v2 = vld [vmem:[%s6710_s1 + $0xf0] sm:$0xff]   ;;  %v504_v24 = vrot.slane %v5221_v39, 6  ;;  %v5001_v50 = vld [vmem:[%s6710_s1 + $0x180] sm:$0xff]   ;;  %v5415_v53 = vld [vmem:[%s5171_s10 + $0x28] sm:$0xf] }
  0x2b   : > { %v427_v63 = vsel %vm5184_vm2, %v425_v58, %v426_v55  ;;  %v430_v54 = vld [vmem:[%s5171_s10 + $0xc] sm:$0xc]  ;;  %v4016_v55 = vcombine.low %v209_v38, %v5351_v6  ;;  %v211_v7 = vld [vmem:[%s5171_s10 + $0x3c] sm:$0xf]  ;;  %v5011_v12 = vld [vmem:[%s6710_s1 + $0x120] sm:$0xff]  }
  0x2c   : > { %4506 = vmatpush3.bf16.msra.mxu1 %v4974_v1  ;;  %4618 = vmatpush3.bf16.msra.mxu0 %v4987_v35  ;;  %v4043_v1 = vcombine.low %v424_v61, %v427_v63  ;;  %v5390_v35 = vld [vmem:[%s5171_s10 + $0x40] sm:$0xf]  ;;  %v506_v48 = vrot.slane %v504_v24, 4  ;;  %v3741_v58 = vrot.slane %v430_v54, 10  ;;  %v5430_v0 = vld [vmem:[%s5171_s10 + $0x4c] sm:$0xf] }
  0x2d   : > { %4507 = vmatprep.subr.bf16.mxu1 %v4978_v17  ;;  %4619 = vmatprep.subr.bf16.mxu0 %v4995_v59  ;;  %v349_v17 = vrot.slane %v242_v8, 5  ;;  %v353_v44 = vrot.slane %v5390_v35, 5  ;;  %v5008_v59 = vld [vmem:[%s6710_s1 + $0x1c8] sm:$0xff]   ;;  %v5458_v39 = vld [vmem:[%s5171_s10 + $0x34] sm:$0xf] }
  0x2f   : > { %2663 = vmatmul.mubr.bf16.gmra.mrb[4].mxu0 %v4013_v25  ;;  %2759 = vmatmul.mubr.bf16.gmra.mrb[4].mxu1 %v4025_v26  ;;  %v511_v25 = vrot.slane %v5263_v5, 6  ;;  %v4994_v26 = vld [vmem:[%s6710_s1 + $0xf8] sm:$0xff]   ;;  %v350_v31 = vsel %vm5184_vm2, %v348_v21, %v349_v17  ;;  %v355_v52 = vrot.slane %v353_v44, 4  ;;  %v3760_v17 = vld [vmem:[%s5171_s10 + $0x30] sm:$0xf] }
  0x30   : > { %4508 = vmatpush3.bf16.msra.mxu1 %v4979_v22  ;;  %2670 = vmatprep.mubr.bf16.mxu0 %v4030_v30  ;;  %v428_v22 = vld [vmem:[%s5171_s10] sm:$0xc]  ;;  %v4996_v30 = vld [vmem:[%s6710_s1 + $0xb8] sm:$0xff]  }
  0x31   : > { %4509 = vmatprep.subr.bf16.mxu1 %v4980_v29  ;;  %2766 = vmatprep.mubr.bf16.mxu1 %v4042_v32  ;;  %v3740_v29 = vrot.slane %v428_v22, 10  ;;  %v500_v32 = vrot.slane %v429_v28, 6  ;;  %v513_v9 = vrot.slane %v511_v25, 4  ;;  %v433_v22 = vld [vmem:[%s5171_s10 + $0x20] sm:$0x3]  ;;  %v4017_v28 = vcombine.low %v211_v7, %v5390_v35 }
  0x32   : > { %4620 = vmatpush3.bf16.msra.mxu0 %v4997_v4  ;;  %v360_v4 = vrot.slane %v5430_v0, 5  ;;  %v249_v5 = vld [vmem:[%s5171_s10 + $0x60] sm:$0xe]  ;;  %v3764_v7 = vld [vmem:[%s5171_s10 + $0x48] sm:$0xf] }
  0x33   : > { %v498_v40 = vsel %vm5370_vm5, %v3740_v29, %v497_v56  ;;  %4621 = vmatprep.subr.bf16.mxu0 %v5004_v33  ;;  %v247_v33 = vld [vmem:[%s5171_s10 + $0x54] sm:$0xe] }
  0x34   : > { %4510 = vmatpush3.bf16.msra.mxu1 %v4981_v34  ;;  %v4032_v34 = vcombine.low %v347_v20, %v350_v31  ;;  %v5016_v20 = vld [vmem:[%s6710_s1 + $0x168] sm:$0xff]   ;;  %v4062_v31 = vcombine.low %v3760_v17, %v5458_v39  ;;  %v3731_v38 = vrot.slane %v247_v33, 9 }
  0x35   : > { %4511 = vmatprep.subr.bf16.mxu1 %v4984_v41  ;;  %v501_v41 = vsel %vm5370_vm5, %v499_v13, %v500_v32  ;;  %v505_v13 = vsel %vm5370_vm5, %v3741_v58, %v504_v24  ;;  %v5466_v32 = vld [vmem:[%s5171_s10 + $0x58] sm:$0xf]  ;;  %v251_v17 = vld [vmem:[%s5171_s10 + $0x6c] sm:$0xe] }
  0x36   : > { %v4044_v56 = vcombine.low %v498_v40, %v501_v41  ;;  %4622 = vmatpush3.bf16.msra.mxu0 %v5005_v49  ;;  %v367_v36 = vrot.slane %v5466_v32, 5  ;;  %v213_v41 = vld [vmem:[%s5171_s10 + $0x48] sm:$0xf]  ;;  %v5487_v49 = vld [vmem:[%s5171_s10 + $0x64] sm:$0xf]  ;;  %v3733_v33 = vrot.slane %v251_v17, 9 }
  0x37   : > { %2671 = vmatmul.mubr.bf16.gmra.mrb[8].mxu0 %v4014_v46  ;;  %2767 = vmatmul.mubr.bf16.gmra.mrb[8].mxu1 %v4026_v47  ;;  %v356_v46 = vrot.slane %v244_v42, 5  ;;  %v3758_v47 = vld [vmem:[%s5171_s10 + $0x24] sm:$0xf]  ;;  %v374_v54 = vrot.slane %v5487_v49, 5 }
  0x38   : > { %4512 = vmatpush3.bf16.msra.mxu1 %v4986_v51  ;;  %2678 = vmatprep.mubr.bf16.mxu0 %v4031_v62  ;;  %v354_v51 = vsel %vm5184_vm2, %v3729_v43, %v353_v44  ;;  %v4061_v63 = vcombine.low %v3758_v47, %v5415_v53  ;;  %v369_v42 = vrot.slane %v367_v36, 4  ;;  %v518_v43 = vrot.slane %v5305_v37, 6  ;;  %v5017_v44 = vld [vmem:[%s6710_s1 + $0x1d0] sm:$0xff]   ;;  %v3762_v47 = vld [vmem:[%s5171_s10 + $0x3c] sm:$0xf] }
  0x39   : > { %4513 = vmatprep.subr.bf16.mxu1 %v4988_v57  ;;  %2774 = vmatprep.mubr.bf16.mxu1 %v4043_v1  ;;  %v431_v57 = vld [vmem:[%s5171_s10 + $0x14] sm:$0x3]  ;;  %v357_v60 = vsel %vm5184_vm2, %v355_v52, %v356_v46  ;;  %v245_v1 = vld [vmem:[%s5171_s10 + $0x48] sm:$0xe]  ;;  %v368_v37 = vsel %vm5184_vm2, %v3731_v38, %v367_v36  ;;  %v435_v52 = vld [vmem:[%s5171_s10 + $0x2c] sm:$0x3] }
  0x3a   : > { %v507_v61 = vrot.slane %v431_v57, 6  ;;  %v4033_v62 = vcombine.low %v354_v51, %v357_v60  ;;  %v3730_v3 = vrot.slane %v245_v1, 9  ;;  %v434_v51 = vld [vmem:[%s5171_s10 + $0x24] sm:$0xc]  ;;  %v5537_v38 = vld [vmem:[%s5171_s10 + $0x7c] sm:$0xf] }
  0x3c   : > { %4514 = vmatpush3.bf16.msra.mxu1 %v4989_v11  ;;  %v5010_v11 = vld [vmem:[%s6710_s1 + $0x160] sm:$0xff]   ;;  %v361_v21 = vsel %vm5184_vm2, %v3730_v3, %v360_v4  ;;  %v525_v3 = vrot.slane %v5351_v6, 6  ;;  %v436_v6 = vld [vmem:[%s5171_s10 + $0x30] sm:$0xc] }
  0x3d   : > { %4515 = vmatprep.subr.bf16.mxu1 %v4992_v2  ;;  %v246_v2 = vld [vmem:[%s5171_s10 + $0x50] sm:$0x1]  ;;  %4623 = vmatprep.subr.bf16.mxu0 %v5010_v11  ;;  %v521_v11 = vrot.slane %v435_v52, 6  ;;  %v253_v52 = vld [vmem:[%s5171_s10 + $0x78] sm:$0xe] }
  0x3e   : > { %v363_v8 = vrot.slane %v246_v2, 5  ;;  %4624 = vmatpush3.bf16.msra.mxu0 %v5011_v12  ;;  %v215_v2 = vld [vmem:[%s5171_s10 + $0x54] sm:$0xf]  ;;  %v5518_v12 = vld [vmem:[%s5171_s10 + $0x70] sm:$0xf] }
  0x3f   : > { %2679 = vmatmul.mubr.bf16.gmra.mrb[12].mxu0 %v4015_v15  ;;  %2775 = vmatmul.mubr.bf16.gmra.mrb[12].mxu1 %v4027_v16  ;;  %v508_v15 = vsel %vm5370_vm5, %v506_v48, %v507_v61  ;;  %v362_v16 = vrot.slane %v360_v4, 4  ;;  %v5484_v48 = vld [vmem:[%s5171_s10 + $0x40] sm:$0xf]  ;;  %v3743_v61 = vrot.slane %v434_v51, 10  ;;  %v5019_v4 = vld [vmem:[%s6710_s1 + $0x190] sm:$0xff]  }
  0x40   : > { %4516 = vmatpush3.bf16.msra.mxu1 %v4993_v19  ;;  %2815 = vmatprep.mubr.bf16.mxu1 %v4060_v27  ;;  %v432_v19 = vld [vmem:[%s5171_s10 + $0x18] sm:$0xc]  ;;  %v514_v27 = vrot.slane %v433_v22, 6  ;;  %v4045_v29 = vcombine.low %v505_v13, %v508_v15  ;;  %v4063_v58 = vcombine.low %v3762_v47, %v5484_v48  ;;  %v4019_v22 = vcombine.low %v215_v2, %v5466_v32  ;;  %v439_v51 = vld [vmem:[%s5171_s10 + $0x44] sm:$0x3] }
  0x41   : > { %4517 = vmatprep.subr.bf16.mxu1 %v4994_v26  ;;  %2686 = vmatprep.mubr.bf16.mxu0 %v4032_v34  ;;  %v364_v24 = vsel %vm5184_vm2, %v362_v16, %v363_v8  ;;  %v3742_v26 = vrot.slane %v432_v19, 10  ;;  %v248_v34 = vld [vmem:[%s5171_s10 + $0x5c] sm:$0x1]  ;;  %v519_v8 = vsel %vm5370_vm5, %v3743_v61, %v518_v43  ;;  %v437_v16 = vld [vmem:[%s5171_s10 + $0x38] sm:$0x3]  ;;  %v381_v19 = vrot.slane %v5518_v12, 5 }
  0x42   : > { %4625 = vmatprep.subr.bf16.mxu0 %v5016_v20  ;;  %v370_v40 = vrot.slane %v248_v34, 5  ;;  %v515_v46 = vsel %vm5370_vm5, %v513_v9, %v514_v27  ;;  %v5022_v20 = vld [vmem:[%s6710_s1 + $0x170] sm:$0xff]   ;;  %v527_v27 = vrot.slane %v525_v3, 4  ;;  %v532_v47 = vrot.slane %v5390_v35, 6  ;;  %v5571_v2 = vld [vmem:[%s5171_s10 + $0x88] sm:$0xf] }
  0x43   : > { %v383_v34 = vrot.slane %v381_v19, 4  ;;  %v3734_v61 = vrot.slane %v253_v52, 9  ;;  %v443_v52 = vld [vmem:[%s5171_s10 + $0x5c] sm:$0x3] }
  0x44   : > { %4518 = vmatpush3.bf16.msra.mxu1 %v4996_v30  ;;  %v4034_v30 = vcombine.low %v361_v21, %v364_v24  ;;  %v252_v21 = vld [vmem:[%s5171_s10 + $0x74] sm:$0x1] }
  0x45   : > { %4727 = vmatprep.subr.bf16.mxu1 %v5000_v45  ;;  %v512_v45 = vsel %vm5370_vm5, %v3742_v26, %v511_v25  ;;  %v250_v25 = vld [vmem:[%s5171_s10 + $0x68] sm:$0x1]  ;;  %v3744_v26 = vrot.slane %v436_v6, 10  ;;  %v384_v36 = vrot.slane %v252_v21, 5 }
  0x46   : > { %v4046_v57 = vcombine.low %v512_v45, %v515_v46  ;;  %v377_v1 = vrot.slane %v250_v25, 5  ;;  %v5549_v45 = vld [vmem:[%s5171_s10 + $0x58] sm:$0xf]  ;;  %v438_v46 = vld [vmem:[%s5171_s10 + $0x3c] sm:$0xc] }
  0x47   : > { %2687 = vmatmul.mubr.bf16.gmra.mrb[16].mxu0 %v4016_v55  ;;  %2816 = vmatmul.mubr.bf16.vlgmr.msra.gmra.mrb[16].mxu1 %v4044_v56  ;;  %v5018_v55 = vld [vmem:[%s6710_s1 + $0x128] sm:$0xff]   ;;  %v4018_v56 = vcombine.low %v213_v41, %v5430_v0  ;;  %v217_v41 = vld [vmem:[%s5171_s10 + $0x60] sm:$0xf] }
  0x48   : > { %4728 = vmatpush3.bf16.msra.mxu1 %v5001_v50  ;;  %2694 = vmatprep.mubr.bf16.mxu0 %v4033_v62  ;;  %v371_v50 = vsel %vm5184_vm2, %v369_v42, %v370_v40  ;;  %v3732_v62 = vrot.slane %v249_v5, 9  ;;  %v5026_v40 = vld [vmem:[%s6710_s1 + $0x1d8] sm:$0xff]   ;;  %v3766_v42 = vld [vmem:[%s5171_s10 + $0x54] sm:$0xf]  ;;  %v388_v5 = vrot.slane %v5537_v38, 5 }
  0x49   : > { %2823 = vmatprep.mubr.bf16.mxu1 %v4061_v63  ;;  %4729 = vmatprep.subr.bf16.mxu1 %v5008_v59  ;;  %v520_v59 = vrot.slane %v518_v43, 4  ;;  %v4035_v60 = vcombine.low %v368_v37, %v371_v50  ;;  %v376_v63 = vrot.slane %v374_v54, 4  ;;  %v526_v43 = vsel %vm5370_vm5, %v3744_v26, %v525_v3  ;;  %v254_v25 = vld [vmem:[%s5171_s10 + $0x80] sm:$0x1] }
  0x4a   : > { %4626 = vmatpush3.bf16.msra.mxu0 %v5018_v55  ;;  %v375_v13 = vsel %vm5184_vm2, %v3732_v62, %v374_v54  ;;  %v382_v37 = vsel %vm5184_vm2, %v3733_v33, %v381_v19  ;;  %v385_v50 = vsel %vm5184_vm2, %v383_v34, %v384_v36  ;;  %v4020_v54 = vcombine.low %v217_v41, %v5487_v49  ;;  %v3768_v3 = vld [vmem:[%s5171_s10 + $0x60] sm:$0xf]  ;;  %v255_v19 = vld [vmem:[%s5171_s10 + $0x84] sm:$0xe]  ;;  %v221_v36 = vld [vmem:[%s5171_s10 + $0x78] sm:$0xf] }
  0x4b   : > { %v522_v9 = vsel %vm5370_vm5, %v520_v59, %v521_v11  ;;  %v378_v15 = vsel %vm5184_vm2, %v376_v63, %v377_v1  ;;  %4627 = vmatprep.subr.bf16.mxu0 %v5022_v20  ;;  %v4065_v35 = vcombine.low %v3766_v42, %v5549_v45  ;;  %v534_v59 = vrot.slane %v532_v47, 4  ;;  %v5030_v63 = vld [vmem:[%s6710_s1 + $0x178] sm:$0xff]   ;;  %v219_v1 = vld [vmem:[%s5171_s10 + $0x6c] sm:$0xf]  ;;  %v5033_v34 = vld [vmem:[%s6710_s1 + $0x1e0] sm:$0xff]  }
  0x4c   : > { %4730 = vmatpush3.bf16.msra.mxu1 %v5009_v10  ;;  %v5514_v10 = vld [vmem:[%s5171_s10 + $0x4c] sm:$0xf]  ;;  %v4047_v24 = vcombine.low %v519_v8, %v522_v9  ;;  %v390_v11 = vrot.slane %v388_v5, 4  ;;  %v391_v62 = vrot.slane %v254_v25, 5  ;;  %v539_v8 = vrot.slane %v5430_v0, 6  ;;  %v5031_v9 = vld [vmem:[%s6710_s1 + $0x138] sm:$0xff]  }
  0x4d   : > { %4731 = vmatprep.subr.bf16.mxu1 %v5017_v44  ;;  %v395_v0 = vrot.slane %v5571_v2, 5  ;;  %v256_v20 = vld [vmem:[%s5171_s10 + $0x8c] sm:$0x1]  ;;  %v4021_v21 = vcombine.low %v219_v1, %v5518_v12  ;;  %v5602_v41 = vld [vmem:[%s5171_s10 + $0x70] sm:$0xf] }
  0x4e   : > { %v392_v17 = vsel %vm5184_vm2, %v390_v11, %v391_v62  ;;  %v398_v33 = vrot.slane %v256_v20, 5  ;;  %v442_v42 = vld [vmem:[%s5171_s10 + $0x54] sm:$0xc]  ;;  %v3836_v25 = vld [vmem:[%s5171_s10 + $0x18] sm:$0xc] }
  0x4f   : > { %2695 = vmatmul.mubr.bf16.gmra.mrb[20].mxu0 %v4017_v28  ;;  %2824 = vmatmul.mubr.bf16.gmra.mrb[20].mxu1 %v4045_v29  ;;  %v5023_v28 = vld [vmem:[%s6710_s1 + $0x130] sm:$0xff]   ;;  %v4036_v29 = vcombine.low %v375_v13, %v378_v15  ;;  %v3868_v11 = vrot.slane %v3836_v25, 10  ;;  %v445_v1 = vld [vmem:[%s5171_s10 + $0x68] sm:$0x3]  ;;  %v3790_v25 = vld [vmem:[%s5171_s10 + $0x24] sm:$0xe] }
  0x50   : > { %2702 = vmatprep.mubr.bf16.mxu0 %v4034_v30  ;;  %2831 = vmatprep.mubr.bf16.mxu1 %v4062_v31  ;;  %v4064_v30 = vcombine.low %v3764_v7, %v5514_v10  ;;  %v528_v31 = vrot.slane %v437_v16, 6  ;;  %v440_v7 = vld [vmem:[%s5171_s10 + $0x48] sm:$0xc]  ;;  %v441_v15 = vld [vmem:[%s5171_s10 + $0x50] sm:$0x3]  ;;  %v389_v16 = vsel %vm5184_vm2, %v3734_v61, %v388_v5  ;;  %v725_v5 = vrot.slane %v5360_v18, 5 }
  0x51   : > { %4732 = vmatpush3.bf16.msra.mxu1 %v5019_v4  ;;  %4628 = vmatpush3.bf16.msra.mxu0 %v5023_v28  ;;  %v5575_v4 = vld [vmem:[%s5171_s10 + $0x64] sm:$0xf]  ;;  %v4038_v26 = vcombine.low %v389_v16, %v392_v17  ;;  %v3746_v28 = vrot.slane %v440_v7, 10  ;;  %v553_v61 = vrot.slane %v5487_v49, 6  ;;  %v5643_v16 = vld [vmem:[%s5171_s10 + $0x7c] sm:$0xf] }
  0x52   : > { %v529_v44 = vsel %vm5370_vm5, %v527_v27, %v528_v31  ;;  %4733 = vmatprep.subr.bf16.mxu1 %v5026_v40  ;;  %4629 = vmatprep.subr.bf16.mxu0 %v5030_v63  ;;  %v4066_v27 = vcombine.low %v3768_v3, %v5575_v4  ;;  %v397_v31 = vrot.slane %v395_v0, 4  ;;  %v3770_v40 = vld [vmem:[%s5171_s10 + $0x6c] sm:$0xf]  ;;  %v444_v63 = vld [vmem:[%s5171_s10 + $0x60] sm:$0xc]  ;;  %v727_v7 = vrot.slane %v725_v5, 4 }
  0x53   : > { %v4048_v55 = vcombine.low %v526_v43, %v529_v44  ;;  %v5034_v43 = vld [vmem:[%s6710_s1 + $0x1a0] sm:$0xff]   ;;  %v546_v44 = vrot.slane %v5466_v32, 6  ;;  %v3788_v3 = vld [vmem:[%s5171_s10 + $0x18] sm:$0xe]  ;;  %v3748_v17 = vrot.slane %v444_v63, 10  ;;  %v3821_v63 = vrot.slane %v3790_v25, 9 }
  0x54   : > { %v399_v32 = vsel %vm5184_vm2, %v397_v31, %v398_v33  ;;  %v5039_v31 = vld [vmem:[%s6710_s1 + $0x1a8] sm:$0xff]   ;;  %v450_v25 = vld [vmem:[%s5171_s10 + $0x84] sm:$0xc] }
  0x55   : > { %4630 = vmatpush3.bf16.msra.mxu0 %v5031_v9  ;;  %v223_v9 = vld [vmem:[%s5171_s10 + $0x84] sm:$0xf] }
  0x57   : > { %2703 = vmatmul.mubr.bf16.gmra.mrb[24].mxu0 %v4018_v56  ;;  %2832 = vmatmul.mubr.bf16.gmra.mrb[24].mxu1 %v4046_v57  ;;  %v5027_v56 = vld [vmem:[%s6710_s1 + $0x198] sm:$0xff]   ;;  %v4037_v57 = vcombine.low %v382_v37, %v385_v50  ;;  %v901_v50 = vrot.slane %v5360_v18, 6 }
  0x58   : > { %2710 = vmatprep.mubr.bf16.mxu0 %v4035_v60  ;;  %2839 = vmatprep.mubr.bf16.mxu1 %v4063_v58  ;;  %v3745_v58 = vrot.slane %v438_v46, 10  ;;  %v535_v60 = vrot.slane %v439_v51, 6  ;;  %v5612_v46 = vld [vmem:[%s6710_s1 + $0x200] sm:$0xff]  }
  0x59   : > { %4734 = vmatpush3.bf16.msra.mxu1 %v5027_v56  ;;  %4863 = vmatprep.subr.bf16.mxu0 %v5612_v46  ;;  %v4067_v56 = vcombine.low %v3770_v40, %v5602_v41  ;;  %v903_v18 = vrot.slane %v901_v50, 4  ;;  %v554_v40 = vsel %vm5370_vm5, %v3748_v17, %v553_v61 }
  0x5a   : > { %v533_v6 = vsel %vm5370_vm5, %v3745_v58, %v532_v47  ;;  %v536_v13 = vsel %vm5370_vm5, %v534_v59, %v535_v60  ;;  %v540_v47 = vsel %vm5370_vm5, %v3746_v28, %v539_v8  ;;  %4735 = vmatprep.subr.bf16.mxu1 %v5033_v34  ;;  %v548_v59 = vrot.slane %v546_v44, 4 }
  0x5b   : > { %v549_v60 = vrot.slane %v443_v52, 6  ;;  %v4023_v28 = vcombine.low %v223_v9, %v5571_v2  ;;  %v447_v52 = vld [vmem:[%s5171_s10 + $0x74] sm:$0x3] }
  0x5d   : > { %4736 = vmatpush3.bf16.msra.mxu1 %v5034_v43 }
  0x5f   : > { %2711 = vmatmul.mubr.bf16.gmra.mrb[28].mxu0 %v4019_v22  ;;  %2840 = vmatmul.mubr.bf16.gmra.mrb[28].mxu1 %v4047_v24  ;;  %v4049_v22 = vcombine.low %v533_v6, %v536_v13  ;;  %v541_v24 = vrot.slane %v539_v8, 4  ;;  %v908_v8 = vrot.slane %v5415_v53, 6  ;;  %v3789_v6 = vld [vmem:[%s5171_s10 + $0x20] sm:$0x1]  ;;  %v550_v13 = vsel %vm5370_vm5, %v548_v59, %v549_v60 }
  0x60   : > { %2718 = vmatprep.mubr.bf16.mxu0 %v4036_v29  ;;  %2847 = vmatprep.mubr.bf16.mxu1 %v4064_v30  ;;  %v542_v29 = vrot.slane %v441_v15, 6  ;;  %v3735_v30 = vrot.slane %v255_v19, 9  ;;  %v3772_v15 = vld [vmem:[%s5171_s10 + $0x78] sm:$0xf]  ;;  %v902_v19 = vsel %vm5370_vm5, %v3868_v11, %v901_v50  ;;  %v3840_v11 = vld [vmem:[%s5171_s10 + $0x30] sm:$0xc] }
  0x61   : > { %v4068_v33 = vcombine.low %v3772_v15, %v5643_v16 }
  0x62   : > { %v543_v37 = vsel %vm5370_vm5, %v541_v24, %v542_v29  ;;  %v396_v51 = vsel %vm5184_vm2, %v3735_v30, %v395_v0  ;;  %v555_v0 = vrot.slane %v553_v61, 4  ;;  %v728_v24 = vrot.slane %v3789_v6, 5  ;;  %v3839_v30 = vld [vmem:[%s5171_s10 + $0x2c] sm:$0x3]  ;;  %v3776_v6 = vld [vmem:[%s5171_s10 + $0x90] sm:$0xf] }
  0x63   : > { %v4039_v58 = vcombine.low %v396_v51, %v399_v32  ;;  %v911_v50 = vrot.slane %v3839_v30, 6  ;;  %v732_v51 = vrot.slane %v5415_v53, 5  ;;  %v446_v32 = vld [vmem:[%s5171_s10 + $0x6c] sm:$0xc]  ;;  %v5044_v53 = vld [vmem:[%s6710_s1 + $0x1b0] sm:$0xff]   ;;  %v563_v61 = vrot.slane %v447_v52, 6 }
  0x64   : > { %v3749_v60 = vrot.slane %v446_v32, 10  ;;  %v922_v30 = vrot.slane %v5484_v48, 6 }
  0x67   : > { %2719 = vmatmul.mubr.bf16.gmra.mrb[32].mxu0 %v4020_v54  ;;  %2848 = vmatmul.mubr.bf16.gmra.mrb[32].mxu1 %v4048_v55  ;;  %v3837_v54 = vld [vmem:[%s5171_s10 + $0x20] sm:$0x3]  ;;  %v4022_v55 = vcombine.low %v221_v36, %v5537_v38  ;;  %v5043_v36 = vld [vmem:[%s6710_s1 + $0x1f0] sm:$0xff]  }
  0x68   : > { %2726 = vmatprep.mubr.bf16.mxu0 %v4037_v57  ;;  %2855 = vmatprep.mubr.bf16.mxu1 %v4065_v35  ;;  %v4050_v35 = vcombine.low %v540_v47, %v543_v37  ;;  %v3747_v57 = vrot.slane %v442_v42, 10  ;;  %v904_v62 = vrot.slane %v3837_v54, 6  ;;  %v910_v37 = vrot.slane %v908_v8, 4  ;;  %v3791_v54 = vld [vmem:[%s5171_s10 + $0x2c] sm:$0x1] }
  0x6a   : > { %v547_v49 = vsel %vm5370_vm5, %v3747_v57, %v546_v44  ;;  %v905_v20 = vsel %vm5370_vm5, %v903_v18, %v904_v62  ;;  %v729_v44 = vsel %vm5184_vm2, %v727_v7, %v728_v24  ;;  %v3774_v57 = vld [vmem:[%s5171_s10 + $0x84] sm:$0xf]  ;;  %v912_v59 = vsel %vm5370_vm5, %v910_v37, %v911_v50  ;;  %v3841_v18 = vld [vmem:[%s5171_s10 + $0x38] sm:$0x3] }
  0x6b   : > { %v4051_v29 = vcombine.low %v547_v49, %v550_v13  ;;  %v4092_v34 = vcombine.low %v902_v19, %v905_v20  ;;  %v5696_v49 = vld [vmem:[%s5171_s10 + $0x94] sm:$0xf]  ;;  %v3870_v13 = vrot.slane %v3840_v11, 10  ;;  %v918_v17 = vrot.slane %v3841_v18, 6  ;;  %v3793_v24 = vld [vmem:[%s5171_s10 + $0x38] sm:$0x1] }
  0x6c   : > { %v739_v19 = vrot.slane %v5458_v39, 5  ;;  %v742_v50 = vrot.slane %v3793_v24, 5  ;;  %v5746_v11 = vld [vmem:[%s5171_s10 + $0xa0] sm:$0xf]  ;;  %v574_v18 = vrot.slane %v5571_v2, 6 }
  0x6d   : > { %v3845_v2 = vld [vmem:[%s5171_s10 + $0x50] sm:$0x3] }
  0x6e   : > { %v741_v37 = vrot.slane %v739_v19, 4 }
  0x6f   : > { %2727 = vmatmul.mubr.bf16.gmra.mrb[36].mxu0 %v4021_v21  ;;  %2856 = vmatmul.mubr.bf16.gmra.mrb[36].mxu1 %v4049_v22  ;;  %v556_v21 = vrot.slane %v445_v1, 6  ;;  %v3820_v22 = vrot.slane %v3788_v3, 9  ;;  %v734_v1 = vrot.slane %v732_v51, 4  ;;  %v735_v3 = vrot.slane %v3791_v54, 5 }
  0x70   : > { %2734 = vmatprep.mubr.bf16.mxu0 %v4038_v26  ;;  %2863 = vmatprep.mubr.bf16.mxu1 %v4066_v27  ;;  %v3838_v26 = vld [vmem:[%s5171_s10 + $0x24] sm:$0xc]  ;;  %v5038_v27 = vld [vmem:[%s6710_s1 + $0x1e8] sm:$0xff]   ;;  %v924_v54 = vrot.slane %v922_v30, 4 }
  0x71   : > { %4737 = vmatprep.subr.bf16.mxu1 %v5038_v27  ;;  %v557_v42 = vsel %vm5370_vm5, %v555_v0, %v556_v21  ;;  %v726_v43 = vsel %vm5184_vm2, %v3820_v22, %v725_v5  ;;  %v3869_v47 = vrot.slane %v3838_v26, 10  ;;  %v560_v5 = vrot.slane %v5518_v12, 6  ;;  %v5040_v0 = vld [vmem:[%s6710_s1 + $0x208] sm:$0xff]   ;;  %v448_v21 = vld [vmem:[%s5171_s10 + $0x78] sm:$0xc] }
  0x72   : > { %4738 = vmatpush3.bf16.msra.mxu1 %v5039_v31  ;;  %v3792_v22 = vld [vmem:[%s5171_s10 + $0x30] sm:$0xe]  ;;  %v5049_v26 = vld [vmem:[%s6710_s1 + $0x1b8] sm:$0xff]  }
  0x73   : > { %4739 = vmatprep.subr.bf16.mxu1 %v5043_v36  ;;  %v909_v12 = vsel %vm5370_vm5, %v3869_v47, %v908_v8  ;;  %v562_v62 = vrot.slane %v560_v5, 4  ;;  %v5048_v8 = vld [vmem:[%s6710_s1 + $0x1f8] sm:$0xff]   ;;  %v561_v20 = vsel %vm5370_vm5, %v3749_v60, %v560_v5  ;;  %v3822_v47 = vrot.slane %v3792_v22, 9 }
  0x74   : > { %v4093_v9 = vcombine.low %v909_v12, %v912_v59  ;;  %v3842_v36 = vld [vmem:[%s5171_s10 + $0x3c] sm:$0xc] }
  0x75   : > { %v564_v27 = vsel %vm5370_vm5, %v562_v62, %v563_v61  ;;  %v3871_v5 = vrot.slane %v3842_v36, 10  ;;  %v5050_v12 = vld [vmem:[%s6710_s1 + $0x218] sm:$0xff]   ;;  %v740_v60 = vsel %vm5184_vm2, %v3822_v47, %v739_v19  ;;  %v743_v61 = vsel %vm5184_vm2, %v741_v37, %v742_v50 }
  0x76   : > { %4740 = vmatpush3.bf16.msra.mxu1 %v5044_v53  ;;  %v929_v53 = vrot.slane %v5514_v10, 6  ;;  %v576_v19 = vrot.slane %v574_v18, 4 }
  0x77   : > { %2735 = vmatmul.mubr.bf16.gmra.mrb[40].mxu0 %v4022_v55  ;;  %2864 = vmatmul.mubr.bf16.gmra.mrb[40].mxu1 %v4050_v35  ;;  %v915_v55 = vrot.slane %v5458_v39, 6  ;;  %v4052_v35 = vcombine.low %v554_v40, %v557_v42  ;;  %v733_v39 = vsel %vm5184_vm2, %v3821_v63, %v732_v51  ;;  %v4053_v40 = vcombine.low %v561_v20, %v564_v27 }
  0x78   : > { %2742 = vmatprep.mubr.bf16.mxu0 %v4039_v58  ;;  %2871 = vmatprep.mubr.bf16.mxu1 %v4067_v56  ;;  %v4076_v56 = vcombine.low %v726_v43, %v729_v44  ;;  %v5679_v58 = vld [vmem:[%s5171_s10 + $0x88] sm:$0xf]  ;;  %v4070_v42 = vcombine.low %v3776_v6, %v5696_v49  ;;  %v3843_v43 = vld [vmem:[%s5171_s10 + $0x44] sm:$0x3]  ;;  %v3750_v44 = vrot.slane %v448_v21, 10  ;;  %v3751_v63 = vrot.slane %v450_v25, 10 }
  0x79   : > { %v4069_v7 = vcombine.low %v3774_v57, %v5679_v58  ;;  %v917_v15 = vrot.slane %v915_v55, 4  ;;  %4741 = vmatprep.subr.bf16.mxu1 %v5048_v8  ;;  %v916_v31 = vsel %vm5370_vm5, %v3870_v13, %v915_v55  ;;  %v925_v55 = vrot.slane %v3843_v43, 6  ;;  %v3844_v6 = vld [vmem:[%s5171_s10 + $0x48] sm:$0xc]  ;;  %v3847_v25 = vld [vmem:[%s5171_s10 + $0x5c] sm:$0x3] }
  0x7a   : > { %4742 = vmatpush3.bf16.msra.mxu1 %v5049_v26  ;;  %v746_v57 = vrot.slane %v5484_v48, 5  ;;  %v3778_v48 = vld [vmem:[%s5171_s10 + $0x9c] sm:$0xf]  ;;  %v923_v8 = vsel %vm5370_vm5, %v3871_v5, %v922_v30  ;;  %v3872_v24 = vrot.slane %v3844_v6, 10  ;;  %v931_v26 = vrot.slane %v929_v53, 4 }
  0x7b   : > { %v4071_v21 = vcombine.low %v3778_v48, %v5746_v11  ;;  %v932_v27 = vrot.slane %v3845_v2, 6  ;;  %v3780_v43 = vld [vmem:[%s5171_s10 + $0xa8] sm:$0xf]  ;;  %v3846_v5 = vld [vmem:[%s5171_s10 + $0x54] sm:$0xc]  ;;  %v760_v48 = vrot.slane %v5549_v45, 5 }
  0x7c   : > { %v748_v13 = vrot.slane %v746_v57, 4  ;;  %v930_v47 = vsel %vm5370_vm5, %v3872_v24, %v929_v53  ;;  %v3798_v6 = vld [vmem:[%s5171_s10 + $0x54] sm:$0xe]  ;;  %v943_v2 = vrot.slane %v5575_v4, 6 }
  0x7d   : > { %v933_v37 = vsel %vm5370_vm5, %v931_v26, %v932_v27  ;;  %v3848_v26 = vld [vmem:[%s5171_s10 + $0x60] sm:$0xc]  ;;  %v3849_v27 = vld [vmem:[%s5171_s10 + $0x68] sm:$0x3] }
  0x7f   : > { %2743 = vmatmul.mubr.bf16.gmra.mrb[44].mxu0 %v4023_v28  ;;  %2872 = vmatmul.mubr.bf16.gmra.mrb[44].mxu1 %v4051_v29  ;;  %v736_v28 = vsel %vm5184_vm2, %v734_v1, %v735_v3  ;;  %v567_v29 = vrot.slane %v5537_v38, 6  ;;  %v5045_v38 = vld [vmem:[%s6710_s1 + $0x210] sm:$0xff]   ;;  %v3795_v3 = vld [vmem:[%s5171_s10 + $0x44] sm:$0x1] }
  0x80   : > { %2879 = vmatprep.mubr.bf16.mxu1 %v4068_v33  ;;  %2976 = vmatprep.mubr.bf16.mxu0 %v4092_v34  ;;  %v919_v33 = vsel %vm5370_vm5, %v917_v15, %v918_v17  ;;  %v449_v34 = vld [vmem:[%s5171_s10 + $0x80] sm:$0x3]  ;;  %v749_v20 = vrot.slane %v3795_v3, 5  ;;  %v454_v3 = vld [vmem:[%s5171_s10 + $0x9c] sm:$0xc] }
  0x81   : > { %v4094_v51 = vcombine.low %v916_v31, %v919_v33  ;;  %v569_v32 = vrot.slane %v567_v29, 4  ;;  %v570_v52 = vrot.slane %v449_v34, 6  ;;  %v568_v59 = vsel %vm5370_vm5, %v3750_v44, %v567_v29  ;;  %v5053_v15 = vld [vmem:[%s6710_s1 + $0x220] sm:$0xff]   ;;  %v5072_v29 = vld [vmem:[%s5171_s10 + $0x94] sm:$0xf]  ;;  %v5056_v31 = vld [vmem:[%s6710_s1 + $0x228] sm:$0xff]  }
  0x82   : > { %v581_v30 = vrot.slane %v5072_v29, 6  ;;  %v753_v33 = vrot.slane %v5514_v10, 5  ;;  %v936_v10 = vrot.slane %v5549_v45, 6  ;;  %v5782_v44 = vld [vmem:[%s5171_s10 + $0xac] sm:$0xf]  ;;  %v762_v29 = vrot.slane %v760_v48, 4 }
  0x83   : > { %v571_v62 = vsel %vm5370_vm5, %v569_v32, %v570_v52  ;;  %v4072_v53 = vcombine.low %v3780_v43, %v5782_v44 }
  0x84   : > { %v4054_v17 = vcombine.low %v568_v59, %v571_v62  ;;  %v583_v52 = vrot.slane %v581_v30, 4  ;;  %v3873_v59 = vrot.slane %v3846_v5, 10  ;;  %v5062_v62 = vld [vmem:[%s6710_s1 + $0x238] sm:$0xff]   ;;  %v3784_v5 = vld [vmem:[%s5171_s10 + $0xc0] sm:$0xf] }
  0x87   : > { %2880 = vmatmul.mubr.bf16.gmra.mrb[48].mxu1 %v4052_v35  ;;  %2977 = vmatmul.mubr.bf16.vlgmr.msra.gmra.mrb[48].mxu0 %v4076_v56  ;;  %v451_v35 = vld [vmem:[%s5171_s10 + $0x8c] sm:$0x3]  ;;  %v3794_v56 = vld [vmem:[%s5171_s10 + $0x3c] sm:$0xe] }
  0x88   : > { %4864 = vmatpush3.bf16.msra.mxu0 %v5612_v46  ;;  %2887 = vmatprep.mubr.bf16.mxu1 %v4069_v7  ;;  %v4077_v46 = vcombine.low %v733_v39, %v736_v28  ;;  %v577_v1 = vrot.slane %v451_v35, 6  ;;  %v3823_v7 = vrot.slane %v3794_v56, 9  ;;  %v575_v39 = vsel %vm5370_vm5, %v3751_v63, %v574_v18  ;;  %v452_v28 = vld [vmem:[%s5171_s10 + $0x90] sm:$0xc] }
  0x89   : > { %2984 = vmatprep.mubr.bf16.mxu0 %v4093_v9  ;;  %4865 = vmatprep.subr.bf16.mxu0 %v5040_v0  ;;  %v926_v9 = vsel %vm5370_vm5, %v924_v54, %v925_v55  ;;  %v3752_v50 = vrot.slane %v452_v28, 10  ;;  %v5059_v54 = vld [vmem:[%s6710_s1 + $0x230] sm:$0xff]   ;;  %v755_v56 = vrot.slane %v753_v33, 4  ;;  %v3825_v28 = vrot.slane %v3798_v6, 9  ;;  %v3786_v6 = vld [vmem:[%s5171_s10 + $0xcc] sm:$0xf] }
  0x8a   : > { %v4095_v22 = vcombine.low %v923_v8, %v926_v9  ;;  %v578_v34 = vsel %vm5370_vm5, %v576_v19, %v577_v1  ;;  %v747_v36 = vsel %vm5184_vm2, %v3823_v7, %v746_v57  ;;  %v455_v7 = vld [vmem:[%s5171_s10 + $0xa4] sm:$0x3]  ;;  %v5073_v8 = vld [vmem:[%s5171_s10 + $0xa0] sm:$0xf] }
  0x8b   : > { %v582_v18 = vsel %vm5370_vm5, %v3752_v50, %v581_v30  ;;  %v588_v9 = vrot.slane %v5073_v8, 6  ;;  %v591_v24 = vrot.slane %v455_v7, 6  ;;  %v761_v43 = vsel %vm5184_vm2, %v3825_v28, %v760_v48  ;;  %v458_v8 = vld [vmem:[%s5171_s10 + $0xb4] sm:$0xc] }
  0x8c   : > { %4866 = vmatpush3.bf16.msra.mxu0 %v5040_v0  ;;  %v4078_v0 = vcombine.low %v740_v60, %v743_v61  ;;  %v938_v60 = vrot.slane %v936_v10, 4  ;;  %v939_v61 = vrot.slane %v3847_v25, 6  ;;  %v5840_v25 = vld [vmem:[%s5171_s10 + $0xc4] sm:$0xf] }
  0x8d   : > { %4867 = vmatprep.subr.bf16.mxu0 %v5045_v38 }
  0x8e   : > { %v940_v19 = vsel %vm5370_vm5, %v938_v60, %v939_v61 }
  0x8f   : > { %2888 = vmatmul.mubr.bf16.gmra.mrb[52].mxu1 %v4053_v40  ;;  %2985 = vmatmul.mubr.bf16.gmra.mrb[52].mxu0 %v4077_v46  ;;  %v453_v40 = vld [vmem:[%s5171_s10 + $0x98] sm:$0x3]  ;;  %v3796_v46 = vld [vmem:[%s5171_s10 + $0x48] sm:$0xe] }
  0x90   : > { %2895 = vmatprep.mubr.bf16.mxu1 %v4070_v42  ;;  %2992 = vmatprep.mubr.bf16.mxu0 %v4094_v51  ;;  %v3797_v42 = vld [vmem:[%s5171_s10 + $0x50] sm:$0x1]  ;;  %v4055_v51 = vcombine.low %v575_v39, %v578_v34  ;;  %v584_v55 = vrot.slane %v453_v40, 6  ;;  %v3824_v35 = vrot.slane %v3796_v46, 9  ;;  %v590_v39 = vrot.slane %v588_v9, 4 }
  0x91   : > { %4868 = vmatpush3.bf16.msra.mxu0 %v5045_v38  ;;  %v750_v38 = vsel %vm5184_vm2, %v748_v13, %v749_v20  ;;  %v756_v57 = vrot.slane %v3797_v42, 5  ;;  %v3799_v13 = vld [vmem:[%s5171_s10 + $0x5c] sm:$0x1]  ;;  %v3874_v34 = vrot.slane %v3848_v26, 10  ;;  %v767_v40 = vrot.slane %v5575_v4, 5 }
  0x92   : > { %4869 = vmatprep.subr.bf16.mxu0 %v5050_v12  ;;  %v4079_v32 = vcombine.low %v747_v36, %v750_v38  ;;  %v585_v63 = vsel %vm5370_vm5, %v583_v52, %v584_v55  ;;  %v754_v1 = vsel %vm5184_vm2, %v3824_v35, %v753_v33  ;;  %v763_v30 = vrot.slane %v3799_v13, 5  ;;  %v456_v42 = vld [vmem:[%s5171_s10 + $0xa8] sm:$0xc]  ;;  %v5074_v4 = vld [vmem:[%s5171_s10 + $0xac] sm:$0xf] }
  0x93   : > { %v757_v45 = vsel %vm5184_vm2, %v755_v56, %v756_v57  ;;  %v4056_v20 = vcombine.low %v582_v18, %v585_v63  ;;  %v945_v36 = vrot.slane %v943_v2, 4  ;;  %v946_v38 = vrot.slane %v3849_v27, 6  ;;  %v459_v13 = vld [vmem:[%s5171_s10 + $0xbc] sm:$0x3]  ;;  %v3803_v27 = vld [vmem:[%s5171_s10 + $0x74] sm:$0x1] }
  0x94   : > { %v595_v50 = vrot.slane %v5074_v4, 6  ;;  %v950_v52 = vrot.slane %v5602_v41, 6  ;;  %v3754_v57 = vrot.slane %v456_v42, 10  ;;  %v769_v48 = vrot.slane %v767_v40, 4 }
  0x95   : > { %4870 = vmatpush3.bf16.msra.mxu0 %v5050_v12  ;;  %v4096_v12 = vcombine.low %v930_v47, %v933_v37  ;;  %v764_v47 = vsel %vm5184_vm2, %v762_v29, %v763_v30  ;;  %v457_v37 = vld [vmem:[%s5171_s10 + $0xb0] sm:$0x3]  ;;  %v947_v55 = vsel %vm5370_vm5, %v945_v36, %v946_v38  ;;  %v3755_v26 = vrot.slane %v458_v8, 10  ;;  %v3919_v8 = vld [vmem:[%s5171_s10 + $0x44] sm:$0x1] }
  0x96   : > { %4871 = vmatprep.subr.bf16.mxu0 %v5053_v15  ;;  %v4081_v56 = vcombine.low %v761_v43, %v764_v47  ;;  %v597_v60 = vrot.slane %v595_v50, 4  ;;  %v605_v30 = vrot.slane %v459_v13, 6  ;;  %v777_v47 = vrot.slane %v3803_v27, 5  ;;  %v5910_v27 = vld [vmem:[%s5171_s10 + $0x4c] sm:$0xf] }
  0x97   : > { %2896 = vmatmul.mubr.bf16.gmra.mrb[56].mxu1 %v4054_v17  ;;  %2993 = vmatmul.mubr.bf16.gmra.mrb[56].mxu0 %v4078_v0  ;;  %v5814_v17 = vld [vmem:[%s5171_s10 + $0xb8] sm:$0xf]  ;;  %v937_v0 = vsel %vm5370_vm5, %v3873_v59, %v936_v10  ;;  %v592_v10 = vsel %vm5370_vm5, %v590_v39, %v591_v24  ;;  %v3851_v59 = vld [vmem:[%s5171_s10 + $0x74] sm:$0x3]  ;;  %v957_v24 = vrot.slane %v5643_v16, 6 }
  0x98   : > { %2903 = vmatprep.mubr.bf16.mxu1 %v4071_v21  ;;  %3000 = vmatprep.mubr.bf16.mxu0 %v4095_v22  ;;  %v4080_v21 = vcombine.low %v754_v1, %v757_v45  ;;  %v3753_v22 = vrot.slane %v454_v3, 10  ;;  %v4097_v33 = vcombine.low %v937_v0, %v940_v19  ;;  %v774_v1 = vrot.slane %v5602_v41, 5  ;;  %v5865_v19 = vld [vmem:[%s5171_s10 + $0xd0] sm:$0xf]  ;;  %v3852_v39 = vld [vmem:[%s5171_s10 + $0x78] sm:$0xc] }
  0x99   : > { %4872 = vmatpush3.bf16.msra.mxu0 %v5053_v15  ;;  %v3782_v15 = vld [vmem:[%s5171_s10 + $0xb4] sm:$0xf]  ;;  %v952_v3 = vrot.slane %v950_v52, 4  ;;  %v953_v7 = vrot.slane %v3851_v59, 6  ;;  %v3876_v4 = vrot.slane %v3852_v39, 10  ;;  %v788_v39 = vrot.slane %v5679_v58, 5 }
  0x9a   : > { %4873 = vmatprep.subr.bf16.mxu0 %v5056_v31  ;;  %v589_v46 = vsel %vm5370_vm5, %v3753_v22, %v588_v9  ;;  %v596_v9 = vsel %vm5370_vm5, %v3754_v57, %v595_v50  ;;  %v3802_v22 = vld [vmem:[%s5171_s10 + $0x6c] sm:$0xe]  ;;  %v776_v43 = vrot.slane %v774_v1, 4  ;;  %v959_v50 = vrot.slane %v957_v24, 4 }
  0x9b   : > { %v4057_v35 = vcombine.low %v589_v46, %v592_v10  ;;  %v954_v29 = vsel %vm5370_vm5, %v952_v3, %v953_v7  ;;  %v3917_v46 = vld [vmem:[%s5171_s10 + $0x38] sm:$0x1]  ;;  %v3827_v10 = vrot.slane %v3802_v22, 9  ;;  %v3918_v7 = vld [vmem:[%s5171_s10 + $0x3c] sm:$0xe] }
  0x9c   : > { %v3949_v22 = vrot.slane %v3918_v7, 9  ;;  %v3858_v7 = vld [vmem:[%s5171_s10 + $0x9c] sm:$0xc] }
  0x9d   : > { %4874 = vmatpush3.bf16.msra.mxu0 %v5056_v31  ;;  %v4073_v31 = vcombine.low %v3782_v15, %v5814_v17  ;;  %v775_v57 = vsel %vm5184_vm2, %v3827_v10, %v774_v1  ;;  %v1143_v10 = vrot.slane %v5910_v27, 5 }
  0x9e   : > { %4875 = vmatprep.subr.bf16.mxu0 %v5059_v54 }
  0x9f   : > { %2904 = vmatmul.mubr.bf16.gmra.mrb[60].mxu1 %v4055_v51  ;;  %3001 = vmatmul.mubr.bf16.gmra.mrb[60].mxu0 %v4079_v32  ;;  %v3800_v51 = vld [vmem:[%s5171_s10 + $0x60] sm:$0xe]  ;;  %v3801_v32 = vld [vmem:[%s5171_s10 + $0x68] sm:$0x1] }
  0xa0   : > { %2911 = vmatprep.mubr.bf16.mxu1 %v4072_v53  ;;  %3008 = vmatprep.mubr.bf16.mxu0 %v4096_v12  ;;  %v598_v53 = vrot.slane %v457_v37, 6  ;;  %v3850_v12 = vld [vmem:[%s5171_s10 + $0x6c] sm:$0xc]  ;;  %v3826_v61 = vrot.slane %v3800_v51, 9  ;;  %v770_v18 = vrot.slane %v3801_v32, 5 }
  0xa1   : > { %4876 = vmatpush3.bf16.msra.mxu0 %v5059_v54  ;;  %v944_v54 = vsel %vm5370_vm5, %v3874_v34, %v943_v2  ;;  %v3875_v45 = vrot.slane %v3850_v12, 10  ;;  %v5856_v2 = vld [vmem:[%s5171_s10 + $0x34] sm:$0xf]  ;;  %v964_v12 = vrot.slane %v5679_v58, 6 }
  0xa2   : > { %4877 = vmatprep.subr.bf16.mxu0 %v5062_v62  ;;  %v4098_v63 = vcombine.low %v944_v54, %v947_v55  ;;  %v599_v15 = vsel %vm5370_vm5, %v597_v60, %v598_v53  ;;  %v768_v41 = vsel %vm5184_vm2, %v3826_v61, %v767_v40  ;;  %v771_v0 = vsel %vm5184_vm2, %v769_v48, %v770_v18  ;;  %v5884_v55 = vld [vmem:[%s5171_s10 + $0x40] sm:$0xf]  ;;  %v3804_v60 = vld [vmem:[%s5171_s10 + $0x78] sm:$0xe] }
  0xa3   : > { %v951_v28 = vsel %vm5370_vm5, %v3875_v45, %v950_v52  ;;  %v1129_v34 = vrot.slane %v5856_v2, 5  ;;  %v4058_v36 = vcombine.low %v596_v9, %v599_v15  ;;  %v4082_v38 = vcombine.low %v768_v41, %v771_v0  ;;  %v3805_v61 = vld [vmem:[%s5171_s10 + $0x80] sm:$0x1] }
  0xa4   : > { %v4075_v40 = vcombine.low %v3786_v6, %v5865_v19  ;;  %v4099_v37 = vcombine.low %v951_v28, %v954_v29  ;;  %v778_v53 = vsel %vm5184_vm2, %v776_v43, %v777_v47  ;;  %v1136_v1 = vrot.slane %v5884_v55, 5 }
  0xa5   : > { %4878 = vmatpush3.bf16.msra.mxu0 %v5062_v62  ;;  %v4074_v62 = vcombine.low %v3784_v5, %v5840_v25  ;;  %v1131_v52 = vrot.slane %v1129_v34, 4  ;;  %v1132_v5 = vrot.slane %v3917_v46, 5  ;;  %v4083_v3 = vcombine.low %v775_v57, %v778_v53  ;;  %v3856_v46 = vld [vmem:[%s5171_s10 + $0x90] sm:$0xc] }
  0xa6   : > { %v3828_v6 = vrot.slane %v3804_v60, 9  ;;  %v784_v15 = vrot.slane %v3805_v61, 5  ;;  %v1145_v53 = vrot.slane %v1143_v10, 4 }
  0xa7   : > { %2912 = vmatmul.mubr.bf16.gmra.mrb[64].mxu1 %v4056_v20  ;;  %3009 = vmatmul.mubr.bf16.gmra.mrb[64].mxu0 %v4080_v21  ;;  %v5075_v20 = vld [vmem:[%s5171_s10 + $0xb8] sm:$0xf]  ;;  %v1133_v18 = vsel %vm5184_vm2, %v1131_v52, %v1132_v5 }
  0xa8   : > { %2919 = vmatprep.mubr.bf16.mxu1 %v4073_v31  ;;  %3016 = vmatprep.mubr.bf16.mxu0 %v4097_v33  ;;  %v602_v21 = vrot.slane %v5075_v20, 6  ;;  %v3853_v31 = vld [vmem:[%s5171_s10 + $0x80] sm:$0x3]  ;;  %v3916_v33 = vld [vmem:[%s5171_s10 + $0x30] sm:$0xe]  ;;  %v966_v20 = vrot.slane %v964_v12, 4 }
  0xa9   : > { %v960_v51 = vrot.slane %v3853_v31, 6  ;;  %v3948_v32 = vrot.slane %v3916_v33, 9  ;;  %v971_v31 = vrot.slane %v5696_v49, 6 }
  0xaa   : > { %v604_v42 = vrot.slane %v602_v21, 4  ;;  %v603_v54 = vsel %vm5370_vm5, %v3755_v26, %v602_v21  ;;  %v1139_v26 = vrot.slane %v3919_v8, 5  ;;  %v3859_v8 = vld [vmem:[%s5171_s10 + $0xa4] sm:$0x3] }
  0xab   : > { %v961_v59 = vsel %vm5370_vm5, %v959_v50, %v960_v51  ;;  %v1130_v48 = vsel %vm5184_vm2, %v3948_v32, %v1129_v34  ;;  %v3806_v34 = vld [vmem:[%s5171_s10 + $0x84] sm:$0xe]  ;;  %v790_v32 = vrot.slane %v788_v39, 4 }
  0xac   : > { %v4124_v41 = vcombine.low %v1130_v48, %v1133_v18  ;;  %v3829_v51 = vrot.slane %v3806_v34, 9  ;;  %v3886_v48 = vld [vmem:[%s5171_s10 + $0x3c] sm:$0xf]  ;;  %v978_v18 = vrot.slane %v5746_v11, 6 }
  0xae   : > { %v789_v60 = vsel %vm5184_vm2, %v3829_v51, %v788_v39  ;;  %v980_v39 = vrot.slane %v978_v18, 4 }
  0xaf   : > { %2920 = vmatmul.mubr.bf16.gmra.mrb[68].mxu1 %v4057_v35  ;;  %3017 = vmatmul.mubr.bf16.gmra.mrb[68].mxu0 %v4081_v56  ;;  %v781_v35 = vrot.slane %v5643_v16, 5  ;;  %v606_v56 = vsel %vm5370_vm5, %v604_v42, %v605_v30  ;;  %v958_v16 = vsel %vm5370_vm5, %v3876_v4, %v957_v24  ;;  %v1138_v24 = vrot.slane %v1136_v1, 4  ;;  %v3884_v30 = vld [vmem:[%s5171_s10 + $0x30] sm:$0xf]  ;;  %v3857_v42 = vld [vmem:[%s5171_s10 + $0x98] sm:$0x3] }
  0xb0   : > { %2927 = vmatprep.mubr.bf16.mxu1 %v4074_v62  ;;  %3024 = vmatprep.mubr.bf16.mxu0 %v4098_v63  ;;  %v3854_v62 = vld [vmem:[%s5171_s10 + $0x84] sm:$0xc]  ;;  %v3855_v63 = vld [vmem:[%s5171_s10 + $0x8c] sm:$0x3]  ;;  %v4059_v45 = vcombine.low %v603_v54, %v606_v56  ;;  %v4100_v9 = vcombine.low %v958_v16, %v961_v59  ;;  %v4108_v47 = vcombine.low %v3884_v30, %v5856_v2  ;;  %v3921_v4 = vld [vmem:[%s5171_s10 + $0x50] sm:$0x1] }
  0xb1   : > { %v783_v13 = vrot.slane %v781_v35, 4  ;;  %v3877_v0 = vrot.slane %v3854_v62, 10  ;;  %v967_v21 = vrot.slane %v3855_v63, 6  ;;  %v782_v28 = vsel %vm5184_vm2, %v3828_v6, %v781_v35  ;;  %v5936_v16 = vld [vmem:[%s5171_s10 + $0x58] sm:$0xf] }
  0xb2   : > { %v3878_v54 = vrot.slane %v3856_v46, 10  ;;  %v973_v35 = vrot.slane %v971_v31, 4  ;;  %v974_v56 = vrot.slane %v3857_v42, 6  ;;  %v795_v59 = vrot.slane %v5696_v49, 5  ;;  %v3808_v63 = vld [vmem:[%s5171_s10 + $0x90] sm:$0xe] }
  0xb3   : > { %v785_v29 = vsel %vm5184_vm2, %v783_v13, %v784_v15  ;;  %v965_v33 = vsel %vm5370_vm5, %v3877_v0, %v964_v12  ;;  %v968_v58 = vsel %vm5370_vm5, %v966_v20, %v967_v21  ;;  %v1146_v12 = vrot.slane %v3921_v4, 5  ;;  %v3922_v15 = vld [vmem:[%s5171_s10 + $0x54] sm:$0xe]  ;;  %v3810_v42 = vld [vmem:[%s5171_s10 + $0x9c] sm:$0xe] }
  0xb4   : > { %v4084_v43 = vcombine.low %v782_v28, %v785_v29  ;;  %v4101_v50 = vcombine.low %v965_v33, %v968_v58  ;;  %v972_v62 = vsel %vm5370_vm5, %v3878_v54, %v971_v31  ;;  %v975_v49 = vsel %vm5370_vm5, %v973_v35, %v974_v56  ;;  %v5962_v33 = vld [vmem:[%s5171_s10 + $0x64] sm:$0xf]  ;;  %v3861_v4 = vld [vmem:[%s5171_s10 + $0xb0] sm:$0x3] }
  0xb5   : > { %v4109_v13 = vcombine.low %v3886_v48, %v5884_v55  ;;  %v4102_v0 = vcombine.low %v972_v62, %v975_v49  ;;  %v3830_v20 = vrot.slane %v3808_v63, 9  ;;  %v797_v21 = vrot.slane %v795_v59, 4  ;;  %v5988_v62 = vld [vmem:[%s5171_s10 + $0x70] sm:$0xf] }
  0xb6   : > { %v981_v28 = vrot.slane %v3859_v8, 6  ;;  %v3951_v29 = vrot.slane %v3922_v15, 9  ;;  %v802_v58 = vrot.slane %v5746_v11, 5  ;;  %v3831_v35 = vrot.slane %v3810_v42, 9  ;;  %v3812_v8 = vld [vmem:[%s5171_s10 + $0xa8] sm:$0xe] }
  0xb7   : > { %2928 = vmatmul.mubr.bf16.gmra.mrb[72].mxu1 %v4058_v36  ;;  %3025 = vmatmul.mubr.bf16.gmra.mrb[72].mxu0 %v4082_v38  ;;  %v3807_v36 = vld [vmem:[%s5171_s10 + $0x8c] sm:$0x1]  ;;  %v1137_v38 = vsel %vm5184_vm2, %v3949_v22, %v1136_v1  ;;  %v3809_v1 = vld [vmem:[%s5171_s10 + $0x98] sm:$0x1]  ;;  %v796_v34 = vsel %vm5184_vm2, %v3830_v20, %v795_v59  ;;  %v809_v49 = vrot.slane %v5782_v44, 5 }
  0xb8   : > { %2935 = vmatprep.mubr.bf16.mxu1 %v4075_v40  ;;  %3032 = vmatprep.mubr.bf16.mxu0 %v4099_v37  ;;  %v1140_v40 = vsel %vm5184_vm2, %v1138_v24, %v1139_v26  ;;  %v3920_v37 = vld [vmem:[%s5171_s10 + $0x48] sm:$0xe]  ;;  %v791_v52 = vrot.slane %v3807_v36, 5  ;;  %v798_v22 = vrot.slane %v3809_v1, 5  ;;  %v3879_v26 = vrot.slane %v3858_v7, 10 }
  0xb9   : > { %v4125_v5 = vcombine.low %v1137_v38, %v1140_v40  ;;  %v3950_v57 = vrot.slane %v3920_v37, 9  ;;  %v3888_v38 = vld [vmem:[%s5171_s10 + $0x48] sm:$0xf]  ;;  %v985_v40 = vrot.slane %v5782_v44, 6  ;;  %v982_v11 = vsel %vm5370_vm5, %v980_v39, %v981_v28  ;;  %v3890_v1 = vld [vmem:[%s5171_s10 + $0x54] sm:$0xf] }
  0xba   : > { %v792_v61 = vsel %vm5184_vm2, %v790_v32, %v791_v52  ;;  %v799_v36 = vsel %vm5184_vm2, %v797_v21, %v798_v22  ;;  %v979_v46 = vsel %vm5370_vm5, %v3879_v26, %v978_v18  ;;  %v3860_v37 = vld [vmem:[%s5171_s10 + $0xa8] sm:$0xc]  ;;  %v4110_v32 = vcombine.low %v3888_v38, %v5910_v27  ;;  %v3924_v52 = vld [vmem:[%s5171_s10 + $0x60] sm:$0xe]  ;;  %v3862_v15 = vld [vmem:[%s5171_s10 + $0xb4] sm:$0xc] }
  0xbb   : > { %v4085_v6 = vcombine.low %v789_v60, %v792_v61  ;;  %v4086_v51 = vcombine.low %v796_v34, %v799_v36  ;;  %v4103_v54 = vcombine.low %v979_v46, %v982_v11  ;;  %v804_v56 = vrot.slane %v802_v58, 4  ;;  %v3863_v20 = vld [vmem:[%s5171_s10 + $0xbc] sm:$0x3]  ;;  %v3926_v21 = vld [vmem:[%s5171_s10 + $0x6c] sm:$0xe] }
  0xbc   : > { %v987_v59 = vrot.slane %v985_v40, 4  ;;  %v988_v60 = vrot.slane %v3861_v4, 6  ;;  %v3952_v61 = vrot.slane %v3924_v52, 9  ;;  %v803_v63 = vsel %vm5184_vm2, %v3831_v35, %v802_v58  ;;  %v3927_v22 = vld [vmem:[%s5171_s10 + $0x74] sm:$0x1] }
  0xbd   : > { %v3832_v39 = vrot.slane %v3812_v8, 9  ;;  %v811_v28 = vrot.slane %v809_v49, 4  ;;  %v995_v34 = vrot.slane %v3863_v20, 6  ;;  %v3953_v36 = vrot.slane %v3926_v21, 9  ;;  %v6014_v46 = vld [vmem:[%s5171_s10 + $0x7c] sm:$0xf] }
  0xbe   : > { %v989_v44 = vsel %vm5370_vm5, %v987_v59, %v988_v60  ;;  %v816_v11 = vrot.slane %v5814_v17, 5  ;;  %v3892_v42 = vld [vmem:[%s5171_s10 + $0x60] sm:$0xf]  ;;  %v3815_v4 = vld [vmem:[%s5171_s10 + $0xbc] sm:$0x1]  ;;  %v1006_v8 = vrot.slane %v5865_v19, 6 }
  0xbf   : > { %2936 = vmatmul.mubr.bf16.gmra.mrb[76].mxu1 %v4059_v45  ;;  %3033 = vmatmul.mubr.bf16.gmra.mrb[76].mxu0 %v4083_v3  ;;  %v1144_v45 = vsel %vm5184_vm2, %v3950_v57, %v1143_v10  ;;  %v1147_v3 = vsel %vm5184_vm2, %v1145_v53, %v1146_v12  ;;  %v3811_v10 = vld [vmem:[%s5171_s10 + $0xa4] sm:$0x1]  ;;  %v3880_v12 = vrot.slane %v3860_v37, 10  ;;  %v3864_v52 = vld [vmem:[%s5171_s10 + $0xc0] sm:$0xc]  ;;  %v819_v60 = vrot.slane %v3815_v4, 5 }
  0xc0   : > { %3040 = vmatprep.mubr.bf16.mxu0 %v4100_v9  ;;  %3137 = vmatprep.mubr.bf16.mxu1 %v4124_v41  ;;  %v1150_v9 = vrot.slane %v5936_v16, 5  ;;  %v3923_v41 = vld [vmem:[%s5171_s10 + $0x5c] sm:$0x1]  ;;  %v4126_v24 = vcombine.low %v1144_v45, %v1147_v3  ;;  %v805_v57 = vrot.slane %v3811_v10, 5  ;;  %v992_v45 = vrot.slane %v5814_v17, 6 }
  0xc1   : > { %v1153_v31 = vrot.slane %v3923_v41, 5  ;;  %v986_v7 = vsel %vm5370_vm5, %v3880_v12, %v985_v40  ;;  %v1164_v41 = vrot.slane %v5988_v62, 5  ;;  %v1167_v40 = vrot.slane %v3927_v22, 5  ;;  %v3814_v17 = vld [vmem:[%s5171_s10 + $0xb4] sm:$0xe] }
  0xc2   : > { %v1152_v30 = vrot.slane %v1150_v9, 4  ;;  %v806_v3 = vsel %vm5184_vm2, %v804_v56, %v805_v57  ;;  %v4104_v26 = vcombine.low %v986_v7, %v989_v44  ;;  %v994_v58 = vrot.slane %v992_v45, 4  ;;  %v3865_v35 = vld [vmem:[%s5171_s10 + $0xc8] sm:$0x3]  ;;  %v3928_v56 = vld [vmem:[%s5171_s10 + $0x78] sm:$0xe] }
  0xc3   : > { %v1166_v38 = vrot.slane %v1164_v41, 4  ;;  %v999_v10 = vrot.slane %v5840_v25, 6  ;;  %v3929_v57 = vld [vmem:[%s5171_s10 + $0x80] sm:$0x1]  ;;  %v3833_v12 = vrot.slane %v3814_v17, 9  ;;  %v818_v59 = vrot.slane %v816_v11, 4 }
  0xc4   : > { %v823_v7 = vrot.slane %v5840_v25, 5  ;;  %v6041_v44 = vld [vmem:[%s5171_s10 + $0x88] sm:$0xf]  ;;  %v3867_v20 = vld [vmem:[%s5171_s10 + $0xd4] sm:$0x3]  ;;  %v830_v17 = vrot.slane %v5865_v19, 5 }
  0xc7   : > { %3041 = vmatmul.mubr.bf16.gmra.mrb[80].mxu0 %v4084_v43  ;;  %3138 = vmatmul.mubr.bf16.vlgmr.msra.gmra.mrb[80].mxu1 %v4108_v47  ;;  %v1151_v43 = vsel %vm5184_vm2, %v3951_v29, %v1150_v9  ;;  %v1154_v47 = vsel %vm5184_vm2, %v1152_v30, %v1153_v31  ;;  %v3881_v31 = vrot.slane %v3862_v15, 10  ;;  %v3816_v15 = vld [vmem:[%s5171_s10 + $0xc0] sm:$0xe] }
  0xc8   : > { %3048 = vmatprep.mubr.bf16.mxu0 %v4101_v50  ;;  %3145 = vmatprep.mubr.bf16.mxu1 %v4125_v5  ;;  %v1157_v50 = vrot.slane %v5962_v33, 5  ;;  %v3925_v5 = vld [vmem:[%s5171_s10 + $0x68] sm:$0x1]  ;;  %v4127_v53 = vcombine.low %v1151_v43, %v1154_v47  ;;  %v810_v43 = vsel %vm5184_vm2, %v3832_v39, %v809_v49  ;;  %v1001_v49 = vrot.slane %v999_v10, 4 }
  0xc9   : > { %v1160_v18 = vrot.slane %v3925_v5, 5  ;;  %v993_v37 = vsel %vm5370_vm5, %v3881_v31, %v992_v45  ;;  %v1171_v5 = vrot.slane %v6014_v46, 5  ;;  %v3930_v31 = vld [vmem:[%s5171_s10 + $0x84] sm:$0xe] }
  0xca   : > { %v1159_v48 = vrot.slane %v1157_v50, 4  ;;  %v1158_v9 = vsel %vm5184_vm2, %v3952_v61, %v1157_v50  ;;  %v996_v50 = vsel %vm5370_vm5, %v994_v58, %v995_v34  ;;  %v3931_v58 = vld [vmem:[%s5171_s10 + $0x8c] sm:$0x1] }
  0xcb   : > { %v4105_v61 = vcombine.low %v993_v37, %v996_v50  ;;  %v1173_v45 = vrot.slane %v1171_v5, 4  ;;  %v1181_v37 = vrot.slane %v3931_v58, 5  ;;  %v3896_v50 = vld [vmem:[%s5171_s10 + $0x78] sm:$0xf] }
  0xcf   : > { %3049 = vmatmul.mubr.bf16.gmra.mrb[84].mxu0 %v4085_v6  ;;  %3146 = vmatmul.mubr.bf16.gmra.mrb[84].mxu1 %v4109_v13  ;;  %v1161_v6 = vsel %vm5184_vm2, %v1159_v48, %v1160_v18  ;;  %v3813_v13 = vld [vmem:[%s5171_s10 + $0xb0] sm:$0x1]  ;;  %v3882_v18 = vrot.slane %v3864_v52, 10 }
  0xd0   : > { %3056 = vmatprep.mubr.bf16.mxu0 %v4102_v0  ;;  %3153 = vmatprep.mubr.bf16.mxu1 %v4126_v24  ;;  %v4111_v0 = vcombine.low %v3890_v1, %v5936_v16  ;;  %v4087_v24 = vcombine.low %v803_v63, %v806_v3  ;;  %v4128_v29 = vcombine.low %v1158_v9, %v1161_v6  ;;  %v812_v30 = vrot.slane %v3813_v13, 5  ;;  %v3894_v13 = vld [vmem:[%s5171_s10 + $0x6c] sm:$0xf] }
  0xd1   : > { %v1002_v63 = vrot.slane %v3865_v35, 6  ;;  %v3954_v1 = vrot.slane %v3928_v56, 9  ;;  %v1174_v3 = vrot.slane %v3929_v57, 5  ;;  %v817_v9 = vsel %vm5184_vm2, %v3833_v12, %v816_v11  ;;  %v3932_v35 = vld [vmem:[%s5171_s10 + $0x90] sm:$0xe] }
  0xd2   : > { %v813_v47 = vsel %vm5184_vm2, %v811_v28, %v812_v30  ;;  %v820_v6 = vsel %vm5184_vm2, %v818_v59, %v819_v60  ;;  %v1000_v25 = vsel %vm5370_vm5, %v3882_v18, %v999_v10  ;;  %v4113_v28 = vcombine.low %v3894_v13, %v5988_v62  ;;  %v6066_v10 = vld [vmem:[%s5171_s10 + $0x94] sm:$0xf]  ;;  %v3933_v56 = vld [vmem:[%s5171_s10 + $0x98] sm:$0x1]  ;;  %v3964_v60 = vld [vmem:[%s5171_s10 + $0x30] sm:$0xc] }
  0xd3   : > { %v1003_v21 = vsel %vm5370_vm5, %v1001_v49, %v1002_v63  ;;  %v1172_v22 = vsel %vm5184_vm2, %v3954_v1, %v1171_v5  ;;  %v4089_v39 = vcombine.low %v817_v9, %v820_v6  ;;  %v825_v30 = vrot.slane %v823_v7, 4  ;;  %v3818_v5 = vld [vmem:[%s5171_s10 + $0xcc] sm:$0xe]  ;;  %v6092_v13 = vld [vmem:[%s5171_s10 + $0xa0] sm:$0xf] }
  0xd4   : > { %v4106_v11 = vcombine.low %v1000_v25, %v1003_v21  ;;  %v1185_v19 = vrot.slane %v6066_v10, 5  ;;  %v1305_v57 = vrot.slane %v5856_v2, 6  ;;  %v3835_v49 = vrot.slane %v3818_v5, 9 }
  0xd5   : > { %v832_v63 = vrot.slane %v830_v17, 4 }
  0xd6   : > { %v1187_v2 = vrot.slane %v1185_v19, 4  ;;  %v1307_v9 = vrot.slane %v1305_v57, 4  ;;  %v831_v25 = vsel %vm5184_vm2, %v3835_v49, %v830_v17  ;;  %v3970_v49 = vld [vmem:[%s5171_s10 + $0x54] sm:$0xc] }
  0xd7   : > { %3057 = vmatmul.mubr.bf16.gmra.mrb[88].mxu0 %v4086_v51  ;;  %3154 = vmatmul.mubr.bf16.gmra.mrb[88].mxu1 %v4110_v32  ;;  %v1165_v51 = vsel %vm5184_vm2, %v3953_v36, %v1164_v41  ;;  %v1168_v32 = vsel %vm5184_vm2, %v1166_v38, %v1167_v40  ;;  %v3817_v41 = vld [vmem:[%s5171_s10 + $0xc8] sm:$0x1]  ;;  %v1008_v38 = vrot.slane %v1006_v8, 4  ;;  %v1009_v40 = vrot.slane %v3867_v20, 6 }
  0xd8   : > { %3064 = vmatprep.mubr.bf16.mxu0 %v4103_v54  ;;  %3161 = vmatprep.mubr.bf16.mxu1 %v4127_v53  ;;  %v4112_v54 = vcombine.low %v3892_v42, %v5962_v33  ;;  %v4088_v53 = vcombine.low %v810_v43, %v813_v47  ;;  %v4129_v48 = vcombine.low %v1165_v51, %v1168_v32  ;;  %v826_v34 = vrot.slane %v3817_v41, 5  ;;  %v3898_v41 = vld [vmem:[%s5171_s10 + $0x84] sm:$0xf] }
  0xd9   : > { %v3955_v43 = vrot.slane %v3930_v31, 9  ;;  %v1010_v52 = vsel %vm5370_vm5, %v1008_v38, %v1009_v40  ;;  %v1319_v31 = vrot.slane %v5910_v27, 6  ;;  %v3969_v38 = vld [vmem:[%s5171_s10 + $0x50] sm:$0x3] }
  0xda   : > { %v827_v51 = vsel %vm5184_vm2, %v825_v30, %v826_v34  ;;  %v3968_v30 = vld [vmem:[%s5171_s10 + $0x48] sm:$0xc]  ;;  %v4115_v34 = vcombine.low %v3898_v41, %v6041_v44 }
  0xdb   : > { %v3998_v27 = vrot.slane %v3968_v30, 10 }
  0xdf   : > { %3065 = vmatmul.mubr.bf16.gmra.mrb[92].mxu0 %v4087_v24  ;;  %3162 = vmatmul.mubr.bf16.gmra.mrb[92].mxu1 %v4111_v0  ;;  %v3866_v0 = vld [vmem:[%s5171_s10 + $0xcc] sm:$0xc]  ;;  %v1175_v24 = vsel %vm5184_vm2, %v1173_v45, %v1174_v3  ;;  %v3956_v45 = vrot.slane %v3932_v35, 9  ;;  %v1188_v3 = vrot.slane %v3933_v56, 5  ;;  %v1321_v35 = vrot.slane %v1319_v31, 4 }
  0xe0   : > { %3072 = vmatprep.mubr.bf16.mxu0 %v4104_v26  ;;  %3169 = vmatprep.mubr.bf16.mxu1 %v4128_v29  ;;  %v1178_v26 = vrot.slane %v6041_v44, 5  ;;  %v3834_v29 = vrot.slane %v3816_v15, 9  ;;  %v3883_v36 = vrot.slane %v3866_v0, 10  ;;  %v4130_v42 = vcombine.low %v1172_v22, %v1175_v24  ;;  %v3966_v0 = vld [vmem:[%s5171_s10 + $0x3c] sm:$0xc] }
  0xe1   : > { %v1312_v15 = vrot.slane %v5884_v55, 6  ;;  %v1186_v21 = vsel %vm5184_vm2, %v3956_v45, %v1185_v19  ;;  %v1189_v22 = vsel %vm5184_vm2, %v1187_v2, %v1188_v3  ;;  %v3967_v55 = vld [vmem:[%s5171_s10 + $0x44] sm:$0x3]  ;;  %v3934_v24 = vld [vmem:[%s5171_s10 + $0x9c] sm:$0xe]  ;;  %v1322_v56 = vrot.slane %v3969_v38, 6 }
  0xe2   : > { %v1180_v47 = vrot.slane %v1178_v26, 4  ;;  %v824_v4 = vsel %vm5184_vm2, %v3834_v29, %v823_v7  ;;  %v1007_v32 = vsel %vm5370_vm5, %v3883_v36, %v1006_v8  ;;  %v1179_v12 = vsel %vm5184_vm2, %v3955_v43, %v1178_v26  ;;  %v3935_v29 = vld [vmem:[%s5171_s10 + $0xa4] sm:$0x1]  ;;  %v3971_v2 = vld [vmem:[%s5171_s10 + $0x5c] sm:$0x3] }
  0xe3   : > { %v4107_v18 = vcombine.low %v1007_v32, %v1010_v52  ;;  %v3996_v8 = vrot.slane %v3964_v60, 10  ;;  %v1192_v26 = vrot.slane %v6092_v13, 5  ;;  %v1314_v58 = vrot.slane %v1312_v15, 4  ;;  %v3936_v3 = vld [vmem:[%s5171_s10 + $0xa8] sm:$0xe] }
  0xe4   : > { %v1182_v59 = vsel %vm5184_vm2, %v1180_v47, %v1181_v37  ;;  %v3997_v36 = vrot.slane %v3966_v0, 10  ;;  %v4132_v43 = vcombine.low %v1186_v21, %v1189_v22  ;;  %v1315_v47 = vrot.slane %v3967_v55, 6 }
  0xe5   : > { %v4131_v7 = vcombine.low %v1179_v12, %v1182_v59  ;;  %v3957_v37 = vrot.slane %v3934_v24, 9  ;;  %v1195_v32 = vrot.slane %v3935_v29, 5  ;;  %v3999_v0 = vrot.slane %v3970_v49, 10 }
  0xe6   : > { %v1313_v59 = vsel %vm5370_vm5, %v3997_v36, %v1312_v15  ;;  %v1333_v15 = vrot.slane %v5962_v33, 6  ;;  %v1347_v49 = vrot.slane %v6014_v46, 6 }
  0xe7   : > { %3073 = vmatmul.mubr.bf16.gmra.mrb[96].mxu0 %v4088_v53  ;;  %3170 = vmatmul.mubr.bf16.gmra.mrb[96].mxu1 %v4112_v54  ;;  %v3819_v54 = vld [vmem:[%s5171_s10 + $0xd4] sm:$0x1]  ;;  %v4114_v53 = vcombine.low %v3896_v50, %v6014_v46 }
  0xe8   : > { %3080 = vmatprep.mubr.bf16.mxu0 %v4105_v61  ;;  %3177 = vmatprep.mubr.bf16.mxu1 %v4129_v48  ;;  %v3965_v61 = vld [vmem:[%s5171_s10 + $0x38] sm:$0x3]  ;;  %v4090_v48 = vcombine.low %v824_v4, %v827_v51  ;;  %v833_v1 = vrot.slane %v3819_v54, 5  ;;  %v1194_v51 = vrot.slane %v1192_v26, 4 }
  0xe9   : > { %v1308_v6 = vrot.slane %v3965_v61, 6 }
  0xea   : > { %v834_v20 = vsel %vm5184_vm2, %v832_v63, %v833_v1  ;;  %v1326_v63 = vrot.slane %v5936_v16, 6  ;;  %v1193_v1 = vsel %vm5184_vm2, %v3957_v37, %v1192_v26  ;;  %v1196_v45 = vsel %vm5184_vm2, %v1194_v51, %v1195_v32  ;;  %v3902_v51 = vld [vmem:[%s5171_s10 + $0x9c] sm:$0xf] }
  0xeb   : > { %v1323_v16 = vsel %vm5370_vm5, %v1321_v35, %v1322_v56  ;;  %v4133_v55 = vcombine.low %v1193_v1, %v1196_v45  ;;  %v1329_v26 = vrot.slane %v3971_v2, 6  ;;  %v3975_v56 = vld [vmem:[%s5171_s10 + $0x74] sm:$0x3]  ;;  %v3977_v2 = vld [vmem:[%s5171_s10 + $0x80] sm:$0x3] }
  0xec   : > { %v1328_v24 = vrot.slane %v1326_v63, 4 }
  0xee   : > { %v1330_v32 = vsel %vm5370_vm5, %v1328_v24, %v1329_v26  ;;  %v1349_v26 = vrot.slane %v1347_v49, 4 }
  0xef   : > { %3081 = vmatmul.mubr.bf16.gmra.mrb[100].mxu0 %v4089_v39  ;;  %3178 = vmatmul.mubr.bf16.gmra.mrb[100].mxu1 %v4113_v28  ;;  %v1306_v39 = vsel %vm5370_vm5, %v3996_v8, %v1305_v57  ;;  %v1309_v28 = vsel %vm5370_vm5, %v1307_v9, %v1308_v6  ;;  %v6122_v57 = vld [vmem:[%s5171_s10 + $0xac] sm:$0xf]  ;;  %v1320_v8 = vsel %vm5370_vm5, %v3998_v27, %v1319_v31  ;;  %v3937_v9 = vld [vmem:[%s5171_s10 + $0xb0] sm:$0x1]  ;;  %v3972_v6 = vld [vmem:[%s5171_s10 + $0x60] sm:$0xc] }
  0xf0   : > { %3088 = vmatprep.mubr.bf16.mxu0 %v4106_v11  ;;  %3185 = vmatprep.mubr.bf16.mxu1 %v4130_v42  ;;  %v4091_v42 = vcombine.low %v831_v25, %v834_v20  ;;  %v4140_v50 = vcombine.low %v1306_v39, %v1309_v28  ;;  %v3973_v20 = vld [vmem:[%s5171_s10 + $0x68] sm:$0x3]  ;;  %v3958_v39 = vrot.slane %v3936_v3, 9  ;;  %v4142_v30 = vcombine.low %v1320_v8, %v1323_v16  ;;  %v3974_v27 = vld [vmem:[%s5171_s10 + $0x6c] sm:$0xc] }
  0xf1   : > { %v4000_v33 = vrot.slane %v3972_v6, 10  ;;  %v4001_v45 = vrot.slane %v3974_v27, 10 }
  0xf7   : > { %3089 = vmatmul.mubr.bf16.gmra.mrb[104].mxu0 %v4090_v48  ;;  %3186 = vmatmul.mubr.bf16.gmra.mrb[104].mxu1 %v4114_v53  ;;  %v3900_v48 = vld [vmem:[%s5171_s10 + $0x90] sm:$0xf] }
  0xf8   : > { %3096 = vmatprep.mubr.bf16.mxu0 %v4107_v18  ;;  %3193 = vmatprep.mubr.bf16.mxu1 %v4131_v7  ;;  %v1316_v18 = vsel %vm5370_vm5, %v1314_v58, %v1315_v47  ;;  %v1199_v7 = vrot.slane %v6122_v57, 5  ;;  %v4116_v25 = vcombine.low %v3900_v48, %v6066_v10  ;;  %v1202_v58 = vrot.slane %v3937_v9, 5  ;;  %v3939_v48 = vld [vmem:[%s5171_s10 + $0xbc] sm:$0x1] }
  0xf9   : > { %v4141_v41 = vcombine.low %v1313_v59, %v1316_v18  ;;  %v1334_v59 = vsel %vm5370_vm5, %v4000_v33, %v1333_v15  ;;  %v3976_v18 = vld [vmem:[%s5171_s10 + $0x78] sm:$0xc]  ;;  %v1343_v9 = vrot.slane %v3975_v56, 6  ;;  %v3904_v33 = vld [vmem:[%s5171_s10 + $0xa8] sm:$0xf]  ;;  %v1361_v56 = vrot.slane %v6066_v10, 6 }
  0xfa   : > { %v4479_v40 = vpop.f32.mrb[0].mxu1  ;;  %v4407_v11 = vpop.f32.mrb[0].mxu0  ;;  %v1201_v31 = vrot.slane %v1199_v7, 4  ;;  %v4002_v46 = vrot.slane %v3976_v18, 10 }
  0xfb   : > { %v4480_v17 = vpop.f32.mrb[1].mxu1  ;;  %v4408_v4 = vpop.f32.mrb[1].mxu0 }
  0xfc   : > { %v6117_v52 = vadd.f32 %v4480_v17, %v4479_v40  ;;  %v4482_v5 = vpop.f32.mrb[2].mxu1  ;;  %v6119_v54 = vadd.f32 %v4408_v4, %v4407_v11  ;;  %v4410_v19 = vpop.f32.mrb[2].mxu0  ;;  %v1335_v11 = vrot.slane %v1333_v15, 4  ;;  %v1327_v17 = vsel %vm5370_vm5, %v3999_v0, %v1326_v63 }
  0xfd   : > { %v4483_v53 = vpop.f32.mrb[3].mxu1  ;;  %v4411_v12 = vpop.f32.mrb[3].mxu0  ;;  %v1203_v35 = vsel %vm5184_vm2, %v1201_v31, %v1202_v58  ;;  %v4117_v63 = vcombine.low %v3902_v51, %v6092_v13  ;;  %v4143_v1 = vcombine.low %v1327_v17, %v1330_v32  ;;  %v1354_v17 = vrot.slane %v6041_v44, 6  ;;  %v3940_v51 = vld [vmem:[%s5171_s10 + $0xc0] sm:$0xe] }
  0xfe   : > { %v6126_v60 = vadd.f32 %v4483_v53, %v4482_v5  ;;  %v6128_v61 = vadd.f32 %v4411_v12, %v4410_v19  ;;  %v1340_v5 = vrot.slane %v5988_v62, 6  ;;  %v1200_v19 = vsel %vm5184_vm2, %v3958_v39, %v1199_v7  ;;  %v3938_v53 = vld [vmem:[%s5171_s10 + $0xb4] sm:$0xe]  ;;  %v3941_v32 = vld [vmem:[%s5171_s10 + $0xc8] sm:$0x1] }
  0xff   : > { %3097 = vmatmul.mubr.bf16.gmra.mrb[108].mxu0 %v4091_v42  ;;  %3194 = vmatmul.mubr.bf16.gmra.mrb[108].mxu1 %v4115_v34  ;;  %v1336_v42 = vrot.slane %v3973_v20, 6  ;;  %v4134_v8 = vcombine.low %v1200_v19, %v1203_v35  ;;  %v3959_v6 = vrot.slane %v3938_v53, 9  ;;  %v1209_v20 = vrot.slane %v3939_v48, 5  ;;  %v3980_v35 = vld [vmem:[%s5171_s10 + $0x90] sm:$0xc] }
 0x100   : > { %3201 = vmatprep.mubr.bf16.mxu1 %v4132_v43  ;;  %4879 = vmatprep.mubr.bf16.mxu0 %v4140_v50  ;;  %v6156_v43 = vld [vmem:[%s5171_s10 + $0xb8] sm:$0xf]  ;;  %v1342_v16 = vrot.slane %v1340_v5, 4  ;;  %v1350_v39 = vrot.slane %v3977_v2, 6  ;;  %v4118_v53 = vcombine.low %v3904_v33, %v6122_v57  ;;  %v4004_v10 = vrot.slane %v3980_v35, 10 }
 0x101   : > { %v1206_v12 = vrot.slane %v6156_v43, 5  ;;  %v1337_v62 = vsel %vm5370_vm5, %v1335_v11, %v1336_v42  ;;  %v3978_v11 = vld [vmem:[%s5171_s10 + $0x84] sm:$0xc]  ;;  %v3979_v42 = vld [vmem:[%s5171_s10 + $0x8c] sm:$0x3] }
 0x102   : > { %v4485_v21 = vpop.f32.mrb[4].mxu1  ;;  %v4413_v22 = vpop.f32.mrb[4].mxu0  ;;  %v1351_v19 = vsel %vm5370_vm5, %v1349_v26, %v1350_v39  ;;  %v3981_v44 = vld [vmem:[%s5171_s10 + $0x98] sm:$0x3]  ;;  %v3906_v39 = vld [vmem:[%s5171_s10 + $0xb4] sm:$0xf] }
 0x103   : > { %v4486_v28 = vpop.f32.mrb[5].mxu1  ;;  %v4414_v29 = vpop.f32.mrb[5].mxu0  ;;  %v1208_v0 = vrot.slane %v1206_v12, 4  ;;  %v3983_v33 = vld [vmem:[%s5171_s10 + $0xa4] sm:$0x3] }
 0x104   : > { %v6151_v34 = vadd.f32 %v4486_v28, %v4485_v21  ;;  %v4488_v36 = vpop.f32.mrb[6].mxu1  ;;  %v6153_v38 = vadd.f32 %v4414_v29, %v4413_v22  ;;  %v4416_v40 = vpop.f32.mrb[6].mxu0  ;;  %v6190_v28 = vld [vmem:[%s5171_s10 + $0xc4] sm:$0xf] }
 0x105   : > { %v4489_v47 = vpop.f32.mrb[7].mxu1  ;;  %v4417_v37 = vpop.f32.mrb[7].mxu0  ;;  %v1213_v27 = vrot.slane %v6190_v28, 5 }
 0x106   : > { %v6160_v4 = vadd.f32 %v4489_v47, %v4488_v36  ;;  %v6162_v50 = vadd.f32 %v4417_v37, %v4416_v40  ;;  %v1341_v36 = vsel %vm5370_vm5, %v4001_v45, %v1340_v5  ;;  %v1344_v40 = vsel %vm5370_vm5, %v1342_v16, %v1343_v9 }
 0x107   : > { %3202 = vmatmul.mubr.bf16.gmra.mrb[112].mxu1 %v4116_v25  ;;  %4880 = vmatmul.mubr.bf16.vlgmr.msra.gmra.mrb[112].mxu0 %v4141_v41  ;;  %v4144_v41 = vcombine.low %v1334_v59, %v1337_v62  ;;  %v1207_v47 = vsel %vm5184_vm2, %v3959_v6, %v1206_v12  ;;  %v1210_v37 = vsel %vm5184_vm2, %v1208_v0, %v1209_v20  ;;  %v4003_v59 = vrot.slane %v3978_v11, 10  ;;  %v6224_v0 = vld [vmem:[%s5171_s10 + $0xd0] sm:$0xf]  ;;  %v3942_v11 = vld [vmem:[%s5171_s10 + $0xcc] sm:$0xe] }
 0x108   : > { %3209 = vmatprep.mubr.bf16.mxu1 %v4133_v55  ;;  %4883 = vmatprep.mubr.bf16.mxu0 %v4142_v30  ;;  %v1348_v5 = vsel %vm5370_vm5, %v4002_v46, %v1347_v49  ;;  %v4145_v12 = vcombine.low %v1341_v36, %v1344_v40  ;;  %v4135_v18 = vcombine.low %v1207_v47, %v1210_v37  ;;  %v1216_v45 = vrot.slane %v3941_v32, 5  ;;  %v3985_v32 = vld [vmem:[%s5171_s10 + $0xb0] sm:$0x3] }
 0x109   : > { %v1220_v47 = vrot.slane %v6224_v0, 5  ;;  %v1362_v37 = vsel %vm5370_vm5, %v4004_v10, %v1361_v56 }
 0x10a   : > { %v4491_v3 = vpop.f32.mrb[8].mxu1  ;;  %v4419_v7 = vpop.f32.mrb[8].mxu0 }
 0x10b   : > { %v4492_v15 = vpop.f32.mrb[9].mxu1  ;;  %v4420_v25 = vpop.f32.mrb[9].mxu0 }
 0x10c   : > { %v6185_v21 = vadd.f32 %v4492_v15, %v4491_v3  ;;  %v4494_v22 = vpop.f32.mrb[10].mxu1  ;;  %v6187_v55 = vadd.f32 %v4420_v25, %v4419_v7  ;;  %v4422_v24 = vpop.f32.mrb[10].mxu0  ;;  %v4146_v3 = vcombine.low %v1348_v5, %v1351_v19  ;;  %v1356_v7 = vrot.slane %v1354_v17, 4  ;;  %v6255_v5 = vld [vmem:[%s6711_s2] ss:$0 sm:$0xff] }
 0x10d   : > { %v4495_v29 = vpop.f32.mrb[11].mxu1  ;;  %v4423_v30 = vpop.f32.mrb[11].mxu0  ;;  %v1363_v25 = vrot.slane %v1361_v56, 4  ;;  %v4119_v19 = vcombine.low %v3906_v39, %v6156_v43 }
 0x10e   : > { %v6192_v31 = vadd.f32 %v4495_v29, %v4494_v22  ;;  %v6194_v58 = vadd.f32 %v4423_v30, %v4422_v24  ;;  %v1368_v22 = vrot.slane %v6092_v13, 6  ;;  %v1355_v29 = vsel %vm5370_vm5, %v4003_v59, %v1354_v17  ;;  %v3982_v30 = vld [vmem:[%s5171_s10 + $0x9c] sm:$0xc] }
 0x10f   : > { %3210 = vmatmul.mubr.bf16.gmra.mrb[116].mxu1 %v4117_v63  ;;  %4884 = vmatmul.mubr.bf16.gmra.mrb[116].mxu0 %v4143_v1  ;;  %v1357_v63 = vrot.slane %v3979_v42, 6  ;;  %v3960_v1 = vrot.slane %v3940_v51, 9  ;;  %v3943_v42 = vld [vmem:[%s5171_s10 + $0xd4] sm:$0x1]  ;;  %v3984_v51 = vld [vmem:[%s5171_s10 + $0xa8] sm:$0xc] }
 0x110   : > { %3217 = vmatprep.mubr.bf16.mxu1 %v4134_v8  ;;  %4887 = vmatprep.mubr.bf16.mxu0 %v4144_v41  ;;  %v1215_v8 = vrot.slane %v1213_v27, 4  ;;  %v1364_v41 = vrot.slane %v3981_v44, 6  ;;  %v4005_v35 = vrot.slane %v3982_v30, 10  ;;  %v3987_v30 = vld [vmem:[%s5171_s10 + $0xbc] sm:$0x3] }
 0x111   : > { %v1358_v36 = vsel %vm5370_vm5, %v1356_v7, %v1357_v63  ;;  %v1214_v13 = vsel %vm5184_vm2, %v3960_v1, %v1213_v27  ;;  %v1375_v27 = vrot.slane %v6122_v57, 6  ;;  %v6259_v63 = vld [vmem:[%s5171_s10 + $0xdc] sm:$0xf]  ;;  %v2657_v7 = vadd.f32 %v6119_v54, %v6255_v5 }
 0x112   : > { %v4497_v62 = vpop.f32.mrb[12].mxu1  ;;  %v4425_v48 = vpop.f32.mrb[12].mxu0  ;;  %v1217_v40 = vsel %vm5184_vm2, %v1215_v8, %v1216_v45  ;;  %v1365_v17 = vsel %vm5370_vm5, %v1363_v25, %v1364_v41  ;;  %v4147_v44 = vcombine.low %v1355_v29, %v1358_v36  ;;  %v3986_v41 = vld [vmem:[%s5171_s10 + $0xb4] sm:$0xc]  ;;  %v1369_v39 = vsel %vm5370_vm5, %v4005_v35, %v1368_v22 }
 0x113   : > { %v4498_v2 = vpop.f32.mrb[13].mxu1  ;;  %v4426_v49 = vpop.f32.mrb[13].mxu0  ;;  %v4148_v45 = vcombine.low %v1362_v37, %v1365_v17  ;;  %v1377_v25 = vrot.slane %v1375_v27, 4  ;;  %v1382_v54 = vrot.slane %v6156_v43, 6  ;;  %v2660_v36 = vadd.f32 %v6128_v61, %v6255_v5  ;;  %v3908_v37 = vld [vmem:[%s5171_s10 + $0xc0] sm:$0xf] }
 0x114   : > { %v6219_v16 = vadd.f32 %v4498_v2, %v4497_v62  ;;  %v4500_v9 = vpop.f32.mrb[14].mxu1  ;;  %v6221_v6 = vadd.f32 %v4426_v49, %v4425_v48  ;;  %v4428_v15 = vpop.f32.mrb[14].mxu0  ;;  %v4136_v62 = vcombine.low %v1214_v13, %v1217_v40  ;;  %v3961_v48 = vrot.slane %v3942_v11, 9 }
 0x115   : > { %v4501_v20 = vpop.f32.mrb[15].mxu1  ;;  %v4429_v46 = vpop.f32.mrb[15].mxu0  ;;  %v1222_v2 = vrot.slane %v1220_v47, 4  ;;  %v4006_v49 = vrot.slane %v3984_v51, 10  ;;  %v4007_v51 = vrot.slane %v3986_v41, 10 }
 0x116   : > { %v6227_v24 = vadd.f32 %v4501_v20, %v4500_v9  ;;  %v6229_v26 = vadd.f32 %v4429_v46, %v4428_v15  ;;  %v1221_v43 = vsel %vm5184_vm2, %v3961_v48, %v1220_v47  ;;  %v1384_v47 = vrot.slane %v1382_v54, 4 }
 0x117   : > { %3218 = vmatmul.mubr.bf16.gmra.mrb[120].mxu1 %v4118_v53  ;;  %4888 = vmatmul.mubr.bf16.gmra.mrb[120].mxu0 %v4145_v12  ;;  %v1370_v53 = vrot.slane %v1368_v22, 4  ;;  %v1371_v12 = vrot.slane %v3983_v33, 6  ;;  %v1227_v33 = vrot.slane %v6259_v63, 5  ;;  %v3945_v22 = vld [vmem:[%s5171_s10 + $0xe0] sm:$0x1]  ;;  %v1376_v61 = vsel %vm5370_vm5, %v4006_v49, %v1375_v27 }
 0x118   : > { %3225 = vmatprep.mubr.bf16.mxu1 %v4135_v18  ;;  %4891 = vmatprep.mubr.bf16.mxu0 %v4146_v3  ;;  %v1223_v18 = vrot.slane %v3943_v42, 5  ;;  %v1378_v3 = vrot.slane %v3985_v32, 6  ;;  %v3944_v42 = vld [vmem:[%s5171_s10 + $0xd8] sm:$0xe]  ;;  %v1230_v48 = vrot.slane %v3945_v22, 5  ;;  %v4120_v27 = vcombine.low %v3908_v37, %v6190_v28 }
 0x119   : > { %v1372_v29 = vsel %vm5370_vm5, %v1370_v53, %v1371_v12  ;;  %v3988_v53 = vld [vmem:[%s5171_s10 + $0xc0] sm:$0xc]  ;;  %v3989_v12 = vld [vmem:[%s5171_s10 + $0xc8] sm:$0x3]  ;;  %v2681_v14 = vadd.f32 %v6221_v6, %v6255_v5 }
 0x11a   : > { %v4519_v59 = vpop.f32.mrb[16].mxu1  ;;  %v4431_v56 = vpop.f32.mrb[16].mxu0  ;;  %v1224_v17 = vsel %vm5184_vm2, %v1222_v2, %v1223_v18  ;;  %v1379_v35 = vsel %vm5370_vm5, %v1377_v25, %v1378_v3  ;;  %v6298_v3 = vsel %vm5370_vm5, %v4007_v51, %v1382_v54  ;;  %v3947_v51 = vld [vmem:[%s5171_s10 + $0xec] sm:$0x1] }
 0x11b   : > { %v4520_v57 = vpop.f32.mrb[17].mxu1  ;;  %v4432_v1 = vpop.f32.mrb[17].mxu0  ;;  %v4150_v49 = vcombine.low %v1376_v61, %v1379_v35  ;;  %v3991_v61 = vld [vmem:[%s5171_s10 + $0xd4] sm:$0x3] }
 0x11c   : > { %v4521_v8 = vadd.f32 %v4520_v57, %v4519_v59  ;;  %v4522_v10 = vpop.f32.mrb[18].mxu1  ;;  %v6263_v9 = vadd.f32 %v4432_v1, %v4431_v56  ;;  %v4434_v15 = vpop.f32.mrb[18].mxu0  ;;  %v1389_v59 = vrot.slane %v6190_v28, 6  ;;  %v3962_v56 = vrot.slane %v3944_v42, 9 }
 0x11d   : > { %v4523_v20 = vpop.f32.mrb[19].mxu1  ;;  %v4435_v46 = vpop.f32.mrb[19].mxu0  ;;  %v4149_v1 = vcombine.low %v1369_v39, %v1372_v29 }
 0x11e   : > { %v6275_v13 = vadd.f32 %v4521_v8, %v2657_v7  ;;  %v4524_v40 = vadd.f32 %v4523_v20, %v4522_v10  ;;  %v6277_v11 = vadd.f32 %v4435_v46, %v4434_v15  ;;  %v4008_v7 = vrot.slane %v3988_v53, 10  ;;  %v6305_v46 = vld [vmem:[%s5171_s10 + $0xe8] sm:$0xf] }
 0x11f   : > { %3226 = vmatmul.mubr.bf16.gmra.mrb[124].mxu1 %v4119_v19  ;;  %4892 = vmatmul.mubr.bf16.gmra.mrb[124].mxu0 %v4147_v44  ;;  %v1385_v19 = vrot.slane %v3987_v30, 6  ;;  %v1229_v44 = vrot.slane %v1227_v33, 4  ;;  %v1392_v8 = vrot.slane %v3989_v12, 6  ;;  %v2665_v10 = vadd.f32 %v6153_v38, %v6255_v5  ;;  %v3992_v12 = vld [vmem:[%s5171_s10 + $0xd8] sm:$0xc] }
 0x120   : > { %v6288_v32 = vadd.f32 %v4524_v40, %v2660_v36  ;;  %3233 = vmatprep.mubr.bf16.mxu1 %v4136_v62  ;;  %4895 = vmatprep.mubr.bf16.mxu0 %v4148_v45  ;;  %v4137_v62 = vcombine.low %v1221_v43, %v1224_v17  ;;  %v1391_v20 = vrot.slane %v1389_v59, 4  ;;  %v1228_v38 = vsel %vm5184_vm2, %v3962_v56, %v1227_v33  ;;  %v3910_v43 = vld [vmem:[%s5171_s10 + $0xcc] sm:$0xf]  ;;  %v3946_v33 = vld [vmem:[%s5171_s10 + $0xe4] sm:$0xe] }
 0x121   : > { %v1386_v30 = vsel %vm5370_vm5, %v1384_v47, %v1385_v19  ;;  %v1231_v54 = vsel %vm5184_vm2, %v1229_v44, %v1230_v48  ;;  %v1396_v36 = vrot.slane %v6224_v0, 6  ;;  %v2668_v40 = vadd.f32 %v6162_v50, %v6255_v5  ;;  %v3990_v17 = vld [vmem:[%s5171_s10 + $0xcc] sm:$0xc]  ;;  %v3993_v47 = vld [vmem:[%s5171_s10 + $0xe0] sm:$0x3] }
 0x122   : > { %v4525_v18 = vpop.f32.mrb[20].mxu1  ;;  %v4437_v57 = vpop.f32.mrb[20].mxu0  ;;  %v1234_v35 = vrot.slane %v6305_v46, 5  ;;  %v1390_v50 = vsel %vm5370_vm5, %v4008_v7, %v1389_v59  ;;  %v1393_v53 = vsel %vm5370_vm5, %v1391_v20, %v1392_v8  ;;  %v1403_v56 = vrot.slane %v6259_v63, 6 }
 0x123   : > { %v4526_v45 = vpop.f32.mrb[21].mxu1  ;;  %v4438_v2 = vpop.f32.mrb[21].mxu0  ;;  %v4121_v44 = vcombine.low %v3910_v43, %v6224_v0  ;;  %v4151_v48 = vcombine.low %v6298_v3, %v1386_v30  ;;  %v2673_v0 = vadd.f32 %v6187_v55, %v6255_v5  ;;  %v2692_v23 = vadd.f32 %v6277_v11, %v6255_v5 }
 0x124   : > { %v4527_v15 = vadd.f32 %v4526_v45, %v4525_v18  ;;  %v4528_v25 = vpop.f32.mrb[22].mxu1  ;;  %v6302_v41 = vadd.f32 %v4438_v2, %v4437_v57  ;;  %v4440_v28 = vpop.f32.mrb[22].mxu0  ;;  %v4138_v18 = vcombine.low %v1228_v38, %v1231_v54  ;;  %v4009_v57 = vrot.slane %v3990_v17, 10  ;;  %v3912_v17 = vld [vmem:[%s5171_s10 + $0xd8] sm:$0xf] }
 0x125   : > { %v4529_v39 = vpop.f32.mrb[23].mxu1  ;;  %v4441_v29 = vpop.f32.mrb[23].mxu0  ;;  %v1399_v45 = vrot.slane %v3991_v61, 6  ;;  %v3963_v2 = vrot.slane %v3946_v33, 9  ;;  %v1236_v8 = vrot.slane %v1234_v35, 4 }
 0x126   : > { %v6316_v42 = vadd.f32 %v4527_v15, %v2665_v10  ;;  %v4530_v22 = vadd.f32 %v4529_v39, %v4528_v25  ;;  %v6318_v37 = vadd.f32 %v4441_v29, %v4440_v28  ;;  %v4152_v10 = vcombine.low %v1390_v50, %v1393_v53  ;;  %v3994_v53 = vld [vmem:[%s5171_s10 + $0xe4] sm:$0xc] }
 0x127   : > { %3234 = vmatmul.mubr.bf16.gmra.mrb[128].mxu1 %v4120_v27  ;;  %4896 = vmatmul.mubr.bf16.gmra.mrb[128].mxu0 %v4149_v1  ;;  %v4010_v15 = vrot.slane %v3992_v12, 10  ;;  %v1406_v25 = vrot.slane %v3993_v47, 6  ;;  %v1405_v29 = vrot.slane %v1403_v56, 4  ;;  %v1397_v54 = vsel %vm5370_vm5, %v4009_v57, %v1396_v36  ;;  %v3995_v12 = vld [vmem:[%s5171_s10 + $0xec] sm:$0x3] }
 0x128   : > { %v6326_v19 = vadd.f32 %v4530_v22, %v2668_v40  ;;  %3241 = vmatprep.mubr.bf16.mxu1 %v4137_v62  ;;  %4899 = vmatprep.mubr.bf16.mxu0 %v4150_v49  ;;  %v1398_v62 = vrot.slane %v1396_v36, 4  ;;  %v1237_v49 = vrot.slane %v3947_v51, 5  ;;  %v2676_v40 = vadd.f32 %v6194_v58, %v6255_v5 }
 0x129   : > { %v1235_v33 = vsel %vm5184_vm2, %v3963_v2, %v1234_v35  ;;  %v1404_v36 = vsel %vm5370_vm5, %v4010_v15, %v1403_v56  ;;  %v1407_v50 = vsel %vm5370_vm5, %v1405_v29, %v1406_v25  ;;  %v1410_v47 = vrot.slane %v6305_v46, 6 }
 0x12a   : > { %v4531_v27 = vpop.f32.mrb[24].mxu1  ;;  %v4443_v1 = vpop.f32.mrb[24].mxu0  ;;  %v1400_v61 = vsel %vm5370_vm5, %v1398_v62, %v1399_v45  ;;  %v1238_v58 = vsel %vm5184_vm2, %v1236_v8, %v1237_v49  ;;  %v4122_v35 = vcombine.low %v3912_v17, %v6259_v63  ;;  %v4011_v62 = vrot.slane %v3994_v53, 10 }
 0x12b   : > { %v4532_v59 = vpop.f32.mrb[25].mxu1  ;;  %v4444_v7 = vpop.f32.mrb[25].mxu0  ;;  %v4153_v57 = vcombine.low %v1397_v54, %v1400_v61  ;;  %v1413_v45 = vrot.slane %v3995_v12, 6  ;;  %v2684_v63 = vadd.f32 %v6229_v26, %v6255_v5  ;;  %v2689_v17 = vadd.f32 %v6263_v9, %v6255_v5 }
 0x12c   : > { %v4533_v28 = vadd.f32 %v4532_v59, %v4531_v27  ;;  %v4534_v3 = vpop.f32.mrb[26].mxu1  ;;  %v6339_v20 = vadd.f32 %v4444_v7, %v4443_v1  ;;  %v4446_v39 = vpop.f32.mrb[26].mxu0  ;;  %v4139_v1 = vcombine.low %v1235_v33, %v1238_v58 }
 0x12d   : > { %v4535_v30 = vpop.f32.mrb[27].mxu1  ;;  %v4447_v38 = vpop.f32.mrb[27].mxu0 }
 0x12e   : > { %v6345_v22 = vadd.f32 %v4533_v28, %v2673_v0  ;;  %v4536_v43 = vadd.f32 %v4535_v30, %v4534_v3  ;;  %v6347_v55 = vadd.f32 %v4447_v38, %v4446_v39  ;;  %v3914_v3 = vld [vmem:[%s5171_s10 + $0xe4] sm:$0xf]  ;;  %v1411_v39 = vsel %vm5370_vm5, %v4011_v62, %v1410_v47  ;;  %s4263_s10 = sshll.u32 %s6722_s12, 7 }
 0x12f   : > { %3242 = vmatmul.mubr.bf16.gmra.mrb[132].mxu1 %v4121_v44  ;;  %4900 = vmatmul.mubr.bf16.gmra.mrb[132].mxu0 %v4151_v48  ;;  %s6645_s8 = scalar_lea.vmem %s6712_s3, %s4263_s10 }
 0x130   : > { %v6356_v51 = vadd.f32 %v4536_v43, %v2676_v40  ;;  %3249 = vmatprep.mubr.bf16.mxu1 %v4138_v18  ;;  %4903 = vmatprep.mubr.bf16.mxu0 %v4152_v10  ;;  %v4154_v18 = vcombine.low %v1404_v36, %v1407_v50  ;;  %v1412_v10 = vrot.slane %v1410_v47, 4  ;;  %v4123_v40 = vcombine.low %v3914_v3, %v6305_v46 }
 0x132   : > { %v4537_v44 = vpop.f32.mrb[28].mxu1  ;;  %v4449_v48 = vpop.f32.mrb[28].mxu0  ;;  %v1414_v29 = vsel %vm5370_vm5, %v1412_v10, %v1413_v45 }
 0x133   : > { %v4538_v56 = vpop.f32.mrb[29].mxu1  ;;  %v4450_v27 = vpop.f32.mrb[29].mxu0  ;;  %v4155_v43 = vcombine.low %v1411_v39, %v1414_v29 }
 0x134   : > { %v4539_v2 = vadd.f32 %v4538_v56, %v4537_v44  ;;  %v4540_v49 = vpop.f32.mrb[30].mxu1  ;;  %v6368_v59 = vadd.f32 %v4450_v27, %v4449_v48  ;;  %v4452_v7 = vpop.f32.mrb[30].mxu0  ;;  %v2697_v56 = vadd.f32 %v6302_v41, %v6255_v5 }
 0x135   : > { %v4541_v8 = vpop.f32.mrb[31].mxu1  ;;  %v4453_v15 = vpop.f32.mrb[31].mxu0 }
 0x136   : > { %v6372_v25 = vadd.f32 %v4539_v2, %v2681_v14  ;;  %v4542_v0 = vadd.f32 %v4541_v8, %v4540_v49  ;;  %v6374_v28 = vadd.f32 %v4453_v15, %v4452_v7  ;;  %v2700_v14 = vadd.f32 %v6318_v37, %v6255_v5 }
 0x137   : > { %3250 = vmatmul.mubr.bf16.gmra.mrb[136].mxu1 %v4122_v35  ;;  %4904 = vmatmul.mubr.bf16.gmra.mrb[136].mxu0 %v4153_v57 }
 0x138   : > { %v6376_v6 = vadd.f32 %v4542_v0, %v2684_v63  ;;  %3257 = vmatprep.mubr.bf16.mxu1 %v4139_v1  ;;  %4907 = vmatprep.mubr.bf16.mxu0 %v4154_v18  ;;  %v2705_v0 = vadd.f32 %v6339_v20, %v6255_v5 }
 0x13a   : > { %v4543_v30 = vpop.f32.mrb[32].mxu1  ;;  %v4455_v26 = vpop.f32.mrb[32].mxu0 }
 0x13b   : > { %v4544_v38 = vpop.f32.mrb[33].mxu1  ;;  %v4456_v54 = vpop.f32.mrb[33].mxu0 }
 0x13c   : > { %v4545_v61 = vadd.f32 %v4544_v38, %v4543_v30  ;;  %v4546_v33 = vpop.f32.mrb[34].mxu1  ;;  %v6386_v36 = vadd.f32 %v4456_v54, %v4455_v26  ;;  %v4458_v58 = vpop.f32.mrb[34].mxu0  ;;  %v2708_v38 = vadd.f32 %v6347_v55, %v6255_v5 }
 0x13d   : > { %v4547_v50 = vpop.f32.mrb[35].mxu1  ;;  %v4459_v53 = vpop.f32.mrb[35].mxu0 }
 0x13e   : > { %v6390_v12 = vadd.f32 %v4545_v61, %v2689_v17  ;;  %v4548_v47 = vadd.f32 %v4547_v50, %v4546_v33  ;;  %v4460_v44 = vadd.f32 %v4459_v53, %v4458_v58  ;;  %v2713_v50 = vadd.f32 %v6368_v59, %v6255_v5 }
 0x13f   : > { %3258 = vmatmul.mubr.bf16.gmra.mrb[140].mxu1 %v4123_v40  ;;  %4908 = vmatmul.mubr.bf16.gmra.mrb[140].mxu0 %v4155_v43 }
 0x140   : > { %v6392_v46 = vadd.f32 %v4548_v47, %v2692_v23 }
 0x142   : > { %v4549_v48 = vpop.f32.mrb[36].mxu1  ;;  %v4461_v9 = vpop.f32.mrb[36].mxu0 }
 0x143   : > { %v4550_v35 = vpop.f32.mrb[37].mxu1  ;;  %v4462_v57 = vpop.f32.mrb[37].mxu0 }
 0x144   : > { %v4551_v27 = vadd.f32 %v4550_v35, %v4549_v48  ;;  %v4552_v1 = vpop.f32.mrb[38].mxu1  ;;  %v6396_v18 = vadd.f32 %v4462_v57, %v4461_v9  ;;  %v4464_v11 = vpop.f32.mrb[38].mxu0  ;;  %v2716_v35 = vadd.f32 %v6374_v28, %v6255_v5  ;;  %v2724_v28 = vadd.f32 %v4460_v44, %v6255_v5 }
 0x145   : > { %v4553_v62 = vpop.f32.mrb[39].mxu1  ;;  %v4465_v45 = vpop.f32.mrb[39].mxu0 }
 0x146   : > { %v6400_v2 = vadd.f32 %v4551_v27, %v2697_v56  ;;  %v4554_v49 = vadd.f32 %v4553_v62, %v4552_v1  ;;  %v4466_v7 = vadd.f32 %v4465_v45, %v4464_v11  ;;  %v2729_v44 = vadd.f32 %v6396_v18, %v6255_v5 }
 0x148   : > { %v6402_v10 = vadd.f32 %v4554_v49, %v2700_v14  ;;  %v2721_v14 = vadd.f32 %v6386_v36, %v6255_v5 }
 0x14a   : > { %v4555_v8 = vpop.f32.mrb[40].mxu1  ;;  %v4467_v15 = vpop.f32.mrb[40].mxu0 }
 0x14b   : > { %v4556_v63 = vpop.f32.mrb[41].mxu1  ;;  %v4468_v41 = vpop.f32.mrb[41].mxu0 }
 0x14c   : > { %v4557_v3 = vadd.f32 %v4556_v63, %v4555_v8  ;;  %v4558_v39 = vpop.f32.mrb[42].mxu1  ;;  %v6406_v29 = vadd.f32 %v4468_v41, %v4467_v15  ;;  %v4470_v30 = vpop.f32.mrb[42].mxu0 }
 0x14d   : > { %v4559_v26 = vpop.f32.mrb[43].mxu1  ;;  %v4471_v37 = vpop.f32.mrb[43].mxu0 }
 0x14e   : > { %v6410_v54 = vadd.f32 %v4557_v3, %v2705_v0  ;;  %v4560_v40 = vadd.f32 %v4559_v26, %v4558_v39  ;;  %v6412_v43 = vadd.f32 %v4471_v37, %v4470_v30 }
 0x150   : > { %v6414_v17 = vadd.f32 %v4560_v40, %v2708_v38 }
 0x152   : > { %v4561_v61 = vpop.f32.mrb[44].mxu1  ;;  %v4473_v33 = vpop.f32.mrb[44].mxu0 }
 0x153   : > { %v4562_v20 = vpop.f32.mrb[45].mxu1  ;;  %v4474_v58 = vpop.f32.mrb[45].mxu0 }
 0x154   : > { %v4563_v53 = vadd.f32 %v4562_v20, %v4561_v61  ;;  %v4564_v23 = vpop.f32.mrb[46].mxu1  ;;  %v6418_v47 = vadd.f32 %v4474_v58, %v4473_v33  ;;  %v4476_v48 = vpop.f32.mrb[46].mxu0 }
 0x155   : > { %v4565_v55 = vpop.f32.mrb[47].mxu1  ;;  %v4477_v9 = vpop.f32.mrb[47].mxu0 }
 0x156   : > { %v6422_v57 = vadd.f32 %v4563_v53, %v2713_v50  ;;  %v4566_v56 = vadd.f32 %v4565_v55, %v4564_v23  ;;  %v6424_v27 = vadd.f32 %v4477_v9, %v4476_v48 }
 0x158   : > { %v6426_v1 = vadd.f32 %v4566_v56, %v2716_v35 }
 0x15a   : > { %v4567_v11 = vpop.f32.mrb[48].mxu1  ;;  %v4631_v62 = vpop.f32.mrb[48].mxu0 }
 0x15b   : > { %v4568_v59 = vpop.f32.mrb[49].mxu1  ;;  %v4632_v45 = vpop.f32.mrb[49].mxu0 }
 0x15c   : > { %v4569_v49 = vadd.f32 %v4568_v59, %v4567_v11  ;;  %v4633_v8 = vadd.f32 %v4632_v45, %v4631_v62  ;;  %v4570_v15 = vpop.f32.mrb[50].mxu1  ;;  %v4634_v63 = vpop.f32.mrb[50].mxu0 }
 0x15d   : > { %v4571_v41 = vpop.f32.mrb[51].mxu1  ;;  %v4635_v0 = vpop.f32.mrb[51].mxu0 }
 0x15e   : > { %v6431_v3 = vadd.f32 %v4569_v49, %v2721_v14  ;;  %v6434_v39 = vadd.f32 %v4633_v8, %v6275_v13  ;;  %v4572_v30 = vadd.f32 %v4571_v41, %v4570_v15  ;;  %v4636_v26 = vadd.f32 %v4635_v0, %v4634_v63 }
 0x15f   : > { %v2732_v13 = vadd.f32 %v4466_v7, %v6255_v5  ;;  %v2737_v7 = vadd.f32 %v6406_v29, %v6255_v5 }
 0x160   : > { %v6436_v37 = vadd.f32 %v4572_v30, %v2724_v28  ;;  %v6439_v38 = vadd.f32 %v4636_v26, %v6288_v32 }
 0x162   : > { %v4573_v36 = vpop.f32.mrb[52].mxu1  ;;  %v4637_v40 = vpop.f32.mrb[52].mxu0 }
 0x163   : > { %v4574_v61 = vpop.f32.mrb[53].mxu1  ;;  %v4638_v33 = vpop.f32.mrb[53].mxu0 }
 0x164   : > { %v4575_v20 = vadd.f32 %v4574_v61, %v4573_v36  ;;  %v4639_v58 = vadd.f32 %v4638_v33, %v4637_v40  ;;  %v4576_v50 = vpop.f32.mrb[54].mxu1  ;;  %v4640_v53 = vpop.f32.mrb[54].mxu0 }
 0x165   : > { %v4577_v23 = vpop.f32.mrb[55].mxu1  ;;  %v4641_v48 = vpop.f32.mrb[55].mxu0 }
 0x166   : > { %v6444_v55 = vadd.f32 %v4575_v20, %v2729_v44  ;;  %v6447_v32 = vadd.f32 %v4639_v58, %v6316_v42  ;;  %v4578_v9 = vadd.f32 %v4577_v23, %v4576_v50  ;;  %v4642_v35 = vadd.f32 %v4641_v48, %v4640_v53 }
 0x167   : > { %v2740_v42 = vadd.f32 %v6412_v43, %v6255_v5  ;;  %v2745_v43 = vadd.f32 %v6418_v47, %v6255_v5 }
 0x168   : > { %v6449_v56 = vadd.f32 %v4578_v9, %v2732_v13  ;;  %v6452_v11 = vadd.f32 %v4642_v35, %v6326_v19 }
 0x16a   : > { %v4579_v18 = vpop.f32.mrb[56].mxu1  ;;  %v4643_v62 = vpop.f32.mrb[56].mxu0 }
 0x16b   : > { %v4580_v59 = vpop.f32.mrb[57].mxu1  ;;  %v4644_v45 = vpop.f32.mrb[57].mxu0 }
 0x16c   : > { %v4581_v14 = vadd.f32 %v4580_v59, %v4579_v18  ;;  %v4645_v49 = vadd.f32 %v4644_v45, %v4643_v62  ;;  %v4582_v8 = vpop.f32.mrb[58].mxu1  ;;  %v4646_v15 = vpop.f32.mrb[58].mxu0 }
 0x16d   : > { %v4583_v63 = vpop.f32.mrb[59].mxu1  ;;  %v4647_v28 = vpop.f32.mrb[59].mxu0 }
 0x16e   : > { %v6458_v41 = vadd.f32 %v4581_v14, %v2737_v7  ;;  %v6461_v19 = vadd.f32 %v4645_v49, %v6345_v22  ;;  %v4584_v0 = vadd.f32 %v4583_v63, %v4582_v8  ;;  %v4648_v30 = vadd.f32 %v4647_v28, %v4646_v15 }
 0x16f   : > { %v2748_v22 = vadd.f32 %v6424_v27, %v6255_v5  ;;  %v2753_v27 = vadd.f32 %v6117_v52, %v6255_v5 }
 0x170   : > { %v6463_v26 = vadd.f32 %v4584_v0, %v2740_v42  ;;  %v6466_v29 = vadd.f32 %v4648_v30, %v6356_v51 }
 0x172   : > { %v4585_v36 = vpop.f32.mrb[60].mxu1  ;;  %v4649_v40 = vpop.f32.mrb[60].mxu0 }
 0x173   : > { %v4586_v61 = vpop.f32.mrb[61].mxu1  ;;  %v4650_v33 = vpop.f32.mrb[61].mxu0 }
 0x174   : > { %v4587_v44 = vadd.f32 %v4586_v61, %v4585_v36  ;;  %v4651_v20 = vadd.f32 %v4650_v33, %v4649_v40  ;;  %v4588_v58 = vpop.f32.mrb[62].mxu1  ;;  %v4652_v50 = vpop.f32.mrb[62].mxu0 }
 0x175   : > { %v4589_v53 = vpop.f32.mrb[63].mxu1  ;;  %v4653_v13 = vpop.f32.mrb[63].mxu0 }
 0x176   : > { %v6472_v23 = vadd.f32 %v4587_v44, %v2745_v43  ;;  %v6475_v51 = vadd.f32 %v4651_v20, %v6372_v25  ;;  %v4590_v48 = vadd.f32 %v4589_v53, %v4588_v58  ;;  %v4654_v9 = vadd.f32 %v4653_v13, %v4652_v50 }
 0x177   : > { %v2756_v25 = vadd.f32 %v6126_v60, %v6255_v5  ;;  %v2761_v60 = vadd.f32 %v6151_v34, %v6255_v5 }
 0x178   : > { %v6477_v35 = vadd.f32 %v4590_v48, %v2748_v22  ;;  %v6480_v47 = vadd.f32 %v4654_v9, %v6376_v6 }
 0x17a   : > { %v4591_v18 = vpop.f32.mrb[64].mxu1  ;;  %v4655_v62 = vpop.f32.mrb[64].mxu0 }
 0x17b   : > { %v4592_v59 = vpop.f32.mrb[65].mxu1  ;;  %v4656_v45 = vpop.f32.mrb[65].mxu0 }
 0x17c   : > { %v4593_v7 = vadd.f32 %v4592_v59, %v4591_v18  ;;  %v4657_v14 = vadd.f32 %v4656_v45, %v4655_v62  ;;  %v4594_v49 = vpop.f32.mrb[66].mxu1  ;;  %v4658_v8 = vpop.f32.mrb[66].mxu0 }
 0x17d   : > { %v4595_v15 = vpop.f32.mrb[67].mxu1  ;;  %v4659_v42 = vpop.f32.mrb[67].mxu0 }
 0x17e   : > { %v6486_v63 = vadd.f32 %v4593_v7, %v2753_v27  ;;  %v6489_v6 = vadd.f32 %v4657_v14, %v6390_v12  ;;  %v4596_v28 = vadd.f32 %v4595_v15, %v4594_v49  ;;  %v4660_v0 = vadd.f32 %v4659_v42, %v4658_v8 }
 0x17f   : > { %v2764_v12 = vadd.f32 %v6160_v4, %v6255_v5  ;;  %v2769_v4 = vadd.f32 %v6185_v21, %v6255_v5 }
 0x180   : > { %v6491_v30 = vadd.f32 %v4596_v28, %v2756_v25  ;;  %v6494_v52 = vadd.f32 %v4660_v0, %v6392_v46 }
 0x182   : > { %v4597_v36 = vpop.f32.mrb[68].mxu1  ;;  %v4661_v40 = vpop.f32.mrb[68].mxu0 }
 0x183   : > { %v4598_v61 = vpop.f32.mrb[69].mxu1  ;;  %v4662_v33 = vpop.f32.mrb[69].mxu0 }
 0x184   : > { %v4599_v43 = vadd.f32 %v4598_v61, %v4597_v36  ;;  %v4663_v44 = vadd.f32 %v4662_v33, %v4661_v40  ;;  %v4600_v20 = vpop.f32.mrb[70].mxu1  ;;  %v4664_v58 = vpop.f32.mrb[70].mxu0 }
 0x185   : > { %v4601_v50 = vpop.f32.mrb[71].mxu1  ;;  %v4665_v22 = vpop.f32.mrb[71].mxu0 }
 0x186   : > { %v6500_v53 = vadd.f32 %v4599_v43, %v2761_v60  ;;  %v6503_v46 = vadd.f32 %v4663_v44, %v6400_v2  ;;  %v4602_v13 = vadd.f32 %v4601_v50, %v4600_v20  ;;  %v4666_v48 = vadd.f32 %v4665_v22, %v4664_v58 }
 0x187   : > { %v2772_v2 = vadd.f32 %v6192_v31, %v6255_v5  ;;  %v2777_v31 = vadd.f32 %v6219_v16, %v6255_v5 }
 0x188   : > { %v6505_v9 = vadd.f32 %v4602_v13, %v2764_v12  ;;  %v6508_v34 = vadd.f32 %v4666_v48, %v6402_v10 }
 0x18a   : > { %v4603_v18 = vpop.f32.mrb[72].mxu1  ;;  %v4667_v62 = vpop.f32.mrb[72].mxu0 }
 0x18b   : > { %v4604_v59 = vpop.f32.mrb[73].mxu1  ;;  %v4668_v45 = vpop.f32.mrb[73].mxu0 }
 0x18c   : > { %v4605_v27 = vadd.f32 %v4604_v59, %v4603_v18  ;;  %v4669_v7 = vadd.f32 %v4668_v45, %v4667_v62  ;;  %v4606_v14 = vpop.f32.mrb[74].mxu1  ;;  %v4670_v49 = vpop.f32.mrb[74].mxu0 }
 0x18d   : > { %v4607_v8 = vpop.f32.mrb[75].mxu1  ;;  %v4671_v25 = vpop.f32.mrb[75].mxu0 }
 0x18e   : > { %v6514_v15 = vadd.f32 %v4605_v27, %v2769_v4  ;;  %v6517_v10 = vadd.f32 %v4669_v7, %v6410_v54  ;;  %v4608_v42 = vadd.f32 %v4607_v8, %v4606_v14  ;;  %v4672_v28 = vadd.f32 %v4671_v25, %v4670_v49 }
 0x18f   : > { %v2780_v54 = vadd.f32 %v6227_v24, %v6255_v5 }
 0x190   : > { %v6519_v0 = vadd.f32 %v4608_v42, %v2772_v2  ;;  %v6522_v21 = vadd.f32 %v4672_v28, %v6414_v17 }
 0x192   : > { %v4609_v36 = vpop.f32.mrb[76].mxu1  ;;  %v4673_v40 = vpop.f32.mrb[76].mxu0 }
 0x193   : > { %v4610_v61 = vpop.f32.mrb[77].mxu1  ;;  %v4674_v33 = vpop.f32.mrb[77].mxu0 }
 0x194   : > { %v4611_v60 = vadd.f32 %v4610_v61, %v4609_v36  ;;  %v4675_v43 = vadd.f32 %v4674_v33, %v4673_v40  ;;  %v4612_v44 = vpop.f32.mrb[78].mxu1  ;;  %v4676_v20 = vpop.f32.mrb[78].mxu0 }
 0x195   : > { %v4613_v58 = vpop.f32.mrb[79].mxu1  ;;  %v4677_v12 = vpop.f32.mrb[79].mxu0 }
 0x196   : > { %v6528_v50 = vadd.f32 %v4611_v60, %v2777_v31  ;;  %v6531_v17 = vadd.f32 %v4675_v43, %v6422_v57  ;;  %v4614_v22 = vadd.f32 %v4613_v58, %v4612_v44  ;;  %v4678_v13 = vadd.f32 %v4677_v12, %v4676_v20 }
 0x198   : > { %v6533_v48 = vadd.f32 %v4614_v22, %v2780_v54  ;;  %v6536_v16 = vadd.f32 %v4678_v13, %v6426_v1 }
 0x19a   : > { %v4679_v18 = vpop.f32.mrb[80].mxu0  ;;  %v4743_v62 = vpop.f32.mrb[80].mxu1 }
 0x19b   : > { %v4680_v59 = vpop.f32.mrb[81].mxu0  ;;  %v4744_v45 = vpop.f32.mrb[81].mxu1 }
 0x19c   : > { %v4681_v4 = vadd.f32 %v4680_v59, %v4679_v18  ;;  %v4745_v24 = vadd.f32 %v4744_v45, %v4743_v62  ;;  %v4682_v5 = vpop.f32.mrb[82].mxu0  ;;  %v4746_v27 = vpop.f32.mrb[82].mxu1 }
 0x19d   : > { %v4683_v7 = vpop.f32.mrb[83].mxu0  ;;  %v4747_v14 = vpop.f32.mrb[83].mxu1 }
 0x19e   : > { %v6539_v57 = vadd.f32 %v4681_v4, %v6431_v3  ;;  %v4684_v49 = vadd.f32 %v4683_v7, %v4682_v5  ;;  %v4748_v2 = vadd.f32 %v4747_v14, %v4746_v27  ;;  %v6542_v8 = vadd.f32 %v4745_v24, %v6434_v39 }
 0x1a0   : > { %v6545_v1 = vadd.f32 %v4684_v49, %v6436_v37  ;;  %v6548_v25 = vadd.f32 %v4748_v2, %v6439_v38 }
 0x1a2   : > { %v4685_v42 = vpop.f32.mrb[84].mxu0  ;;  %v4749_v28 = vpop.f32.mrb[84].mxu1 }
 0x1a3   : > { %v4686_v36 = vpop.f32.mrb[85].mxu0  ;;  %v4750_v40 = vpop.f32.mrb[85].mxu1 }
 0x1a4   : > { %v4687_v61 = vadd.f32 %v4686_v36, %v4685_v42  ;;  %v4751_v33 = vadd.f32 %v4750_v40, %v4749_v28  ;;  %v4688_v31 = vpop.f32.mrb[86].mxu0  ;;  %v4752_v3 = vpop.f32.mrb[86].mxu1 }
 0x1a5   : > { %v4689_v60 = vpop.f32.mrb[87].mxu0  ;;  %v4753_v43 = vpop.f32.mrb[87].mxu1 }
 0x1a6   : > { %v6551_v44 = vadd.f32 %v4687_v61, %v6444_v55  ;;  %v4690_v39 = vadd.f32 %v4689_v60, %v4688_v31  ;;  %v4754_v20 = vadd.f32 %v4753_v43, %v4752_v3  ;;  %v6554_v37 = vadd.f32 %v4751_v33, %v6447_v32 }
 0x1a8   : > { %v6557_v38 = vadd.f32 %v4690_v39, %v6449_v56  ;;  %v6560_v54 = vadd.f32 %v4754_v20, %v6452_v11 }
 0x1aa   : > { %v4691_v58 = vpop.f32.mrb[88].mxu0  ;;  %v4755_v12 = vpop.f32.mrb[88].mxu1 }
 0x1ab   : > { %v4692_v22 = vpop.f32.mrb[89].mxu0  ;;  %v4756_v13 = vpop.f32.mrb[89].mxu1 }
 0x1ac   : > { %v4693_v18 = vadd.f32 %v4692_v22, %v4691_v58  ;;  %v4757_v62 = vadd.f32 %v4756_v13, %v4755_v12  ;;  %v4694_v59 = vpop.f32.mrb[90].mxu0  ;;  %v4758_v55 = vpop.f32.mrb[90].mxu1 }
 0x1ad   : > { %v4695_v45 = vpop.f32.mrb[91].mxu0  ;;  %v4759_v4 = vpop.f32.mrb[91].mxu1 }
 0x1ae   : > { %v6563_v24 = vadd.f32 %v4693_v18, %v6458_v41  ;;  %v4696_v32 = vadd.f32 %v4695_v45, %v4694_v59  ;;  %v4760_v5 = vadd.f32 %v4759_v4, %v4758_v55  ;;  %v6566_v56 = vadd.f32 %v4757_v62, %v6461_v19 }
 0x1b0   : > { %v6569_v11 = vadd.f32 %v4696_v32, %v6463_v26  ;;  %v6572_v27 = vadd.f32 %v4760_v5, %v6466_v29 }
 0x1b2   : > { %v4697_v7 = vpop.f32.mrb[92].mxu0  ;;  %v4761_v14 = vpop.f32.mrb[92].mxu1 }
 0x1b3   : > { %v4698_v49 = vpop.f32.mrb[93].mxu0  ;;  %v4762_v2 = vpop.f32.mrb[93].mxu1 }
 0x1b4   : > { %v4699_v42 = vadd.f32 %v4698_v49, %v4697_v7  ;;  %v4763_v28 = vadd.f32 %v4762_v2, %v4761_v14  ;;  %v4700_v36 = vpop.f32.mrb[94].mxu0  ;;  %v4764_v41 = vpop.f32.mrb[94].mxu1 }
 0x1b5   : > { %v4701_v40 = vpop.f32.mrb[95].mxu0  ;;  %v4765_v61 = vpop.f32.mrb[95].mxu1 }
 0x1b6   : > { %v6575_v33 = vadd.f32 %v4699_v42, %v6472_v23  ;;  %v4702_v19 = vadd.f32 %v4701_v40, %v4700_v36  ;;  %v4766_v31 = vadd.f32 %v4765_v61, %v4764_v41  ;;  %v6578_v26 = vadd.f32 %v4763_v28, %v6475_v51 }
 0x1b8   : > { %v6581_v29 = vadd.f32 %v4702_v19, %v6477_v35  ;;  %v6584_v3 = vadd.f32 %v4766_v31, %v6480_v47 }
 0x1ba   : > { %v4703_v60 = vpop.f32.mrb[96].mxu0  ;;  %v4767_v43 = vpop.f32.mrb[96].mxu1 }
 0x1bb   : > { %v4704_v39 = vpop.f32.mrb[97].mxu0  ;;  %v4768_v20 = vpop.f32.mrb[97].mxu1 }
 0x1bc   : > { %v4705_v58 = vadd.f32 %v4704_v39, %v4703_v60  ;;  %v4769_v12 = vadd.f32 %v4768_v20, %v4767_v43  ;;  %v4706_v22 = vpop.f32.mrb[98].mxu0  ;;  %v4770_v23 = vpop.f32.mrb[98].mxu1 }
 0x1bd   : > { %v4707_v13 = vpop.f32.mrb[99].mxu0  ;;  %v4771_v18 = vpop.f32.mrb[99].mxu1 }
 0x1be   : > { %v6587_v62 = vadd.f32 %v4705_v58, %v6486_v63  ;;  %v4708_v51 = vadd.f32 %v4707_v13, %v4706_v22  ;;  %v4772_v59 = vadd.f32 %v4771_v18, %v4770_v23  ;;  %v6590_v35 = vadd.f32 %v4769_v12, %v6489_v6 }
 0x1c0   : > { %v6593_v47 = vadd.f32 %v4708_v51, %v6491_v30  ;;  %v6596_v55 = vadd.f32 %v4772_v59, %v6494_v52 }
 0x1c2   : > { %v4709_v45 = vpop.f32.mrb[100].mxu0  ;;  %v4773_v4 = vpop.f32.mrb[100].mxu1 }
 0x1c3   : > { %v4710_v32 = vpop.f32.mrb[101].mxu0  ;;  %v4774_v5 = vpop.f32.mrb[101].mxu1 }
 0x1c4   : > { %v4711_v7 = vadd.f32 %v4710_v32, %v4709_v45  ;;  %v4775_v14 = vadd.f32 %v4774_v5, %v4773_v4  ;;  %v4712_v49 = vpop.f32.mrb[102].mxu0  ;;  %v4776_v63 = vpop.f32.mrb[102].mxu1 }
 0x1c5   : > { %v4713_v2 = vpop.f32.mrb[103].mxu0  ;;  %v4777_v42 = vpop.f32.mrb[103].mxu1 }
 0x1c6   : > { %v6599_v28 = vadd.f32 %v4711_v7, %v6500_v53  ;;  %v4714_v6 = vadd.f32 %v4713_v2, %v4712_v49  ;;  %v4778_v36 = vadd.f32 %v4777_v42, %v4776_v63  ;;  %v6602_v30 = vadd.f32 %v4775_v14, %v6503_v46 }
 0x1c8   : > { %v6605_v52 = vadd.f32 %v4714_v6, %v6505_v9  ;;  %v6608_v41 = vadd.f32 %v4778_v36, %v6508_v34 }
 0x1ca   : > { %v4715_v40 = vpop.f32.mrb[104].mxu0  ;;  %v4779_v61 = vpop.f32.mrb[104].mxu1 }
 0x1cb   : > { %v4716_v19 = vpop.f32.mrb[105].mxu0  ;;  %v4780_v31 = vpop.f32.mrb[105].mxu1 }
 0x1cc   : > { %v4717_v60 = vadd.f32 %v4716_v19, %v4715_v40  ;;  %v4781_v43 = vadd.f32 %v4780_v31, %v4779_v61  ;;  %v4718_v39 = vpop.f32.mrb[106].mxu0  ;;  %v4782_v53 = vpop.f32.mrb[106].mxu1 }
 0x1cd   : > { %v4719_v20 = vpop.f32.mrb[107].mxu0  ;;  %v4783_v58 = vpop.f32.mrb[107].mxu1 }
 0x1ce   : > { %v6611_v12 = vadd.f32 %v4717_v60, %v6514_v15  ;;  %v4720_v46 = vadd.f32 %v4719_v20, %v4718_v39  ;;  %v4784_v22 = vadd.f32 %v4783_v58, %v4782_v53  ;;  %v6614_v9 = vadd.f32 %v4781_v43, %v6517_v10 }
 0x1d0   : > { %v6617_v34 = vadd.f32 %v4720_v46, %v6519_v0  ;;  %v6620_v23 = vadd.f32 %v4784_v22, %v6522_v21 }
 0x1d2   : > { %v4721_v13 = vpop.f32.mrb[108].mxu0  ;;  %v4785_v18 = vpop.f32.mrb[108].mxu1 }
 0x1d3   : > { %v4722_v51 = vpop.f32.mrb[109].mxu0  ;;  %v4786_v59 = vpop.f32.mrb[109].mxu1 }
 0x1d4   : > { %v4723_v45 = vadd.f32 %v4722_v51, %v4721_v13  ;;  %v4787_v4 = vadd.f32 %v4786_v59, %v4785_v18  ;;  %v4724_v32 = vpop.f32.mrb[110].mxu0  ;;  %v4788_v15 = vpop.f32.mrb[110].mxu1 }
 0x1d5   : > { %v4725_v5 = vpop.f32.mrb[111].mxu0  ;;  %v4789_v7 = vpop.f32.mrb[111].mxu1 }
 0x1d6   : > { %v6623_v10 = vadd.f32 %v4723_v45, %v6528_v50  ;;  %v4726_v14 = vadd.f32 %v4725_v5, %v4724_v32  ;;  %v4790_v0 = vadd.f32 %v4789_v7, %v4788_v15  ;;  %v6626_v49 = vadd.f32 %v4787_v4, %v6531_v17 }
 0x1d8   : > { %v6629_v21 = vadd.f32 %v4726_v14, %v6533_v48  ;;  %v6632_v63 = vadd.f32 %v4790_v0, %v6536_v16 }
 0x1da   : > { %v4791_v2 = vpop.f32.mrb[112].mxu1  ;;  %v4881_v42 = vpop.f32.mrb[112].mxu0 }
 0x1db   : > { %v3309_v6 = vadd.f32 %v4881_v42, %v6554_v37  ;;  %v4792_v36 = vpop.f32.mrb[113].mxu1  ;;  %v3300_v40 = vpop.f32.mrb[113].mxu0 }
 0x1dc   : > { %v4793_v61 = vadd.f32 %v4792_v36, %v4791_v2  ;;  %v3301_v50 = vadd.f32 %v3300_v40, %v6542_v8  ;;  %v4794_v19 = vpop.f32.mrb[114].mxu1  ;;  %v4882_v31 = vpop.f32.mrb[114].mxu0 }
 0x1dd   : > { %v3312_v17 = vadd.f32 %v4882_v31, %v6560_v54  ;;  %v4795_v60 = vpop.f32.mrb[115].mxu1  ;;  %v3303_v48 = vpop.f32.mrb[115].mxu0  ;;  %v3429_v53 = vmax.f32 %v3309_v6, 0.0 }
 0x1de   : > { %v4796_v43 = vadd.f32 %v4795_v60, %v4794_v19  ;;  %v3304_v16 = vadd.f32 %v3303_v48, %v6548_v25  ;;  %v6640_v39 = vadd.f32 %v4793_v61, %v6539_v57  ;;  %v3427_v20 = vmax.f32 %v3301_v50, 0.0 }
 0x1df   : > { %v3430_v37 = vmax.f32 %v3312_v17, 0.0 }
 0x1e0   : > { %v3428_v8 = vmax.f32 %v3304_v16, 0.0  ;;  %v6648_v54 = vadd.f32 %v4796_v43, %v6545_v1 }
 0x1e1   : > { %v4304_v58 = vpack.c.bf16 %v3430_v37, %v3429_v53 }
 0x1e2   : > { %v4299_v46 = vpack.c.bf16 %v3428_v8, %v3427_v20  ;;  %v4797_v25 = vpop.f32.mrb[116].mxu1  ;;  %v4885_v22 = vpop.f32.mrb[116].mxu0 }
 0x1e3   : > { %4376 = vst [vmem:[%s6645_s8 + $0x8] sm:$0xff] %v4304_v58   ;;  %v3325_v57 = vadd.f32 %v4885_v22, %v6578_v26  ;;  %v4798_v13 = vpop.f32.mrb[117].mxu1  ;;  %v3316_v18 = vpop.f32.mrb[117].mxu0 }
 0x1e4   : > { %4300 = vst [vmem:[%s6645_s8] sm:$0xff] %v4299_v46   ;;  %v4799_v51 = vadd.f32 %v4798_v13, %v4797_v25  ;;  %v3317_v59 = vadd.f32 %v3316_v18, %v6566_v56  ;;  %v4800_v45 = vpop.f32.mrb[118].mxu1  ;;  %v4886_v4 = vpop.f32.mrb[118].mxu0 }
 0x1e5   : > { %v3328_v32 = vadd.f32 %v4886_v4, %v6584_v3  ;;  %v4801_v1 = vpop.f32.mrb[119].mxu1  ;;  %v3319_v15 = vpop.f32.mrb[119].mxu0  ;;  %v3433_v26 = vmax.f32 %v3325_v57, 0.0 }
 0x1e6   : > { %v4802_v5 = vadd.f32 %v4801_v1, %v4800_v45  ;;  %v3320_v7 = vadd.f32 %v3319_v15, %v6572_v27  ;;  %v3212_v14 = vadd.f32 %v4799_v51, %v6551_v44  ;;  %v3431_v2 = vmax.f32 %v3317_v59, 0.0 }
 0x1e7   : > { %v3434_v0 = vmax.f32 %v3328_v32, 0.0 }
 0x1e8   : > { %v3432_v42 = vmax.f32 %v3320_v7, 0.0  ;;  %v3215_v6 = vadd.f32 %v4802_v5, %v6557_v38 }
 0x1e9   : > { %v4314_v56 = vpack.c.bf16 %v3434_v0, %v3433_v26 }
 0x1ea   : > { %v4309_v36 = vpack.c.bf16 %v3432_v42, %v3431_v2  ;;  %v4803_v40 = vpop.f32.mrb[120].mxu1  ;;  %v4889_v61 = vpop.f32.mrb[120].mxu0 }
 0x1eb   : > { %4378 = vst [vmem:[%s6645_s8 + $0x18] sm:$0xff] %v4314_v56   ;;  %v3341_v3 = vadd.f32 %v4889_v61, %v6602_v30  ;;  %v4804_v50 = vpop.f32.mrb[121].mxu1  ;;  %v3332_v19 = vpop.f32.mrb[121].mxu0 }
 0x1ec   : > { %4377 = vst [vmem:[%s6645_s8 + $0x10] sm:$0xff] %v4309_v36   ;;  %v4805_v31 = vadd.f32 %v4804_v50, %v4803_v40  ;;  %v3333_v27 = vadd.f32 %v3332_v19, %v6590_v35  ;;  %v4806_v44 = vpop.f32.mrb[122].mxu1  ;;  %v4890_v17 = vpop.f32.mrb[122].mxu0 }
 0x1ed   : > { %v3344_v60 = vadd.f32 %v4890_v17, %v6608_v41  ;;  %v4807_v48 = vpop.f32.mrb[123].mxu1  ;;  %v3335_v38 = vpop.f32.mrb[123].mxu0  ;;  %v3437_v30 = vmax.f32 %v3341_v3, 0.0 }
 0x1ee   : > { %v4808_v43 = vadd.f32 %v4807_v48, %v4806_v44  ;;  %v3336_v16 = vadd.f32 %v3335_v38, %v6596_v55  ;;  %v6665_v53 = vadd.f32 %v4805_v31, %v6563_v24  ;;  %v3435_v20 = vmax.f32 %v3333_v27, 0.0 }
 0x1ef   : > { %v3438_v37 = vmax.f32 %v3344_v60, 0.0 }
 0x1f0   : > { %v3436_v8 = vmax.f32 %v3336_v16, 0.0  ;;  %v6668_v35 = vadd.f32 %v4808_v43, %v6569_v11 }
 0x1f1   : > { %v4324_v58 = vpack.c.bf16 %v3438_v37, %v3437_v30 }
 0x1f2   : > { %v4319_v46 = vpack.c.bf16 %v3436_v8, %v3435_v20  ;;  %v4809_v25 = vpop.f32.mrb[124].mxu1  ;;  %v4893_v41 = vpop.f32.mrb[124].mxu0 }
 0x1f3   : > { %4380 = vst [vmem:[%s6645_s8 + $0x28] sm:$0xff] %v4324_v58   ;;  %v3357_v22 = vadd.f32 %v4893_v41, %v6626_v49  ;;  %v4810_v57 = vpop.f32.mrb[125].mxu1  ;;  %v3348_v13 = vpop.f32.mrb[125].mxu0 }
 0x1f4   : > { %4379 = vst [vmem:[%s6645_s8 + $0x20] sm:$0xff] %v4319_v46   ;;  %v4811_v55 = vadd.f32 %v4810_v57, %v4809_v25  ;;  %v3349_v24 = vadd.f32 %v3348_v13, %v6614_v9  ;;  %v4812_v18 = vpop.f32.mrb[126].mxu1  ;;  %v4894_v51 = vpop.f32.mrb[126].mxu0 }
 0x1f5   : > { %v3360_v59 = vadd.f32 %v4894_v51, %v6632_v63  ;;  %v4813_v11 = vpop.f32.mrb[127].mxu1  ;;  %v3351_v45 = vpop.f32.mrb[127].mxu0  ;;  %v3441_v49 = vmax.f32 %v3357_v22, 0.0 }
 0x1f6   : > { %v4814_v4 = vadd.f32 %v4813_v11, %v4812_v18  ;;  %v3352_v32 = vadd.f32 %v3351_v45, %v6620_v23  ;;  %v3228_v1 = vadd.f32 %v4811_v55, %v6575_v33  ;;  %v3439_v5 = vmax.f32 %v3349_v24, 0.0 }
 0x1f7   : > { %v3442_v15 = vmax.f32 %v3360_v59, 0.0 }
 0x1f8   : > { %v3440_v7 = vmax.f32 %v3352_v32, 0.0  ;;  %v3231_v26 = vadd.f32 %v4814_v4, %v6581_v29 }
 0x1f9   : > { %v4334_v9 = vpack.c.bf16 %v3442_v15, %v3441_v49 }
 0x1fa   : > { %v4329_v0 = vpack.c.bf16 %v3440_v7, %v3439_v5  ;;  %v4815_v2 = vpop.f32.mrb[128].mxu1  ;;  %v4897_v42 = vpop.f32.mrb[128].mxu0 }
 0x1fb   : > { %4382 = vst [vmem:[%s6645_s8 + $0x38] sm:$0xff] %v4334_v9   ;;  %v3373_v63 = vadd.f32 %v4897_v42, %v3212_v14  ;;  %v4816_v56 = vpop.f32.mrb[129].mxu1  ;;  %v3364_v36 = vpop.f32.mrb[129].mxu0 }
 0x1fc   : > { %4381 = vst [vmem:[%s6645_s8 + $0x30] sm:$0xff] %v4329_v0   ;;  %v4817_v40 = vadd.f32 %v4816_v56, %v4815_v2  ;;  %v3365_v23 = vadd.f32 %v3364_v36, %v6640_v39  ;;  %v4818_v61 = vpop.f32.mrb[130].mxu1  ;;  %v4898_v33 = vpop.f32.mrb[130].mxu0 }
 0x1fd   : > { %v3376_v3 = vadd.f32 %v4898_v33, %v3215_v6  ;;  %v4819_v50 = vpop.f32.mrb[131].mxu1  ;;  %v3367_v19 = vpop.f32.mrb[131].mxu0  ;;  %v3445_v44 = vmax.f32 %v3373_v63, 0.0 }
 0x1fe   : > { %v4820_v31 = vadd.f32 %v4819_v50, %v4818_v61  ;;  %v3368_v29 = vadd.f32 %v3367_v19, %v6648_v54  ;;  %v3236_v27 = vadd.f32 %v4817_v40, %v6587_v62  ;;  %v3443_v17 = vmax.f32 %v3365_v23, 0.0 }
 0x1ff   : > { %v3446_v14 = vmax.f32 %v3376_v3, 0.0 }
 0x200   : > { %v3444_v60 = vmax.f32 %v3368_v29, 0.0  ;;  %v3239_v48 = vadd.f32 %v4820_v31, %v6593_v47 }
 0x201   : > { %v4344_v38 = vpack.c.bf16 %v3446_v14, %v3445_v44 }
 0x202   : > { %v4339_v39 = vpack.c.bf16 %v3444_v60, %v3443_v17  ;;  %v4821_v43 = vpop.f32.mrb[132].mxu1  ;;  %v4901_v16 = vpop.f32.mrb[132].mxu0 }
 0x203   : > { %4384 = vst [vmem:[%s6645_s8 + $0x48] sm:$0xff] %v4344_v38   ;;  %v3389_v6 = vadd.f32 %v4901_v16, %v3228_v1  ;;  %v4822_v30 = vpop.f32.mrb[133].mxu1  ;;  %v3380_v37 = vpop.f32.mrb[133].mxu0 }
 0x204   : > { %4383 = vst [vmem:[%s6645_s8 + $0x40] sm:$0xff] %v4339_v39   ;;  %v4823_v20 = vadd.f32 %v4822_v30, %v4821_v43  ;;  %v3381_v54 = vadd.f32 %v3380_v37, %v6665_v53  ;;  %v4824_v8 = vpop.f32.mrb[134].mxu1  ;;  %v4902_v62 = vpop.f32.mrb[134].mxu0 }
 0x205   : > { %v3392_v58 = vadd.f32 %v4902_v62, %v3231_v26  ;;  %v4825_v46 = vpop.f32.mrb[135].mxu1  ;;  %v3383_v25 = vpop.f32.mrb[135].mxu0  ;;  %v3449_v57 = vmax.f32 %v3389_v6, 0.0 }
 0x206   : > { %v4826_v41 = vadd.f32 %v4825_v46, %v4824_v8  ;;  %v3384_v47 = vadd.f32 %v3383_v25, %v6668_v35  ;;  %v3244_v22 = vadd.f32 %v4823_v20, %v6599_v28  ;;  %v3447_v55 = vmax.f32 %v3381_v54, 0.0 }
 0x207   : > { %v3450_v13 = vmax.f32 %v3392_v58, 0.0 }
 0x208   : > { %v3448_v24 = vmax.f32 %v3384_v47, 0.0  ;;  %v3247_v18 = vadd.f32 %v4826_v41, %v6605_v52 }
 0x209   : > { %v4354_v51 = vpack.c.bf16 %v3450_v13, %v3449_v57 }
 0x20a   : > { %v4349_v53 = vpack.c.bf16 %v3448_v24, %v3447_v55  ;;  %v4827_v59 = vpop.f32.mrb[136].mxu1  ;;  %v4905_v11 = vpop.f32.mrb[136].mxu0 }
 0x20b   : > { %4386 = vst [vmem:[%s6645_s8 + $0x58] sm:$0xff] %v4354_v51   ;;  %v3405_v45 = vadd.f32 %v4905_v11, %v3244_v22  ;;  %v4828_v4 = vpop.f32.mrb[137].mxu1  ;;  %v3396_v32 = vpop.f32.mrb[137].mxu0 }
 0x20c   : > { %4385 = vst [vmem:[%s6645_s8 + $0x50] sm:$0xff] %v4349_v53   ;;  %v4829_v1 = vadd.f32 %v4828_v4, %v4827_v59  ;;  %v3397_v49 = vadd.f32 %v3396_v32, %v3236_v27  ;;  %v4830_v35 = vpop.f32.mrb[138].mxu1  ;;  %v4906_v15 = vpop.f32.mrb[138].mxu0 }
 0x20d   : > { %v3408_v28 = vadd.f32 %v4906_v15, %v3247_v18  ;;  %v4831_v5 = vpop.f32.mrb[139].mxu1  ;;  %v3399_v7 = vpop.f32.mrb[139].mxu0  ;;  %v3453_v0 = vmax.f32 %v3405_v45, 0.0 }
 0x20e   : > { %v4832_v26 = vadd.f32 %v4831_v5, %v4830_v35  ;;  %v3400_v52 = vadd.f32 %v3399_v7, %v3239_v48  ;;  %v3252_v9 = vadd.f32 %v4829_v1, %v6611_v12  ;;  %v3451_v42 = vmax.f32 %v3397_v49, 0.0 }
 0x20f   : > { %v3454_v2 = vmax.f32 %v3408_v28, 0.0 }
 0x210   : > { %v3452_v63 = vmax.f32 %v3400_v52, 0.0  ;;  %v3255_v56 = vadd.f32 %v4832_v26, %v6617_v34 }
 0x211   : > { %v4364_v36 = vpack.c.bf16 %v3454_v2, %v3453_v0 }
 0x212   : > { %v4359_v40 = vpack.c.bf16 %v3452_v63, %v3451_v42  ;;  %v4833_v23 = vpop.f32.mrb[140].mxu1  ;;  %v4909_v61 = vpop.f32.mrb[140].mxu0 }
 0x213   : > { %4388 = vst [vmem:[%s6645_s8 + $0x68] sm:$0xff] %v4364_v36   ;;  %v4834_v33 = vpop.f32.mrb[141].mxu1  ;;  %v3412_v3 = vpop.f32.mrb[141].mxu0 }
 0x214   : > { %4387 = vst [vmem:[%s6645_s8 + $0x60] sm:$0xff] %v4359_v40   ;;  %v4835_v50 = vadd.f32 %v4834_v33, %v4833_v23  ;;  %v3413_v19 = vadd.f32 %v3412_v3, %v3252_v9  ;;  %v4836_v31 = vpop.f32.mrb[142].mxu1  ;;  %v4910_v29 = vpop.f32.mrb[142].mxu0 }
 0x215   : > { %v4837_v12 = vpop.f32.mrb[143].mxu1  ;;  %v3415_v27 = vpop.f32.mrb[143].mxu0 }
 0x216   : > { %v3260_v44 = vadd.f32 %v4835_v50, %v6623_v10  ;;  %v4838_v14 = vadd.f32 %v4837_v12, %v4836_v31  ;;  %v3416_v34 = vadd.f32 %v3415_v27, %v3255_v56  ;;  %v3455_v60 = vmax.f32 %v3413_v19, 0.0 }
 0x218   : > { %v3421_v17 = vadd.f32 %v4909_v61, %v3260_v44  ;;  %v3263_v48 = vadd.f32 %v4838_v14, %v6629_v21  ;;  %v3456_v38 = vmax.f32 %v3416_v34, 0.0 }
 0x21a   : > { %v3424_v39 = vadd.f32 %v4910_v29, %v3263_v48  ;;  %v4369_v43 = vpack.c.bf16 %v3456_v38, %v3455_v60  ;;  %v3457_v16 = vmax.f32 %v3421_v17, 0.0 }
 0x21c   : > { %v3458_v6 = vmax.f32 %v3424_v39, 0.0  ;;  %4389 = vst [vmem:[%s6645_s8 + $0x70] sm:$0xff] %v4369_v43  }
 0x21e   : > { %v4374_v30 = vpack.c.bf16 %v3458_v6, %v3457_v16 }
 0x220   : > { %4390 = vst [vmem:[%s6645_s8 + $0x78] sm:$0xff] %v4374_v30  }
 0x221 PF: > { %s13_s14 = sadd.s32 1, %s5098_s14   ;;  %s6717_s12 = smov %s5094_s13 }
 0x222   : > { %p10_p5 = scmp.ge.s32.totalorder %s13_s14, 4   ;;  %s6718_s13 = smov %s6720_s15 }
 0x224   :  { %12 = sbr.rel (!%p10_p5) target bundleno = 2 (0x2), region = 65 }

// kernel: decblock_forward.8
= control target key start
LH: loop header
LB: loop body
LE: loop exit
PB: predicated region body
PF: predicated region fallthrough
CT: control target
= control target key end

     0   :  { %s2534_s12 = smov 0   ;;  %s2536_s13 = smov 0   ;;  %s3373_s0 = inlined_call_operand.vmem [shape: bf16[2,18,18,128], index: 0, kind: input, shape index: {}]   ;;  %s3374_s1 = inlined_call_operand.vmem [shape: bf16[512,128], index: 1, kind: input, shape index: {}]   ;;  %s3375_s2 = inlined_call_operand.vmem [shape: f32[1,128], index: 2, kind: input, shape index: {}]   ;;  %s3376_s3 = inlined_call_operand.vmem [shape: bf16[2,16,16,128], index: 3, kind: output, shape index: {}]  }
   0x1   :  { %s2538_s14 = smov 0  }
   0x2 LB: > { %s25_s15 = sadd.s32 1, %s2508_s13  ;;  %p1818_p0 = scmp.ge.s32.totalorder %s2512_s14, 1  ;;  %s2512_s14 = sphi %s2538_s14, %s13_s14   ;;  %s2508_s13 = sphi %s2536_s13, %s3396_s13   ;;  %s2504_s12 = sphi %s2534_s12, %s3395_s12  }
   0x3   : > { %p27_p1 = scmp.ge.s32.totalorder %s25_s15, 2  ;;  %p151_p2 = scmp.lt.s32.totalorder %s2512_s14, 3 }
   0x5   : > { %s3398_s15 = smov (%p27_p1, %s25_s15), 0  ;;  %p152_p3 = pnand %p1818_p0, %p151_p2 }
   0x6   : > { %v2426_v0 = vld [vmem:[%s3374_s1 + $0x40] sm:$0xff] (!%p152_p3)   ;;  %v2430_v4 = vld [vmem:[%s3374_s1 + $0x48] sm:$0xff] (!%p152_p3)   ;;  %v2434_v8 = vld [vmem:[%s3374_s1 + $0x50] sm:$0xff] (!%p152_p3)   ;;  %p180_p4 = scmp.lt.s32.totalorder (!%p152_p3), %s2504_s12, 1  ;;  %vm313_vm0 = vcmask (!%p152_p3), 1042432   ;;  %vm314_vm1 = vcmask (!%p152_p3), 1046532  }
   0x7   : > { %155 = sbr.rel (%p152_p3) target bundleno = 386 (0x182), region = 32  ;;  %v2427_v1 = vld [vmem:[%s3374_s1 + $0xc0] sm:$0xff] (!%p152_p3)   ;;  %2177 = vmatprep.subr.bf16.mxu0 (!%p152_p3), %v2426_v0  ;;  %v2431_v5 = vld [vmem:[%s3374_s1 + $0xc8] sm:$0xff] (!%p152_p3)   ;;  %v2435_v9 = vld [vmem:[%s3374_s1 + $0xd0] sm:$0xff] (!%p152_p3)  }
   0x8   : > { %v2428_v2 = vld [vmem:[%s3374_s1] sm:$0xff] (!%p152_p3)   ;;  %2289 = vmatprep.subr.bf16.mxu1 (!%p152_p3), %v2427_v1  ;;  %v2432_v6 = vld [vmem:[%s3374_s1 + $0x8] sm:$0xff] (!%p152_p3)   ;;  %v2436_v10 = vld [vmem:[%s3374_s1 + $0x10] sm:$0xff] (!%p152_p3)  }
   0x9   : > { %v2429_v3 = vld [vmem:[%s3374_s1 + $0x80] sm:$0xff] (!%p152_p3)   ;;  %2178 = vmatpush3.bf16.msra.mxu0 (!%p152_p3), %v2428_v2  ;;  %v2433_v7 = vld [vmem:[%s3374_s1 + $0x88] sm:$0xff] (!%p152_p3)   ;;  %v2437_v11 = vld [vmem:[%s3374_s1 + $0x90] sm:$0xff] (!%p152_p3)  }
   0xa   : > { %2290 = vmatpush3.bf16.msra.mxu1 (!%p152_p3), %v2429_v3  ;;  %2179 = vmatprep.subr.bf16.mxu0 (!%p152_p3), %v2430_v4  ;;  %v2438_v12 = vld [vmem:[%s3374_s1 + $0x58] sm:$0xff] (!%p152_p3)   ;;  %v2442_v16 = vld [vmem:[%s3374_s1 + $0x60] sm:$0xff] (!%p152_p3)   ;;  %v2446_v20 = vld [vmem:[%s3374_s1 + $0x68] sm:$0xff] (!%p152_p3)  }
   0xb   : > { %2291 = vmatprep.subr.bf16.mxu1 (!%p152_p3), %v2431_v5  ;;  %v2439_v13 = vld [vmem:[%s3374_s1 + $0xd8] sm:$0xff] (!%p152_p3)   ;;  %v2443_v17 = vld [vmem:[%s3374_s1 + $0xe0] sm:$0xff] (!%p152_p3)   ;;  %v2447_v21 = vld [vmem:[%s3374_s1 + $0xe8] sm:$0xff] (!%p152_p3)  }
   0xc   : > { %v2440_v14 = vld [vmem:[%s3374_s1 + $0x18] sm:$0xff] (!%p152_p3)   ;;  %v2444_v18 = vld [vmem:[%s3374_s1 + $0x20] sm:$0xff] (!%p152_p3)   ;;  %v2448_v22 = vld [vmem:[%s3374_s1 + $0x28] sm:$0xff] (!%p152_p3)  }
   0xd   : > { %2180 = vmatpush3.bf16.msra.mxu0 (!%p152_p3), %v2432_v6  ;;  %v2441_v15 = vld [vmem:[%s3374_s1 + $0x98] sm:$0xff] (!%p152_p3)   ;;  %v2445_v19 = vld [vmem:[%s3374_s1 + $0xa0] sm:$0xff] (!%p152_p3)   ;;  %v2449_v23 = vld [vmem:[%s3374_s1 + $0xa8] sm:$0xff] (!%p152_p3)  }
   0xe   : > { %2292 = vmatpush3.bf16.msra.mxu1 %v2433_v7  ;;  %2181 = vmatprep.subr.bf16.mxu0 %v2434_v8  ;;  %s3400_s12 = smov (!%p180_p4, %s2504_s12), 1  ;;  %v2450_v24 = vld [vmem:[%s3374_s1 + $0x70] sm:$0xff]   ;;  %v2454_v28 = vld [vmem:[%s3374_s1 + $0x78] sm:$0xff]   ;;  %vm2663_vm2 = vmor %vm313_vm0, %vm314_vm1 }
   0xf   : > { %2293 = vmatprep.subr.bf16.mxu1 %v2435_v9  ;;  %v2451_v25 = vld [vmem:[%s3374_s1 + $0xf0] sm:$0xff]   ;;  %s2401_s22 = smul.u32 216, %s3400_s12  ;;  %v2455_v29 = vld [vmem:[%s3374_s1 + $0xf8] sm:$0xff]   ;;  %s2049_s17 = sshll.u32 %s3400_s12, 7 }
  0x10   : > { %v2452_v26 = vld [vmem:[%s3374_s1 + $0x30] sm:$0xff]   ;;  %v2456_v30 = vld [vmem:[%s3374_s1 + $0x38] sm:$0xff]   ;;  %s3316_s20 = scalar_lea.vmem %s3376_s3, %s2049_s17 }
  0x11   : > { %2182 = vmatpush3.bf16.msra.mxu0 %v2436_v10  ;;  %v2453_v27 = vld [vmem:[%s3374_s1 + $0xb0] sm:$0xff]   ;;  %s2652_s6 = scalar_lea.vmem %s3373_s0, %s2401_s22  ;;  %v2457_v31 = vld [vmem:[%s3374_s1 + $0xb8] sm:$0xff]  }
  0x12   : > { %2294 = vmatpush3.bf16.msra.mxu1 %v2437_v11  ;;  %2183 = vmatprep.subr.bf16.mxu0 %v2438_v12  ;;  %v202_v32 = vld [vmem:[%s2652_s6 + $0x4] sm:$0xf]  ;;  %v233_v33 = vld [vmem:[%s2652_s6] sm:$0xe]  ;;  %v234_v34 = vld [vmem:[%s2652_s6 + $0x8] sm:$0x1] }
  0x13   : > { %2295 = vmatprep.subr.bf16.mxu1 %v2439_v13  ;;  %v1822_v36 = vrot.slane %v233_v33, 9  ;;  %v318_v37 = vrot.slane %v202_v32, 5  ;;  %v321_v38 = vrot.slane %v234_v34, 5  ;;  %v1839_v39 = vld [vmem:[%s2652_s6 + $0x1c] sm:$0xf] }
  0x14   : > { %v1870_v40 = vld [vmem:[%s2652_s6 + $0x18] sm:$0xe]  ;;  %v1871_v41 = vld [vmem:[%s2652_s6 + $0x20] sm:$0x1]  ;;  %v546_v42 = vrot.slane %v1839_v39, 5 }
  0x15   : > { %2184 = vmatpush3.bf16.msra.mxu0 %v2440_v14  ;;  %v319_v43 = vsel %vm2663_vm2, %v1822_v36, %v318_v37  ;;  %v320_v44 = vrot.slane %v318_v37, 4  ;;  %v1902_v45 = vrot.slane %v1870_v40, 9  ;;  %v549_v46 = vrot.slane %v1871_v41, 5  ;;  %v201_v47 = vld [vmem:[%s2652_s6] sm:$0xf] }
  0x16   : > { %2296 = vmatpush3.bf16.msra.mxu1 %v2441_v15  ;;  %2185 = vmatprep.subr.bf16.mxu0 %v2442_v16  ;;  %v548_v48 = vrot.slane %v546_v42, 4  ;;  %v1918_v49 = vcombine.low %v201_v47, %v202_v32  ;;  %v1838_v50 = vld [vmem:[%s2652_s6 + $0x18] sm:$0xf]  ;;  %v2675_v51 = vld [vmem:[%s2652_s6 + $0x10] sm:$0xf] }
  0x17   : > { %2297 = vmatprep.subr.bf16.mxu1 %v2443_v17  ;;  %v322_v52 = vsel %vm2663_vm2, %v320_v44, %v321_v38  ;;  %v547_v53 = vsel %vm2663_vm2, %v1902_v45, %v546_v42  ;;  %v1950_v54 = vcombine.low %v1838_v50, %v1839_v39  ;;  %v235_v55 = vld [vmem:[%s2652_s6 + $0xc] sm:$0xe]  ;;  %v236_v56 = vld [vmem:[%s2652_s6 + $0x14] sm:$0x1]  ;;  %v325_v57 = vrot.slane %v2675_v51, 5 }
  0x18   : > { %v1934_v58 = vcombine.low %v319_v43, %v322_v52  ;;  %v550_v59 = vsel %vm2663_vm2, %v548_v48, %v549_v46  ;;  %v1823_v60 = vrot.slane %v235_v55, 9  ;;  %v328_v61 = vrot.slane %v236_v56, 5  ;;  %v2687_v62 = vld [vmem:[%s2652_s6 + $0x28] sm:$0xf]  ;;  %v1872_v63 = vld [vmem:[%s2652_s6 + $0x24] sm:$0xe] }
  0x19   : > { %2186 = vmatpush3.bf16.msra.mxu0 %v2444_v18  ;;  %v1966_v0 = vcombine.low %v547_v53, %v550_v59  ;;  %v327_v1 = vrot.slane %v325_v57, 4  ;;  %v1873_v2 = vld [vmem:[%s2652_s6 + $0x2c] sm:$0x1]  ;;  %v1903_v3 = vrot.slane %v1872_v63, 9  ;;  %v553_v4 = vrot.slane %v2687_v62, 5 }
  0x1a   : > { %2298 = vmatpush3.bf16.msra.mxu1 %v2445_v19  ;;  %2187 = vmatprep.subr.bf16.mxu0 %v2446_v20  ;;  %v326_v5 = vsel %vm2663_vm2, %v1823_v60, %v325_v57  ;;  %v556_v6 = vrot.slane %v1873_v2, 5  ;;  %v203_v7 = vld [vmem:[%s2652_s6 + $0xc] sm:$0xf]  ;;  %v1840_v8 = vld [vmem:[%s2652_s6 + $0x24] sm:$0xf] }
  0x1b   : > { %2299 = vmatprep.subr.bf16.mxu1 %v2447_v21  ;;  %1239 = vmatprep.mubr.bf16.mxu0 %v1934_v58  ;;  %v329_v9 = vsel %vm2663_vm2, %v327_v1, %v328_v61  ;;  %v554_v10 = vsel %vm2663_vm2, %v1903_v3, %v553_v4  ;;  %v555_v11 = vrot.slane %v553_v4, 4  ;;  %v2701_v12 = vld [vmem:[%s2652_s6 + $0x1c] sm:$0xf]  ;;  %v237_v13 = vld [vmem:[%s2652_s6 + $0x18] sm:$0xe] }
  0x1c   : > { %1400 = vmatprep.mubr.bf16.mxu1 %v1966_v0  ;;  %v1935_v14 = vcombine.low %v326_v5, %v329_v9  ;;  %v238_v15 = vld [vmem:[%s2652_s6 + $0x20] sm:$0x1]  ;;  %v1824_v16 = vrot.slane %v237_v13, 9  ;;  %v332_v17 = vrot.slane %v2701_v12, 5  ;;  %v2707_v18 = vld [vmem:[%s2652_s6 + $0x34] sm:$0xf] }
  0x1d   : > { %2188 = vmatpush3.bf16.msra.mxu0 %v2448_v22  ;;  %v557_v19 = vsel %vm2663_vm2, %v555_v11, %v556_v6  ;;  %v335_v20 = vrot.slane %v238_v15, 5  ;;  %v1874_v21 = vld [vmem:[%s2652_s6 + $0x30] sm:$0xe]  ;;  %v1875_v22 = vld [vmem:[%s2652_s6 + $0x38] sm:$0x1] }
  0x1e   : > { %2300 = vmatpush3.bf16.msra.mxu1 %v2449_v23  ;;  %2189 = vmatprep.subr.bf16.mxu0 %v2450_v24  ;;  %v560_v23 = vrot.slane %v2707_v18, 5  ;;  %v1967_v24 = vcombine.low %v554_v10, %v557_v19  ;;  %v2719_v32 = vld [vmem:[%s2652_s6 + $0x28] sm:$0xf]  ;;  %v239_v33 = vld [vmem:[%s2652_s6 + $0x24] sm:$0xe] }
  0x1f   : > { %2301 = vmatprep.subr.bf16.mxu1 %v2451_v25  ;;  %v333_v25 = vsel %vm2663_vm2, %v1824_v16, %v332_v17  ;;  %v240_v37 = vld [vmem:[%s2652_s6 + $0x2c] sm:$0x1]  ;;  %v1825_v38 = vrot.slane %v239_v33, 9  ;;  %v339_v39 = vrot.slane %v2719_v32, 5  ;;  %v2729_v40 = vld [vmem:[%s2652_s6 + $0x40] sm:$0xf] }
  0x20   : > { %v342_v43 = vrot.slane %v240_v37, 5  ;;  %v1876_v44 = vld [vmem:[%s2652_s6 + $0x3c] sm:$0xe]  ;;  %v1877_v45 = vld [vmem:[%s2652_s6 + $0x44] sm:$0x1]  ;;  %v567_v46 = vrot.slane %v2729_v40, 5 }
  0x21   : > { %2190 = vmatpush3.bf16.msra.mxu0 %v2452_v26  ;;  %v334_v26 = vrot.slane %v332_v17, 4  ;;  %v205_v48 = vld [vmem:[%s2652_s6 + $0x18] sm:$0xf]  ;;  %v1905_v50 = vrot.slane %v1876_v44, 9  ;;  %v570_v53 = vrot.slane %v1877_v45, 5  ;;  %v340_v56 = vsel %vm2663_vm2, %v1825_v38, %v339_v39 }
  0x22   : > { %2302 = vmatpush3.bf16.msra.mxu1 %v2453_v27  ;;  %2191 = vmatprep.subr.bf16.mxu0 %v2454_v28  ;;  %v1904_v27 = vrot.slane %v1874_v21, 9  ;;  %v1919_v28 = vcombine.low %v203_v7, %v2675_v51  ;;  %v1842_v51 = vld [vmem:[%s2652_s6 + $0x30] sm:$0xf]  ;;  %v569_v52 = vrot.slane %v567_v46, 4  ;;  %v242_v57 = vld [vmem:[%s2652_s6 + $0x38] sm:$0x1]  ;;  %v1920_v6 = vcombine.low %v205_v48, %v2701_v12 }
  0x23   : > { %2303 = vmatprep.subr.bf16.mxu1 %v2455_v29  ;;  %v1951_v29 = vcombine.low %v1840_v8, %v2687_v62  ;;  %v336_v34 = vsel %vm2663_vm2, %v334_v26, %v335_v20  ;;  %v241_v55 = vld [vmem:[%s2652_s6 + $0x30] sm:$0xe]  ;;  %v2747_v59 = vld [vmem:[%s2652_s6 + $0x4c] sm:$0xf]  ;;  %v568_v61 = vsel %vm2663_vm2, %v1905_v50, %v567_v46  ;;  %v1878_v63 = vld [vmem:[%s2652_s6 + $0x48] sm:$0xe]  ;;  %v1952_v11 = vcombine.low %v1842_v51, %v2707_v18 }
  0x24   : > { %v561_v36 = vsel %vm2663_vm2, %v1904_v27, %v560_v23  ;;  %v1936_v41 = vcombine.low %v333_v25, %v336_v34  ;;  %v1826_v62 = vrot.slane %v241_v55, 9  ;;  %v1879_v0 = vld [vmem:[%s2652_s6 + $0x50] sm:$0x1]  ;;  %v574_v1 = vrot.slane %v2747_v59, 5  ;;  %v2760_v9 = vld [vmem:[%s2652_s6 + $0x40] sm:$0xf] }
  0x25   : > { %2192 = vmatpush3.bf16.msra.mxu0 %v2456_v30  ;;  %v562_v30 = vrot.slane %v560_v23, 4  ;;  %v571_v2 = vsel %vm2663_vm2, %v569_v52, %v570_v53  ;;  %v349_v4 = vrot.slane %v242_v57, 5  ;;  %v1906_v5 = vrot.slane %v1878_v63, 9  ;;  %v243_v10 = vld [vmem:[%s2652_s6 + $0x3c] sm:$0xe] }
  0x26   : > { %2304 = vmatpush3.bf16.msra.mxu1 %v2457_v31  ;;  %v563_v31 = vrot.slane %v1875_v22, 5  ;;  %v576_v7 = vrot.slane %v574_v1, 4  ;;  %v577_v8 = vrot.slane %v1879_v0, 5  ;;  %v244_v15 = vld [vmem:[%s2652_s6 + $0x44] sm:$0x1]  ;;  %v353_v16 = vrot.slane %v2760_v9, 5 }
  0x27   : > { %v2770_v17 = vld [vmem:[%s2652_s6 + $0x58] sm:$0xf]  ;;  %v1969_v19 = vcombine.low %v568_v61, %v571_v2  ;;  %v2773_v20 = vld [vmem:[%s2652_s6 + $0x3c] sm:$0xf]  ;;  %v1880_v21 = vld [vmem:[%s2652_s6 + $0x54] sm:$0xe] }
  0x28   : > { %1240 = vmatmul.mubr.bf16.vlgmr.msra.gmra.mrb[0].mxu0 %v1918_v49  ;;  %v564_v42 = vsel %vm2663_vm2, %v562_v30, %v563_v31  ;;  %v341_v49 = vrot.slane %v339_v39, 4  ;;  %v1881_v22 = vld [vmem:[%s2652_s6 + $0x5c] sm:$0x1]  ;;  %v581_v18 = vrot.slane %v2770_v17, 5  ;;  %v1827_v25 = vrot.slane %v243_v10, 9 }
  0x29   : > { %1401 = vmatmul.mubr.bf16.vlgmr.msra.gmra.mrb[0].mxu1 %v1950_v54  ;;  %1247 = vmatprep.mubr.bf16.mxu0 %v1935_v14  ;;  %v1968_v47 = vcombine.low %v561_v36, %v564_v42  ;;  %v2739_v54 = vld [vmem:[%s2652_s6 + $0x34] sm:$0xf]  ;;  %v2765_v14 = vld [vmem:[%s2652_s6 + $0x24] sm:$0xf]  ;;  %v355_v26 = vrot.slane %v353_v16, 4  ;;  %v356_v27 = vrot.slane %v244_v15, 5  ;;  %v1953_v45 = vcombine.low %v2773_v20, %v2729_v40 }
  0x2a   : > { %1408 = vmatprep.mubr.bf16.mxu1 %v1967_v24  ;;  %v346_v58 = vrot.slane %v2739_v54, 5  ;;  %v343_v60 = vsel %vm2663_vm2, %v341_v49, %v342_v43  ;;  %v2785_v24 = vld [vmem:[%s2652_s6 + $0x30] sm:$0xf]  ;;  %v1907_v30 = vrot.slane %v1880_v21, 9  ;;  %v583_v31 = vrot.slane %v581_v18, 4 }
  0x2b   : > { %v1937_v13 = vcombine.low %v340_v56, %v343_v60  ;;  %v2794_v33 = vld [vmem:[%s2652_s6 + $0x4c] sm:$0xf]  ;;  %v245_v34 = vld [vmem:[%s2652_s6 + $0x48] sm:$0xe]  ;;  %v584_v36 = vrot.slane %v1881_v22, 5  ;;  %v1922_v48 = vcombine.low %v2785_v24, %v2739_v54  ;;  %v2824_v51 = vsel %vm2663_vm2, %v1827_v25, %v353_v16 }
  0x2c   : > { %v348_v3 = vrot.slane %v346_v58, 4  ;;  %v2777_v12 = vsel %vm2663_vm2, %v1826_v62, %v346_v58  ;;  %v246_v37 = vld [vmem:[%s2652_s6 + $0x50] sm:$0x1]  ;;  %v360_v38 = vrot.slane %v2794_v33, 5  ;;  %v2800_v39 = vld [vmem:[%s2652_s6 + $0x64] sm:$0xf]  ;;  %v2828_v40 = vsel %vm2663_vm2, %v355_v26, %v356_v27 }
  0x2d   : > { %v2805_v42 = vld [vmem:[%s2652_s6 + $0x48] sm:$0xf]  ;;  %v2808_v43 = vld [vmem:[%s2652_s6 + $0x3c] sm:$0xf]  ;;  %v588_v44 = vrot.slane %v2800_v39, 5  ;;  %v1828_v52 = vrot.slane %v245_v34, 9  ;;  %v2836_v57 = vsel %vm2663_vm2, %v1907_v30, %v581_v18  ;;  %v2840_v58 = vsel %vm2663_vm2, %v583_v31, %v584_v36 }
  0x2e   : > { %v350_v23 = vsel %vm2663_vm2, %v348_v3, %v349_v4  ;;  %v1882_v49 = vld [vmem:[%s2652_s6 + $0x60] sm:$0xe]  ;;  %v1883_v50 = vld [vmem:[%s2652_s6 + $0x68] sm:$0x1]  ;;  %v363_v53 = vrot.slane %v246_v37, 5  ;;  %v362_v60 = vrot.slane %v360_v38, 4  ;;  %v1971_v15 = vcombine.low %v2836_v57, %v2840_v58 }
  0x2f   : > { %v1938_v46 = vcombine.low %v2777_v12, %v350_v23  ;;  %v2831_v55 = vld [vmem:[%s2652_s6 + $0x58] sm:$0xf]  ;;  %v247_v56 = vld [vmem:[%s2652_s6 + $0x54] sm:$0xe]  ;;  %v2843_v61 = vld [vmem:[%s2652_s6 + $0x5c] sm:$0x1]  ;;  %v2881_v21 = vsel %vm2663_vm2, %v1828_v52, %v360_v38 }
  0x30   : > { %1248 = vmatmul.mubr.bf16.gmra.mrb[4].mxu0 %v1919_v28  ;;  %v2789_v28 = vsel %vm2663_vm2, %v1906_v5, %v574_v1  ;;  %v367_v62 = vrot.slane %v2831_v55, 5  ;;  %v2847_v63 = vld [vmem:[%s2652_s6 + $0x70] sm:$0xf]  ;;  %v1908_v0 = vrot.slane %v1882_v49, 9  ;;  %v590_v1 = vrot.slane %v588_v44, 4 }
  0x31   : > { %1409 = vmatmul.mubr.bf16.gmra.mrb[4].mxu1 %v1951_v29  ;;  %1255 = vmatprep.mubr.bf16.mxu0 %v1936_v41  ;;  %v578_v29 = vsel %vm2663_vm2, %v576_v7, %v577_v8  ;;  %v1921_v41 = vcombine.low %v2765_v14, %v2719_v32  ;;  %v2818_v32 = vld [vmem:[%s2652_s6 + $0x54] sm:$0xf]  ;;  %v591_v2 = vrot.slane %v1883_v50, 5  ;;  %v2850_v3 = vld [vmem:[%s2652_s6 + $0x6c] sm:$0xe]  ;;  %v595_v4 = vrot.slane %v2847_v63, 5 }
  0x32   : > { %1416 = vmatprep.mubr.bf16.mxu1 %v1968_v47  ;;  %v1970_v47 = vcombine.low %v2789_v28, %v578_v29  ;;  %v1954_v5 = vcombine.low %v2805_v42, %v2747_v59  ;;  %v1955_v7 = vcombine.low %v2818_v32, %v2770_v17  ;;  %v2860_v8 = vld [vmem:[%s2652_s6 + $0x48] sm:$0xf]  ;;  %v2863_v10 = vld [vmem:[%s2652_s6 + $0x60] sm:$0xf]  ;;  %v1939_v14 = vcombine.low %v2824_v51, %v2828_v40  ;;  %v2874_v20 = vld [vmem:[%s2652_s6 + $0x64] sm:$0xf] }
  0x33   : > { %v369_v16 = vrot.slane %v367_v62, 4  ;;  %v2877_v12 = vld [vmem:[%s2652_s6 + $0x60] sm:$0xe]  ;;  %v2885_v22 = vsel %vm2663_vm2, %v362_v60, %v363_v53  ;;  %v1909_v18 = vrot.slane %v2850_v3, 9  ;;  %v2889_v23 = vld [vmem:[%s2652_s6 + $0x68] sm:$0x1]  ;;  %v2897_v27 = vsel %vm2663_vm2, %v1908_v0, %v588_v44 }
  0x34   : > { %v374_v25 = vrot.slane %v2874_v20, 5  ;;  %v2893_v26 = vld [vmem:[%s2652_s6 + $0x7c] sm:$0xf]  ;;  %v2901_v28 = vsel %vm2663_vm2, %v590_v1, %v591_v2  ;;  %v597_v29 = vrot.slane %v595_v4, 4  ;;  %v2906_v30 = vld [vmem:[%s2652_s6 + $0x54] sm:$0xf]  ;;  %v1940_v52 = vcombine.low %v2881_v21, %v2885_v22 }
  0x35   : > { %v2909_v31 = vld [vmem:[%s2652_s6 + $0x78] sm:$0xe]  ;;  %v3377_v34 = vrot.slane %v2893_v26, 5  ;;  %v2914_v37 = vld [vmem:[%s2652_s6 + $0x6c] sm:$0xf]  ;;  %v1830_v38 = vrot.slane %v2877_v12, 9  ;;  %v1972_v53 = vcombine.low %v2897_v27, %v2901_v28 }
  0x36   : > { %v377_v44 = vrot.slane %v2889_v23, 5  ;;  %v2935_v51 = vld [vmem:[%s2652_s6 + $0x70] sm:$0xf]  ;;  %v251_v40 = vld [vmem:[%s2652_s6 + $0x6c] sm:$0xe] }
  0x37   : > { %v2932_v50 = vrot.slane %v3377_v34, 4  ;;  %v1831_v57 = vrot.slane %v251_v40, 9  ;;  %v381_v58 = vrot.slane %v2935_v51, 5  ;;  %v2945_v60 = vld [vmem:[%s2652_s6 + $0x88] sm:$0xf] }
  0x38   : > { %1256 = vmatmul.mubr.bf16.gmra.mrb[8].mxu0 %v1920_v6  ;;  %v1923_v6 = vcombine.low %v2808_v43, %v2760_v9  ;;  %v1888_v2 = vld [vmem:[%s2652_s6 + $0x84] sm:$0xe]  ;;  %v3032_v59 = vld [vmem:[%s2652_s6 + $0xa0] sm:$0xf]  ;;  %v1894_v21 = vld [vmem:[%s2652_s6 + $0xa8] sm:$0xe] }
  0x39   : > { %1417 = vmatmul.mubr.bf16.gmra.mrb[8].mxu1 %v1952_v11  ;;  %1263 = vmatprep.mubr.bf16.mxu0 %v1937_v13  ;;  %v1829_v11 = vrot.slane %v247_v56, 9  ;;  %v2866_v13 = vld [vmem:[%s2652_s6 + $0x74] sm:$0x1]  ;;  %v2959_v49 = vsel %vm2663_vm2, %v1831_v57, %v381_v58  ;;  %v383_v34 = vrot.slane %v381_v58, 4  ;;  %v2971_v57 = vld [vmem:[%s2652_s6 + $0x7c] sm:$0xf] }
  0x3a   : > { %1424 = vmatprep.mubr.bf16.mxu1 %v1969_v19  ;;  %v370_v19 = vrot.slane %v2843_v61, 5  ;;  %v598_v36 = vrot.slane %v2866_v13, 5  ;;  %v252_v56 = vld [vmem:[%s2652_s6 + $0x74] sm:$0x1]  ;;  %v1889_v13 = vld [vmem:[%s2652_s6 + $0x8c] sm:$0x1] }
  0x3b   : > { %v2949_v61 = vsel %vm2663_vm2, %v1829_v11, %v367_v62  ;;  %v384_v1 = vrot.slane %v252_v56, 5  ;;  %v1911_v62 = vrot.slane %v1888_v2, 9  ;;  %v612_v40 = vrot.slane %v1889_v13, 5  ;;  %v253_v58 = vld [vmem:[%s2652_s6 + $0x78] sm:$0xe] }
  0x3c   : > { %v2966_v11 = vsel %vm2663_vm2, %v369_v16, %v370_v19  ;;  %v1832_v16 = vrot.slane %v253_v58, 9  ;;  %v388_v19 = vrot.slane %v2971_v57, 5  ;;  %v2988_v2 = vld [vmem:[%s2652_s6 + $0x94] sm:$0xf]  ;;  %v1895_v22 = vld [vmem:[%s2652_s6 + $0xb0] sm:$0x1] }
  0x3d   : > { %v2979_v54 = vsel %vm2663_vm2, %v383_v34, %v384_v1  ;;  %v1891_v34 = vld [vmem:[%s2652_s6 + $0x98] sm:$0x1]  ;;  %v260_v23 = vld [vmem:[%s2652_s6 + $0xa4] sm:$0x1] }
  0x3e   : > { %v390_v13 = vrot.slane %v388_v19, 4  ;;  %v1856_v35 = vld [vmem:[%s2652_s6 + $0x84] sm:$0xf] }
  0x40   : > { %1264 = vmatmul.mubr.bf16.gmra.mrb[12].mxu0 %v1921_v41  ;;  %v2919_v41 = vrot.slane %v374_v25, 4 }
  0x41   : > { %1425 = vmatmul.mubr.bf16.gmra.mrb[12].mxu1 %v1953_v45  ;;  %1271 = vmatprep.mubr.bf16.mxu0 %v1938_v46  ;;  %v2923_v45 = vld [vmem:[%s2652_s6 + $0x80] sm:$0x1]  ;;  %v3057_v46 = vld [vmem:[%s2652_s6 + $0x94] sm:$0xf] }
  0x42   : > { %1432 = vmatprep.mubr.bf16.mxu1 %v1970_v47  ;;  %v609_v47 = vrot.slane %v2945_v60, 5 }
  0x44   : > { %v611_v0 = vrot.slane %v609_v47, 4  ;;  %v2983_v24 = vsel %vm2663_vm2, %v1911_v62, %v609_v47  ;;  %v616_v47 = vrot.slane %v2988_v2, 5 }
  0x46   : > { %v2994_v42 = vsel %vm2663_vm2, %v611_v0, %v612_v40  ;;  %v3011_v0 = vsel %vm2663_vm2, %v1909_v18, %v595_v4  ;;  %v3015_v40 = vsel %vm2663_vm2, %v597_v29, %v598_v36  ;;  %v618_v58 = vrot.slane %v616_v47, 4  ;;  %v256_v4 = vld [vmem:[%s2652_s6 + $0x8c] sm:$0x1] }
  0x48   : > { %1272 = vmatmul.mubr.bf16.gmra.mrb[16].mxu0 %v1922_v48  ;;  %v254_v48 = vld [vmem:[%s2652_s6 + $0x80] sm:$0x1] }
  0x49   : > { %1433 = vmatmul.mubr.bf16.gmra.mrb[16].mxu1 %v1954_v5  ;;  %1279 = vmatprep.mubr.bf16.mxu0 %v1939_v14  ;;  %v391_v5 = vrot.slane %v254_v48, 5  ;;  %v1890_v14 = vld [vmem:[%s2652_s6 + $0x90] sm:$0xe]  ;;  %v619_v48 = vrot.slane %v1891_v34, 5  ;;  %v1892_v34 = vld [vmem:[%s2652_s6 + $0x9c] sm:$0xe] }
  0x4a   : > { %1440 = vmatprep.mubr.bf16.mxu1 %v1971_v15  ;;  %v3003_v15 = vsel %vm2663_vm2, %v1832_v16, %v388_v19  ;;  %v1912_v62 = vrot.slane %v1890_v14, 9  ;;  %v3018_v16 = vld [vmem:[%s2652_s6 + $0x88] sm:$0xf]  ;;  %v255_v19 = vld [vmem:[%s2652_s6 + $0x84] sm:$0xe]  ;;  %v1913_v29 = vrot.slane %v1892_v34, 9 }
  0x4b   : > { %v3023_v14 = vsel %vm2663_vm2, %v390_v13, %v391_v5  ;;  %v1833_v18 = vrot.slane %v255_v19, 9  ;;  %v395_v1 = vrot.slane %v3018_v16, 5  ;;  %v3038_v36 = vsel %vm2663_vm2, %v618_v58, %v619_v48  ;;  %v1893_v13 = vld [vmem:[%s2652_s6 + $0xa4] sm:$0x1]  ;;  %v3113_v34 = vld [vmem:[%s2652_s6 + $0xa0] sm:$0xf] }
  0x4c   : > { %v3027_v3 = vsel %vm2663_vm2, %v1912_v62, %v616_v47  ;;  %v398_v5 = vrot.slane %v256_v4, 5  ;;  %v623_v47 = vrot.slane %v3032_v59, 5  ;;  %v1941_v58 = vcombine.low %v2949_v61, %v2966_v11 }
  0x4d   : > { %v3047_v19 = vsel %vm2663_vm2, %v1833_v18, %v395_v1  ;;  %v397_v56 = vrot.slane %v395_v1, 4  ;;  %v1973_v48 = vcombine.low %v3011_v0, %v3015_v40  ;;  %v626_v62 = vrot.slane %v1893_v13, 5  ;;  %v257_v18 = vld [vmem:[%s2652_s6 + $0x90] sm:$0xe]  ;;  %v3077_v1 = vld [vmem:[%s2652_s6 + $0xac] sm:$0xf] }
  0x4e   : > { %v625_v4 = vrot.slane %v623_v47, 4  ;;  %v3072_v43 = vsel %vm2663_vm2, %v1913_v29, %v623_v47  ;;  %v1834_v61 = vrot.slane %v257_v18, 9  ;;  %v402_v11 = vrot.slane %v3057_v46, 5  ;;  %v259_v13 = vld [vmem:[%s2652_s6 + $0x9c] sm:$0xe] }
  0x4f   : > { %v3068_v9 = vsel %vm2663_vm2, %v397_v56, %v398_v5  ;;  %v1914_v56 = vrot.slane %v1894_v21, 9  ;;  %v3103_v0 = vsel %vm2663_vm2, %v1830_v38, %v374_v25  ;;  %v3110_v40 = vsel %vm2663_vm2, %v2919_v41, %v377_v44  ;;  %v1896_v18 = vld [vmem:[%s2652_s6 + $0xb4] sm:$0xe] }
  0x50   : > { %1280 = vmatmul.mubr.bf16.gmra.mrb[20].mxu0 %v1923_v6  ;;  %v258_v6 = vld [vmem:[%s2652_s6 + $0x98] sm:$0x1]  ;;  %v1945_v17 = vcombine.low %v3047_v19, %v3068_v9  ;;  %v3086_v32 = vsel %vm2663_vm2, %v625_v4, %v626_v62  ;;  %v3095_v28 = vsel %vm2663_vm2, %v1834_v61, %v402_v11  ;;  %v633_v5 = vrot.slane %v1895_v22, 5  ;;  %v227_v9 = vld [vmem:[%s2652_s6 + $0x9c] sm:$0xf] }
  0x51   : > { %1441 = vmatmul.mubr.bf16.gmra.mrb[20].mxu1 %v1955_v7  ;;  %1287 = vmatprep.mubr.bf16.mxu0 %v1940_v52  ;;  %v405_v7 = vrot.slane %v258_v6, 5  ;;  %v630_v52 = vrot.slane %v3077_v1, 5  ;;  %v1977_v27 = vcombine.low %v3072_v43, %v3086_v32  ;;  %v1835_v38 = vrot.slane %v259_v13, 9  ;;  %v3127_v62 = vld [vmem:[%s2652_s6 + $0xb8] sm:$0xf] }
  0x52   : > { %1448 = vmatprep.mubr.bf16.mxu1 %v1972_v53  ;;  %v404_v53 = vrot.slane %v402_v11, 4  ;;  %v409_v47 = vrot.slane %v3113_v34, 5  ;;  %v412_v4 = vrot.slane %v260_v23, 5  ;;  %v1897_v6 = vld [vmem:[%s2652_s6 + $0xbc] sm:$0x1]  ;;  %v637_v61 = vrot.slane %v3127_v62, 5 }
  0x53   : > { %v632_v29 = vrot.slane %v630_v52, 4  ;;  %v3122_v25 = vsel %vm2663_vm2, %v1914_v56, %v630_v52  ;;  %v1915_v22 = vrot.slane %v1896_v18, 9  ;;  %v3380_v52 = vcombine.low %v2860_v8, %v2794_v33  ;;  %v261_v33 = vld [vmem:[%s2652_s6 + $0xa8] sm:$0xe] }
  0x54   : > { %v3118_v12 = vsel %vm2663_vm2, %v404_v53, %v405_v7  ;;  %v3142_v7 = vsel %vm2663_vm2, %v1835_v38, %v409_v47  ;;  %v411_v21 = vrot.slane %v409_v47, 4  ;;  %v3381_v53 = vrot.slane %v2893_v26, 5  ;;  %v3159_v47 = vld [vmem:[%s2652_s6 + $0xac] sm:$0xf] }
  0x55   : > { %v1946_v41 = vcombine.low %v3095_v28, %v3118_v12  ;;  %v3133_v44 = vsel %vm2663_vm2, %v632_v29, %v633_v5  ;;  %v3382_v56 = vrot.slane %v2909_v31, 9  ;;  %v3383_v5 = vrot.slane %v2923_v45, 5  ;;  %v1866_v28 = vld [vmem:[%s2652_s6 + $0xc0] sm:$0xf] }
  0x56   : > { %v639_v23 = vrot.slane %v637_v61, 4  ;;  %v640_v38 = vrot.slane %v1897_v6, 5  ;;  %v3384_v8 = vcombine.low %v2863_v10, %v2800_v39  ;;  %v3167_v31 = vsel %vm2663_vm2, %v411_v21, %v412_v4  ;;  %v1898_v4 = vld [vmem:[%s2652_s6 + $0xc0] sm:$0xe] }
  0x57   : > { %v603_v29 = vsel %vm2663_vm2, %v3382_v56, %v3381_v53  ;;  %v606_v13 = vsel %vm2663_vm2, %v2932_v50, %v3383_v5  ;;  %v3171_v45 = vsel %vm2663_vm2, %v1915_v22, %v637_v61  ;;  %v262_v50 = vld [vmem:[%s2652_s6 + $0xb0] sm:$0x1]  ;;  %v1836_v18 = vrot.slane %v261_v33, 9  ;;  %v1899_v61 = vld [vmem:[%s2652_s6 + $0xc8] sm:$0x1] }
  0x58   : > { %1288 = vmatmul.mubr.bf16.gmra.mrb[24].mxu0 %v3380_v52  ;;  %v416_v6 = vrot.slane %v3159_v47, 5  ;;  %v3176_v52 = vld [vmem:[%s2652_s6 + $0xc4] sm:$0xf]  ;;  %v3182_v10 = vsel %vm2663_vm2, %v639_v23, %v640_v38  ;;  %v1916_v56 = vrot.slane %v1898_v4, 9  ;;  %v1942_v5 = vcombine.low %v3103_v0, %v3110_v40  ;;  %v3210_v0 = vld [vmem:[%s2652_s6 + $0xd0] sm:$0xf] }
  0x59   : > { %1449 = vmatmul.mubr.bf16.gmra.mrb[24].mxu1 %v3384_v8  ;;  %1295 = vmatprep.mubr.bf16.mxu0 %v1941_v58  ;;  %v419_v58 = vrot.slane %v262_v50, 5  ;;  %v644_v21 = vrot.slane %v3176_v52, 5  ;;  %v1974_v23 = vcombine.low %v603_v29, %v606_v13  ;;  %v647_v33 = vrot.slane %v1899_v61, 5  ;;  %v3196_v8 = vld [vmem:[%s2652_s6 + $0xb8] sm:$0xf] }
  0x5a   : > { %1456 = vmatprep.mubr.bf16.mxu1 %v1973_v48  ;;  %v3191_v48 = vsel %vm2663_vm2, %v1836_v18, %v416_v6  ;;  %v418_v53 = vrot.slane %v416_v6, 4  ;;  %v263_v50 = vld [vmem:[%s2652_s6 + $0xb4] sm:$0xe]  ;;  %v264_v6 = vld [vmem:[%s2652_s6 + $0xbc] sm:$0x1]  ;;  %v423_v39 = vrot.slane %v3196_v8, 5  ;;  %v3385_v40 = vcombine.low %v2906_v30, %v2831_v55 }
  0x5b   : > { %v646_v38 = vrot.slane %v644_v21, 4  ;;  %v3205_v18 = vsel %vm2663_vm2, %v1916_v56, %v644_v21  ;;  %v1837_v4 = vrot.slane %v263_v50, 9  ;;  %v426_v13 = vrot.slane %v264_v6, 5  ;;  %v1901_v61 = vld [vmem:[%s2652_s6 + $0xd4] sm:$0x1] }
  0x5c   : > { %v3201_v22 = vsel %vm2663_vm2, %v418_v53, %v419_v58  ;;  %v1900_v58 = vld [vmem:[%s2652_s6 + $0xcc] sm:$0xe]  ;;  %v651_v21 = vrot.slane %v3210_v0, 5  ;;  %v425_v50 = vrot.slane %v423_v39, 4  ;;  %v3386_v6 = vcombine.low %v2914_v37, %v2847_v63 }
  0x5d   : > { %v3216_v29 = vsel %vm2663_vm2, %v646_v38, %v647_v33  ;;  %v3225_v56 = vsel %vm2663_vm2, %v1837_v4, %v423_v39  ;;  %v1917_v11 = vrot.slane %v1900_v58, 9  ;;  %v654_v33 = vrot.slane %v1901_v61, 5 }
  0x5e   : > { %v1980_v53 = vcombine.low %v3205_v18, %v3216_v29  ;;  %v653_v38 = vrot.slane %v651_v21, 4  ;;  %v217_v18 = vld [vmem:[%s2652_s6 + $0x60] sm:$0xf]  ;;  %v427_v4 = vsel %vm2663_vm2, %v425_v50, %v426_v13  ;;  %v1854_v29 = vld [vmem:[%s2652_s6 + $0x78] sm:$0xf]  ;;  %v3393_v43 = vcombine.low %v3171_v45, %v3182_v10 }
  0x5f   : > { %v652_v39 = vsel %vm2663_vm2, %v1917_v11, %v651_v21  ;;  %v1949_v55 = vcombine.low %v3225_v56, %v427_v4  ;;  %v1926_v37 = vcombine.low %v217_v18, %v2874_v20  ;;  %v219_v11 = vld [vmem:[%s2652_s6 + $0x6c] sm:$0xf]  ;;  %v1959_v20 = vcombine.low %v1856_v35, %v2945_v60  ;;  %v223_v60 = vld [vmem:[%s2652_s6 + $0x84] sm:$0xf] }
  0x60   : > { %1296 = vmatmul.mubr.bf16.gmra.mrb[28].mxu0 %v3385_v40  ;;  %v655_v30 = vsel %vm2663_vm2, %v653_v38, %v654_v33  ;;  %v3387_v40 = vcombine.low %v2959_v49, %v2979_v54  ;;  %v1927_v13 = vcombine.low %v219_v11, %v2935_v51  ;;  %v221_v49 = vld [vmem:[%s2652_s6 + $0x78] sm:$0xf]  ;;  %v3390_v54 = vcombine.low %v3027_v3, %v3038_v36  ;;  %v1862_v36 = vld [vmem:[%s2652_s6 + $0xa8] sm:$0xf] }
  0x61   : > { %1457 = vmatmul.mubr.bf16.gmra.mrb[28].mxu1 %v3386_v6  ;;  %1303 = vmatprep.mubr.bf16.mxu0 %v1942_v5  ;;  %v1981_v63 = vcombine.low %v652_v39, %v655_v30  ;;  %v1958_v5 = vcombine.low %v1854_v29, %v2893_v26  ;;  %v3389_v26 = vcombine.low %v3003_v15, %v3023_v14  ;;  %v1860_v15 = vld [vmem:[%s2652_s6 + $0x9c] sm:$0xf] }
  0x62   : > { %1464 = vmatprep.mubr.bf16.mxu1 %v1974_v23  ;;  %v3388_v23 = vcombine.low %v2983_v24, %v2994_v42  ;;  %v1858_v24 = vld [vmem:[%s2652_s6 + $0x90] sm:$0xf]  ;;  %v1928_v42 = vcombine.low %v221_v49, %v2971_v57  ;;  %v1929_v14 = vcombine.low %v223_v60, %v3018_v16  ;;  %v1961_v57 = vcombine.low %v1860_v15, %v3032_v59 }
  0x63   : > { %v1960_v51 = vcombine.low %v1858_v24, %v2988_v2  ;;  %v225_v2 = vld [vmem:[%s2652_s6 + $0x90] sm:$0xf]  ;;  %v3391_v3 = vcombine.low %v3122_v25, %v3133_v44  ;;  %v1962_v16 = vcombine.low %v1862_v36, %v3077_v1  ;;  %v3392_v59 = vcombine.low %v3142_v7, %v3167_v31 }
  0x64   : > { %v1930_v19 = vcombine.low %v225_v2, %v3057_v46  ;;  %v1931_v32 = vcombine.low %v227_v9, %v3113_v34  ;;  %v3394_v1 = vcombine.low %v3191_v48, %v3201_v22  ;;  %v1964_v25 = vcombine.low %v1866_v28, %v3176_v52  ;;  %v1868_v34 = vld [vmem:[%s2652_s6 + $0xcc] sm:$0xf] }
  0x65   : > { %v1965_v44 = vcombine.low %v1868_v34, %v3210_v0 }
  0x68   : > { %1304 = vmatmul.mubr.bf16.gmra.mrb[32].mxu0 %v1926_v37 }
  0x69   : > { %1465 = vmatmul.mubr.bf16.gmra.mrb[32].mxu1 %v1958_v5  ;;  %1311 = vmatprep.mubr.bf16.mxu0 %v3387_v40 }
  0x6a   : > { %1472 = vmatprep.mubr.bf16.mxu1 %v3388_v23 }
  0x70   : > { %1312 = vmatmul.mubr.bf16.gmra.mrb[36].mxu0 %v1927_v13 }
  0x71   : > { %1473 = vmatmul.mubr.bf16.gmra.mrb[36].mxu1 %v1959_v20  ;;  %1319 = vmatprep.mubr.bf16.mxu0 %v3389_v26 }
  0x72   : > { %1480 = vmatprep.mubr.bf16.mxu1 %v3390_v54 }
  0x78   : > { %1320 = vmatmul.mubr.bf16.gmra.mrb[40].mxu0 %v1928_v42 }
  0x79   : > { %1481 = vmatmul.mubr.bf16.gmra.mrb[40].mxu1 %v1960_v51  ;;  %1327 = vmatprep.mubr.bf16.mxu0 %v1945_v17  ;;  %v1864_v17 = vld [vmem:[%s2652_s6 + $0xb4] sm:$0xf] }
  0x7a   : > { %1488 = vmatprep.mubr.bf16.mxu1 %v1977_v27  ;;  %v1963_v46 = vcombine.low %v1864_v17, %v3127_v62  ;;  %v229_v27 = vld [vmem:[%s2652_s6 + $0xa8] sm:$0xf] }
  0x7b   : > { %v1932_v12 = vcombine.low %v229_v27, %v3159_v47  ;;  %v3308_v47 = vld [vmem:[%s3375_s2] ss:$0 sm:$0xff] }
  0x80   : > { %1328 = vmatmul.mubr.bf16.gmra.mrb[44].mxu0 %v1929_v14 }
  0x81   : > { %1489 = vmatmul.mubr.bf16.gmra.mrb[44].mxu1 %v1961_v57  ;;  %1335 = vmatprep.mubr.bf16.mxu0 %v1946_v41  ;;  %v231_v41 = vld [vmem:[%s2652_s6 + $0xb4] sm:$0xf] }
  0x82   : > { %1496 = vmatprep.mubr.bf16.mxu1 %v3391_v3  ;;  %v1933_v62 = vcombine.low %v231_v41, %v3196_v8 }
  0x88   : > { %1336 = vmatmul.mubr.bf16.gmra.mrb[48].mxu0 %v1930_v19 }
  0x89   : > { %1497 = vmatmul.mubr.bf16.gmra.mrb[48].mxu1 %v1962_v16  ;;  %1343 = vmatprep.mubr.bf16.mxu0 %v3392_v59 }
  0x8a   : > { %1504 = vmatprep.mubr.bf16.mxu1 %v3393_v43 }
  0x90   : > { %1344 = vmatmul.mubr.bf16.gmra.mrb[52].mxu0 %v1931_v32 }
  0x91   : > { %1505 = vmatmul.mubr.bf16.gmra.mrb[52].mxu1 %v1963_v46  ;;  %1351 = vmatprep.mubr.bf16.mxu0 %v3394_v1 }
  0x92   : > { %1512 = vmatprep.mubr.bf16.mxu1 %v1980_v53 }
  0x98   : > { %1352 = vmatmul.mubr.bf16.gmra.mrb[56].mxu0 %v1932_v12 }
  0x99   : > { %1513 = vmatmul.mubr.bf16.gmra.mrb[56].mxu1 %v1964_v25  ;;  %1359 = vmatprep.mubr.bf16.mxu0 %v1949_v55 }
  0x9a   : > { %1520 = vmatprep.mubr.bf16.mxu1 %v1981_v63 }
  0xa0   : > { %1360 = vmatmul.mubr.bf16.gmra.mrb[60].mxu0 %v1933_v62 }
  0xa1   : > { %1521 = vmatmul.mubr.bf16.gmra.mrb[60].mxu1 %v1965_v44 }
  0xfb   : > { %v2193_v7 = vpop.f32.mrb[0].mxu0 }
  0xfc   : > { %v2305_v31 = vpop.f32.mrb[0].mxu1  ;;  %v2194_v45 = vpop.f32.mrb[1].mxu0 }
  0xfd   : > { %v2195_v52 = vadd.f32 %v2194_v45, %v2193_v7  ;;  %v2306_v10 = vpop.f32.mrb[1].mxu1  ;;  %v2196_v22 = vpop.f32.mrb[2].mxu0 }
  0xfe   : > { %v2307_v48 = vadd.f32 %v2306_v10, %v2305_v31  ;;  %v2308_v58 = vpop.f32.mrb[2].mxu1  ;;  %v2197_v61 = vpop.f32.mrb[3].mxu0 }
  0xff   : > { %v1242_v8 = vadd.f32 %v2195_v52, %v3308_v47  ;;  %v2198_v0 = vadd.f32 %v2197_v61, %v2196_v22  ;;  %v2309_v21 = vpop.f32.mrb[3].mxu1 }
 0x100   : > { %v2310_v53 = vadd.f32 %v2309_v21, %v2308_v58 }
 0x101   : > { %v1403_v56 = vadd.f32 %v2307_v48, %v1242_v8  ;;  %v1245_v50 = vadd.f32 %v2198_v0, %v3308_v47 }
 0x103   : > { %v1406_v38 = vadd.f32 %v2310_v53, %v1245_v50  ;;  %v2199_v33 = vpop.f32.mrb[4].mxu0  ;;  %v1529_v4 = vmax.f32 %v1403_v56, 0.0 }
 0x104   : > { %v2311_v6 = vpop.f32.mrb[4].mxu1  ;;  %v2200_v18 = vpop.f32.mrb[5].mxu0 }
 0x105   : > { %v1530_v39 = vmax.f32 %v1406_v38, 0.0  ;;  %v2201_v29 = vadd.f32 %v2200_v18, %v2199_v33  ;;  %v2312_v55 = vpop.f32.mrb[5].mxu1  ;;  %v2202_v30 = vpop.f32.mrb[6].mxu0 }
 0x106   : > { %v2313_v63 = vadd.f32 %v2312_v55, %v2311_v6  ;;  %v2314_v37 = vpop.f32.mrb[6].mxu1  ;;  %v2203_v5 = vpop.f32.mrb[7].mxu0 }
 0x107   : > { %v2085_v40 = vpack.c.bf16 %v1530_v39, %v1529_v4  ;;  %v1250_v11 = vadd.f32 %v2201_v29, %v3308_v47  ;;  %v2204_v23 = vadd.f32 %v2203_v5, %v2202_v30  ;;  %v2315_v35 = vpop.f32.mrb[7].mxu1 }
 0x108   : > { %v2316_v13 = vadd.f32 %v2315_v35, %v2314_v37 }
 0x109   : > { %2086 = vst [vmem:[%s3316_s20] sm:$0xff] %v2085_v40   ;;  %v1411_v20 = vadd.f32 %v2313_v63, %v1250_v11  ;;  %v1253_v26 = vadd.f32 %v2204_v23, %v3308_v47 }
 0x10b   : > { %v1414_v49 = vadd.f32 %v2316_v13, %v1253_v26  ;;  %v2205_v54 = vpop.f32.mrb[8].mxu0  ;;  %v1531_v51 = vmax.f32 %v1411_v20, 0.0 }
 0x10c   : > { %v2317_v24 = vpop.f32.mrb[8].mxu1  ;;  %v2206_v42 = vpop.f32.mrb[9].mxu0 }
 0x10d   : > { %v1532_v60 = vmax.f32 %v1414_v49, 0.0  ;;  %v2207_v15 = vadd.f32 %v2206_v42, %v2205_v54  ;;  %v2318_v14 = vpop.f32.mrb[9].mxu1  ;;  %v2208_v57 = vpop.f32.mrb[10].mxu0 }
 0x10e   : > { %v2319_v2 = vadd.f32 %v2318_v14, %v2317_v24  ;;  %v2320_v3 = vpop.f32.mrb[10].mxu1  ;;  %v2209_v36 = vpop.f32.mrb[11].mxu0 }
 0x10f   : > { %v2090_v19 = vpack.c.bf16 %v1532_v60, %v1531_v51  ;;  %v1258_v16 = vadd.f32 %v2207_v15, %v3308_v47  ;;  %v2210_v59 = vadd.f32 %v2209_v36, %v2208_v57  ;;  %v2321_v9 = vpop.f32.mrb[11].mxu1 }
 0x110   : > { %v2322_v43 = vadd.f32 %v2321_v9, %v2320_v3 }
 0x111   : > { %2162 = vst [vmem:[%s3316_s20 + $0x8] sm:$0xff] %v2090_v19   ;;  %v1419_v17 = vadd.f32 %v2319_v2, %v1258_v16  ;;  %v1261_v32 = vadd.f32 %v2210_v59, %v3308_v47 }
 0x113   : > { %v1422_v46 = vadd.f32 %v2322_v43, %v1261_v32  ;;  %v2211_v1 = vpop.f32.mrb[12].mxu0  ;;  %v1533_v12 = vmax.f32 %v1419_v17, 0.0 }
 0x114   : > { %v2323_v27 = vpop.f32.mrb[12].mxu1  ;;  %v2212_v28 = vpop.f32.mrb[13].mxu0 }
 0x115   : > { %v1534_v25 = vmax.f32 %v1422_v46, 0.0  ;;  %v2213_v41 = vadd.f32 %v2212_v28, %v2211_v1  ;;  %v2324_v34 = vpop.f32.mrb[13].mxu1  ;;  %v2214_v62 = vpop.f32.mrb[14].mxu0 }
 0x116   : > { %v2325_v44 = vadd.f32 %v2324_v34, %v2323_v27  ;;  %v2326_v7 = vpop.f32.mrb[14].mxu1  ;;  %v2215_v31 = vpop.f32.mrb[15].mxu0 }
 0x117   : > { %v2095_v45 = vpack.c.bf16 %v1534_v25, %v1533_v12  ;;  %v1266_v52 = vadd.f32 %v2213_v41, %v3308_v47  ;;  %v2216_v10 = vadd.f32 %v2215_v31, %v2214_v62  ;;  %v2327_v22 = vpop.f32.mrb[15].mxu1 }
 0x118   : > { %v2328_v48 = vadd.f32 %v2327_v22, %v2326_v7 }
 0x119   : > { %2163 = vst [vmem:[%s3316_s20 + $0x10] sm:$0xff] %v2095_v45   ;;  %v1427_v58 = vadd.f32 %v2325_v44, %v1266_v52  ;;  %v1269_v61 = vadd.f32 %v2216_v10, %v3308_v47 }
 0x11b   : > { %v1430_v8 = vadd.f32 %v2328_v48, %v1269_v61  ;;  %v2217_v0 = vpop.f32.mrb[16].mxu0  ;;  %v1535_v56 = vmax.f32 %v1427_v58, 0.0 }
 0x11c   : > { %v2329_v21 = vpop.f32.mrb[16].mxu1  ;;  %v2218_v53 = vpop.f32.mrb[17].mxu0 }
 0x11d   : > { %v1536_v50 = vmax.f32 %v1430_v8, 0.0  ;;  %v2219_v38 = vadd.f32 %v2218_v53, %v2217_v0  ;;  %v2330_v33 = vpop.f32.mrb[17].mxu1  ;;  %v2220_v6 = vpop.f32.mrb[18].mxu0 }
 0x11e   : > { %v2331_v18 = vadd.f32 %v2330_v33, %v2329_v21  ;;  %v2332_v4 = vpop.f32.mrb[18].mxu1  ;;  %v2221_v39 = vpop.f32.mrb[19].mxu0 }
 0x11f   : > { %v2100_v29 = vpack.c.bf16 %v1536_v50, %v1535_v56  ;;  %v1274_v55 = vadd.f32 %v2219_v38, %v3308_v47  ;;  %v2222_v30 = vadd.f32 %v2221_v39, %v2220_v6  ;;  %v2333_v63 = vpop.f32.mrb[19].mxu1 }
 0x120   : > { %v2334_v37 = vadd.f32 %v2333_v63, %v2332_v4 }
 0x121   : > { %2164 = vst [vmem:[%s3316_s20 + $0x18] sm:$0xff] %v2100_v29   ;;  %v1435_v5 = vadd.f32 %v2331_v18, %v1274_v55  ;;  %v1277_v40 = vadd.f32 %v2222_v30, %v3308_v47 }
 0x123   : > { %v1438_v11 = vadd.f32 %v2334_v37, %v1277_v40  ;;  %v2223_v23 = vpop.f32.mrb[20].mxu0  ;;  %v1537_v20 = vmax.f32 %v1435_v5, 0.0 }
 0x124   : > { %v2335_v35 = vpop.f32.mrb[20].mxu1  ;;  %v2224_v13 = vpop.f32.mrb[21].mxu0 }
 0x125   : > { %v1538_v26 = vmax.f32 %v1438_v11, 0.0  ;;  %v2225_v49 = vadd.f32 %v2224_v13, %v2223_v23  ;;  %v2336_v54 = vpop.f32.mrb[21].mxu1  ;;  %v2226_v24 = vpop.f32.mrb[22].mxu0 }
 0x126   : > { %v2337_v42 = vadd.f32 %v2336_v54, %v2335_v35  ;;  %v2338_v51 = vpop.f32.mrb[22].mxu1  ;;  %v2227_v60 = vpop.f32.mrb[23].mxu0 }
 0x127   : > { %v2105_v15 = vpack.c.bf16 %v1538_v26, %v1537_v20  ;;  %v1282_v14 = vadd.f32 %v2225_v49, %v3308_v47  ;;  %v2228_v57 = vadd.f32 %v2227_v60, %v2226_v24  ;;  %v2339_v2 = vpop.f32.mrb[23].mxu1 }
 0x128   : > { %v2340_v3 = vadd.f32 %v2339_v2, %v2338_v51 }
 0x129   : > { %2165 = vst [vmem:[%s3316_s20 + $0x20] sm:$0xff] %v2105_v15   ;;  %v1443_v36 = vadd.f32 %v2337_v42, %v1282_v14  ;;  %v1285_v19 = vadd.f32 %v2228_v57, %v3308_v47 }
 0x12b   : > { %v1446_v16 = vadd.f32 %v2340_v3, %v1285_v19  ;;  %v2229_v59 = vpop.f32.mrb[24].mxu0  ;;  %v1539_v17 = vmax.f32 %v1443_v36, 0.0 }
 0x12c   : > { %v2341_v9 = vpop.f32.mrb[24].mxu1  ;;  %v2230_v43 = vpop.f32.mrb[25].mxu0 }
 0x12d   : > { %v1540_v32 = vmax.f32 %v1446_v16, 0.0  ;;  %v2231_v46 = vadd.f32 %v2230_v43, %v2229_v59  ;;  %v2342_v1 = vpop.f32.mrb[25].mxu1  ;;  %v2232_v27 = vpop.f32.mrb[26].mxu0 }
 0x12e   : > { %v2343_v28 = vadd.f32 %v2342_v1, %v2341_v9  ;;  %v2344_v12 = vpop.f32.mrb[26].mxu1  ;;  %v2233_v25 = vpop.f32.mrb[27].mxu0 }
 0x12f   : > { %v2110_v41 = vpack.c.bf16 %v1540_v32, %v1539_v17  ;;  %v1290_v34 = vadd.f32 %v2231_v46, %v3308_v47  ;;  %v2234_v62 = vadd.f32 %v2233_v25, %v2232_v27  ;;  %v2345_v44 = vpop.f32.mrb[27].mxu1 }
 0x130   : > { %v2346_v7 = vadd.f32 %v2345_v44, %v2344_v12 }
 0x131   : > { %2166 = vst [vmem:[%s3316_s20 + $0x28] sm:$0xff] %v2110_v41   ;;  %v1451_v31 = vadd.f32 %v2343_v28, %v1290_v34  ;;  %v1293_v45 = vadd.f32 %v2234_v62, %v3308_v47 }
 0x133   : > { %v1454_v52 = vadd.f32 %v2346_v7, %v1293_v45  ;;  %v2235_v10 = vpop.f32.mrb[28].mxu0  ;;  %v1541_v58 = vmax.f32 %v1451_v31, 0.0 }
 0x134   : > { %v2347_v22 = vpop.f32.mrb[28].mxu1  ;;  %v2236_v48 = vpop.f32.mrb[29].mxu0 }
 0x135   : > { %v1542_v61 = vmax.f32 %v1454_v52, 0.0  ;;  %v2237_v8 = vadd.f32 %v2236_v48, %v2235_v10  ;;  %v2348_v0 = vpop.f32.mrb[29].mxu1  ;;  %v2238_v21 = vpop.f32.mrb[30].mxu0 }
 0x136   : > { %v2349_v53 = vadd.f32 %v2348_v0, %v2347_v22  ;;  %v2350_v56 = vpop.f32.mrb[30].mxu1  ;;  %v2239_v50 = vpop.f32.mrb[31].mxu0 }
 0x137   : > { %v2115_v38 = vpack.c.bf16 %v1542_v61, %v1541_v58  ;;  %v1298_v33 = vadd.f32 %v2237_v8, %v3308_v47  ;;  %v2240_v6 = vadd.f32 %v2239_v50, %v2238_v21  ;;  %v2351_v18 = vpop.f32.mrb[31].mxu1 }
 0x138   : > { %v2352_v4 = vadd.f32 %v2351_v18, %v2350_v56 }
 0x139   : > { %2167 = vst [vmem:[%s3316_s20 + $0x30] sm:$0xff] %v2115_v38   ;;  %v1459_v39 = vadd.f32 %v2349_v53, %v1298_v33  ;;  %v1301_v29 = vadd.f32 %v2240_v6, %v3308_v47 }
 0x13b   : > { %v1462_v55 = vadd.f32 %v2352_v4, %v1301_v29  ;;  %v2241_v30 = vpop.f32.mrb[32].mxu0  ;;  %v1543_v5 = vmax.f32 %v1459_v39, 0.0 }
 0x13c   : > { %v2353_v63 = vpop.f32.mrb[32].mxu1  ;;  %v2242_v37 = vpop.f32.mrb[33].mxu0 }
 0x13d   : > { %v1544_v40 = vmax.f32 %v1462_v55, 0.0  ;;  %v2243_v11 = vadd.f32 %v2242_v37, %v2241_v30  ;;  %v2354_v23 = vpop.f32.mrb[33].mxu1  ;;  %v2244_v35 = vpop.f32.mrb[34].mxu0 }
 0x13e   : > { %v2355_v13 = vadd.f32 %v2354_v23, %v2353_v63  ;;  %v2356_v20 = vpop.f32.mrb[34].mxu1  ;;  %v2245_v26 = vpop.f32.mrb[35].mxu0 }
 0x13f   : > { %v2120_v49 = vpack.c.bf16 %v1544_v40, %v1543_v5  ;;  %v1306_v54 = vadd.f32 %v2243_v11, %v3308_v47  ;;  %v2246_v24 = vadd.f32 %v2245_v26, %v2244_v35  ;;  %v2357_v42 = vpop.f32.mrb[35].mxu1 }
 0x140   : > { %v2358_v51 = vadd.f32 %v2357_v42, %v2356_v20 }
 0x141   : > { %2168 = vst [vmem:[%s3316_s20 + $0x38] sm:$0xff] %v2120_v49   ;;  %v1467_v60 = vadd.f32 %v2355_v13, %v1306_v54  ;;  %v1309_v15 = vadd.f32 %v2246_v24, %v3308_v47 }
 0x143   : > { %v1470_v14 = vadd.f32 %v2358_v51, %v1309_v15  ;;  %v2247_v57 = vpop.f32.mrb[36].mxu0  ;;  %v1545_v36 = vmax.f32 %v1467_v60, 0.0 }
 0x144   : > { %v2359_v2 = vpop.f32.mrb[36].mxu1  ;;  %v2248_v3 = vpop.f32.mrb[37].mxu0 }
 0x145   : > { %v1546_v19 = vmax.f32 %v1470_v14, 0.0  ;;  %v2249_v16 = vadd.f32 %v2248_v3, %v2247_v57  ;;  %v2360_v59 = vpop.f32.mrb[37].mxu1  ;;  %v2250_v9 = vpop.f32.mrb[38].mxu0 }
 0x146   : > { %v2361_v43 = vadd.f32 %v2360_v59, %v2359_v2  ;;  %v2362_v17 = vpop.f32.mrb[38].mxu1  ;;  %v2251_v32 = vpop.f32.mrb[39].mxu0 }
 0x147   : > { %v2125_v46 = vpack.c.bf16 %v1546_v19, %v1545_v36  ;;  %v1314_v1 = vadd.f32 %v2249_v16, %v3308_v47  ;;  %v2252_v27 = vadd.f32 %v2251_v32, %v2250_v9  ;;  %v2363_v28 = vpop.f32.mrb[39].mxu1 }
 0x148   : > { %v2364_v12 = vadd.f32 %v2363_v28, %v2362_v17 }
 0x149   : > { %2169 = vst [vmem:[%s3316_s20 + $0x40] sm:$0xff] %v2125_v46   ;;  %v1475_v25 = vadd.f32 %v2361_v43, %v1314_v1  ;;  %v1317_v41 = vadd.f32 %v2252_v27, %v3308_v47 }
 0x14b   : > { %v1478_v34 = vadd.f32 %v2364_v12, %v1317_v41  ;;  %v2253_v62 = vpop.f32.mrb[40].mxu0  ;;  %v1547_v31 = vmax.f32 %v1475_v25, 0.0 }
 0x14c   : > { %v2365_v44 = vpop.f32.mrb[40].mxu1  ;;  %v2254_v7 = vpop.f32.mrb[41].mxu0 }
 0x14d   : > { %v1548_v45 = vmax.f32 %v1478_v34, 0.0  ;;  %v2255_v52 = vadd.f32 %v2254_v7, %v2253_v62  ;;  %v2366_v10 = vpop.f32.mrb[41].mxu1  ;;  %v2256_v22 = vpop.f32.mrb[42].mxu0 }
 0x14e   : > { %v2367_v48 = vadd.f32 %v2366_v10, %v2365_v44  ;;  %v2368_v58 = vpop.f32.mrb[42].mxu1  ;;  %v2257_v61 = vpop.f32.mrb[43].mxu0 }
 0x14f   : > { %v2130_v8 = vpack.c.bf16 %v1548_v45, %v1547_v31  ;;  %v1322_v0 = vadd.f32 %v2255_v52, %v3308_v47  ;;  %v2258_v21 = vadd.f32 %v2257_v61, %v2256_v22  ;;  %v2369_v53 = vpop.f32.mrb[43].mxu1 }
 0x150   : > { %v2370_v56 = vadd.f32 %v2369_v53, %v2368_v58 }
 0x151   : > { %2170 = vst [vmem:[%s3316_s20 + $0x48] sm:$0xff] %v2130_v8   ;;  %v1483_v50 = vadd.f32 %v2367_v48, %v1322_v0  ;;  %v1325_v38 = vadd.f32 %v2258_v21, %v3308_v47 }
 0x153   : > { %v1486_v33 = vadd.f32 %v2370_v56, %v1325_v38  ;;  %v2259_v6 = vpop.f32.mrb[44].mxu0  ;;  %v1549_v39 = vmax.f32 %v1483_v50, 0.0 }
 0x154   : > { %v2371_v18 = vpop.f32.mrb[44].mxu1  ;;  %v2260_v4 = vpop.f32.mrb[45].mxu0 }
 0x155   : > { %v1550_v29 = vmax.f32 %v1486_v33, 0.0  ;;  %v2261_v55 = vadd.f32 %v2260_v4, %v2259_v6  ;;  %v2372_v30 = vpop.f32.mrb[45].mxu1  ;;  %v2262_v63 = vpop.f32.mrb[46].mxu0 }
 0x156   : > { %v2373_v37 = vadd.f32 %v2372_v30, %v2371_v18  ;;  %v2374_v5 = vpop.f32.mrb[46].mxu1  ;;  %v2263_v40 = vpop.f32.mrb[47].mxu0 }
 0x157   : > { %v2135_v11 = vpack.c.bf16 %v1550_v29, %v1549_v39  ;;  %v1330_v23 = vadd.f32 %v2261_v55, %v3308_v47  ;;  %v2264_v35 = vadd.f32 %v2263_v40, %v2262_v63  ;;  %v2375_v13 = vpop.f32.mrb[47].mxu1 }
 0x158   : > { %v2376_v20 = vadd.f32 %v2375_v13, %v2374_v5 }
 0x159   : > { %2171 = vst [vmem:[%s3316_s20 + $0x50] sm:$0xff] %v2135_v11   ;;  %v1491_v26 = vadd.f32 %v2373_v37, %v1330_v23  ;;  %v1333_v49 = vadd.f32 %v2264_v35, %v3308_v47 }
 0x15b   : > { %v1494_v54 = vadd.f32 %v2376_v20, %v1333_v49  ;;  %v2265_v24 = vpop.f32.mrb[48].mxu0  ;;  %v1551_v60 = vmax.f32 %v1491_v26, 0.0 }
 0x15c   : > { %v2377_v42 = vpop.f32.mrb[48].mxu1  ;;  %v2266_v51 = vpop.f32.mrb[49].mxu0 }
 0x15d   : > { %v1552_v15 = vmax.f32 %v1494_v54, 0.0  ;;  %v2267_v14 = vadd.f32 %v2266_v51, %v2265_v24  ;;  %v2378_v57 = vpop.f32.mrb[49].mxu1  ;;  %v2268_v2 = vpop.f32.mrb[50].mxu0 }
 0x15e   : > { %v2379_v3 = vadd.f32 %v2378_v57, %v2377_v42  ;;  %v2380_v36 = vpop.f32.mrb[50].mxu1  ;;  %v2269_v19 = vpop.f32.mrb[51].mxu0 }
 0x15f   : > { %v2140_v16 = vpack.c.bf16 %v1552_v15, %v1551_v60  ;;  %v1338_v59 = vadd.f32 %v2267_v14, %v3308_v47  ;;  %v2270_v9 = vadd.f32 %v2269_v19, %v2268_v2  ;;  %v2381_v43 = vpop.f32.mrb[51].mxu1 }
 0x160   : > { %v2382_v17 = vadd.f32 %v2381_v43, %v2380_v36 }
 0x161   : > { %2172 = vst [vmem:[%s3316_s20 + $0x58] sm:$0xff] %v2140_v16   ;;  %v1499_v32 = vadd.f32 %v2379_v3, %v1338_v59  ;;  %v1341_v46 = vadd.f32 %v2270_v9, %v3308_v47 }
 0x163   : > { %v1502_v1 = vadd.f32 %v2382_v17, %v1341_v46  ;;  %v2271_v27 = vpop.f32.mrb[52].mxu0  ;;  %v1553_v25 = vmax.f32 %v1499_v32, 0.0 }
 0x164   : > { %v2383_v28 = vpop.f32.mrb[52].mxu1  ;;  %v2272_v12 = vpop.f32.mrb[53].mxu0 }
 0x165   : > { %v1554_v41 = vmax.f32 %v1502_v1, 0.0  ;;  %v2273_v34 = vadd.f32 %v2272_v12, %v2271_v27  ;;  %v2384_v62 = vpop.f32.mrb[53].mxu1  ;;  %v2274_v44 = vpop.f32.mrb[54].mxu0 }
 0x166   : > { %v2385_v7 = vadd.f32 %v2384_v62, %v2383_v28  ;;  %v2386_v31 = vpop.f32.mrb[54].mxu1  ;;  %v2275_v45 = vpop.f32.mrb[55].mxu0 }
 0x167   : > { %v2145_v52 = vpack.c.bf16 %v1554_v41, %v1553_v25  ;;  %v1346_v10 = vadd.f32 %v2273_v34, %v3308_v47  ;;  %v2276_v22 = vadd.f32 %v2275_v45, %v2274_v44  ;;  %v2387_v48 = vpop.f32.mrb[55].mxu1 }
 0x168   : > { %v2388_v58 = vadd.f32 %v2387_v48, %v2386_v31 }
 0x169   : > { %2173 = vst [vmem:[%s3316_s20 + $0x60] sm:$0xff] %v2145_v52   ;;  %v1507_v61 = vadd.f32 %v2385_v7, %v1346_v10  ;;  %v1349_v8 = vadd.f32 %v2276_v22, %v3308_v47 }
 0x16b   : > { %v1510_v0 = vadd.f32 %v2388_v58, %v1349_v8  ;;  %v2277_v21 = vpop.f32.mrb[56].mxu0  ;;  %v1555_v50 = vmax.f32 %v1507_v61, 0.0 }
 0x16c   : > { %v2389_v53 = vpop.f32.mrb[56].mxu1  ;;  %v2278_v56 = vpop.f32.mrb[57].mxu0 }
 0x16d   : > { %v1556_v38 = vmax.f32 %v1510_v0, 0.0  ;;  %v2279_v33 = vadd.f32 %v2278_v56, %v2277_v21  ;;  %v2390_v6 = vpop.f32.mrb[57].mxu1  ;;  %v2280_v18 = vpop.f32.mrb[58].mxu0 }
 0x16e   : > { %v2391_v4 = vadd.f32 %v2390_v6, %v2389_v53  ;;  %v2392_v39 = vpop.f32.mrb[58].mxu1  ;;  %v2281_v29 = vpop.f32.mrb[59].mxu0 }
 0x16f   : > { %v2150_v55 = vpack.c.bf16 %v1556_v38, %v1555_v50  ;;  %v1354_v30 = vadd.f32 %v2279_v33, %v3308_v47  ;;  %v2282_v63 = vadd.f32 %v2281_v29, %v2280_v18  ;;  %v2393_v37 = vpop.f32.mrb[59].mxu1 }
 0x170   : > { %v2394_v5 = vadd.f32 %v2393_v37, %v2392_v39 }
 0x171   : > { %2174 = vst [vmem:[%s3316_s20 + $0x68] sm:$0xff] %v2150_v55   ;;  %v1515_v40 = vadd.f32 %v2391_v4, %v1354_v30  ;;  %v1357_v11 = vadd.f32 %v2282_v63, %v3308_v47 }
 0x173   : > { %v1518_v23 = vadd.f32 %v2394_v5, %v1357_v11  ;;  %v2283_v35 = vpop.f32.mrb[60].mxu0  ;;  %v1557_v26 = vmax.f32 %v1515_v40, 0.0 }
 0x174   : > { %v2395_v13 = vpop.f32.mrb[60].mxu1  ;;  %v2284_v20 = vpop.f32.mrb[61].mxu0 }
 0x175   : > { %v1558_v49 = vmax.f32 %v1518_v23, 0.0  ;;  %v2285_v54 = vadd.f32 %v2284_v20, %v2283_v35  ;;  %v2396_v24 = vpop.f32.mrb[61].mxu1  ;;  %v2286_v42 = vpop.f32.mrb[62].mxu0 }
 0x176   : > { %v2397_v51 = vadd.f32 %v2396_v24, %v2395_v13  ;;  %v2398_v60 = vpop.f32.mrb[62].mxu1  ;;  %v2287_v15 = vpop.f32.mrb[63].mxu0 }
 0x177   : > { %v2155_v14 = vpack.c.bf16 %v1558_v49, %v1557_v26  ;;  %v1362_v57 = vadd.f32 %v2285_v54, %v3308_v47  ;;  %v2288_v2 = vadd.f32 %v2287_v15, %v2286_v42  ;;  %v2399_v3 = vpop.f32.mrb[63].mxu1 }
 0x178   : > { %v2400_v36 = vadd.f32 %v2399_v3, %v2398_v60 }
 0x179   : > { %2175 = vst [vmem:[%s3316_s20 + $0x70] sm:$0xff] %v2155_v14   ;;  %v1523_v19 = vadd.f32 %v2397_v51, %v1362_v57  ;;  %v1365_v16 = vadd.f32 %v2288_v2, %v3308_v47 }
 0x17b   : > { %v1526_v59 = vadd.f32 %v2400_v36, %v1365_v16  ;;  %v1559_v9 = vmax.f32 %v1523_v19, 0.0 }
 0x17d   : > { %v1560_v43 = vmax.f32 %v1526_v59, 0.0 }
 0x17f   : > { %v2160_v17 = vpack.c.bf16 %v1560_v43, %v1559_v9 }
 0x181   : > { %2176 = vst [vmem:[%s3316_s20 + $0x78] sm:$0xff] %v2160_v17  }
 0x182 PF: > { %s13_s14 = sadd.s32 1, %s2512_s14   ;;  %s3395_s12 = smov %s2508_s13 }
 0x183   : > { %p10_p5 = scmp.ge.s32.totalorder %s13_s14, 4   ;;  %s3396_s13 = smov %s3398_s15 }
 0x185   :  { %12 = sbr.rel (!%p10_p5) target bundleno = 2 (0x2), region = 64 }

// kernel: decblock_forward.9
= control target key start
LH: loop header
LB: loop body
LE: loop exit
PB: predicated region body
PF: predicated region fallthrough
CT: control target
= control target key end

     0   :  { %v3016_v0 = vmov 0   ;;  %s4211_s5 = inlined_call_operand.vmem [shape: bf16[384,128], index: 5, kind: input, shape index: {}]   ;;  %s4212_s3 = inlined_call_operand.vmem [shape: bf16[512,128], index: 3, kind: input, shape index: {}]   ;;  %s4213_s2 = inlined_call_operand.vmem [shape: bf16[512,128], index: 2, kind: input, shape index: {}]   ;;  %s4214_s1 = inlined_call_operand.vmem [shape: bf16[512,128], index: 1, kind: input, shape index: {}]   ;;  %s4215_s4 = inlined_call_operand.vmem [shape: bf16[128,128], index: 4, kind: input, shape index: {}]   ;;  %s4216_s0 = inlined_call_operand.vmem [shape: bf16[512,128], index: 0, kind: input, shape index: {}]   ;;  %s4217_s7 = inlined_call_operand.vmem [shape: f32[1,128], index: 7, kind: input, shape index: {}]   ;;  %s4218_s6 = inlined_call_operand.vmem [shape: f32[1,128], index: 6, kind: input, shape index: {}]   ;;  %s4219_s8 = inlined_call_operand.vmem [shape: f32[512,128], index: 8, kind: output, shape index: {}]  }
   0x1   :  { %1077 = vmatprep.subr.bf16.mxu0 %v3016_v0  ;;  %v2854_v1 = vld [vmem:[%s4211_s5] sm:$0xff]   ;;  %v2856_v3 = vld [vmem:[%s4211_s5 + $0x8] sm:$0xff]   ;;  %v2859_v5 = vld [vmem:[%s4211_s5 + $0x90] sm:$0xff]  }
   0x2   :  { %v2855_v2 = vld [vmem:[%s4211_s5 + $0x80] sm:$0xff]   ;;  %1078 = vmatpush1.bf16.msra.mxu0 %v2854_v1  ;;  %v2857_v4 = vld [vmem:[%s4211_s5 + $0x88] sm:$0xff]   ;;  %v2858_v6 = vld [vmem:[%s4211_s5 + $0x10] sm:$0xff]  }
   0x3   :  { %2693 = vmatprep.subr.bf16.mxu1 %v2855_v2  ;;  %1079 = vmatprep.subr.bf16.mxu0 %v3016_v0  ;;  %v2861_v7 = vld [vmem:[%s4211_s5 + $0x98] sm:$0xff]   ;;  %v2863_v9 = vld [vmem:[%s4211_s5 + $0xa0] sm:$0xff]   ;;  %v2865_v12 = vld [vmem:[%s4211_s5 + $0xa8] sm:$0xff]  }
   0x4   :  { %2694 = vmatpush3.bf16.msra.mxu1 %v2855_v2  ;;  %v2860_v8 = vld [vmem:[%s4211_s5 + $0x18] sm:$0xff]   ;;  %v2862_v10 = vld [vmem:[%s4211_s5 + $0x20] sm:$0xff]   ;;  %v2864_v13 = vld [vmem:[%s4211_s5 + $0x28] sm:$0xff]  }
   0x5   :  { %2695 = vmatprep.subr.bf16.mxu1 %v2857_v4  ;;  %v2870_v11 = vld [vmem:[%s4212_s3] sm:$0xff]   ;;  %v2867_v14 = vld [vmem:[%s4211_s5 + $0xb0] sm:$0xff]   ;;  %v2869_v16 = vld [vmem:[%s4211_s5 + $0xb8] sm:$0xff]  }
   0x6   :  { %1080 = vmatpush1.bf16.msra.mxu0 %v2856_v3  ;;  %2709 = vmatprep.mubr.bf16.mxu1 %v2870_v11  ;;  %v2866_v15 = vld [vmem:[%s4211_s5 + $0x30] sm:$0xff]   ;;  %v2868_v17 = vld [vmem:[%s4211_s5 + $0x38] sm:$0xff]   ;;  %v2871_v18 = vld [vmem:[%s4211_s5 + $0x40] sm:$0xff]  }
   0x7   :  { %1081 = vmatprep.subr.bf16.mxu0 %v3016_v0  ;;  %v2872_v19 = vld [vmem:[%s4212_s3 + $0x8] sm:$0xff]   ;;  %v2874_v20 = vld [vmem:[%s4212_s3 + $0x10] sm:$0xff]   ;;  %v2886_v21 = vld [vmem:[%s4213_s2] sm:$0xff]  }
   0x8   :  { %2696 = vmatpush3.bf16.msra.mxu1 %v2857_v4  ;;  %v2873_v22 = vld [vmem:[%s4211_s5 + $0x48] sm:$0xff]   ;;  %1109 = vmatprep.mubr.bf16.mxu0 %v2886_v21  ;;  %v2889_v23 = vld [vmem:[%s4215_s4] sm:$0xff]   ;;  %v2875_v24 = vld [vmem:[%s4211_s5 + $0x50] sm:$0xff]  }
   0x9   :  { %2697 = vmatprep.subr.bf16.mxu1 %v2859_v5  ;;  %v2876_v25 = vld [vmem:[%s4212_s3 + $0x18] sm:$0xff]   ;;  %v2878_v26 = vld [vmem:[%s4212_s3 + $0x20] sm:$0xff]   ;;  %v2898_v28 = vld [vmem:[%s4215_s4 + $0x8] sm:$0xff]  }
   0xa   :  { %1082 = vmatpush1.bf16.msra.mxu0 %v2858_v6  ;;  %v2877_v27 = vld [vmem:[%s4211_s5 + $0x58] sm:$0xff]   ;;  %v2879_v29 = vld [vmem:[%s4211_s5 + $0x60] sm:$0xff]   ;;  %v2880_v30 = vld [vmem:[%s4212_s3 + $0x28] sm:$0xff]  }
   0xb   :  { %1083 = vmatprep.subr.bf16.mxu0 %v3016_v0  ;;  %v2882_v31 = vld [vmem:[%s4212_s3 + $0x30] sm:$0xff]   ;;  %v2881_v32 = vld [vmem:[%s4211_s5 + $0x68] sm:$0xff]   ;;  %v2884_v35 = vld [vmem:[%s4212_s3 + $0x38] sm:$0xff]  }
   0xc   :  { %2698 = vmatpush3.bf16.msra.mxu1 %v2859_v5  ;;  %v2907_v33 = vld [vmem:[%s4215_s4 + $0x10] sm:$0xff]   ;;  %v2888_v36 = vld [vmem:[%s4212_s3 + $0x40] sm:$0xff]   ;;  %v2885_v37 = vld [vmem:[%s4211_s5 + $0x78] sm:$0xff]  }
   0xd   :  { %2699 = vmatprep.subr.bf16.mxu1 %v2861_v7  ;;  %v2883_v34 = vld [vmem:[%s4211_s5 + $0x70] sm:$0xff]   ;;  %v2887_v38 = vld [vmem:[%s4214_s1] sm:$0xff]   ;;  %v2891_v39 = vld [vmem:[%s4213_s2 + $0x8] sm:$0xff]  }
   0xe   :  { %1084 = vmatpush1.bf16.msra.mxu0 %v2860_v8  ;;  %v2916_v40 = vld [vmem:[%s4215_s4 + $0x18] sm:$0xff]   ;;  %v2890_v41 = vld [vmem:[%s4212_s3 + $0x48] sm:$0xff]   ;;  %v2893_v42 = vld [vmem:[%s4212_s3 + $0x50] sm:$0xff]  }
   0xf   :  { %1085 = vmatprep.subr.bf16.mxu0 %v3016_v0  ;;  %v2892_v43 = vld [vmem:[%s4214_s1 + $0x8] sm:$0xff]   ;;  %v2894_v44 = vld [vmem:[%s4212_s3 + $0x58] sm:$0xff]   ;;  %v2895_v45 = vld [vmem:[%s4213_s2 + $0x10] sm:$0xff]  }
  0x10   :  { %2700 = vmatpush3.bf16.msra.mxu1 %v2861_v7  ;;  %v2925_v46 = vld [vmem:[%s4215_s4 + $0x20] sm:$0xff]   ;;  %v2896_v48 = vld [vmem:[%s4214_s1 + $0x10] sm:$0xff]   ;;  %v2899_v49 = vld [vmem:[%s4212_s3 + $0x68] sm:$0xff]  }
  0x11   :  { %2701 = vmatprep.subr.bf16.mxu1 %v2863_v9  ;;  %v2897_v47 = vld [vmem:[%s4212_s3 + $0x60] sm:$0xff]   ;;  %v2900_v50 = vld [vmem:[%s4213_s2 + $0x18] sm:$0xff]   ;;  %v2902_v51 = vld [vmem:[%s4212_s3 + $0x70] sm:$0xff]  }
  0x12   :  { %1086 = vmatpush1.bf16.msra.mxu0 %v2862_v10  ;;  %v2934_v52 = vld [vmem:[%s4215_s4 + $0x28] sm:$0xff]   ;;  %v2901_v53 = vld [vmem:[%s4214_s1 + $0x18] sm:$0xff]   ;;  %v2904_v55 = vld [vmem:[%s4213_s2 + $0x20] sm:$0xff]  }
  0x13   :  { %1087 = vmatprep.subr.bf16.mxu0 %v3016_v0  ;;  %v2903_v54 = vld [vmem:[%s4212_s3 + $0x78] sm:$0xff]   ;;  %v2940_v56 = vld [vmem:[%s4215_s4 + $0x30] sm:$0xff]   ;;  %v2906_v58 = vld [vmem:[%s4212_s3 + $0x80] sm:$0xff]  }
  0x14   :  { %2702 = vmatpush3.bf16.msra.mxu1 %v2863_v9  ;;  %v2941_v57 = vld [vmem:[%s4215_s4 + $0x38] sm:$0xff]   ;;  %v2905_v59 = vld [vmem:[%s4214_s1 + $0x20] sm:$0xff]   ;;  %v2909_v60 = vld [vmem:[%s4213_s2 + $0x28] sm:$0xff]  }
  0x15   :  { %2703 = vmatprep.subr.bf16.mxu1 %v2865_v12  ;;  %v2908_v61 = vld [vmem:[%s4212_s3 + $0x88] sm:$0xff]   ;;  %v2911_v62 = vld [vmem:[%s4212_s3 + $0x90] sm:$0xff]   ;;  %v2912_v1 = vld [vmem:[%s4212_s3 + $0x98] sm:$0xff]  }
  0x16   :  { %1088 = vmatpush1.bf16.msra.mxu0 %v2864_v13  ;;  %v2910_v63 = vld [vmem:[%s4214_s1 + $0x28] sm:$0xff]   ;;  %v2915_v2 = vld [vmem:[%s4212_s3 + $0xa0] sm:$0xff]   ;;  %v2914_v3 = vld [vmem:[%s4214_s1 + $0x30] sm:$0xff]  }
  0x17   :  { %1089 = vmatprep.subr.bf16.mxu0 %v3016_v0  ;;  %v2918_v4 = vld [vmem:[%s4213_s2 + $0x38] sm:$0xff]   ;;  %v2917_v5 = vld [vmem:[%s4212_s3 + $0xa8] sm:$0xff]   ;;  %v2920_v6 = vld [vmem:[%s4212_s3 + $0xb0] sm:$0xff]  }
  0x18   :  { %2704 = vmatpush3.bf16.msra.mxu1 %v2865_v12  ;;  %v2919_v7 = vld [vmem:[%s4214_s1 + $0x38] sm:$0xff]   ;;  %v2922_v8 = vld [vmem:[%s4213_s2 + $0x40] sm:$0xff]   ;;  %v2927_v12 = vld [vmem:[%s4213_s2 + $0x48] sm:$0xff]  }
  0x19   :  { %2705 = vmatprep.subr.bf16.mxu1 %v2867_v14  ;;  %v2921_v9 = vld [vmem:[%s4212_s3 + $0xb8] sm:$0xff]   ;;  %v2924_v10 = vld [vmem:[%s4212_s3 + $0xc0] sm:$0xff]   ;;  %v2926_v13 = vld [vmem:[%s4212_s3 + $0xc8] sm:$0xff]  }
  0x1a   :  { %1090 = vmatpush1.bf16.msra.mxu0 %v2866_v15  ;;  %v2923_v11 = vld [vmem:[%s4214_s1 + $0x40] sm:$0xff]   ;;  %v2928_v15 = vld [vmem:[%s4214_s1 + $0x48] sm:$0xff]  }
  0x1b   :  { %1091 = vmatprep.subr.bf16.mxu0 %v3016_v0  ;;  %v2935_v21 = vld [vmem:[%s4212_s3 + $0xe8] sm:$0xff]  }
  0x1c   :  { %2706 = vmatpush3.bf16.msra.mxu1 %v2867_v14  ;;  %v2929_v14 = vld [vmem:[%s4212_s3 + $0xd0] sm:$0xff]  }
  0x1d   :  { %2707 = vmatprep.subr.bf16.mxu1 %v2869_v16 }
  0x1e   :  { %1092 = vmatpush1.bf16.msra.mxu0 %v2868_v17  ;;  %v2930_v17 = vld [vmem:[%s4212_s3 + $0xd8] sm:$0xff]  }
  0x1f   :  { %1093 = vmatprep.subr.bf16.mxu0 %v3016_v0 }
  0x20   :  { %2708 = vmatpush3.bf16.msra.mxu1 %v2869_v16  ;;  %v2931_v16 = vld [vmem:[%s4213_s2 + $0x50] sm:$0xff]  }
  0x21   :  { %2773 = vmatprep.subr.bf16.mxu1 %v2889_v23 }
  0x22   :  { %1094 = vmatpush1.bf16.msra.mxu0 %v2871_v18  ;;  %v2933_v18 = vld [vmem:[%s4212_s3 + $0xe0] sm:$0xff]  }
  0x23   :  { %2710 = vmatmul.mubr.bf16.vlgmr.msra.gmra.mrb[0].mxu1 %v2872_v19  ;;  %1095 = vmatprep.subr.bf16.mxu0 %v3016_v0  ;;  %v2932_v19 = vld [vmem:[%s4214_s1 + $0x50] sm:$0xff]  }
  0x24   :  { %2713 = vmatprep.mubr.bf16.mxu1 %v2874_v20  ;;  %2774 = vmatpush3.bf16.msra.mxu1 %v2889_v23  ;;  %v2936_v20 = vld [vmem:[%s4213_s2 + $0x58] sm:$0xff]  }
  0x25   :  { %2775 = vmatprep.subr.bf16.mxu1 %v2898_v28  ;;  %v2937_v23 = vld [vmem:[%s4214_s1 + $0x58] sm:$0xff]  }
  0x26   :  { %1096 = vmatpush1.bf16.msra.mxu0 %v2873_v22  ;;  %v2938_v22 = vld [vmem:[%s4212_s3 + $0xf0] sm:$0xff]  }
  0x27   :  { %1097 = vmatprep.subr.bf16.mxu0 %v3016_v0 }
  0x28   :  { %2776 = vmatpush3.bf16.msra.mxu1 %v2898_v28  ;;  %v2946_v28 = vld [vmem:[%s4213_s2 + $0x68] sm:$0xff]  }
  0x29   :  { %2777 = vmatprep.subr.bf16.mxu1 %v2907_v33 }
  0x2a   :  { %1098 = vmatpush1.bf16.msra.mxu0 %v2875_v24  ;;  %v2942_v24 = vld [vmem:[%s4213_s2 + $0x60] sm:$0xff]  }
  0x2b   :  { %2714 = vmatmul.mubr.bf16.gmra.mrb[4].mxu1 %v2876_v25  ;;  %1099 = vmatprep.subr.bf16.mxu0 %v3016_v0  ;;  %v2939_v25 = vld [vmem:[%s4212_s3 + $0xf8] sm:$0xff]  }
  0x2c   :  { %2717 = vmatprep.mubr.bf16.mxu1 %v2878_v26  ;;  %2778 = vmatpush3.bf16.msra.mxu1 %v2907_v33  ;;  %v2944_v26 = vld [vmem:[%s4216_s0] sm:$0xff]   ;;  %v2949_v33 = vld [vmem:[%s4216_s0 + $0x18] sm:$0xff]  }
  0x2d   :  { %2779 = vmatprep.subr.bf16.mxu1 %v2916_v40 }
  0x2e   :  { %1100 = vmatpush1.bf16.msra.mxu0 %v2877_v27  ;;  %v2943_v27 = vld [vmem:[%s4214_s1 + $0x60] sm:$0xff]  }
  0x2f   :  { %1101 = vmatprep.subr.bf16.mxu0 %v3016_v0 }
  0x30   :  { %2780 = vmatpush3.bf16.msra.mxu1 %v2916_v40  ;;  %v2958_v40 = vld [vmem:[%s4213_s2 + $0x80] sm:$0xff]  }
  0x31   :  { %2781 = vmatprep.subr.bf16.mxu1 %v2925_v46 }
  0x32   :  { %1102 = vmatpush1.bf16.msra.mxu0 %v2879_v29  ;;  %v2945_v29 = vld [vmem:[%s4216_s0 + $0x8] sm:$0xff]  }
  0x33   :  { %2718 = vmatmul.mubr.bf16.gmra.mrb[8].mxu1 %v2880_v30  ;;  %1103 = vmatprep.subr.bf16.mxu0 %v3016_v0  ;;  %v2948_v30 = vld [vmem:[%s4216_s0 + $0x10] sm:$0xff]  }
  0x34   :  { %2721 = vmatprep.mubr.bf16.mxu1 %v2882_v31  ;;  %2782 = vmatpush3.bf16.msra.mxu1 %v2925_v46  ;;  %v2947_v31 = vld [vmem:[%s4214_s1 + $0x68] sm:$0xff]   ;;  %v2964_v46 = vld [vmem:[%s4216_s0 + $0x50] sm:$0xff]  }
  0x35   :  { %2783 = vmatprep.subr.bf16.mxu1 %v2934_v52 }
  0x36   :  { %1104 = vmatpush1.bf16.msra.mxu0 %v2881_v32  ;;  %v2950_v32 = vld [vmem:[%s4213_s2 + $0x70] sm:$0xff]  }
  0x37   :  { %1105 = vmatprep.subr.bf16.mxu0 %v3016_v0 }
  0x38   :  { %2784 = vmatpush3.bf16.msra.mxu1 %v2934_v52  ;;  %v2970_v52 = vld [vmem:[%s4213_s2 + $0x98] sm:$0xff]  }
  0x39   :  { %2785 = vmatprep.subr.bf16.mxu1 %v2940_v56 }
  0x3a   :  { %1106 = vmatpush1.bf16.msra.mxu0 %v2883_v34  ;;  %v2952_v34 = vld [vmem:[%s4216_s0 + $0x20] sm:$0xff]  }
  0x3b   :  { %2722 = vmatmul.mubr.bf16.gmra.mrb[12].mxu1 %v2884_v35  ;;  %1107 = vmatprep.subr.bf16.mxu0 %v3016_v0  ;;  %v2913_v0 = vld [vmem:[%s4213_s2 + $0x30] sm:$0xff]  }
  0x3c   :  { %2725 = vmatprep.mubr.bf16.mxu1 %v2888_v36  ;;  %2786 = vmatpush3.bf16.msra.mxu1 %v2940_v56  ;;  %v2951_v35 = vld [vmem:[%s4214_s1 + $0x70] sm:$0xff]   ;;  %v2954_v36 = vld [vmem:[%s4213_s2 + $0x78] sm:$0xff]   ;;  %v2974_v56 = vld [vmem:[%s4213_s2 + $0xa0] sm:$0xff]  }
  0x3d   :  { %2787 = vmatprep.subr.bf16.mxu1 %v2941_v57 }
  0x3e   :  { %1108 = vmatpush1.bf16.msra.mxu0 %v2885_v37  ;;  %v2953_v37 = vld [vmem:[%s4216_s0 + $0x28] sm:$0xff]  }
  0x40   :  { %2788 = vmatpush3.bf16.msra.mxu1 %v2941_v57  ;;  %v2973_v57 = vld [vmem:[%s4216_s0 + $0x78] sm:$0xff]  }
  0x41   :  { %1110 = vmatmul.mubr.bf16.vlgmr.msra.gmra.mrb[0].mxu0 %v2887_v38  ;;  %v2956_v38 = vld [vmem:[%s4216_s0 + $0x30] sm:$0xff]  }
  0x42   :  { %1117 = vmatprep.mubr.bf16.mxu0 %v2891_v39  ;;  %v2955_v39 = vld [vmem:[%s4214_s1 + $0x78] sm:$0xff]  }
  0x43   :  { %2726 = vmatmul.mubr.bf16.gmra.mrb[16].mxu1 %v2890_v41  ;;  %v2957_v41 = vld [vmem:[%s4216_s0 + $0x38] sm:$0xff]  }
  0x44   :  { %2729 = vmatprep.mubr.bf16.mxu1 %v2893_v42  ;;  %v2960_v42 = vld [vmem:[%s4216_s0 + $0x40] sm:$0xff]  }
  0x49   :  { %1118 = vmatmul.mubr.bf16.gmra.mrb[4].mxu0 %v2892_v43  ;;  %v2959_v43 = vld [vmem:[%s4214_s1 + $0x80] sm:$0xff]  }
  0x4a   :  { %1125 = vmatprep.mubr.bf16.mxu0 %v2895_v45  ;;  %v2961_v45 = vld [vmem:[%s4216_s0 + $0x48] sm:$0xff]  }
  0x4b   :  { %2730 = vmatmul.mubr.bf16.gmra.mrb[20].mxu1 %v2894_v44  ;;  %v2962_v44 = vld [vmem:[%s4213_s2 + $0x88] sm:$0xff]  }
  0x4c   :  { %2733 = vmatprep.mubr.bf16.mxu1 %v2897_v47  ;;  %v2963_v47 = vld [vmem:[%s4214_s1 + $0x88] sm:$0xff]  }
  0x51   :  { %1126 = vmatmul.mubr.bf16.gmra.mrb[8].mxu0 %v2896_v48  ;;  %v2966_v48 = vld [vmem:[%s4213_s2 + $0x90] sm:$0xff]  }
  0x52   :  { %1133 = vmatprep.mubr.bf16.mxu0 %v2900_v50  ;;  %v2968_v50 = vld [vmem:[%s4216_s0 + $0x60] sm:$0xff]  }
  0x53   :  { %2734 = vmatmul.mubr.bf16.gmra.mrb[24].mxu1 %v2899_v49  ;;  %v2965_v49 = vld [vmem:[%s4216_s0 + $0x58] sm:$0xff]  }
  0x54   :  { %2737 = vmatprep.mubr.bf16.mxu1 %v2902_v51  ;;  %v2967_v51 = vld [vmem:[%s4214_s1 + $0x90] sm:$0xff]  }
  0x59   :  { %1134 = vmatmul.mubr.bf16.gmra.mrb[12].mxu0 %v2901_v53  ;;  %v2969_v53 = vld [vmem:[%s4216_s0 + $0x68] sm:$0xff]  }
  0x5a   :  { %1141 = vmatprep.mubr.bf16.mxu0 %v2904_v55  ;;  %v2971_v55 = vld [vmem:[%s4214_s1 + $0x98] sm:$0xff]  }
  0x5b   :  { %2738 = vmatmul.mubr.bf16.gmra.mrb[28].mxu1 %v2903_v54  ;;  %v2972_v54 = vld [vmem:[%s4216_s0 + $0x70] sm:$0xff]  }
  0x5c   :  { %2741 = vmatprep.mubr.bf16.mxu1 %v2906_v58  ;;  %v2976_v58 = vld [vmem:[%s4216_s0 + $0x80] sm:$0xff]  }
  0x61   :  { %1142 = vmatmul.mubr.bf16.gmra.mrb[16].mxu0 %v2905_v59  ;;  %v2975_v59 = vld [vmem:[%s4214_s1 + $0xa0] sm:$0xff]  }
  0x62   :  { %1149 = vmatprep.mubr.bf16.mxu0 %v2909_v60  ;;  %v2978_v60 = vld [vmem:[%s4213_s2 + $0xa8] sm:$0xff]  }
  0x63   :  { %2742 = vmatmul.mubr.bf16.gmra.mrb[32].mxu1 %v2908_v61  ;;  %v2977_v61 = vld [vmem:[%s4216_s0 + $0x88] sm:$0xff]  }
  0x64   :  { %2745 = vmatprep.mubr.bf16.mxu1 %v2911_v62  ;;  %v2980_v62 = vld [vmem:[%s4216_s0 + $0x90] sm:$0xff]  }
  0x69   :  { %1150 = vmatmul.mubr.bf16.gmra.mrb[20].mxu0 %v2910_v63  ;;  %v2979_v63 = vld [vmem:[%s4214_s1 + $0xa8] sm:$0xff]  }
  0x6a   :  { %1157 = vmatprep.mubr.bf16.mxu0 %v2913_v0  ;;  %v2982_v0 = vld [vmem:[%s4213_s2 + $0xb0] sm:$0xff]  }
  0x6b   :  { %2746 = vmatmul.mubr.bf16.gmra.mrb[36].mxu1 %v2912_v1  ;;  %v2981_v1 = vld [vmem:[%s4216_s0 + $0x98] sm:$0xff]  }
  0x6c   :  { %2749 = vmatprep.mubr.bf16.mxu1 %v2915_v2  ;;  %v2984_v2 = vld [vmem:[%s4216_s0 + $0xa0] sm:$0xff]  }
  0x71   :  { %1158 = vmatmul.mubr.bf16.gmra.mrb[24].mxu0 %v2914_v3  ;;  %v2983_v3 = vld [vmem:[%s4214_s1 + $0xb0] sm:$0xff]  }
  0x72   :  { %1165 = vmatprep.mubr.bf16.mxu0 %v2918_v4  ;;  %v2986_v4 = vld [vmem:[%s4213_s2 + $0xb8] sm:$0xff]  }
  0x73   :  { %2750 = vmatmul.mubr.bf16.gmra.mrb[40].mxu1 %v2917_v5  ;;  %v2985_v5 = vld [vmem:[%s4216_s0 + $0xa8] sm:$0xff]  }
  0x74   :  { %2753 = vmatprep.mubr.bf16.mxu1 %v2920_v6  ;;  %v2988_v6 = vld [vmem:[%s4216_s0 + $0xb0] sm:$0xff]  }
  0x79   :  { %1166 = vmatmul.mubr.bf16.gmra.mrb[28].mxu0 %v2919_v7  ;;  %v2987_v7 = vld [vmem:[%s4214_s1 + $0xb8] sm:$0xff]  }
  0x7a   :  { %1173 = vmatprep.mubr.bf16.mxu0 %v2922_v8  ;;  %v2990_v8 = vld [vmem:[%s4213_s2 + $0xc0] sm:$0xff]  }
  0x7b   :  { %2754 = vmatmul.mubr.bf16.gmra.mrb[44].mxu1 %v2921_v9 }
  0x7c   :  { %2757 = vmatprep.mubr.bf16.mxu1 %v2924_v10  ;;  %v2989_v10 = vld [vmem:[%s4216_s0 + $0xb8] sm:$0xff]  }
  0x81   :  { %1174 = vmatmul.mubr.bf16.gmra.mrb[32].mxu0 %v2923_v11 }
  0x82   :  { %1181 = vmatprep.mubr.bf16.mxu0 %v2927_v12  ;;  %v2992_v12 = vld [vmem:[%s4216_s0 + $0xc0] sm:$0xff]  }
  0x83   :  { %2758 = vmatmul.mubr.bf16.gmra.mrb[48].mxu1 %v2926_v13 }
  0x84   :  { %2761 = vmatprep.mubr.bf16.mxu1 %v2929_v14 }
  0x89   :  { %1182 = vmatmul.mubr.bf16.gmra.mrb[36].mxu0 %v2928_v15  ;;  %v2991_v15 = vld [vmem:[%s4214_s1 + $0xc0] sm:$0xff]  }
  0x8a   :  { %1189 = vmatprep.mubr.bf16.mxu0 %v2931_v16  ;;  %v2994_v16 = vld [vmem:[%s4213_s2 + $0xc8] sm:$0xff]  }
  0x8b   :  { %2762 = vmatmul.mubr.bf16.gmra.mrb[52].mxu1 %v2930_v17 }
  0x8c   :  { %2765 = vmatprep.mubr.bf16.mxu1 %v2933_v18  ;;  %v2993_v18 = vld [vmem:[%s4216_s0 + $0xc8] sm:$0xff]  }
  0x91   :  { %1190 = vmatmul.mubr.bf16.gmra.mrb[40].mxu0 %v2932_v19 }
  0x92   :  { %1197 = vmatprep.mubr.bf16.mxu0 %v2936_v20  ;;  %v2998_v20 = vld [vmem:[%s4216_s0 + $0xd0] sm:$0xff]  }
  0x93   :  { %2766 = vmatmul.mubr.bf16.gmra.mrb[56].mxu1 %v2935_v21 }
  0x94   :  { %2769 = vmatprep.mubr.bf16.mxu1 %v2938_v22 }
  0x99   :  { %1198 = vmatmul.mubr.bf16.gmra.mrb[44].mxu0 %v2937_v23  ;;  %v2995_v23 = vld [vmem:[%s4214_s1 + $0xc8] sm:$0xff]  }
  0x9a   :  { %1205 = vmatprep.mubr.bf16.mxu0 %v2942_v24  ;;  %v2996_v24 = vld [vmem:[%s4213_s2 + $0xd0] sm:$0xff]  }
  0x9b   :  { %2770 = vmatmul.mubr.bf16.gmra.mrb[60].mxu1 %v2939_v25 }
  0x9c   :  { %2789 = vmatprep.mubr.bf16.mxu1 %v2944_v26  ;;  %v2999_v26 = vld [vmem:[%s4216_s0 + $0xd8] sm:$0xff]  }
  0xa1   :  { %1206 = vmatmul.mubr.bf16.gmra.mrb[48].mxu0 %v2943_v27 }
  0xa2   :  { %1213 = vmatprep.mubr.bf16.mxu0 %v2946_v28  ;;  %v3004_v28 = vld [vmem:[%s4216_s0 + $0xe0] sm:$0xff]  }
  0xa3   :  { %2790 = vmatmul.mubr.bf16.vlgmr.msra.gmra.mrb[64].mxu1 %v2945_v29 }
  0xa4   :  { %2793 = vmatprep.mubr.bf16.mxu1 %v2948_v30 }
  0xa9   :  { %1214 = vmatmul.mubr.bf16.gmra.mrb[52].mxu0 %v2947_v31  ;;  %v2997_v31 = vld [vmem:[%s4214_s1 + $0xd0] sm:$0xff]  }
  0xaa   :  { %1221 = vmatprep.mubr.bf16.mxu0 %v2950_v32  ;;  %v3000_v32 = vld [vmem:[%s4213_s2 + $0xd8] sm:$0xff]  }
  0xab   :  { %2794 = vmatmul.mubr.bf16.gmra.mrb[68].mxu1 %v2949_v33 }
  0xac   :  { %2797 = vmatprep.mubr.bf16.mxu1 %v2952_v34  ;;  %v3005_v34 = vld [vmem:[%s4216_s0 + $0xe8] sm:$0xff]  }
  0xb1   :  { %1222 = vmatmul.mubr.bf16.gmra.mrb[56].mxu0 %v2951_v35 }
  0xb2   :  { %1229 = vmatprep.mubr.bf16.mxu0 %v2954_v36 }
  0xb3   :  { %2798 = vmatmul.mubr.bf16.gmra.mrb[72].mxu1 %v2953_v37  ;;  %v3010_v37 = vld [vmem:[%s4216_s0 + $0xf0] sm:$0xff]  }
  0xb4   :  { %2801 = vmatprep.mubr.bf16.mxu1 %v2956_v38 }
  0xb9   :  { %1230 = vmatmul.mubr.bf16.gmra.mrb[60].mxu0 %v2955_v39  ;;  %v3559_v39 = vld [vmem:[%s4217_s7] ss:$0 sm:$0xff] }
  0xba   :  { %1237 = vmatprep.mubr.bf16.mxu0 %v2958_v40 }
  0xbb   :  { %2802 = vmatmul.mubr.bf16.gmra.mrb[76].mxu1 %v2957_v41 }
  0xbc   :  { %2805 = vmatprep.mubr.bf16.mxu1 %v2960_v42 }
  0xc1   :  { %1238 = vmatmul.mubr.bf16.gmra.mrb[64].mxu0 %v2959_v43  ;;  %v3001_v43 = vld [vmem:[%s4214_s1 + $0xd8] sm:$0xff]  }
  0xc2   :  { %1245 = vmatprep.mubr.bf16.mxu0 %v2962_v44 }
  0xc3   :  { %2806 = vmatmul.mubr.bf16.gmra.mrb[80].mxu1 %v2961_v45  ;;  %v3002_v45 = vld [vmem:[%s4213_s2 + $0xe0] sm:$0xff]  }
  0xc4   :  { %2809 = vmatprep.mubr.bf16.mxu1 %v2964_v46 }
  0xc9   :  { %1246 = vmatmul.mubr.bf16.gmra.mrb[68].mxu0 %v2963_v47 }
  0xca   :  { %1253 = vmatprep.mubr.bf16.mxu0 %v2966_v48 }
  0xcb   :  { %2810 = vmatmul.mubr.bf16.gmra.mrb[84].mxu1 %v2965_v49 }
  0xcc   :  { %2813 = vmatprep.mubr.bf16.mxu1 %v2968_v50  ;;  %v3011_v50 = vld [vmem:[%s4216_s0 + $0xf8] sm:$0xff]  }
  0xd1   :  { %1254 = vmatmul.mubr.bf16.gmra.mrb[72].mxu0 %v2967_v51 }
  0xd2   :  { %1261 = vmatprep.mubr.bf16.mxu0 %v2970_v52 }
  0xd3   :  { %2814 = vmatmul.mubr.bf16.gmra.mrb[88].mxu1 %v2969_v53 }
  0xd4   :  { %2817 = vmatprep.mubr.bf16.mxu1 %v2972_v54 }
  0xd9   :  { %1262 = vmatmul.mubr.bf16.gmra.mrb[76].mxu0 %v2971_v55 }
  0xda   :  { %1269 = vmatprep.mubr.bf16.mxu0 %v2974_v56 }
  0xdb   :  { %2818 = vmatmul.mubr.bf16.gmra.mrb[92].mxu1 %v2973_v57 }
  0xdc   :  { %2821 = vmatprep.mubr.bf16.mxu1 %v2976_v58  ;;  %v3003_v58 = vld [vmem:[%s4214_s1 + $0xe0] sm:$0xff]  }
  0xe1   :  { %1270 = vmatmul.mubr.bf16.gmra.mrb[80].mxu0 %v2975_v59 }
  0xe2   :  { %1277 = vmatprep.mubr.bf16.mxu0 %v2978_v60  ;;  %v3006_v60 = vld [vmem:[%s4213_s2 + $0xe8] sm:$0xff]  }
  0xe3   :  { %2822 = vmatmul.mubr.bf16.gmra.mrb[96].mxu1 %v2977_v61 }
  0xe4   :  { %2825 = vmatprep.mubr.bf16.mxu1 %v2980_v62 }
  0xe9   :  { %1278 = vmatmul.mubr.bf16.gmra.mrb[84].mxu0 %v2979_v63 }
  0xea   :  { %1285 = vmatprep.mubr.bf16.mxu0 %v2982_v0 }
  0xeb   :  { %2826 = vmatmul.mubr.bf16.gmra.mrb[100].mxu1 %v2981_v1 }
  0xec   :  { %2829 = vmatprep.mubr.bf16.mxu1 %v2984_v2 }
  0xf1   :  { %1286 = vmatmul.mubr.bf16.gmra.mrb[88].mxu0 %v2983_v3 }
  0xf2   :  { %1293 = vmatprep.mubr.bf16.mxu0 %v2986_v4 }
  0xf3   :  { %2830 = vmatmul.mubr.bf16.gmra.mrb[104].mxu1 %v2985_v5 }
  0xf4   :  { %2833 = vmatprep.mubr.bf16.mxu1 %v2988_v6 }
  0xf6   :  { %v3486_v9 = vpop.f32.mrb[0].mxu1 }
  0xf7   :  { %v1400_v11 = vpop.f32.mrb[1].mxu1 }
  0xf8   :  { %v3494_v13 = vpop.f32.mrb[2].mxu1 }
  0xf9   :  { %1294 = vmatmul.mubr.bf16.gmra.mrb[92].mxu0 %v2987_v7  ;;  %v1403_v14 = vpop.f32.mrb[3].mxu1 }
  0xfa   :  { %1301 = vmatprep.mubr.bf16.mxu0 %v2990_v8  ;;  %v3007_v8 = vld [vmem:[%s4214_s1 + $0xe8] sm:$0xff]  }
  0xfb   :  { %2834 = vmatmul.mubr.bf16.gmra.mrb[108].mxu1 %v2989_v10  ;;  %v3008_v10 = vld [vmem:[%s4213_s2 + $0xf0] sm:$0xff]  }
  0xfc   :  { %2837 = vmatprep.mubr.bf16.mxu1 %v2992_v12 }
  0xfe   :  { %v3502_v17 = vpop.f32.mrb[4].mxu1 }
  0xff   :  { %v3507_v19 = vpop.f32.mrb[5].mxu1 }
 0x100   :  { %v3512_v21 = vpop.f32.mrb[6].mxu1 }
 0x101   :  { %1302 = vmatmul.mubr.bf16.gmra.mrb[96].mxu0 %v2991_v15  ;;  %v3514_v22 = vpop.f32.mrb[7].mxu1 }
 0x102   :  { %1309 = vmatprep.mubr.bf16.mxu0 %v2994_v16 }
 0x103   :  { %2838 = vmatmul.mubr.bf16.gmra.mrb[112].mxu1 %v2993_v18 }
 0x104   :  { %2841 = vmatprep.mubr.bf16.mxu1 %v2998_v20 }
 0x106   :  { %v3522_v25 = vpop.f32.mrb[8].mxu1 }
 0x107   :  { %v3527_v27 = vpop.f32.mrb[9].mxu1 }
 0x108   :  { %v3532_v29 = vpop.f32.mrb[10].mxu1 }
 0x109   :  { %1310 = vmatmul.mubr.bf16.gmra.mrb[100].mxu0 %v2995_v23  ;;  %v3534_v30 = vpop.f32.mrb[11].mxu1 }
 0x10a   :  { %1317 = vmatprep.mubr.bf16.mxu0 %v2996_v24 }
 0x10b   :  { %2842 = vmatmul.mubr.bf16.gmra.mrb[116].mxu1 %v2999_v26 }
 0x10c   :  { %2845 = vmatprep.mubr.bf16.mxu1 %v3004_v28 }
 0x10e   :  { %v3542_v33 = vpop.f32.mrb[12].mxu1 }
 0x10f   :  { %v3547_v35 = vpop.f32.mrb[13].mxu1 }
 0x110   :  { %v3549_v36 = vpop.f32.mrb[14].mxu1 }
 0x111   :  { %1318 = vmatmul.mubr.bf16.gmra.mrb[104].mxu0 %v2997_v31  ;;  %v3554_v38 = vpop.f32.mrb[15].mxu1  ;;  %v3012_v31 = vld [vmem:[%s4213_s2 + $0xf8] sm:$0xff]  }
 0x112   :  { %1325 = vmatprep.mubr.bf16.mxu0 %v3000_v32 }
 0x113   :  { %2846 = vmatmul.mubr.bf16.gmra.mrb[120].mxu1 %v3005_v34 }
 0x114   :  { %v1111_v40 = vpop.f32.mrb[0].mxu0  ;;  %2849 = vmatprep.mubr.bf16.mxu1 %v3010_v37 }
 0x115   :  { %v1112_v41 = vadd.f32 %v3559_v39, %v1111_v40  ;;  %v1113_v42 = vpop.f32.mrb[1].mxu0 }
 0x116   :  { %v1114_v44 = vpop.f32.mrb[2].mxu0  ;;  %v3568_v46 = vpop.f32.mrb[16].mxu1 }
 0x117   :  { %v3570_v47 = vadd.f32 %v1400_v11, %v1112_v41  ;;  %v1115_v48 = vadd.f32 %v3559_v39, %v1114_v44  ;;  %v1116_v49 = vpop.f32.mrb[3].mxu0  ;;  %v3576_v51 = vpop.f32.mrb[17].mxu1 }
 0x118   :  { %v3578_v52 = vpop.f32.mrb[18].mxu1 }
 0x119   :  { %v3580_v53 = vadd.f32 %v1403_v14, %v1115_v48  ;;  %1326 = vmatmul.mubr.bf16.gmra.mrb[108].mxu0 %v3001_v43  ;;  %v3582_v54 = vpop.f32.mrb[19].mxu1 }
 0x11a   :  { %1333 = vmatprep.mubr.bf16.mxu0 %v3002_v45 }
 0x11b   :  { %2850 = vmatmul.mubr.bf16.gmra.mrb[124].mxu1 %v3011_v50 }
 0x11c   :  { %v1119_v55 = vpop.f32.mrb[4].mxu0 }
 0x11d   :  { %v1120_v56 = vadd.f32 %v3559_v39, %v1119_v55  ;;  %v1121_v57 = vpop.f32.mrb[5].mxu0 }
 0x11e   :  { %v1122_v59 = vpop.f32.mrb[6].mxu0  ;;  %v3591_v61 = vpop.f32.mrb[20].mxu1 }
 0x11f   :  { %v3594_v62 = vadd.f32 %v3486_v9, %v1120_v56  ;;  %v1123_v63 = vadd.f32 %v3559_v39, %v1122_v59  ;;  %v1124_v0 = vpop.f32.mrb[7].mxu0  ;;  %v3597_v1 = vpop.f32.mrb[21].mxu1 }
 0x120   :  { %v3599_v2 = vpop.f32.mrb[22].mxu1 }
 0x121   :  { %v3602_v3 = vadd.f32 %v3494_v13, %v1123_v63  ;;  %1334 = vmatmul.mubr.bf16.gmra.mrb[112].mxu0 %v3003_v58  ;;  %v3604_v4 = vpop.f32.mrb[23].mxu1 }
 0x122   :  { %1341 = vmatprep.mubr.bf16.mxu0 %v3006_v60 }
 0x124   :  { %v1127_v5 = vpop.f32.mrb[8].mxu0 }
 0x125   :  { %v1128_v6 = vadd.f32 %v3559_v39, %v1127_v5  ;;  %v1129_v7 = vpop.f32.mrb[9].mxu0 }
 0x126   :  { %v1130_v9 = vpop.f32.mrb[10].mxu0  ;;  %v3613_v11 = vpop.f32.mrb[24].mxu1 }
 0x127   :  { %v3616_v12 = vadd.f32 %v3507_v19, %v1128_v6  ;;  %v1131_v13 = vadd.f32 %v3559_v39, %v1130_v9  ;;  %v1132_v14 = vpop.f32.mrb[11].mxu0  ;;  %v3619_v15 = vpop.f32.mrb[25].mxu1  ;;  %v3009_v19 = vld [vmem:[%s4214_s1 + $0xf0] sm:$0xff]  }
 0x128   :  { %v3621_v16 = vpop.f32.mrb[26].mxu1 }
 0x129   :  { %v3624_v18 = vadd.f32 %v3514_v22, %v1131_v13  ;;  %1342 = vmatmul.mubr.bf16.gmra.mrb[116].mxu0 %v3007_v8  ;;  %v3626_v20 = vpop.f32.mrb[27].mxu1 }
 0x12a   :  { %1349 = vmatprep.mubr.bf16.mxu0 %v3008_v10 }
 0x12c   :  { %v1135_v23 = vpop.f32.mrb[12].mxu0 }
 0x12d   :  { %v1136_v24 = vadd.f32 %v3559_v39, %v1135_v23  ;;  %v1137_v26 = vpop.f32.mrb[13].mxu0 }
 0x12e   :  { %v1138_v28 = vpop.f32.mrb[14].mxu0  ;;  %v3635_v32 = vpop.f32.mrb[28].mxu1 }
 0x12f   :  { %v3638_v22 = vadd.f32 %v3502_v17, %v1136_v24  ;;  %v1139_v34 = vadd.f32 %v3559_v39, %v1138_v28  ;;  %v1140_v37 = vpop.f32.mrb[15].mxu0  ;;  %v3641_v40 = vpop.f32.mrb[29].mxu1  ;;  %v3013_v17 = vld [vmem:[%s4214_s1 + $0xf8] sm:$0xff]  }
 0x130   :  { %v3643_v41 = vpop.f32.mrb[30].mxu1 }
 0x131   :  { %v3646_v42 = vadd.f32 %v3512_v21, %v1139_v34  ;;  %1350 = vmatmul.mubr.bf16.gmra.mrb[120].mxu0 %v3009_v19  ;;  %v3648_v43 = vpop.f32.mrb[31].mxu1 }
 0x132   :  { %1357 = vmatprep.mubr.bf16.mxu0 %v3012_v31 }
 0x134   :  { %v1143_v44 = vpop.f32.mrb[16].mxu0 }
 0x135   :  { %v1144_v45 = vadd.f32 %v3559_v39, %v1143_v44  ;;  %v1145_v48 = vpop.f32.mrb[17].mxu0 }
 0x136   :  { %v1146_v49 = vpop.f32.mrb[18].mxu0  ;;  %v3654_v50 = vpop.f32.mrb[32].mxu1 }
 0x137   :  { %v3657_v55 = vadd.f32 %v3527_v27, %v1144_v45  ;;  %v1147_v21 = vadd.f32 %v3559_v39, %v1146_v49  ;;  %v1148_v56 = vpop.f32.mrb[19].mxu0  ;;  %v3660_v57 = vpop.f32.mrb[33].mxu1 }
 0x138   :  { %v3662_v58 = vpop.f32.mrb[34].mxu1 }
 0x139   :  { %v3665_v59 = vadd.f32 %v3534_v30, %v1147_v21  ;;  %1358 = vmatmul.mubr.bf16.gmra.mrb[124].mxu0 %v3013_v17  ;;  %v3667_v60 = vpop.f32.mrb[35].mxu1 }
 0x13c   :  { %v1151_v63 = vpop.f32.mrb[20].mxu0 }
 0x13d   :  { %v1152_v0 = vadd.f32 %v3559_v39, %v1151_v63  ;;  %v1153_v5 = vpop.f32.mrb[21].mxu0 }
 0x13e   :  { %v1154_v6 = vpop.f32.mrb[22].mxu0  ;;  %v3670_v27 = vpop.f32.mrb[36].mxu1 }
 0x13f   :  { %v3673_v7 = vadd.f32 %v3522_v25, %v1152_v0  ;;  %v1155_v8 = vadd.f32 %v3559_v39, %v1154_v6  ;;  %v1156_v9 = vpop.f32.mrb[23].mxu0  ;;  %v3676_v10 = vpop.f32.mrb[37].mxu1 }
 0x140   :  { %v3678_v30 = vpop.f32.mrb[38].mxu1 }
 0x141   :  { %v3681_v13 = vadd.f32 %v3532_v29, %v1155_v8  ;;  %v3683_v14 = vpop.f32.mrb[39].mxu1 }
 0x144   :  { %v1159_v23 = vpop.f32.mrb[24].mxu0 }
 0x145   :  { %v1160_v24 = vadd.f32 %v3559_v39, %v1159_v23  ;;  %v1161_v26 = vpop.f32.mrb[25].mxu0 }
 0x146   :  { %v1162_v19 = vpop.f32.mrb[26].mxu0  ;;  %v3686_v28 = vpop.f32.mrb[40].mxu1 }
 0x147   :  { %v3689_v25 = vadd.f32 %v3547_v35, %v1160_v24  ;;  %v1163_v31 = vadd.f32 %v3559_v39, %v1162_v19  ;;  %v1164_v34 = vpop.f32.mrb[27].mxu0  ;;  %v3692_v37 = vpop.f32.mrb[41].mxu1 }
 0x148   :  { %v3694_v44 = vpop.f32.mrb[42].mxu1 }
 0x149   :  { %v3697_v29 = vadd.f32 %v3554_v38, %v1163_v31  ;;  %v3699_v45 = vpop.f32.mrb[43].mxu1 }
 0x14c   :  { %v1167_v48 = vpop.f32.mrb[28].mxu0 }
 0x14d   :  { %v1168_v17 = vadd.f32 %v3559_v39, %v1167_v48  ;;  %v1169_v49 = vpop.f32.mrb[29].mxu0 }
 0x14e   :  { %v1170_v21 = vpop.f32.mrb[30].mxu0  ;;  %v3702_v56 = vpop.f32.mrb[44].mxu1 }
 0x14f   :  { %4220 = vst [vmem:[#allocation2_spill] sm:$0xff] %v3702_v56  ;;  %v3705_v35 = vadd.f32 %v3542_v33, %v1168_v17  ;;  %v1171_v63 = vadd.f32 %v3559_v39, %v1170_v21  ;;  %v1172_v0 = vpop.f32.mrb[31].mxu0  ;;  %v3708_v5 = vpop.f32.mrb[45].mxu1 }
 0x150   :  { %v3710_v6 = vpop.f32.mrb[46].mxu1 }
 0x151   :  { %4221 = vst [vmem:[#allocation3_spill] sm:$0xff] %v3710_v6  ;;  %v3713_v38 = vadd.f32 %v3549_v36, %v1171_v63  ;;  %v3715_v8 = vpop.f32.mrb[47].mxu1 }
 0x152   :  { %4222 = vst [vmem:[#allocation4_spill] sm:$0xff] %v3715_v8 }
 0x154   :  { %v1175_v9 = vpop.f32.mrb[32].mxu0 }
 0x155   :  { %v1176_v23 = vadd.f32 %v3559_v39, %v1175_v9  ;;  %v1177_v24 = vpop.f32.mrb[33].mxu0 }
 0x156   :  { %v1178_v26 = vpop.f32.mrb[34].mxu0  ;;  %v3718_v19 = vpop.f32.mrb[48].mxu1 }
 0x157   :  { %4223 = vst [vmem:[#allocation5_spill] sm:$0xff] %v3718_v19  ;;  %v3721_v33 = vadd.f32 %v3576_v51, %v1176_v23  ;;  %v1179_v31 = vadd.f32 %v3559_v39, %v1178_v26  ;;  %v1180_v34 = vpop.f32.mrb[35].mxu0  ;;  %v3724_v48 = vpop.f32.mrb[49].mxu1 }
 0x158   :  { %4224 = vst [vmem:[#allocation6_spill] sm:$0xff] %v3724_v48  ;;  %v3726_v17 = vpop.f32.mrb[50].mxu1 }
 0x159   :  { %4225 = vst [vmem:[#allocation7_spill] sm:$0xff] %v3726_v17  ;;  %v3729_v36 = vadd.f32 %v3582_v54, %v1179_v31  ;;  %v3731_v49 = vpop.f32.mrb[51].mxu1 }
 0x15a   :  { %4226 = vst [vmem:[#allocation8_spill] sm:$0xff] %v3731_v49 }
 0x15c   :  { %v1183_v21 = vpop.f32.mrb[36].mxu0 }
 0x15d   :  { %v1184_v63 = vadd.f32 %v3559_v39, %v1183_v21  ;;  %v1185_v0 = vpop.f32.mrb[37].mxu0 }
 0x15e   :  { %v1186_v9 = vpop.f32.mrb[38].mxu0  ;;  %v3734_v24 = vpop.f32.mrb[52].mxu1 }
 0x15f   :  { %4227 = vst [vmem:[#allocation9_spill] sm:$0xff] %v3734_v24  ;;  %v3737_v51 = vadd.f32 %v3568_v46, %v1184_v63  ;;  %v1187_v23 = vadd.f32 %v3559_v39, %v1186_v9  ;;  %v1188_v26 = vpop.f32.mrb[39].mxu0  ;;  %v3740_v34 = vpop.f32.mrb[53].mxu1 }
 0x160   :  { %4228 = vst [vmem:[#allocation10_spill] sm:$0xff] %v3740_v34  ;;  %v3742_v17 = vpop.f32.mrb[54].mxu1 }
 0x161   :  { %4229 = vst [vmem:[#allocation11_spill] sm:$0xff] %v3742_v17  ;;  %v3745_v54 = vadd.f32 %v3578_v52, %v1187_v23  ;;  %v3747_v31 = vpop.f32.mrb[55].mxu1 }
 0x162   :  { %4230 = vst [vmem:[#allocation12_spill] sm:$0xff] %v3747_v31 }
 0x164   :  { %v1191_v21 = vpop.f32.mrb[40].mxu0 }
 0x165   :  { %v1192_v0 = vadd.f32 %v3559_v39, %v1191_v21  ;;  %v1193_v19 = vpop.f32.mrb[41].mxu0 }
 0x166   :  { %v1194_v24 = vpop.f32.mrb[42].mxu0  ;;  %v3750_v49 = vpop.f32.mrb[56].mxu1 }
 0x167   :  { %4231 = vst [vmem:[#allocation13_spill] sm:$0xff] %v3750_v49  ;;  %v3753_v46 = vadd.f32 %v3597_v1, %v1192_v0  ;;  %v1195_v63 = vadd.f32 %v3559_v39, %v1194_v24  ;;  %v1196_v9 = vpop.f32.mrb[43].mxu0  ;;  %v3756_v26 = vpop.f32.mrb[57].mxu1 }
 0x168   :  { %4232 = vst [vmem:[#allocation14_spill] sm:$0xff] %v3756_v26  ;;  %v3758_v17 = vpop.f32.mrb[58].mxu1  ;;  %v1657_v26 = vmax.f32 %v3594_v62, 0.0 }
 0x169   :  { %4233 = vst [vmem:[#allocation15_spill] sm:$0xff] %v3758_v17  ;;  %v3761_v52 = vadd.f32 %v3604_v4, %v1195_v63  ;;  %v3763_v23 = vpop.f32.mrb[59].mxu1 }
 0x16a   :  { %4234 = vst [vmem:[#allocation16_spill] sm:$0xff] %v3763_v23 }
 0x16c   :  { %v1199_v21 = vpop.f32.mrb[44].mxu0 }
 0x16d   :  { %v1200_v19 = vadd.f32 %v3559_v39, %v1199_v21  ;;  %v1201_v31 = vpop.f32.mrb[45].mxu0 }
 0x16e   :  { %v1202_v49 = vpop.f32.mrb[46].mxu0  ;;  %v3766_v34 = vpop.f32.mrb[60].mxu1  ;;  %v3784_v31 = vld [vmem:[%s4218_s6] ss:$0 sm:$0xff] }
 0x16f   :  { %4235 = vst [vmem:[#allocation17_spill] sm:$0xff] %v3766_v34  ;;  %v3769_v1 = vadd.f32 %v3591_v61, %v1200_v19  ;;  %v1203_v24 = vadd.f32 %v3559_v39, %v1202_v49  ;;  %v1204_v0 = vpop.f32.mrb[47].mxu0  ;;  %v3772_v9 = vpop.f32.mrb[61].mxu1 }
 0x170   :  { %4236 = vst [vmem:[#allocation18_spill] sm:$0xff] %v3772_v9  ;;  %v3774_v17 = vpop.f32.mrb[62].mxu1 }
 0x171   :  { %4237 = vst [vmem:[#allocation19_spill] sm:$0xff] %v3774_v17  ;;  %v3777_v4 = vadd.f32 %v3599_v2, %v1203_v24  ;;  %v3779_v63 = vpop.f32.mrb[63].mxu1 }
 0x172   :  { %4238 = vst [vmem:[#allocation20_spill] sm:$0xff] %v3779_v63 }
 0x174   :  { %v1207_v21 = vpop.f32.mrb[48].mxu0 }
 0x175   :  { %v1208_v61 = vadd.f32 %v3559_v39, %v1207_v21  ;;  %v1209_v19 = vpop.f32.mrb[49].mxu0 }
 0x176   :  { %v2791_v49 = vpop.f32.mrb[64].mxu1  ;;  %v1210_v0 = vpop.f32.mrb[50].mxu0 }
 0x177   :  { %v3788_v34 = vadd.f32 %v3619_v15, %v1208_v61  ;;  %v2009_v17 = vadd.f32 %v2791_v49, %v3784_v31  ;;  %v1211_v2 = vadd.f32 %v3559_v39, %v1210_v0  ;;  %v2000_v24 = vpop.f32.mrb[65].mxu1  ;;  %v1212_v63 = vpop.f32.mrb[51].mxu0  ;;  %v1655_v15 = vmax.f32 %v3570_v47, 0.0 }
 0x178   :  { %v2001_v9 = vadd.f32 %v3784_v31, %v2000_v24  ;;  %v2792_v23 = vpop.f32.mrb[66].mxu1  ;;  %v1658_v0 = vmax.f32 %v3602_v3, 0.0  ;;  %v1656_v24 = vmax.f32 %v3580_v53, 0.0 }
 0x179   :  { %v2257_v48 = vmax.f32 %v2009_v17, 0.0  ;;  %v3795_v21 = vadd.f32 %v3626_v20, %v1211_v2  ;;  %v2012_v19 = vadd.f32 %v2792_v23, %v3784_v31  ;;  %v2003_v6 = vpop.f32.mrb[67].mxu1 }
 0x17a   :  { %v2255_v61 = vmax.f32 %v2001_v9, 0.0  ;;  %v2004_v49 = vadd.f32 %v3784_v31, %v2003_v6 }
 0x17b   :  { %v2321_v63 = vadd.f32 %v2257_v48, %v1657_v26  ;;  %v2258_v56 = vmax.f32 %v2012_v19, 0.0 }
 0x17c   :  { %v2319_v8 = vadd.f32 %v2255_v61, %v1655_v15  ;;  %v2256_v62 = vmax.f32 %v2004_v49, 0.0  ;;  %v1215_v17 = vpop.f32.mrb[52].mxu0  ;;  %v1661_v15 = vmax.f32 %v3638_v22, 0.0 }
 0x17d   :  { %2385 = vst [vmem:[%s4219_s8 + $0x10] sm:$0xff] %v2321_v63  ;;  %v2322_v20 = vadd.f32 %v2258_v56, %v1658_v0  ;;  %v1216_v23 = vadd.f32 %v3559_v39, %v1215_v17  ;;  %v1217_v47 = vpop.f32.mrb[53].mxu0  ;;  %v1659_v63 = vmax.f32 %v3616_v12, 0.0  ;;  %v1662_v17 = vmax.f32 %v3646_v42, 0.0 }
 0x17e   :  { %2383 = vst [vmem:[%s4219_s8] sm:$0xff] %v2319_v8  ;;  %v2320_v3 = vadd.f32 %v2256_v62, %v1656_v24  ;;  %v2795_v6 = vpop.f32.mrb[68].mxu1  ;;  %v1218_v48 = vpop.f32.mrb[54].mxu0  ;;  %v1660_v47 = vmax.f32 %v3624_v18, 0.0 }
 0x17f   :  { %2386 = vst [vmem:[%s4219_s8 + $0x18] sm:$0xff] %v2322_v20  ;;  %v3813_v53 = vadd.f32 %v3613_v11, %v1216_v23  ;;  %v2025_v26 = vadd.f32 %v2795_v6, %v3784_v31  ;;  %v1219_v56 = vadd.f32 %v3559_v39, %v1218_v48  ;;  %v2016_v9 = vpop.f32.mrb[69].mxu1  ;;  %v1220_v2 = vpop.f32.mrb[55].mxu0 }
 0x180   :  { %2384 = vst [vmem:[%s4219_s8 + $0x8] sm:$0xff] %v2320_v3  ;;  %v2017_v8 = vadd.f32 %v3784_v31, %v2016_v9  ;;  %v2796_v19 = vpop.f32.mrb[70].mxu1 }
 0x181   :  { %v2261_v61 = vmax.f32 %v2025_v26, 0.0  ;;  %v3823_v49 = vadd.f32 %v3621_v16, %v1219_v56  ;;  %v2028_v11 = vadd.f32 %v2796_v19, %v3784_v31  ;;  %v2019_v0 = vpop.f32.mrb[71].mxu1 }
 0x182   :  { %v2259_v24 = vmax.f32 %v2017_v8, 0.0  ;;  %v2020_v62 = vadd.f32 %v3784_v31, %v2019_v0 }
 0x183   :  { %v2325_v20 = vadd.f32 %v2261_v61, %v1661_v15  ;;  %v2262_v23 = vmax.f32 %v2028_v11, 0.0  ;;  %v1665_v11 = vmax.f32 %v3673_v7, 0.0 }
 0x184   :  { %v2323_v3 = vadd.f32 %v2259_v24, %v1659_v63  ;;  %v2260_v22 = vmax.f32 %v2020_v62, 0.0  ;;  %v1223_v6 = vpop.f32.mrb[56].mxu0  ;;  %v1663_v62 = vmax.f32 %v3657_v55, 0.0 }
 0x185   :  { %2389 = vst [vmem:[%s4219_s8 + $0x30] sm:$0xff] %v2325_v20  ;;  %v2326_v16 = vadd.f32 %v2262_v23, %v1662_v17  ;;  %v1224_v48 = vadd.f32 %v3559_v39, %v1223_v6  ;;  %v1225_v12 = vpop.f32.mrb[57].mxu0  ;;  %v1666_v23 = vmax.f32 %v3681_v13, 0.0 }
 0x186   :  { %2387 = vst [vmem:[%s4219_s8 + $0x20] sm:$0xff] %v2323_v3  ;;  %v2324_v42 = vadd.f32 %v2260_v22, %v1660_v47  ;;  %v2799_v26 = vpop.f32.mrb[72].mxu1  ;;  %v1226_v56 = vpop.f32.mrb[58].mxu0  ;;  %v1664_v22 = vmax.f32 %v3665_v59, 0.0 }
 0x187   :  { %2390 = vst [vmem:[%s4219_s8 + $0x38] sm:$0xff] %v2326_v16  ;;  %v3841_v18 = vadd.f32 %v3641_v40, %v1224_v48  ;;  %v2041_v9 = vadd.f32 %v2799_v26, %v3784_v31  ;;  %v1227_v2 = vadd.f32 %v3559_v39, %v1226_v56  ;;  %v2032_v8 = vpop.f32.mrb[73].mxu1  ;;  %v1228_v19 = vpop.f32.mrb[59].mxu0 }
 0x188   :  { %2388 = vst [vmem:[%s4219_s8 + $0x28] sm:$0xff] %v2324_v42  ;;  %v2033_v15 = vadd.f32 %v3784_v31, %v2032_v8  ;;  %v2800_v61 = vpop.f32.mrb[74].mxu1 }
 0x189   :  { %v2265_v0 = vmax.f32 %v2041_v9, 0.0  ;;  %v3851_v63 = vadd.f32 %v3648_v43, %v1227_v2  ;;  %v2044_v40 = vadd.f32 %v2800_v61, %v3784_v31  ;;  %v2035_v24 = vpop.f32.mrb[75].mxu1 }
 0x18a   :  { %v2263_v17 = vmax.f32 %v2033_v15, 0.0  ;;  %v2036_v20 = vadd.f32 %v3784_v31, %v2035_v24  ;;  %v1669_v15 = vmax.f32 %v3705_v35, 0.0 }
 0x18b   :  { %v2329_v47 = vadd.f32 %v2265_v0, %v1665_v11  ;;  %v2266_v3 = vmax.f32 %v2044_v40, 0.0  ;;  %v1667_v40 = vmax.f32 %v3689_v25, 0.0 }
 0x18c   :  { %v2327_v6 = vadd.f32 %v2263_v17, %v1663_v62  ;;  %v2264_v7 = vmax.f32 %v2036_v20, 0.0  ;;  %v1231_v16 = vpop.f32.mrb[60].mxu0  ;;  %v1670_v17 = vmax.f32 %v3713_v38, 0.0 }
 0x18d   :  { %2393 = vst [vmem:[%s4219_s8 + $0x50] sm:$0xff] %v2329_v47  ;;  %v2330_v43 = vadd.f32 %v2266_v3, %v1666_v23  ;;  %v1232_v48 = vadd.f32 %v3559_v39, %v1231_v16  ;;  %v1233_v55 = vpop.f32.mrb[61].mxu0  ;;  %v1668_v47 = vmax.f32 %v3697_v29, 0.0 }
 0x18e   :  { %2391 = vst [vmem:[%s4219_s8 + $0x40] sm:$0xff] %v2327_v6  ;;  %v2328_v13 = vadd.f32 %v2264_v7, %v1664_v22  ;;  %v2803_v12 = vpop.f32.mrb[76].mxu1  ;;  %v1234_v42 = vpop.f32.mrb[62].mxu0 }
 0x18f   :  { %2394 = vst [vmem:[%s4219_s8 + $0x58] sm:$0xff] %v2330_v43  ;;  %v3869_v59 = vadd.f32 %v3635_v32, %v1232_v48  ;;  %v2057_v26 = vadd.f32 %v2803_v12, %v3784_v31  ;;  %v1235_v56 = vadd.f32 %v3559_v39, %v1234_v42  ;;  %v2048_v9 = vpop.f32.mrb[77].mxu1  ;;  %v1236_v2 = vpop.f32.mrb[63].mxu0 }
 0x190   :  { %2392 = vst [vmem:[%s4219_s8 + $0x48] sm:$0xff] %v2328_v13  ;;  %v2049_v8 = vadd.f32 %v3784_v31, %v2048_v9  ;;  %v2804_v19 = vpop.f32.mrb[78].mxu1 }
 0x191   :  { %v2269_v61 = vmax.f32 %v2057_v26, 0.0  ;;  %v3879_v11 = vadd.f32 %v3643_v41, %v1235_v56  ;;  %v2060_v32 = vadd.f32 %v2804_v19, %v3784_v31  ;;  %v2051_v0 = vpop.f32.mrb[79].mxu1  ;;  %v1673_v26 = vmax.f32 %v3737_v51, 0.0 }
 0x192   :  { %v2267_v24 = vmax.f32 %v2049_v8, 0.0  ;;  %v2052_v62 = vadd.f32 %v3784_v31, %v2051_v0  ;;  %v1671_v8 = vmax.f32 %v3721_v33, 0.0 }
 0x193   :  { %v2333_v20 = vadd.f32 %v2269_v61, %v1669_v15  ;;  %v2270_v23 = vmax.f32 %v2060_v32, 0.0  ;;  %v1674_v61 = vmax.f32 %v3745_v54, 0.0 }
 0x194   :  { %v2331_v3 = vadd.f32 %v2267_v24, %v1667_v40  ;;  %v2268_v35 = vmax.f32 %v2052_v62, 0.0  ;;  %v1239_v22 = vpop.f32.mrb[64].mxu0  ;;  %v1672_v40 = vmax.f32 %v3729_v36, 0.0 }
 0x195   :  { %2397 = vst [vmem:[%s4219_s8 + $0x70] sm:$0xff] %v2333_v20  ;;  %v2334_v41 = vadd.f32 %v2270_v23, %v1670_v17  ;;  %v1240_v6 = vadd.f32 %v3559_v39, %v1239_v22  ;;  %v1241_v25 = vpop.f32.mrb[65].mxu0 }
 0x196   :  { %2395 = vst [vmem:[%s4219_s8 + $0x60] sm:$0xff] %v2331_v3  ;;  %v2332_v38 = vadd.f32 %v2268_v35, %v1668_v47  ;;  %v2807_v7 = vpop.f32.mrb[80].mxu1  ;;  %v1242_v16 = vpop.f32.mrb[66].mxu0  ;;  %v1677_v25 = vmax.f32 %v3769_v1, 0.0 }
 0x197   :  { %2398 = vst [vmem:[%s4219_s8 + $0x78] sm:$0xff] %v2334_v41  ;;  %v3897_v29 = vadd.f32 %v3660_v57, %v1240_v6  ;;  %v2073_v43 = vadd.f32 %v2807_v7, %v3784_v31  ;;  %v1243_v48 = vadd.f32 %v3559_v39, %v1242_v16  ;;  %v2064_v55 = vpop.f32.mrb[81].mxu1  ;;  %v1244_v13 = vpop.f32.mrb[67].mxu0 }
 0x198   :  { %2396 = vst [vmem:[%s4219_s8 + $0x68] sm:$0xff] %v2332_v38  ;;  %v2065_v12 = vadd.f32 %v3784_v31, %v2064_v55  ;;  %v2808_v42 = vpop.f32.mrb[82].mxu1  ;;  %v1678_v13 = vmax.f32 %v3777_v4, 0.0 }
 0x199   :  { %v2273_v56 = vmax.f32 %v2073_v43, 0.0  ;;  %v3907_v9 = vadd.f32 %v3667_v60, %v1243_v48  ;;  %v2076_v57 = vadd.f32 %v2808_v42, %v3784_v31  ;;  %v2067_v2 = vpop.f32.mrb[83].mxu1  ;;  %v1675_v43 = vmax.f32 %v3753_v46, 0.0 }
 0x19a   :  { %v2271_v19 = vmax.f32 %v2065_v12, 0.0  ;;  %v2068_v15 = vadd.f32 %v3784_v31, %v2067_v2 }
 0x19b   :  { %v2337_v32 = vadd.f32 %v2273_v56, %v1673_v26  ;;  %v2274_v0 = vmax.f32 %v2076_v57, 0.0  ;;  %v1676_v26 = vmax.f32 %v3761_v52, 0.0 }
 0x19c   :  { %v2335_v24 = vadd.f32 %v2271_v19, %v1671_v8  ;;  %v2272_v51 = vmax.f32 %v2068_v15, 0.0  ;;  %v1247_v62 = vpop.f32.mrb[68].mxu0 }
 0x19d   :  { %2401 = vst [vmem:[%s4219_s8 + $0x90] sm:$0xff] %v2337_v32  ;;  %v2338_v60 = vadd.f32 %v2274_v0, %v1674_v61  ;;  %v1248_v17 = vadd.f32 %v3559_v39, %v1247_v62  ;;  %v1249_v33 = vpop.f32.mrb[69].mxu0 }
 0x19e   :  { %2399 = vst [vmem:[%s4219_s8 + $0x80] sm:$0xff] %v2335_v24  ;;  %v2336_v54 = vadd.f32 %v2272_v51, %v1672_v40  ;;  %v2811_v20 = vpop.f32.mrb[84].mxu1  ;;  %v1250_v23 = vpop.f32.mrb[70].mxu0  ;;  %v1681_v51 = vmax.f32 %v3813_v53, 0.0  ;;  %v1679_v33 = vmax.f32 %v3788_v34, 0.0 }
 0x19f   :  { %2402 = vst [vmem:[%s4219_s8 + $0x98] sm:$0xff] %v2338_v60  ;;  %v3925_v36 = vadd.f32 %v3654_v50, %v1248_v17  ;;  %v2089_v47 = vadd.f32 %v2811_v20, %v3784_v31  ;;  %v1251_v3 = vadd.f32 %v3559_v39, %v1250_v23  ;;  %v2080_v35 = vpop.f32.mrb[85].mxu1  ;;  %v1252_v22 = vpop.f32.mrb[71].mxu0  ;;  %v1682_v23 = vmax.f32 %v3823_v49, 0.0 }
 0x1a0   :  { %2400 = vst [vmem:[%s4219_s8 + $0x88] sm:$0xff] %v2336_v54  ;;  %v2081_v41 = vadd.f32 %v3784_v31, %v2080_v35  ;;  %v2812_v6 = vpop.f32.mrb[86].mxu1  ;;  %v1680_v35 = vmax.f32 %v3795_v21, 0.0 }
 0x1a1   :  { %v2277_v38 = vmax.f32 %v2089_v47, 0.0  ;;  %v3935_v7 = vadd.f32 %v3662_v58, %v1251_v3  ;;  %v2092_v50 = vadd.f32 %v2812_v6, %v3784_v31  ;;  %v2083_v16 = vpop.f32.mrb[87].mxu1 }
 0x1a2   :  { %v2275_v48 = vmax.f32 %v2081_v41, 0.0  ;;  %v2084_v55 = vadd.f32 %v3784_v31, %v2083_v16 }
 0x1a3   :  { %v2341_v12 = vadd.f32 %v2277_v38, %v1677_v25  ;;  %v2278_v42 = vmax.f32 %v2092_v50, 0.0 }
 0x1a4   :  { %v2339_v56 = vadd.f32 %v2275_v48, %v1675_v43  ;;  %v2276_v1 = vmax.f32 %v2084_v55, 0.0  ;;  %v1255_v57 = vpop.f32.mrb[72].mxu0 }
 0x1a5   :  { %2405 = vst [vmem:[%s4219_s8 + $0xb0] sm:$0xff] %v2341_v12  ;;  %v2342_v58 = vadd.f32 %v2278_v42, %v1678_v13  ;;  %v1256_v2 = vadd.f32 %v3559_v39, %v1255_v57  ;;  %v1257_v46 = vpop.f32.mrb[73].mxu0  ;;  %v1685_v12 = vmax.f32 %v3869_v59, 0.0 }
 0x1a6   :  { %2403 = vst [vmem:[%s4219_s8 + $0xa0] sm:$0xff] %v2339_v56  ;;  %v2340_v4 = vadd.f32 %v2276_v1, %v1676_v26  ;;  %v2815_v8 = vpop.f32.mrb[88].mxu1  ;;  %v1258_v19 = vpop.f32.mrb[74].mxu0  ;;  %v1683_v1 = vmax.f32 %v3841_v18, 0.0 }
 0x1a7   :  { %2406 = vst [vmem:[%s4219_s8 + $0xb8] sm:$0xff] %v2342_v58  ;;  %v3953_v52 = vadd.f32 %v3676_v10, %v1256_v2  ;;  %v2105_v15 = vadd.f32 %v2815_v8, %v3784_v31  ;;  %v1259_v61 = vadd.f32 %v3559_v39, %v1258_v19  ;;  %v2096_v32 = vpop.f32.mrb[89].mxu1  ;;  %v1260_v0 = vpop.f32.mrb[75].mxu0  ;;  %v1686_v2 = vmax.f32 %v3879_v11, 0.0 }
 0x1a8   :  { %2404 = vst [vmem:[%s4219_s8 + $0xa8] sm:$0xff] %v2340_v4  ;;  %v2097_v40 = vadd.f32 %v3784_v31, %v2096_v32  ;;  %v2816_v24 = vpop.f32.mrb[90].mxu1  ;;  %v1684_v8 = vmax.f32 %v3851_v63, 0.0 }
 0x1a9   :  { %v2281_v62 = vmax.f32 %v2105_v15, 0.0  ;;  %v3963_v60 = vadd.f32 %v3683_v14, %v1259_v61  ;;  %v2108_v10 = vadd.f32 %v2816_v24, %v3784_v31  ;;  %v2099_v17 = vpop.f32.mrb[91].mxu1 }
 0x1aa   :  { %v2279_v54 = vmax.f32 %v2097_v40, 0.0  ;;  %v2100_v20 = vadd.f32 %v3784_v31, %v2099_v17 }
 0x1ab   :  { %v2345_v47 = vadd.f32 %v2281_v62, %v1681_v51  ;;  %v2282_v3 = vmax.f32 %v2108_v10, 0.0 }
 0x1ac   :  { %v2343_v22 = vadd.f32 %v2279_v54, %v1679_v33  ;;  %v2280_v53 = vmax.f32 %v2100_v20, 0.0  ;;  %v1263_v41 = vpop.f32.mrb[76].mxu0  ;;  %v1689_v33 = vmax.f32 %v3925_v36, 0.0 }
 0x1ad   :  { %2409 = vst [vmem:[%s4219_s8 + $0xd0] sm:$0xff] %v2345_v47  ;;  %v2346_v14 = vadd.f32 %v2282_v3, %v1682_v23  ;;  %v1264_v6 = vadd.f32 %v3559_v39, %v1263_v41  ;;  %v1265_v34 = vpop.f32.mrb[77].mxu0  ;;  %v1687_v47 = vmax.f32 %v3897_v29, 0.0 }
 0x1ae   :  { %2407 = vst [vmem:[%s4219_s8 + $0xc0] sm:$0xff] %v2343_v22  ;;  %v2344_v49 = vadd.f32 %v2280_v53, %v1680_v35  ;;  %v2819_v25 = vpop.f32.mrb[92].mxu1  ;;  %v1266_v38 = vpop.f32.mrb[78].mxu0  ;;  %v1690_v22 = vmax.f32 %v3935_v7, 0.0 }
 0x1af   :  { %2410 = vst [vmem:[%s4219_s8 + $0xd8] sm:$0xff] %v2346_v14  ;;  %v3981_v21 = vadd.f32 %v3670_v27, %v1264_v6  ;;  %v2121_v50 = vadd.f32 %v2819_v25, %v3784_v31  ;;  %v1267_v16 = vadd.f32 %v3559_v39, %v1266_v38  ;;  %v2112_v43 = vpop.f32.mrb[93].mxu1  ;;  %v1268_v48 = vpop.f32.mrb[79].mxu0  ;;  %v1688_v14 = vmax.f32 %v3907_v9, 0.0 }
 0x1b0   :  { %2408 = vst [vmem:[%s4219_s8 + $0xc8] sm:$0xff] %v2344_v49  ;;  %v2113_v55 = vadd.f32 %v3784_v31, %v2112_v43  ;;  %v2820_v13 = vpop.f32.mrb[94].mxu1 }
 0x1b1   :  { %v2285_v42 = vmax.f32 %v2121_v50, 0.0  ;;  %v3991_v26 = vadd.f32 %v3678_v30, %v1267_v16  ;;  %v2124_v27 = vadd.f32 %v2820_v13, %v3784_v31  ;;  %v2115_v56 = vpop.f32.mrb[95].mxu1 }
 0x1b2   :  { %v2283_v57 = vmax.f32 %v2113_v55, 0.0  ;;  %v2116_v58 = vadd.f32 %v3784_v31, %v2115_v56 }
 0x1b3   :  { %v2349_v46 = vadd.f32 %v2285_v42, %v1685_v12  ;;  %v2286_v4 = vmax.f32 %v2124_v27, 0.0  ;;  %v1693_v12 = vmax.f32 %v3981_v21, 0.0 }
 0x1b4   :  { %v2347_v19 = vadd.f32 %v2283_v57, %v1683_v1  ;;  %v2284_v59 = vmax.f32 %v2116_v58, 0.0  ;;  %v1271_v15 = vpop.f32.mrb[80].mxu0  ;;  %v1691_v1 = vmax.f32 %v3953_v52, 0.0 }
 0x1b5   :  { %2413 = vst [vmem:[%s4219_s8 + $0xf0] sm:$0xff] %v2349_v46  ;;  %v2350_v30 = vadd.f32 %v2286_v4, %v1686_v2  ;;  %v1272_v61 = vadd.f32 %v3559_v39, %v1271_v15  ;;  %v1273_v18 = vpop.f32.mrb[81].mxu0  ;;  %v1694_v2 = vmax.f32 %v3991_v26, 0.0 }
 0x1b6   :  { %2411 = vst [vmem:[%s4219_s8 + $0xe0] sm:$0xff] %v2347_v19  ;;  %v2348_v11 = vadd.f32 %v2284_v59, %v1684_v8  ;;  %v2823_v32 = vpop.f32.mrb[96].mxu1  ;;  %v1274_v0 = vpop.f32.mrb[82].mxu0  ;;  %v1692_v8 = vmax.f32 %v3963_v60, 0.0 }
 0x1b7   :  { %2414 = vst [vmem:[%s4219_s8 + $0xf8] sm:$0xff] %v2350_v30  ;;  %v4009_v63 = vadd.f32 %v3692_v37, %v1272_v61  ;;  %v2137_v40 = vadd.f32 %v2823_v32, %v3784_v31  ;;  %v1275_v24 = vadd.f32 %v3559_v39, %v1274_v0  ;;  %v2128_v51 = vpop.f32.mrb[97].mxu1  ;;  %v1276_v62 = vpop.f32.mrb[83].mxu0 }
 0x1b8   :  { %2412 = vst [vmem:[%s4219_s8 + $0xe8] sm:$0xff] %v2348_v11  ;;  %v2129_v10 = vadd.f32 %v3784_v31, %v2128_v51  ;;  %v2824_v17 = vpop.f32.mrb[98].mxu1 }
 0x1b9   :  { %v2289_v54 = vmax.f32 %v2137_v40, 0.0  ;;  %v4019_v20 = vadd.f32 %v3699_v45, %v1275_v24  ;;  %v2140_v37 = vadd.f32 %v2824_v17, %v3784_v31  ;;  %v2131_v23 = vpop.f32.mrb[99].mxu1 }
 0x1ba   :  { %v2287_v3 = vmax.f32 %v2129_v10, 0.0  ;;  %v2132_v35 = vadd.f32 %v3784_v31, %v2131_v23  ;;  %v4239_v10 = vld [vmem:[#allocation4_spill] sm:$0xff] }
 0x1bb   :  { %v2353_v53 = vadd.f32 %v2289_v54, %v1689_v33  ;;  %v2290_v41 = vmax.f32 %v2140_v37, 0.0  ;;  %v1695_v54 = vmax.f32 %v4009_v63, 0.0  ;;  %v4078_v63 = vld [vmem:[%s4217_s7] ss:$0 sm:$0xff] }
 0x1bc   :  { %v2351_v6 = vadd.f32 %v2287_v3, %v1687_v47  ;;  %v2288_v36 = vmax.f32 %v2132_v35, 0.0  ;;  %v1279_v34 = vpop.f32.mrb[84].mxu0  ;;  %v1696_v35 = vmax.f32 %v4019_v20, 0.0 }
 0x1bd   :  { %2417 = vst [vmem:[%s4219_s8 + $0x110] sm:$0xff] %v2353_v53  ;;  %v2354_v45 = vadd.f32 %v2290_v41, %v1690_v22  ;;  %v1280_v49 = vadd.f32 %v3559_v39, %v1279_v34  ;;  %v1281_v29 = vpop.f32.mrb[85].mxu0 }
 0x1be   :  { %2415 = vst [vmem:[%s4219_s8 + $0x100] sm:$0xff] %v2351_v6  ;;  %v2352_v7 = vadd.f32 %v2288_v36, %v1688_v14  ;;  %v2827_v25 = vpop.f32.mrb[100].mxu1  ;;  %v1282_v38 = vpop.f32.mrb[86].mxu0 }
 0x1bf   :  { %2418 = vst [vmem:[%s4219_s8 + $0x118] sm:$0xff] %v2354_v45  ;;  %v1569_v9 = vadd.f32 %v3686_v28, %v1280_v49  ;;  %v2153_v50 = vadd.f32 %v2827_v25, %v3784_v31  ;;  %v1283_v16 = vadd.f32 %v3559_v39, %v1282_v38  ;;  %v2144_v43 = vpop.f32.mrb[101].mxu1  ;;  %v1284_v48 = vpop.f32.mrb[87].mxu0  ;;  %v4240_v49 = vld [vmem:[#allocation2_spill] sm:$0xff] }
 0x1c0   :  { %2416 = vst [vmem:[%s4219_s8 + $0x108] sm:$0xff] %v2352_v7  ;;  %v2145_v55 = vadd.f32 %v3784_v31, %v2144_v43  ;;  %v2828_v13 = vpop.f32.mrb[102].mxu1 }
 0x1c1   :  { %v2293_v42 = vmax.f32 %v2153_v50, 0.0  ;;  %v1572_v27 = vadd.f32 %v3694_v44, %v1283_v16  ;;  %v2156_v28 = vadd.f32 %v2828_v13, %v3784_v31  ;;  %v2147_v56 = vpop.f32.mrb[103].mxu1  ;;  %v1697_v51 = vmax.f32 %v1569_v9, 0.0 }
 0x1c2   :  { %v2291_v57 = vmax.f32 %v2145_v55, 0.0  ;;  %v2148_v58 = vadd.f32 %v3784_v31, %v2147_v56  ;;  %v4241_v55 = vld [vmem:[#allocation3_spill] sm:$0xff] }
 0x1c3   :  { %v2357_v46 = vadd.f32 %v2293_v42, %v1693_v12  ;;  %v2294_v4 = vmax.f32 %v2156_v28, 0.0  ;;  %v1698_v23 = vmax.f32 %v1572_v27, 0.0 }
 0x1c4   :  { %v2355_v19 = vadd.f32 %v2291_v57, %v1691_v1  ;;  %v2292_v59 = vmax.f32 %v2148_v58, 0.0  ;;  %v1287_v21 = vpop.f32.mrb[88].mxu0 }
 0x1c5   :  { %2421 = vst [vmem:[%s4219_s8 + $0x130] sm:$0xff] %v2357_v46  ;;  %v2358_v44 = vadd.f32 %v2294_v4, %v1694_v2  ;;  %v1288_v15 = vadd.f32 %v3559_v39, %v1287_v21  ;;  %v1289_v52 = vpop.f32.mrb[89].mxu0 }
 0x1c6   :  { %2419 = vst [vmem:[%s4219_s8 + $0x120] sm:$0xff] %v2355_v19  ;;  %v2356_v26 = vadd.f32 %v2292_v59, %v1692_v8  ;;  %v2831_v30 = vpop.f32.mrb[104].mxu1  ;;  %v1290_v61 = vpop.f32.mrb[90].mxu0 }
 0x1c7   :  { %2422 = vst [vmem:[%s4219_s8 + $0x138] sm:$0xff] %v2358_v44  ;;  %v1577_v60 = vadd.f32 %v3708_v5, %v1288_v15  ;;  %v2169_v18 = vadd.f32 %v2831_v30, %v3784_v31  ;;  %v1291_v11 = vadd.f32 %v3559_v39, %v1290_v61  ;;  %v2160_v32 = vpop.f32.mrb[105].mxu1  ;;  %v1292_v0 = vpop.f32.mrb[91].mxu0 }
 0x1c8   :  { %2420 = vst [vmem:[%s4219_s8 + $0x128] sm:$0xff] %v2356_v26  ;;  %v2161_v40 = vadd.f32 %v3784_v31, %v2160_v32  ;;  %v2832_v24 = vpop.f32.mrb[106].mxu1  ;;  %v4242_v26 = vld [vmem:[#allocation6_spill] sm:$0xff] }
 0x1c9   :  { %v2297_v62 = vmax.f32 %v2169_v18, 0.0  ;;  %v1580_v17 = vadd.f32 %v4239_v10, %v1291_v11  ;;  %v2172_v33 = vadd.f32 %v2832_v24, %v3784_v31  ;;  %v2163_v5 = vpop.f32.mrb[107].mxu1  ;;  %v1699_v27 = vmax.f32 %v1577_v60, 0.0 }
 0x1ca   :  { %v2295_v37 = vmax.f32 %v2161_v40, 0.0  ;;  %v2164_v39 = vadd.f32 %v3784_v31, %v2163_v5  ;;  %v4243_v40 = vld [vmem:[#allocation8_spill] sm:$0xff] }
 0x1cb   :  { %v2361_v47 = vadd.f32 %v2297_v62, %v1697_v51  ;;  %v2298_v3 = vmax.f32 %v2172_v33, 0.0  ;;  %v1700_v2 = vmax.f32 %v1580_v17, 0.0 }
 0x1cc   :  { %v2359_v22 = vadd.f32 %v2295_v37, %v1695_v54  ;;  %v2296_v53 = vmax.f32 %v2164_v39, 0.0  ;;  %v1295_v41 = vpop.f32.mrb[92].mxu0 }
 0x1cd   :  { %2425 = vst [vmem:[%s4219_s8 + $0x150] sm:$0xff] %v2361_v47  ;;  %v2362_v14 = vadd.f32 %v2298_v3, %v1698_v23  ;;  %v1296_v6 = vadd.f32 %v4078_v63, %v1295_v41  ;;  %v1297_v36 = vpop.f32.mrb[93].mxu0  ;;  %v4244_v41 = vld [vmem:[#allocation5_spill] sm:$0xff] }
 0x1ce   :  { %2423 = vst [vmem:[%s4219_s8 + $0x140] sm:$0xff] %v2359_v22  ;;  %v2360_v20 = vadd.f32 %v2296_v53, %v1696_v35  ;;  %v2835_v34 = vpop.f32.mrb[108].mxu1  ;;  %v1298_v45 = vpop.f32.mrb[94].mxu0 }
 0x1cf   :  { %2426 = vst [vmem:[%s4219_s8 + $0x158] sm:$0xff] %v2362_v14  ;;  %v1585_v29 = vadd.f32 %v4240_v49, %v1296_v6  ;;  %v2185_v7 = vadd.f32 %v2835_v34, %v3784_v31  ;;  %v1299_v25 = vadd.f32 %v4078_v63, %v1298_v45  ;;  %v2176_v38 = vpop.f32.mrb[109].mxu1  ;;  %v1300_v9 = vpop.f32.mrb[95].mxu0 }
 0x1d0   :  { %2424 = vst [vmem:[%s4219_s8 + $0x148] sm:$0xff] %v2360_v20  ;;  %v2177_v50 = vadd.f32 %v3784_v31, %v2176_v38  ;;  %v2836_v16 = vpop.f32.mrb[110].mxu1 }
 0x1d1   :  { %v1701_v43 = vmax.f32 %v1585_v29, 0.0  ;;  %v2301_v48 = vmax.f32 %v2185_v7, 0.0  ;;  %v1588_v13 = vadd.f32 %v4241_v55, %v1299_v25  ;;  %v2188_v12 = vadd.f32 %v2836_v16, %v3784_v31  ;;  %v2179_v42 = vpop.f32.mrb[111].mxu1  ;;  %v4245_v29 = vld [vmem:[#allocation7_spill] sm:$0xff] }
 0x1d2   :  { %v2299_v28 = vmax.f32 %v2177_v50, 0.0  ;;  %v2180_v56 = vadd.f32 %v3784_v31, %v2179_v42 }
 0x1d3   :  { %v2365_v1 = vadd.f32 %v2301_v48, %v1701_v43  ;;  %v1702_v57 = vmax.f32 %v1588_v13, 0.0  ;;  %v2302_v58 = vmax.f32 %v2188_v12, 0.0 }
 0x1d4   :  { %v2363_v46 = vadd.f32 %v2299_v28, %v1699_v27  ;;  %v2300_v4 = vmax.f32 %v2180_v56, 0.0  ;;  %v1303_v8 = vpop.f32.mrb[96].mxu0  ;;  %v4246_v27 = vld [vmem:[#allocation10_spill] sm:$0xff] }
 0x1d5   :  { %2429 = vst [vmem:[%s4219_s8 + $0x170] sm:$0xff] %v2365_v1  ;;  %v2366_v19 = vadd.f32 %v2302_v58, %v1702_v57  ;;  %v1304_v59 = vadd.f32 %v4078_v63, %v1303_v8  ;;  %v1305_v21 = vpop.f32.mrb[97].mxu0 }
 0x1d6   :  { %2427 = vst [vmem:[%s4219_s8 + $0x160] sm:$0xff] %v2363_v46  ;;  %v2364_v44 = vadd.f32 %v2300_v4, %v1700_v2  ;;  %v2839_v15 = vpop.f32.mrb[112].mxu1  ;;  %v1306_v52 = vpop.f32.mrb[98].mxu0  ;;  %v4247_v4 = vld [vmem:[#allocation12_spill] sm:$0xff] }
 0x1d7   :  { %2430 = vst [vmem:[%s4219_s8 + $0x178] sm:$0xff] %v2366_v19  ;;  %v1593_v30 = vadd.f32 %v4242_v26, %v1304_v59  ;;  %v1307_v61 = vadd.f32 %v4078_v63, %v1306_v52  ;;  %v2192_v60 = vpop.f32.mrb[113].mxu1  ;;  %v1308_v18 = vpop.f32.mrb[99].mxu0  ;;  %v2201_v17 = vadd.f32 %v2839_v15, %v3784_v31 }
 0x1d8   :  { %2428 = vst [vmem:[%s4219_s8 + $0x168] sm:$0xff] %v2364_v44  ;;  %v2193_v11 = vadd.f32 %v3784_v31, %v2192_v60  ;;  %v2840_v32 = vpop.f32.mrb[114].mxu1 }
 0x1d9   :  { %v1703_v0 = vmax.f32 %v1593_v30, 0.0  ;;  %v1596_v24 = vadd.f32 %v4243_v40, %v1307_v61  ;;  %v2195_v51 = vpop.f32.mrb[115].mxu1  ;;  %v2204_v39 = vadd.f32 %v2840_v32, %v3784_v31  ;;  %v2305_v53 = vmax.f32 %v2201_v17, 0.0 }
 0x1da   :  { %v2303_v62 = vmax.f32 %v2193_v11, 0.0  ;;  %v2196_v10 = vadd.f32 %v3784_v31, %v2195_v51 }
 0x1db   :  { %v1704_v33 = vmax.f32 %v1596_v24, 0.0  ;;  %v2306_v45 = vmax.f32 %v2204_v39, 0.0 }
 0x1dc   :  { %v2367_v5 = vadd.f32 %v2303_v62, %v1703_v0  ;;  %v2304_v54 = vmax.f32 %v2196_v10, 0.0  ;;  %v1311_v37 = vpop.f32.mrb[100].mxu0  ;;  %v4248_v0 = vld [vmem:[#allocation9_spill] sm:$0xff] }
 0x1dd   :  { %v1312_v23 = vadd.f32 %v4078_v63, %v1311_v37  ;;  %v1313_v47 = vpop.f32.mrb[101].mxu0 }
 0x1de   :  { %2431 = vst [vmem:[%s4219_s8 + $0x180] sm:$0xff] %v2367_v5  ;;  %v2368_v3 = vadd.f32 %v2304_v54, %v1704_v33  ;;  %v1314_v35 = vpop.f32.mrb[102].mxu0  ;;  %v2843_v22 = vpop.f32.mrb[116].mxu1  ;;  %v4249_v5 = vld [vmem:[#allocation11_spill] sm:$0xff] }
 0x1df   :  { %v1601_v14 = vadd.f32 %v4244_v41, %v1312_v23  ;;  %v1315_v6 = vadd.f32 %v4078_v63, %v1314_v35  ;;  %v1316_v36 = vpop.f32.mrb[103].mxu0  ;;  %v2208_v20 = vpop.f32.mrb[117].mxu1  ;;  %v2217_v21 = vadd.f32 %v2843_v22, %v3784_v31 }
 0x1e0   :  { %2432 = vst [vmem:[%s4219_s8 + $0x188] sm:$0xff] %v2368_v3  ;;  %v2844_v34 = vpop.f32.mrb[118].mxu1  ;;  %v2209_v50 = vadd.f32 %v3784_v31, %v2208_v20 }
 0x1e1   :  { %v1705_v49 = vmax.f32 %v1601_v14, 0.0  ;;  %v1604_v7 = vadd.f32 %v4245_v29, %v1315_v6  ;;  %v2211_v25 = vpop.f32.mrb[119].mxu1  ;;  %v2220_v26 = vadd.f32 %v2844_v34, %v3784_v31  ;;  %v2309_v32 = vmax.f32 %v2217_v21, 0.0  ;;  %v4250_v6 = vld [vmem:[#allocation14_spill] sm:$0xff]  ;;  %v4251_v29 = vld [vmem:[#allocation16_spill] sm:$0xff] }
 0x1e2   :  { %v2212_v13 = vadd.f32 %v3784_v31, %v2211_v25  ;;  %v2307_v1 = vmax.f32 %v2209_v50, 0.0 }
 0x1e3   :  { %v2369_v38 = vadd.f32 %v2305_v53, %v1705_v49  ;;  %v1706_v9 = vmax.f32 %v1604_v7, 0.0  ;;  %v2310_v17 = vmax.f32 %v2220_v26, 0.0 }
 0x1e4   :  { %v1319_v16 = vpop.f32.mrb[104].mxu0  ;;  %v2308_v19 = vmax.f32 %v2212_v13, 0.0 }
 0x1e5   :  { %2433 = vst [vmem:[%s4219_s8 + $0x190] sm:$0xff] %v2369_v38  ;;  %v2370_v43 = vadd.f32 %v2306_v45, %v1706_v9  ;;  %v1320_v48 = vadd.f32 %v4078_v63, %v1319_v16  ;;  %v1321_v55 = vpop.f32.mrb[105].mxu0 }
 0x1e6   :  { %v1322_v12 = vpop.f32.mrb[106].mxu0  ;;  %v2847_v42 = vpop.f32.mrb[120].mxu1 }
 0x1e7   :  { %2434 = vst [vmem:[%s4219_s8 + $0x198] sm:$0xff] %v2370_v43  ;;  %v1609_v28 = vadd.f32 %v4246_v27, %v1320_v48  ;;  %v1323_v56 = vadd.f32 %v4078_v63, %v1322_v12  ;;  %v1324_v57 = vpop.f32.mrb[107].mxu0  ;;  %v2224_v58 = vpop.f32.mrb[121].mxu1  ;;  %v2233_v38 = vadd.f32 %v2847_v42, %v3784_v31  ;;  %v4252_v42 = vld [vmem:[#allocation13_spill] sm:$0xff] }
 0x1e8   :  { %v2848_v2 = vpop.f32.mrb[122].mxu1  ;;  %v2225_v47 = vadd.f32 %v3784_v31, %v2224_v58 }
 0x1e9   :  { %v1707_v46 = vmax.f32 %v1609_v28, 0.0  ;;  %v1612_v8 = vadd.f32 %v4247_v4, %v1323_v56  ;;  %v2227_v59 = vpop.f32.mrb[123].mxu1  ;;  %v2236_v43 = vadd.f32 %v2848_v2, %v3784_v31  ;;  %v2313_v27 = vmax.f32 %v2233_v38, 0.0 }
 0x1ea   :  { %v2228_v41 = vadd.f32 %v3784_v31, %v2227_v59  ;;  %v2311_v34 = vmax.f32 %v2225_v47, 0.0 }
 0x1eb   :  { %v1708_v44 = vmax.f32 %v1612_v8, 0.0  ;;  %v2371_v15 = vadd.f32 %v2307_v1, %v1707_v46  ;;  %v2314_v57 = vmax.f32 %v2236_v43, 0.0  ;;  %v4253_v46 = vld [vmem:[#allocation15_spill] sm:$0xff] }
 0x1ec   :  { %v1327_v52 = vpop.f32.mrb[108].mxu0  ;;  %v2312_v25 = vmax.f32 %v2228_v41, 0.0 }
 0x1ed   :  { %2435 = vst [vmem:[%s4219_s8 + $0x1a0] sm:$0xff] %v2371_v15  ;;  %v2372_v30 = vadd.f32 %v2308_v19, %v1708_v44  ;;  %v1328_v61 = vadd.f32 %v4078_v63, %v1327_v52  ;;  %v1329_v60 = vpop.f32.mrb[109].mxu0  ;;  %v3015_v52 = vld [vmem:[%s4218_s6] ss:$0 sm:$0xff] }
 0x1ee   :  { %v1330_v18 = vpop.f32.mrb[110].mxu0  ;;  %v4145_v11 = vpop.f32.mrb[124].mxu1 }
 0x1ef   :  { %2436 = vst [vmem:[%s4219_s8 + $0x1a8] sm:$0xff] %v2372_v30  ;;  %v1617_v40 = vadd.f32 %v4248_v0, %v1328_v61  ;;  %v1331_v24 = vadd.f32 %v4078_v63, %v1330_v18  ;;  %v1332_v51 = vpop.f32.mrb[111].mxu0  ;;  %v2240_v62 = vpop.f32.mrb[125].mxu1 }
 0x1f0   :  { %v4152_v10 = vpop.f32.mrb[126].mxu1  ;;  %v2241_v19 = vadd.f32 %v3784_v31, %v2240_v62  ;;  %v4254_v31 = vld [vmem:[#allocation18_spill] sm:$0xff]  ;;  %v2249_v62 = vadd.f32 %v3015_v52, %v4145_v11  ;;  %v4256_v11 = vld [vmem:[#allocation17_spill] sm:$0xff] }
 0x1f1   :  { %v1709_v33 = vmax.f32 %v1617_v40, 0.0  ;;  %v1620_v54 = vadd.f32 %v4249_v5, %v1331_v24  ;;  %v2243_v37 = vpop.f32.mrb[127].mxu1  ;;  %v4255_v40 = vld [vmem:[#allocation20_spill] sm:$0xff] }
 0x1f2   :  { %v2244_v26 = vadd.f32 %v3015_v52, %v2243_v37  ;;  %v2315_v18 = vmax.f32 %v2241_v19, 0.0  ;;  %v2317_v47 = vmax.f32 %v2249_v62, 0.0 }
 0x1f3   :  { %v2373_v39 = vadd.f32 %v2309_v32, %v1709_v33  ;;  %v1710_v23 = vmax.f32 %v1620_v54, 0.0 }
 0x1f4   :  { %v1335_v3 = vpop.f32.mrb[112].mxu0  ;;  %v2316_v51 = vmax.f32 %v2244_v26, 0.0 }
 0x1f5   :  { %2437 = vst [vmem:[%s4219_s8 + $0x1b0] sm:$0xff] %v2373_v39  ;;  %v2374_v35 = vadd.f32 %v2310_v17, %v1710_v23  ;;  %v1336_v22 = vadd.f32 %v4078_v63, %v1335_v3  ;;  %v1337_v53 = vpop.f32.mrb[113].mxu0  ;;  %v2252_v3 = vadd.f32 %v3015_v52, %v4152_v10 }
 0x1f6   :  { %v1338_v14 = vpop.f32.mrb[114].mxu0 }
 0x1f7   :  { %2438 = vst [vmem:[%s4219_s8 + $0x1b8] sm:$0xff] %v2374_v35  ;;  %v1625_v36 = vadd.f32 %v4250_v6, %v1336_v22  ;;  %v1339_v20 = vadd.f32 %v4078_v63, %v1338_v14  ;;  %v1340_v45 = vpop.f32.mrb[115].mxu0  ;;  %v4257_v14 = vld [vmem:[#allocation19_spill] sm:$0xff] }
 0x1f9   :  { %v1711_v49 = vmax.f32 %v1625_v36, 0.0  ;;  %v1628_v7 = vadd.f32 %v4251_v29, %v1339_v20  ;;  %v2318_v36 = vmax.f32 %v2252_v3, 0.0 }
 0x1fb   :  { %v1712_v9 = vmax.f32 %v1628_v7, 0.0  ;;  %v2375_v50 = vadd.f32 %v2311_v34, %v1711_v49 }
 0x1fc   :  { %v1343_v16 = vpop.f32.mrb[116].mxu0 }
 0x1fd   :  { %2439 = vst [vmem:[%s4219_s8 + $0x1c0] sm:$0xff] %v2375_v50  ;;  %v2376_v48 = vadd.f32 %v2312_v25, %v1712_v9  ;;  %v1344_v55 = vadd.f32 %v4078_v63, %v1343_v16  ;;  %v1345_v13 = vpop.f32.mrb[117].mxu0 }
 0x1fe   :  { %v1346_v12 = vpop.f32.mrb[118].mxu0 }
 0x1ff   :  { %2440 = vst [vmem:[%s4219_s8 + $0x1c8] sm:$0xff] %v2376_v48  ;;  %v1633_v28 = vadd.f32 %v4252_v42, %v1344_v55  ;;  %v1347_v56 = vadd.f32 %v4078_v63, %v1346_v12  ;;  %v1348_v1 = vpop.f32.mrb[119].mxu0 }
 0x201   :  { %v1713_v58 = vmax.f32 %v1633_v28, 0.0  ;;  %v1636_v4 = vadd.f32 %v4253_v46, %v1347_v56 }
 0x203   :  { %v2377_v2 = vadd.f32 %v2313_v27, %v1713_v58  ;;  %v1714_v8 = vmax.f32 %v1636_v4, 0.0 }
 0x204   :  { %v1351_v59 = vpop.f32.mrb[120].mxu0 }
 0x205   :  { %2441 = vst [vmem:[%s4219_s8 + $0x1d0] sm:$0xff] %v2377_v2  ;;  %v2378_v21 = vadd.f32 %v2314_v57, %v1714_v8  ;;  %v1352_v44 = vadd.f32 %v4078_v63, %v1351_v59  ;;  %v1353_v15 = vpop.f32.mrb[121].mxu0 }
 0x206   :  { %v1354_v30 = vpop.f32.mrb[122].mxu0 }
 0x207   :  { %2442 = vst [vmem:[%s4219_s8 + $0x1d8] sm:$0xff] %v2378_v21  ;;  %v1641_v61 = vadd.f32 %v4254_v31, %v1352_v44  ;;  %v1355_v60 = vadd.f32 %v4078_v63, %v1354_v30  ;;  %v1356_v32 = vpop.f32.mrb[123].mxu0 }
 0x209   :  { %v1715_v0 = vmax.f32 %v1641_v61, 0.0  ;;  %v1644_v24 = vadd.f32 %v4255_v40, %v1355_v60 }
 0x20b   :  { %v1716_v17 = vmax.f32 %v1644_v24, 0.0  ;;  %v2379_v33 = vadd.f32 %v2315_v18, %v1715_v0 }
 0x20c   :  { %v1359_v5 = vpop.f32.mrb[124].mxu0 }
 0x20d   :  { %2443 = vst [vmem:[%s4219_s8 + $0x1e0] sm:$0xff] %v2379_v33  ;;  %v2380_v54 = vadd.f32 %v2316_v51, %v1716_v17  ;;  %v1360_v37 = vadd.f32 %v4078_v63, %v1359_v5  ;;  %v1361_v39 = vpop.f32.mrb[125].mxu0 }
 0x20e   :  { %v1362_v23 = vpop.f32.mrb[126].mxu0 }
 0x20f   :  { %2444 = vst [vmem:[%s4219_s8 + $0x1e8] sm:$0xff] %v2380_v54  ;;  %v1649_v35 = vadd.f32 %v4256_v11, %v1360_v37  ;;  %v1363_v22 = vadd.f32 %v4078_v63, %v1362_v23  ;;  %v1364_v53 = vpop.f32.mrb[127].mxu0 }
 0x211   :  { %v1717_v41 = vmax.f32 %v1649_v35, 0.0  ;;  %v1652_v6 = vadd.f32 %v4257_v14, %v1363_v22 }
 0x213   :  { %v2381_v20 = vadd.f32 %v2317_v47, %v1717_v41  ;;  %v1718_v34 = vmax.f32 %v1652_v6, 0.0 }
 0x215   :  { %2445 = vst [vmem:[%s4219_s8 + $0x1f0] sm:$0xff] %v2381_v20  ;;  %v2382_v10 = vadd.f32 %v2318_v36, %v1718_v34 }
 0x217   :  { %2446 = vst [vmem:[%s4219_s8 + $0x1f8] sm:$0xff] %v2382_v10 }

</bundles_post_ra>
